<compile_context>
chip_gen: v7x
topology: tpu7x:2x2x1
jax: 0.10.0
libtpu: 0.0.40
codegen_flags: <defaults>
</compile_context>

<pallas_src>
import jax
import jax.numpy as jnp
from jax.experimental import pallas as pl
from jax.experimental.pallas import tpu as pltpu


def _text_encoder_kernel(tok_ref,          # VMEM (TB, S) int32
                         emb_ref,          # VMEM (V, E)  bf16  (resident)
                         w1_ref, b1_ref,   # VMEM (E, H) bf16, (1, H) f32
                         w2_ref, b2_ref,   # VMEM (H, H) bf16, (1, H) f32
                         w3_ref, b3_ref,   # VMEM (H, O) bf16, (1, O) f32
                         o_ref):           # VMEM (TB, O) f32
    tile_b, seq_len = tok_ref.shape
    vocab = emb_ref.shape[0]

    tok = tok_ref[...]                                              # (TB, S) int32
    vocab_iota = jax.lax.broadcasted_iota(jnp.int32, (tile_b, vocab), 1)

    # ---- embedding gather + mean pool as one MXU matmul ---------------------
    # counts[b, v] = #{s : tok[b, s] == v}  (exact small ints, bf16-safe)
    counts = (tok[:, 0:1] == vocab_iota).astype(jnp.float32)
    for s in range(1, seq_len):
        counts = counts + (tok[:, s:s + 1] == vocab_iota).astype(jnp.float32)

    x = jnp.dot(counts.astype(jnp.bfloat16), emb_ref[...],
                preferred_element_type=jnp.float32) * (1.0 / seq_len)  # (TB, E) f32

    # ---- 3-layer MLP: bf16 MXU inputs, f32 accumulation, f32 epilogue -------
    h = jnp.dot(x.astype(jnp.bfloat16), w1_ref[...],
                preferred_element_type=jnp.float32) + b1_ref[...]
    h = jnp.maximum(h, 0.0)

    h = jnp.dot(h.astype(jnp.bfloat16), w2_ref[...],
                preferred_element_type=jnp.float32) + b2_ref[...]
    h = jnp.maximum(h, 0.0)

    o_ref[...] = (jnp.dot(h.astype(jnp.bfloat16), w3_ref[...],
                          preferred_element_type=jnp.float32)
                  + b3_ref[...]).astype(o_ref.dtype)


def simple_text_encoder(tokens, embed_table, w1, b1, w2, b2, w3, b3, *, block_b=128):
    """tokens: (B, S) int32.  Returns (B, output_dim) float32.

    block_b: 128 fills the v5e MXU; use 256 on v6e/v7x at production batch sizes
    (and keep >= 2 batch tiles so v7x's second TensorCore gets work).
    """
    B, S = tokens.shape
    V, E = embed_table.shape
    H = w1.shape[1]
    O = w3.shape[1]

    # pad batch to a multiple of the tile so every matmul M is sublane-full and
    # the output store is unmasked / lane-dense
    b_pad = ((B + block_b - 1) // block_b) * block_b
    tokens_p = jnp.zeros((b_pad, S), jnp.int32).at[:B].set(tokens.astype(jnp.int32))

    # bf16 MXU inputs; biases stay f32 for the f32 epilogue
    emb_bf = embed_table.astype(jnp.bfloat16)
    w1b = w1.astype(jnp.bfloat16)
    w2b = w2.astype(jnp.bfloat16)
    w3b = w3.astype(jnp.bfloat16)

    grid = (b_pad // block_b,)
    const = lambda i: (0, 0)                 # table / weights resident across tiles

    flops = 2 * b_pad * (V * E + E * H + H * H + H * O)
    bytes_accessed = (b_pad * S * 4                      # tokens
                      + V * E * 2                        # bf16 embedding table
                      + 2 * (E * H + H * H + H * O)      # bf16 weights
                      + 4 * (2 * H + O)                  # f32 biases
                      + b_pad * O * 4)                   # output

    out = pl.pallas_call(
        _text_encoder_kernel,
        out_shape=jax.ShapeDtypeStruct((b_pad, O), jnp.float32),
        grid_spec=pltpu.PrefetchScalarGridSpec(
            num_scalar_prefetch=0,
            grid=grid,
            in_specs=[
                pl.BlockSpec((block_b, S), lambda i: (i, 0)),   # tokens walk batch
                pl.BlockSpec((V, E), const),                    # VMEM-resident table
                pl.BlockSpec((E, H), const),
                pl.BlockSpec((1, H), const),
                pl.BlockSpec((H, H), const),
                pl.BlockSpec((1, H), const),
                pl.BlockSpec((H, O), const),
                pl.BlockSpec((1, O), const),
            ],
            out_specs=pl.BlockSpec((block_b, O), lambda i: (i, 0)),
        ),
        compiler_params=pltpu.CompilerParams(
            # batch tiles are independent -> megacore sharding on v7x
            dimension_semantics=("parallel",),
        ),
        cost_estimate=pl.CostEstimate(flops=flops, transcendentals=0,
                                      bytes_accessed=bytes_accessed),
    )(tokens_p, emb_bf, w1b, b1, w2b, b2, w3b, b3)

    return out[:B]


def init_params(key, vocab_size, embed_dim, hidden_dim, output_dim):
    ks = jax.random.split(key, 7)
    embed_table = jax.random.normal(ks[0], (vocab_size, embed_dim), jnp.float32)
    # weights stored (in, out); biases stored (1, out):  y = x @ W + b
    w1 = jax.random.normal(ks[1], (embed_dim, hidden_dim), jnp.float32) * 0.02
    b1 = jax.random.normal(ks[2], (1, hidden_dim), jnp.float32) * 0.01
    w2 = jax.random.normal(ks[3], (hidden_dim, hidden_dim), jnp.float32) * 0.02
    b2 = jax.random.normal(ks[4], (1, hidden_dim), jnp.float32) * 0.01
    w3 = jax.random.normal(ks[5], (hidden_dim, output_dim), jnp.float32) * 0.02
    b3 = jax.random.normal(ks[6], (1, output_dim), jnp.float32) * 0.01
    return embed_table, w1, b1, w2, b2, w3, b3


if __name__ == "__main__":
    VOCAB, EMBED, HIDDEN, OUT = 1000, 128, 256, 256
    B, S = 2, 8

    key = jax.random.PRNGKey(0)
    pkey, tkey = jax.random.split(key)
    params = init_params(pkey, VOCAB, EMBED, HIDDEN, OUT)
    tokens = jax.random.randint(tkey, (B, S), 0, VOCAB, dtype=jnp.int32)

    out = simple_text_encoder(tokens, *params)
    jax.block_until_ready(out)

    # sanity check against a pure-JAX f32 reference of the same forward pass
    emb_table, w1, b1, w2, b2, w3, b3 = params
    x = jnp.take(emb_table, tokens, axis=0).mean(axis=1)
    h = jnp.maximum(x @ w1 + b1, 0.0)
    h = jnp.maximum(h @ w2 + b2, 0.0)
    ref = h @ w3 + b3
    assert out.shape == (B, OUT)
    err = float(jnp.max(jnp.abs(out - ref)))
    assert jnp.allclose(out, ref, atol=2e-2, rtol=2e-2), err

    print("KERNEL_OK")
</pallas_src>

<mosaic_0001>
module attributes {stable_mosaic.version = 11 : i64} {
  func.func @_text_encoder_kernel(%arg0: i32, %arg1: memref<128x8xi32, #tpu.memory_space<vmem>>, %arg2: memref<1000x128xbf16, #tpu.memory_space<vmem>>, %arg3: memref<128x256xbf16, #tpu.memory_space<vmem>>, %arg4: memref<1x256xf32, #tpu.memory_space<vmem>>, %arg5: memref<256x256xbf16, #tpu.memory_space<vmem>>, %arg6: memref<1x256xf32, #tpu.memory_space<vmem>>, %arg7: memref<256x256xbf16, #tpu.memory_space<vmem>>, %arg8: memref<1x256xf32, #tpu.memory_space<vmem>>, %arg9: memref<128x256xf32, #tpu.memory_space<vmem>>) attributes {dimension_semantics = [#tpu.dimension_semantics<parallel>], iteration_bounds = array<i64: 1>, scalar_prefetch = 0 : i64, scratch_operands = 0 : i64, tpu.core_type = #tpu.core_type<tc>, window_params = [{transform_indices = @transform_0, window_bounds = array<i64: 128, 8>}, {pipeline_mode = #tpu.pipeline_mode<synchronous>, transform_indices = @transform_1, window_bounds = array<i64: 1000, 128>}, {pipeline_mode = #tpu.pipeline_mode<synchronous>, transform_indices = @transform_2, window_bounds = array<i64: 128, 256>}, {pipeline_mode = #tpu.pipeline_mode<synchronous>, transform_indices = @transform_3, window_bounds = array<i64: 1, 256>}, {pipeline_mode = #tpu.pipeline_mode<synchronous>, transform_indices = @transform_4, window_bounds = array<i64: 256, 256>}, {pipeline_mode = #tpu.pipeline_mode<synchronous>, transform_indices = @transform_5, window_bounds = array<i64: 1, 256>}, {pipeline_mode = #tpu.pipeline_mode<synchronous>, transform_indices = @transform_6, window_bounds = array<i64: 256, 256>}, {pipeline_mode = #tpu.pipeline_mode<synchronous>, transform_indices = @transform_7, window_bounds = array<i64: 1, 256>}, {transform_indices = @transform_8, window_bounds = array<i64: 128, 256>}]} {
    %c0 = arith.constant 0 : index
    %c0_0 = arith.constant 0 : index
    %0 = vector.load %arg1[%c0, %c0_0] : memref<128x8xi32, #tpu.memory_space<vmem>>, vector<128x8xi32>
    %1 = tpu.iota {dimensions = array<i32: 1>} : vector<128x1000xi32>
    %2 = vector.extract_strided_slice %0 {offsets = [0, 0], sizes = [128, 1], strides = [1, 1]} : vector<128x8xi32> to vector<128x1xi32>
    %3 = vector.broadcast %2 : vector<128x1xi32> to vector<128x1000xi32>
    %4 = arith.cmpi eq, %3, %1 : vector<128x1000xi32>
    %5 = arith.extui %4 : vector<128x1000xi1> to vector<128x1000xi32>
    %6 = arith.sitofp %5 : vector<128x1000xi32> to vector<128x1000xf32>
    %7 = vector.extract_strided_slice %0 {offsets = [0, 1], sizes = [128, 1], strides = [1, 1]} : vector<128x8xi32> to vector<128x1xi32>
    %8 = vector.broadcast %7 : vector<128x1xi32> to vector<128x1000xi32>
    %9 = arith.cmpi eq, %8, %1 : vector<128x1000xi32>
    %10 = arith.extui %9 : vector<128x1000xi1> to vector<128x1000xi32>
    %11 = arith.sitofp %10 : vector<128x1000xi32> to vector<128x1000xf32>
    %12 = arith.addf %6, %11 : vector<128x1000xf32>
    %13 = vector.extract_strided_slice %0 {offsets = [0, 2], sizes = [128, 1], strides = [1, 1]} : vector<128x8xi32> to vector<128x1xi32>
    %14 = vector.broadcast %13 : vector<128x1xi32> to vector<128x1000xi32>
    %15 = arith.cmpi eq, %14, %1 : vector<128x1000xi32>
    %16 = arith.extui %15 : vector<128x1000xi1> to vector<128x1000xi32>
    %17 = arith.sitofp %16 : vector<128x1000xi32> to vector<128x1000xf32>
    %18 = arith.addf %12, %17 : vector<128x1000xf32>
    %19 = vector.extract_strided_slice %0 {offsets = [0, 3], sizes = [128, 1], strides = [1, 1]} : vector<128x8xi32> to vector<128x1xi32>
    %20 = vector.broadcast %19 : vector<128x1xi32> to vector<128x1000xi32>
    %21 = arith.cmpi eq, %20, %1 : vector<128x1000xi32>
    %22 = arith.extui %21 : vector<128x1000xi1> to vector<128x1000xi32>
    %23 = arith.sitofp %22 : vector<128x1000xi32> to vector<128x1000xf32>
    %24 = arith.addf %18, %23 : vector<128x1000xf32>
    %25 = vector.extract_strided_slice %0 {offsets = [0, 4], sizes = [128, 1], strides = [1, 1]} : vector<128x8xi32> to vector<128x1xi32>
    %26 = vector.broadcast %25 : vector<128x1xi32> to vector<128x1000xi32>
    %27 = arith.cmpi eq, %26, %1 : vector<128x1000xi32>
    %28 = arith.extui %27 : vector<128x1000xi1> to vector<128x1000xi32>
    %29 = arith.sitofp %28 : vector<128x1000xi32> to vector<128x1000xf32>
    %30 = arith.addf %24, %29 : vector<128x1000xf32>
    %31 = vector.extract_strided_slice %0 {offsets = [0, 5], sizes = [128, 1], strides = [1, 1]} : vector<128x8xi32> to vector<128x1xi32>
    %32 = vector.broadcast %31 : vector<128x1xi32> to vector<128x1000xi32>
    %33 = arith.cmpi eq, %32, %1 : vector<128x1000xi32>
    %34 = arith.extui %33 : vector<128x1000xi1> to vector<128x1000xi32>
    %35 = arith.sitofp %34 : vector<128x1000xi32> to vector<128x1000xf32>
    %36 = arith.addf %30, %35 : vector<128x1000xf32>
    %37 = vector.extract_strided_slice %0 {offsets = [0, 6], sizes = [128, 1], strides = [1, 1]} : vector<128x8xi32> to vector<128x1xi32>
    %38 = vector.broadcast %37 : vector<128x1xi32> to vector<128x1000xi32>
    %39 = arith.cmpi eq, %38, %1 : vector<128x1000xi32>
    %40 = arith.extui %39 : vector<128x1000xi1> to vector<128x1000xi32>
    %41 = arith.sitofp %40 : vector<128x1000xi32> to vector<128x1000xf32>
    %42 = arith.addf %36, %41 : vector<128x1000xf32>
    %43 = vector.extract_strided_slice %0 {offsets = [0, 7], sizes = [128, 1], strides = [1, 1]} : vector<128x8xi32> to vector<128x1xi32>
    %44 = vector.broadcast %43 : vector<128x1xi32> to vector<128x1000xi32>
    %45 = arith.cmpi eq, %44, %1 : vector<128x1000xi32>
    %46 = arith.extui %45 : vector<128x1000xi1> to vector<128x1000xi32>
    %47 = arith.sitofp %46 : vector<128x1000xi32> to vector<128x1000xf32>
    %48 = arith.addf %42, %47 : vector<128x1000xf32>
    %49 = arith.truncf %48 : vector<128x1000xf32> to vector<128x1000xbf16>
    %c0_1 = arith.constant 0 : index
    %c0_2 = arith.constant 0 : index
    %50 = vector.load %arg2[%c0_1, %c0_2] : memref<1000x128xbf16, #tpu.memory_space<vmem>>, vector<1000x128xbf16>
    %cst = arith.constant dense<0.000000e+00> : vector<128x128xf32>
    %51 = tpu.matmul %49, %50, %cst {dimension_numbers = #tpu.dot_dimension_numbers<[1], [0], [0], [1], [0, 0, 1, 1], [], []>} : vector<128x1000xbf16>, vector<1000x128xbf16>, vector<128x128xf32> -> vector<128x128xf32>
    %cst_3 = arith.constant 1.250000e-01 : f32
    %52 = vector.broadcast %cst_3 : f32 to vector<128x128xf32>
    %53 = arith.mulf %51, %52 : vector<128x128xf32>
    %54 = arith.truncf %53 : vector<128x128xf32> to vector<128x128xbf16>
    %c0_4 = arith.constant 0 : index
    %c0_5 = arith.constant 0 : index
    %55 = vector.load %arg3[%c0_4, %c0_5] : memref<128x256xbf16, #tpu.memory_space<vmem>>, vector<128x256xbf16>
    %cst_6 = arith.constant dense<0.000000e+00> : vector<128x256xf32>
    %56 = tpu.matmul %54, %55, %cst_6 {dimension_numbers = #tpu.dot_dimension_numbers<[1], [0], [0], [1], [0, 0, 1, 1], [], []>} : vector<128x128xbf16>, vector<128x256xbf16>, vector<128x256xf32> -> vector<128x256xf32>
    %c0_7 = arith.constant 0 : index
    %c0_8 = arith.constant 0 : index
    %57 = vector.load %arg4[%c0_7, %c0_8] : memref<1x256xf32, #tpu.memory_space<vmem>>, vector<1x256xf32>
    %58 = vector.broadcast %57 : vector<1x256xf32> to vector<128x256xf32>
    %59 = arith.addf %56, %58 : vector<128x256xf32>
    %cst_9 = arith.constant 0.000000e+00 : f32
    %60 = vector.broadcast %cst_9 : f32 to vector<128x256xf32>
    %61 = arith.maximumf %59, %60 : vector<128x256xf32>
    %62 = arith.truncf %61 : vector<128x256xf32> to vector<128x256xbf16>
    %c0_10 = arith.constant 0 : index
    %c0_11 = arith.constant 0 : index
    %63 = vector.load %arg5[%c0_10, %c0_11] : memref<256x256xbf16, #tpu.memory_space<vmem>>, vector<256x256xbf16>
    %cst_12 = arith.constant dense<0.000000e+00> : vector<128x256xf32>
    %64 = tpu.matmul %62, %63, %cst_12 {dimension_numbers = #tpu.dot_dimension_numbers<[1], [0], [0], [1], [0, 0, 1, 1], [], []>} : vector<128x256xbf16>, vector<256x256xbf16>, vector<128x256xf32> -> vector<128x256xf32>
    %c0_13 = arith.constant 0 : index
    %c0_14 = arith.constant 0 : index
    %65 = vector.load %arg6[%c0_13, %c0_14] : memref<1x256xf32, #tpu.memory_space<vmem>>, vector<1x256xf32>
    %66 = vector.broadcast %65 : vector<1x256xf32> to vector<128x256xf32>
    %67 = arith.addf %64, %66 : vector<128x256xf32>
    %cst_15 = arith.constant 0.000000e+00 : f32
    %68 = vector.broadcast %cst_15 : f32 to vector<128x256xf32>
    %69 = arith.maximumf %67, %68 : vector<128x256xf32>
    %70 = arith.truncf %69 : vector<128x256xf32> to vector<128x256xbf16>
    %c0_16 = arith.constant 0 : index
    %c0_17 = arith.constant 0 : index
    %71 = vector.load %arg7[%c0_16, %c0_17] : memref<256x256xbf16, #tpu.memory_space<vmem>>, vector<256x256xbf16>
    %cst_18 = arith.constant dense<0.000000e+00> : vector<128x256xf32>
    %72 = tpu.matmul %70, %71, %cst_18 {dimension_numbers = #tpu.dot_dimension_numbers<[1], [0], [0], [1], [0, 0, 1, 1], [], []>} : vector<128x256xbf16>, vector<256x256xbf16>, vector<128x256xf32> -> vector<128x256xf32>
    %c0_19 = arith.constant 0 : index
    %c0_20 = arith.constant 0 : index
    %73 = vector.load %arg8[%c0_19, %c0_20] : memref<1x256xf32, #tpu.memory_space<vmem>>, vector<1x256xf32>
    %74 = vector.broadcast %73 : vector<1x256xf32> to vector<128x256xf32>
    %75 = arith.addf %72, %74 : vector<128x256xf32>
    %c0_21 = arith.constant 0 : index
    %c0_22 = arith.constant 0 : index
    %76 = vector.load %arg9[%c0_21, %c0_22] : memref<128x256xf32, #tpu.memory_space<vmem>>, vector<128x256xf32>
    tpu.vector_store %arg9[%c0_21, %c0_22], %75 {strides = array<i32>} : memref<128x256xf32, #tpu.memory_space<vmem>>, vector<128x256xf32>,
    return
  }
  func.func @transform_0(%arg0: i32) -> (i32, i32) {
    %c0_i32 = arith.constant 0 : i32
    %c0_i32_0 = arith.constant 0 : i32
    return %arg0, %c0_i32 : i32, i32
  }
  func.func @transform_1(%arg0: i32) -> (i32, i32) {
    %c0_i32 = arith.constant 0 : i32
    %c0_i32_0 = arith.constant 0 : i32
    %c0_i32_1 = arith.constant 0 : i32
    return %c0_i32, %c0_i32_0 : i32, i32
  }
  func.func @transform_2(%arg0: i32) -> (i32, i32) {
    %c0_i32 = arith.constant 0 : i32
    %c0_i32_0 = arith.constant 0 : i32
    %c0_i32_1 = arith.constant 0 : i32
    return %c0_i32, %c0_i32_0 : i32, i32
  }
  func.func @transform_3(%arg0: i32) -> (i32, i32) {
    %c0_i32 = arith.constant 0 : i32
    %c0_i32_0 = arith.constant 0 : i32
    %c0_i32_1 = arith.constant 0 : i32
    return %c0_i32, %c0_i32_0 : i32, i32
  }
  func.func @transform_4(%arg0: i32) -> (i32, i32) {
    %c0_i32 = arith.constant 0 : i32
    %c0_i32_0 = arith.constant 0 : i32
    %c0_i32_1 = arith.constant 0 : i32
    return %c0_i32, %c0_i32_0 : i32, i32
  }
  func.func @transform_5(%arg0: i32) -> (i32, i32) {
    %c0_i32 = arith.constant 0 : i32
    %c0_i32_0 = arith.constant 0 : i32
    %c0_i32_1 = arith.constant 0 : i32
    return %c0_i32, %c0_i32_0 : i32, i32
  }
  func.func @transform_6(%arg0: i32) -> (i32, i32) {
    %c0_i32 = arith.constant 0 : i32
    %c0_i32_0 = arith.constant 0 : i32
    %c0_i32_1 = arith.constant 0 : i32
    return %c0_i32, %c0_i32_0 : i32, i32
  }
  func.func @transform_7(%arg0: i32) -> (i32, i32) {
    %c0_i32 = arith.constant 0 : i32
    %c0_i32_0 = arith.constant 0 : i32
    %c0_i32_1 = arith.constant 0 : i32
    return %c0_i32, %c0_i32_0 : i32, i32
  }
  func.func @transform_8(%arg0: i32) -> (i32, i32) {
    %c0_i32 = arith.constant 0 : i32
    %c0_i32_0 = arith.constant 0 : i32
    return %arg0, %c0_i32 : i32, i32
  }
}

</mosaic_0001>

<bundles_post_ra>
// kernel: tpu_custom_call.1
= control target key start
LH: loop header
LB: loop body
LE: loop exit
PB: predicated region body
PF: predicated region fallthrough
CT: control target
= control target key end

     0   :  { %13 = vsyncpa [#allocation3], 0  ;;  %s14293_s0 = inlined_call_operand.vmem [shape: s32[128,8], index: 0, kind: input, shape index: {}]   ;;  %s14294_s1 = inlined_call_operand.hbm [shape: bf16[1000,128], index: 1, kind: input, shape index: {}]   ;;  %s14295_s2 = inlined_call_operand.vmem [shape: bf16[128,256], index: 2, kind: input, shape index: {}]   ;;  %s14296_s3 = inlined_call_operand.vmem [shape: f32[1,256], index: 3, kind: input, shape index: {}]   ;;  %s14297_s4 = inlined_call_operand.hbm [shape: bf16[256,256], index: 4, kind: input, shape index: {}]   ;;  %s14298_s5 = inlined_call_operand.vmem [shape: f32[1,256], index: 5, kind: input, shape index: {}]   ;;  %s14299_s6 = inlined_call_operand.hbm [shape: bf16[256,256], index: 6, kind: input, shape index: {}]   ;;  %s14300_s7 = inlined_call_operand.vmem [shape: f32[1,256], index: 7, kind: input, shape index: {}]   ;;  %s14301_s8 = inlined_call_operand.hbm [shape: f32[128,256], index: 8, kind: output, shape index: {}]  }
   0x1   :  { %14 = vsyncpa [#allocation6], 0 }
   0x2   :  { %15 = vsyncpa [#allocation4], 0  ;;  %s8217_s27 = smov [#allocation5]   ;;  %s8123_s9 = scalar_lea.hbm %s14297_s4, 4096 }
   0x3   :  { %s39_s28 = sshll.u32 %s8217_s27, 4  ;;  %p8124_p0 = scmp.ne.s32.totalorder %s14297_s4, %s8123_s9  ;;  %s40_s28 = int_to_ptr.vmem [resolvable:$true] %s39_s28 }
   0x4   :  { %p8127_p1 = scmp.lt.u32.totalorder %s8123_s9, %s14297_s4 }
   0x6   :  { %p8129_p2 = pnand %p8127_p1, %p8124_p0 }
   0x8   :  { %8132 = shalt.err (!%p8129_p2)
}
   0x9   :  { %s8133_s14 = scalar_lea.vmem %s40_s28, 4096  ;;  %p8138_p4 = scmp.lt.s32.totalorder %s40_s28, %s40_s28 }
   0xa   :  { %p8134_p3 = scmp.ne.s32.totalorder %s40_s28, %s8133_s14  ;;  %p8139_p5 = scmp.lt.s32.totalorder %s8133_s14, %s8133_s14 }
   0xc   :  { %p8140_p6 = por %p8139_p5, %p8138_p4 }
   0xe   :  { %p8141_p7 = pnand %p8140_p6, %p8134_p3 }
  0x10   :  { %8144 = shalt.err (!%p8141_p7)
}
  0x11   :  { %s8218_s15 = smov 128   ;;  %s8219_s16 = smov 8  }
  0x12   :  { %45 = dma.hbm_to_vmem [thread:$0]  %s14297_s4, 4096, %s40_s28, [#allocation6], %s8218_s15, %s8218_s15, %s8219_s16  }
  0x13   :  { %s8220_s19 = smov [#allocation2]   ;;  %s8145_s23 = scalar_lea.hbm %s14294_s1, 8000 }
  0x14   :  { %s23_s20 = sshll.u32 %s8220_s19, 4  ;;  %p8146_p8 = scmp.ne.s32.totalorder %s14294_s1, %s8145_s23  ;;  %s24_s20 = int_to_ptr.vmem [resolvable:$true] %s23_s20 }
  0x15   :  { %p8149_p9 = scmp.lt.u32.totalorder %s8145_s23, %s14294_s1 }
  0x17   :  { %p8151_p10 = pnand %p8149_p9, %p8146_p8 }
  0x19   :  { %8154 = shalt.err (!%p8151_p10)
}
  0x1a   :  { %s8155_s29 = scalar_lea.vmem %s24_s20, 8000  ;;  %p8160_p12 = scmp.lt.s32.totalorder %s24_s20, %s24_s20 }
  0x1b   :  { %p8156_p11 = scmp.ne.s32.totalorder %s24_s20, %s8155_s29  ;;  %p8161_p13 = scmp.lt.s32.totalorder %s8155_s29, %s8155_s29 }
  0x1d   :  { %p8162_p0 = por %p8161_p13, %p8160_p12 }
  0x1f   :  { %p8163_p1 = pnand %p8162_p0, %p8156_p11 }
  0x21   :  { %8166 = shalt.err (!%p8163_p1)
}
  0x22   :  { %s8221_s4 = smov 64   ;;  %s8222_s28 = smov 4  }
  0x23   :  { %29 = dma.hbm_to_vmem [thread:$0]  %s14294_s1, 8000, %s24_s20, [#allocation3], %s8221_s4, %s8221_s4, %s8222_s28  }
  0x24   :  { %s8223_s10 = smov [#allocation7]   ;;  %s8167_s14 = scalar_lea.hbm %s14299_s6, 4096 }
  0x25   :  { %s53_s11 = sshll.u32 %s8223_s10, 4  ;;  %p8168_p2 = scmp.ne.s32.totalorder %s14299_s6, %s8167_s14  ;;  %s54_s11 = int_to_ptr.vmem [resolvable:$true] %s53_s11 }
  0x26   :  { %p8171_p3 = scmp.lt.u32.totalorder %s8167_s14, %s14299_s6 }
  0x28   :  { %p8173_p4 = pnand %p8171_p3, %p8168_p2 }
  0x2a   :  { %8176 = shalt.err (!%p8173_p4)
}
  0x2b   :  { %s8177_s22 = scalar_lea.vmem %s54_s11, 4096  ;;  %p8182_p6 = scmp.lt.s32.totalorder %s54_s11, %s54_s11 }
  0x2c   :  { %p8178_p5 = scmp.ne.s32.totalorder %s54_s11, %s8177_s22  ;;  %p8183_p7 = scmp.lt.s32.totalorder %s8177_s22, %s8177_s22 }
  0x2e   :  { %p8184_p8 = por %p8183_p7, %p8182_p6 }
  0x30   :  { %p8185_p9 = pnand %p8184_p8, %p8178_p5 }
  0x32   :  { %8188 = shalt.err (!%p8185_p9)
}
  0x33   :  { %59 = dma.hbm_to_vmem [thread:$0]  %s14299_s6, 4096, %s54_s11, [#allocation6], %s8218_s15, %s8218_s15, %s8219_s16  }
  0x34   :  { %8211 = dma.done.wait [#allocation3], 8000  }
  0x35   :  { %8212 = vsyncadd [#allocation3], 4294959296 }
  0x36   :  { %8213 = dma.done.wait [#allocation6], 8192  }
  0x37   :  { %8214 = vsyncadd [#allocation6], 4294959104  ;;  %v14315_v0 = vmov 7   ;;  %v14307_v1 = vmov 1   ;;  %v8328_v2 = vld [vmem:[%s14293_s0 + $0x40] sm:$0xff]  ;;  %v8335_v3 = vld [vmem:[%s14293_s0 + $0x48] sm:$0xff] }
  0x38   :  { %7867 = vset.pattern.permute.xlu0 %v14315_v0  ;;  %7857 = vset.pattern.permute.xlu1 %v14307_v1  ;;  %v8340_v4 = vld [vmem:[%s14293_s0 + $0x58] sm:$0xff]  ;;  %v14313_v5 = vmov 4   ;;  %v8347_v6 = vld [vmem:[%s14293_s0 + $0x60] sm:$0xff]  ;;  %v14303_v7 = vmov 2   ;;  %v8354_v8 = vld [vmem:[%s14293_s0 + $0x8] sm:$0xff]  ;;  %v14317_v9 = vmov 3  }
  0x39   :  { %3914 = vperm.xlu0 %7867, %v8328_v2   ;;  %554 = vperm.xlu1 %7857, %v8328_v2   ;;  %v14309_v10 = vmov 6   ;;  %v8365_v11 = vld [vmem:[%s14293_s0 + $0x50] sm:$0xff]  ;;  %v8373_v12 = vld [vmem:[%s14293_s0 + $0x78] sm:$0xff]  ;;  %v8380_v13 = vld [vmem:[%s14293_s0] sm:$0xff]  ;;  %v14311_v14 = vmov 0   ;;  %v14305_v15 = vmov 5  }
  0x3a   :  { %v8397_v16 = vld [vmem:[%s14293_s0 + $0x10] sm:$0xff]  ;;  %v8408_v17 = vld [vmem:[%s14293_s0 + $0x68] sm:$0xff]  ;;  %v8423_v19 = vld [vmem:[%s14293_s0 + $0x18] sm:$0xff] }
  0x3b   :  { %v8415_v18 = vld [vmem:[%s14293_s0 + $0x70] sm:$0xff]  ;;  %v8430_v20 = vld [vmem:[%s14293_s0 + $0x20] sm:$0xff]  ;;  %v8454_v21 = vld [vmem:[%s14293_s0 + $0x28] sm:$0xff] }
  0x3c   :  { %v8461_v22 = vld [vmem:[%s14293_s0 + $0x30] sm:$0xff]  ;;  %v7932_v23 = vld [vmem:[#allocation2 + $0x40] sm:$0xff]   ;;  %v7934_v25 = vld [vmem:[#allocation2 + $0x48] sm:$0xff]  }
  0x3d   :  { %7870 = vset.pattern.permute.xlu0 %v14313_v5  ;;  %557 = vperm.xlu1 %7857, %v8335_v3   ;;  %v7933_v24 = vld [vmem:[#allocation2] sm:$0xff]   ;;  %v7935_v26 = vld [vmem:[#allocation2 + $0x8] sm:$0xff]   ;;  %v8480_v27 = vld [vmem:[%s14293_s0 + $0x38] sm:$0xff] }
  0x3e   :  { %2243 = vperm.xlu0 %7870, %v8340_v4   ;;  %7822 = vmatprep.subr.bf16.mxu1 %v7932_v23  ;;  %v7936_v28 = vld [vmem:[#allocation2 + $0x50] sm:$0xff]   ;;  %v7938_v30 = vld [vmem:[#allocation2 + $0x58] sm:$0xff]   ;;  %v7940_v32 = vld [vmem:[#allocation2 + $0x60] sm:$0xff]  }
  0x3f   :  { %7830 = vmatpush3.bf16.msra.mxu1 %v7933_v24  ;;  %7630 = vmatprep.subr.bf16.mxu0 %v7932_v23  ;;  %v7937_v29 = vld [vmem:[#allocation2 + $0x10] sm:$0xff]   ;;  %v7939_v31 = vld [vmem:[#allocation2 + $0x18] sm:$0xff]   ;;  %v7941_v33 = vld [vmem:[#allocation2 + $0x20] sm:$0xff]  }
  0x40   :  { %7631 = vmatpush3.bf16.msra.mxu0 %v7933_v24  ;;  %7823 = vmatprep.subr.bf16.mxu1 %v7934_v25  ;;  %v7942_v36 = vld [vmem:[#allocation2 + $0x68] sm:$0xff]   ;;  %v7944_v38 = vld [vmem:[#allocation2 + $0x70] sm:$0xff]   ;;  %v7946_v42 = vld [vmem:[#allocation2 + $0x78] sm:$0xff]  }
  0x41   :  { %7858 = vset.pattern.permute.xlu1 %v14303_v7  ;;  %7632 = vmatprep.subr.bf16.mxu0 %v7934_v25  ;;  %v7943_v37 = vld [vmem:[#allocation2 + $0x28] sm:$0xff]   ;;  %v7945_v41 = vld [vmem:[#allocation2 + $0x30] sm:$0xff]   ;;  %v7947_v45 = vld [vmem:[#allocation2 + $0x38] sm:$0xff]  }
  0x42   :  { %2246 = vperm.xlu0 %7870, %v8347_v6   ;;  %1117 = vperm.xlu1 %7858, %v8335_v3  }
  0x43   :  { %7831 = vmatpush3.bf16.msra.mxu1 %v7935_v26 }
  0x44   :  { %7633 = vmatpush3.bf16.msra.mxu0 %v7935_v26  ;;  %7824 = vmatprep.subr.bf16.mxu1 %v7936_v28 }
  0x45   :  { %7634 = vmatprep.subr.bf16.mxu0 %v7936_v28 }
  0x46   :  { %7859 = vset.pattern.permute.xlu1 %v14317_v9  ;;  %2213 = vperm.xlu0 %7870, %v8354_v8  }
  0x47   :  { %1674 = vperm.xlu1 %7859, %v8328_v2   ;;  %7832 = vmatpush3.bf16.msra.mxu1 %v7937_v29 }
  0x48   :  { %7635 = vmatpush3.bf16.msra.mxu0 %v7937_v29  ;;  %7825 = vmatprep.subr.bf16.mxu1 %v7938_v30 }
  0x49   :  { %7636 = vmatprep.subr.bf16.mxu0 %v7938_v30 }
  0x4a   :  { %7895 = vset.pattern.permute.xlu0 %v14309_v10 }
  0x4b   :  { %7860 = vset.pattern.permute.xlu1 %v14313_v5  ;;  %3357 = vperm.xlu0 %7895, %v8335_v3  }
  0x4c   :  { %2234 = vperm.xlu1 %7860, %v8328_v2   ;;  %7833 = vmatpush3.bf16.msra.mxu1 %v7939_v31 }
  0x4d   :  { %7637 = vmatpush3.bf16.msra.mxu0 %v7939_v31  ;;  %7826 = vmatprep.subr.bf16.mxu1 %v7940_v32 }
  0x4e   :  { %7638 = vmatprep.subr.bf16.mxu0 %v7940_v32 }
  0x4f   :  { %3360 = vperm.xlu0 %7895, %v8365_v11  }
  0x50   :  { %2237 = vperm.xlu1 %7860, %v8335_v3   ;;  %7834 = vmatpush3.bf16.msra.mxu1 %v7941_v33 }
  0x51   :  { %7827 = vmatprep.subr.bf16.mxu1 %v7942_v36  ;;  %7639 = vmatpush3.bf16.msra.mxu0 %v7941_v33  ;;  %v14370_v33 = vmov 0.0  }
  0x52   :  { %7640 = vmatprep.subr.bf16.mxu0 %v7942_v36 }
  0x53   :  { %3375 = vperm.xlu0 %7895, %v8373_v12  }
  0x54   :  { %7861 = vset.pattern.permute.xlu1 %v14311_v14  ;;  %7835 = vmatpush3.bf16.msra.mxu1 %v7943_v37 }
  0x55   :  { %131 = vperm.xlu1 %7861, %v8340_v4   ;;  %7828 = vmatprep.subr.bf16.mxu1 %v7944_v38 }
  0x56   :  { %7641 = vmatpush3.bf16.msra.mxu0 %v7943_v37 }
  0x57   :  { %3330 = vperm.xlu0 %7895, %v8380_v13   ;;  %7642 = vmatprep.subr.bf16.mxu0 %v7944_v38 }
  0x58   :  { %7836 = vmatpush3.bf16.msra.mxu1 %v7945_v41 }
  0x59   :  { %7862 = vset.pattern.permute.xlu1 %v14307_v1  ;;  %7829 = vmatprep.subr.bf16.mxu1 %v7946_v42 }
  0x5a   :  { %560 = vperm.xlu1 %7862, %v8365_v11   ;;  %7643 = vmatpush3.bf16.msra.mxu0 %v7945_v41 }
  0x5b   :  { %7900 = vset.pattern.permute.xlu0 %v14305_v15  ;;  %7644 = vmatprep.subr.bf16.mxu0 %v7946_v42 }
  0x5c   :  { %2803 = vperm.xlu0 %7900, %v8340_v4   ;;  %7837 = vmatpush3.bf16.msra.mxu1 %v7947_v45 }
  0x5e   :  { %7863 = vset.pattern.permute.xlu1 %v14305_v15  ;;  %7645 = vmatpush3.bf16.msra.mxu0 %v7947_v45 }
  0x5f   :  { %2794 = vperm.xlu1 %7863, %v8328_v2  }
  0x60   :  { %2806 = vperm.xlu0 %7900, %v8347_v6  }
  0x63   :  { %2797 = vperm.xlu1 %7863, %v8335_v3  }
  0x64   :  { %2773 = vperm.xlu0 %7900, %v8354_v8  }
  0x67   :  { %7864 = vset.pattern.permute.xlu1 %v14303_v7 }
  0x68   :  { %1123 = vperm.xlu1 %7864, %v8340_v4   ;;  %2776 = vperm.xlu0 %7900, %v8397_v16  }
  0x6c   :  { %7865 = vset.pattern.permute.xlu1 %v14309_v10  ;;  %7907 = vset.pattern.permute.xlu0 %v14317_v9 }
  0x6d   :  { %3354 = vperm.xlu1 %7865, %v8328_v2   ;;  %1677 = vperm.xlu0 %7907, %v8335_v3  }
  0x71   :  { %7866 = vset.pattern.permute.xlu1 %v14317_v9  ;;  %1689 = vperm.xlu0 %7907, %v8408_v17  }
  0x72   :  { %1680 = vperm.xlu1 %7866, %v8365_v11  }
  0x75   :  { %1692 = vperm.xlu0 %7907, %v8415_v18  }
  0x76   :  { %1683 = vperm.xlu1 %7866, %v8340_v4  }
  0x79   :  { %1659 = vperm.xlu0 %7907, %v8423_v19  }
  0x7a   :  { %7868 = vset.pattern.permute.xlu1 %v14315_v0 }
  0x7b   :  { %3917 = vperm.xlu1 %7868, %v8335_v3  }
  0x7d   :  { %1662 = vperm.xlu0 %7907, %v8430_v20  }
  0x7f   :  { %7869 = vset.pattern.permute.xlu1 %v14313_v5 }
  0x80   :  { %2240 = vperm.xlu1 %7869, %v8365_v11  }
  0x81   :  { %7911 = vset.pattern.permute.xlu0 %v14311_v14 }
  0x82   :  { %122 = vperm.xlu0 %7911, %v8328_v2  }
  0x84   :  { %7871 = vset.pattern.permute.xlu1 %v14311_v14 }
  0x85   :  { %134 = vperm.xlu1 %7871, %v8347_v6  }
  0x86   :  { %125 = vperm.xlu0 %7911, %v8335_v3  }
  0x89   :  { %137 = vperm.xlu1 %7871, %v8408_v17  }
  0x8a   :  { %128 = vperm.xlu0 %7911, %v8365_v11  }
  0x8d   :  { %7872 = vset.pattern.permute.xlu1 %v14307_v1 }
  0x8e   :  { %569 = vperm.xlu1 %7872, %v8408_v17   ;;  %143 = vperm.xlu0 %7911, %v8373_v12  }
  0x92   :  { %7873 = vset.pattern.permute.xlu1 %v14305_v15  ;;  %98 = vperm.xlu0 %7911, %v8380_v13  }
  0x93   :  { %2800 = vperm.xlu1 %7873, %v8365_v11  }
  0x96   :  { %113 = vperm.xlu0 %7911, %v8454_v21  }
  0x97   :  { %7874 = vset.pattern.permute.xlu1 %v14303_v7 }
  0x98   :  { %1126 = vperm.xlu1 %7874, %v8347_v6  }
  0x9a   :  { %116 = vperm.xlu0 %7911, %v8461_v22  }
  0x9c   :  { %1129 = vperm.xlu1 %7874, %v8408_v17  }
  0x9e   :  { %7915 = vset.pattern.permute.xlu0 %v14307_v1 }
  0x9f   :  { %563 = vperm.xlu0 %7915, %v8340_v4  }
  0xa0   :  { %7875 = vset.pattern.permute.xlu1 %v14309_v10 }
  0xa1   :  { %3363 = vperm.xlu1 %7875, %v8340_v4  }
  0xa3   :  { %566 = vperm.xlu0 %7915, %v8347_v6  }
  0xa5   :  { %7876 = vset.pattern.permute.xlu1 %v14317_v9 }
  0xa6   :  { %1686 = vperm.xlu1 %7876, %v8347_v6  }
  0xa7   :  { %533 = vperm.xlu0 %7915, %v8354_v8  }
  0xaa   :  { %7877 = vset.pattern.permute.xlu1 %v14315_v0 }
  0xab   :  { %3920 = vperm.xlu1 %7877, %v8365_v11   ;;  %536 = vperm.xlu0 %7915, %v8397_v16  }
  0xaf   :  { %3923 = vperm.xlu1 %7877, %v8340_v4   ;;  %551 = vperm.xlu0 %7915, %v8480_v27  }
  0xb3   :  { %7878 = vset.pattern.permute.xlu1 %v14313_v5  ;;  %7918 = vset.pattern.permute.xlu0 %v14303_v7 }
  0xb4   :  { %2249 = vperm.xlu1 %7878, %v8408_v17   ;;  %1114 = vperm.xlu0 %7918, %v8328_v2  }
  0xb8   :  { %7879 = vset.pattern.permute.xlu1 %v14311_v14  ;;  %v8489_v34 = vpop.permute.xlu1 %554  ;;  %1120 = vperm.xlu0 %7918, %v8365_v11   ;;  %v8492_v35 = vpop.permute.xlu0 %3914 }
  0xb9   :  { %14720 = vst [vmem:[#allocation12_spill] sm:$0xff] %v8489_v34  ;;  %14721 = vst [vmem:[#allocation13_spill] sm:$0xff] %v8492_v35  ;;  %140 = vperm.xlu1 %7879, %v8415_v18  }
  0xbc   :  { %v8495_v39 = vpop.permute.xlu1 %557  ;;  %1135 = vperm.xlu0 %7918, %v8373_v12  }
  0xbd   :  { %14722 = vst [vmem:[#allocation14_spill] sm:$0xff] %v8495_v39  ;;  %7880 = vset.pattern.permute.xlu1 %v14307_v1  ;;  %v8499_v40 = vpop.permute.xlu0 %2243 }
  0xbe   :  { %14723 = vst [vmem:[#allocation15_spill] sm:$0xff] %v8499_v40  ;;  %572 = vperm.xlu1 %7880, %v8415_v18  }
  0xc0   :  { %1090 = vperm.xlu0 %7918, %v8380_v13  }
  0xc1   :  { %v8503_v43 = vpop.permute.xlu1 %1117  ;;  %v8505_v44 = vpop.permute.xlu0 %2246 }
  0xc2   :  { %14724 = vst [vmem:[#allocation16_spill] sm:$0xff] %v8503_v43  ;;  %14725 = vst [vmem:[#allocation17_spill] sm:$0xff] %v8505_v44  ;;  %575 = vperm.xlu1 %7880, %v8373_v12  }
  0xc4   :  { %1105 = vperm.xlu0 %7918, %v8454_v21  }
  0xc5   :  { %v8509_v46 = vpop.permute.xlu0 %2213 }
  0xc6   :  { %14726 = vst [vmem:[#allocation18_spill] sm:$0xff] %v8509_v46  ;;  %7881 = vset.pattern.permute.xlu1 %v14305_v15  ;;  %v8512_v47 = vpop.permute.xlu1 %1674 }
  0xc7   :  { %14727 = vst [vmem:[#allocation19_spill] sm:$0xff] %v8512_v47  ;;  %2809 = vperm.xlu1 %7881, %v8408_v17  }
  0xc8   :  { %1108 = vperm.xlu0 %7918, %v8461_v22  }
  0xca   :  { %v8516_v48 = vpop.permute.xlu0 %3357 }
  0xcb   :  { %14728 = vst [vmem:[#allocation20_spill] sm:$0xff] %v8516_v48  ;;  %7882 = vset.pattern.permute.xlu1 %v14303_v7  ;;  %v8519_v49 = vpop.permute.xlu1 %2234 }
  0xcc   :  { %14729 = vst [vmem:[#allocation21_spill] sm:$0xff] %v8519_v49  ;;  %1132 = vperm.xlu1 %7882, %v8415_v18   ;;  %7920 = vset.pattern.permute.xlu0 %v14315_v0 }
  0xcd   :  { %3929 = vperm.xlu0 %7920, %v8408_v17  }
  0xce   :  { %v8524_v50 = vpop.permute.xlu0 %3360 }
  0xcf   :  { %14730 = vst [vmem:[#allocation22_spill] sm:$0xff] %v8524_v50  ;;  %v8526_v51 = vpop.permute.xlu1 %2237 }
  0xd0   :  { %14731 = vst [vmem:[#allocation23_spill] sm:$0xff] %v8526_v51  ;;  %7883 = vset.pattern.permute.xlu1 %v14309_v10 }
  0xd1   :  { %3366 = vperm.xlu1 %7883, %v8347_v6   ;;  %3932 = vperm.xlu0 %7920, %v8415_v18  }
  0xd2   :  { %v8531_v52 = vpop.permute.xlu0 %3375 }
  0xd3   :  { %14732 = vst [vmem:[#allocation24_spill] sm:$0xff] %v8531_v52 }
  0xd4   :  { %v8533_v53 = vpop.permute.xlu1 %131 }
  0xd5   :  { %14733 = vst [vmem:[#allocation25_spill] sm:$0xff] %v8533_v53  ;;  %3369 = vperm.xlu1 %7883, %v8408_v17   ;;  %3899 = vperm.xlu0 %7920, %v8423_v19  }
  0xd6   :  { %v8537_v54 = vpop.permute.xlu0 %3330 }
  0xd7   :  { %14734 = vst [vmem:[#allocation26_spill] sm:$0xff] %v8537_v54 }
  0xd9   :  { %7884 = vset.pattern.permute.xlu1 %v14317_v9  ;;  %v8540_v55 = vpop.permute.xlu1 %560  ;;  %3902 = vperm.xlu0 %7920, %v8430_v20  }
  0xda   :  { %14735 = vst [vmem:[#allocation27_spill] sm:$0xff] %v8540_v55  ;;  %1695 = vperm.xlu1 %7884, %v8373_v12  }
  0xdb   :  { %v8544_v56 = vpop.permute.xlu0 %2803 }
  0xdc   :  { %14736 = vst [vmem:[#allocation28_spill] sm:$0xff] %v8544_v56 }
  0xdd   :  { %7924 = vset.pattern.permute.xlu0 %v14313_v5 }
  0xde   :  { %7885 = vset.pattern.permute.xlu1 %v14315_v0  ;;  %v8548_v57 = vpop.permute.xlu1 %2794  ;;  %2216 = vperm.xlu0 %7924, %v8397_v16  }
  0xdf   :  { %14737 = vst [vmem:[#allocation29_spill] sm:$0xff] %v8548_v57  ;;  %3926 = vperm.xlu1 %7885, %v8347_v6   ;;  %v8552_v58 = vpop.permute.xlu0 %2806  ;;  %v14302_v6 = vlaneseq }
  0xe0   :  { %14738 = vst [vmem:[#allocation30_spill] sm:$0xff] %v8552_v58 }
  0xe1   :  { %v8588_v20 = vand.u32 127, %v14302_v6 }
  0xe2   :  { %v8554_v59 = vpop.permute.xlu1 %2797  ;;  %2231 = vperm.xlu0 %7924, %v8480_v27  }
  0xe3   :  { %14739 = vst [vmem:[#allocation31_spill] sm:$0xff] %v8554_v59  ;;  %7886 = vset.pattern.permute.xlu1 %v14313_v5  ;;  %v8558_v60 = vpop.permute.xlu0 %2773  ;;  %v8597_v23 = vadd.s32 128, %v8588_v20  ;;  %v8601_v24 = vadd.s32 384, %v8588_v20  ;;  %v8606_v26 = vadd.s32 256, %v8588_v20  ;;  %vm641_vm1 = vcmp.eq.s32.totalorder %v8489_v34, %v8588_v20 }
  0xe4   :  { %14740 = vst [vmem:[#allocation32_spill] sm:$0xff] %v8558_v60  ;;  %2252 = vperm.xlu1 %7886, %v8415_v18   ;;  %v8616_v28 = vadd.s32 768, %v8588_v20  ;;  %v8627_v30 = vadd.s32 640, %v8588_v20  ;;  %vm649_vm4 = vcmp.eq.s32.totalorder %v8495_v39, %v8588_v20  ;;  %vm2345_vm6 = vcmp.eq.s32.totalorder %v8499_v40, %v8588_v20 }
  0xe5   :  { %14751 = vst [vmem:[#allocation43_spill] sm:$0xff] %v8601_v24  ;;  %vm642_vm0 = vcmp.eq.s32.totalorder %v8489_v34, %v8597_v23  ;;  %vm650_vm2 = vcmp.eq.s32.totalorder %v8495_v39, %v8597_v23  ;;  %vm644_vm3 = vcmp.eq.s32.totalorder %v8489_v34, %v8601_v24  ;;  %vm2346_vm5 = vcmp.eq.s32.totalorder %v8499_v40, %v8597_v23 }
  0xe6   :  { %7927 = vset.pattern.permute.xlu0 %v14309_v10  ;;  %14754 = vst [vmem:[#allocation46_spill] sm:$0xff] %v8616_v28  ;;  %14756 = vst [vmem:[#allocation48_spill] sm:$0xff] %v8627_v30  ;;  %v8636_v31 = vadd.s32 896, %v8588_v20  ;;  %v8644_v36 = vsel %vm642_vm0, 1.0, %v14370_v33  ;;  %v8650_v37 = vsel %vm641_vm1, 1.0, %v14370_v33  ;;  %vm652_vm7 = vcmp.eq.s32.totalorder %v8495_v39, %v8601_v24 }
  0xe7   :  { %v8562_v61 = vpop.permute.xlu1 %1123  ;;  %v8564_v62 = vpop.permute.xlu0 %2776  ;;  %3345 = vperm.xlu0 %7927, %v8454_v21   ;;  %v8655_v38 = vsel %vm650_vm2, 1.0, %v14370_v33  ;;  %vm1210_vm8 = vcmp.eq.s32.totalorder %v8503_v43, %v8597_v23  ;;  %vm1209_vm9 = vcmp.eq.s32.totalorder %v8503_v43, %v8588_v20  ;;  %v8662_v41 = vsel %vm644_vm3, 1.0, %v14370_v33 }
  0xe8   :  { %14741 = vst [vmem:[#allocation33_spill] sm:$0xff] %v8562_v61  ;;  %14742 = vst [vmem:[#allocation34_spill] sm:$0xff] %v8564_v62  ;;  %2255 = vperm.xlu1 %7886, %v8373_v12   ;;  %v8665_v42 = vsel %vm649_vm4, 1.0, %v14370_v33  ;;  %v8668_v45 = vsel %vm2346_vm5, 1.0, %v14370_v33  ;;  %v8671_v6 = vsel %vm2345_vm6, 1.0, %v14370_v33  ;;  %vm2354_vm10 = vcmp.eq.s32.totalorder %v8505_v44, %v8597_v23 }
  0xe9   :  { %14757 = vst [vmem:[#allocation49_spill] sm:$0xff] %v8636_v31  ;;  %14759 = vst [vmem:[#allocation51_spill] sm:$0xff] %v8662_v41  ;;  %vm4002_vm11 = vcmp.eq.s32.totalorder %v8492_v35, %v8597_v23  ;;  %vm4001_vm12 = vcmp.eq.s32.totalorder %v8492_v35, %v8588_v20  ;;  %vm2353_vm13 = vcmp.eq.s32.totalorder %v8505_v44, %v8588_v20  ;;  %v14773_v30 = vmov 3  }
  0xea   :  { %14760 = vst [vmem:[#allocation52_spill] sm:$0xff] %v8671_v6  ;;  %vm2267_vm14 = vcmp.eq.s32.totalorder %v8509_v46, %v8606_v26  ;;  %vm2271_vm0 = vcmp.eq.s32.totalorder %v8509_v46, %v8616_v28  ;;  %vm1762_vm1 = vcmp.eq.s32.totalorder %v8512_v47, %v8597_v23  ;;  %vm1761_vm2 = vcmp.eq.s32.totalorder %v8512_v47, %v8588_v20 }
  0xeb   :  { %3348 = vperm.xlu0 %7927, %v8461_v22   ;;  %vm3450_vm3 = vcmp.eq.s32.totalorder %v8516_v48, %v8597_v23  ;;  %v8721_v5 = vsel %vm4002_vm11, 1.0, %v14370_v33  ;;  %v8727_v9 = vsel %vm2353_vm13, 1.0, %v14370_v33  ;;  %v8730_v40 = vsel %vm2267_vm14, 1.0, %v14370_v33 }
  0xec   :  { %7887 = vset.pattern.permute.xlu1 %v14311_v14  ;;  %v8570_v63 = vpop.permute.xlu1 %3354  ;;  %v8572_v2 = vpop.permute.xlu0 %1677  ;;  %v8704_v14 = vsel %vm1209_vm9, 1.0, %v14370_v33  ;;  %14765 = vst [vmem:[#allocation57_spill] sm:$0xff] %v8721_v5  ;;  %14767 = vst [vmem:[#allocation59_spill] sm:$0xff] %v8727_v9  ;;  %vm2322_vm4 = vcmp.eq.s32.totalorder %v8519_v49, %v8597_v23  ;;  %vm3449_vm5 = vcmp.eq.s32.totalorder %v8516_v48, %v8588_v20  ;;  %v8742_v34 = vsel %vm2271_vm0, 1.0, %v14370_v33 }
  0xed   :  { %14743 = vst [vmem:[#allocation35_spill] sm:$0xff] %v8570_v63  ;;  %14744 = vst [vmem:[#allocation36_spill] sm:$0xff] %v8572_v2  ;;  %101 = vperm.xlu1 %7887, %v8354_v8   ;;  %vm2321_vm6 = vcmp.eq.s32.totalorder %v8519_v49, %v8588_v20  ;;  %vm1212_vm9 = vcmp.eq.s32.totalorder %v8503_v43, %v8601_v24  ;;  %vm2329_vm11 = vcmp.eq.s32.totalorder %v8526_v51, %v8588_v20  ;;  %v14783_v9 = vmov 7  }
  0xee   :  { %14768 = vst [vmem:[#allocation60_spill] sm:$0xff] %v8730_v40  ;;  %14771 = vst [vmem:[#allocation63_spill] sm:$0xff] %v8742_v34  ;;  %v8748_v40 = vsel %vm1762_vm1, 1.0, %v14370_v33  ;;  %v8760_v34 = vsel %vm3450_vm3, 1.0, %v14370_v33  ;;  %v8776_v48 = vsel %vm3449_vm5, 1.0, %v14370_v33  ;;  %v8779_v41 = vsel %vm2321_vm6, 1.0, %v14370_v33 }
  0xef   :  { %7931 = vset.pattern.permute.xlu0 %v14315_v0  ;;  %v8724_v0 = vsel %vm4001_vm12, 1.0, %v14370_v33  ;;  %vm234_vm12 = vcmp.eq.s32.totalorder %v8533_v53, %v8597_v23  ;;  %vm233_vm13 = vcmp.eq.s32.totalorder %v8533_v53, %v8588_v20  ;;  %vm1764_vm14 = vcmp.eq.s32.totalorder %v8512_v47, %v8601_v24 }
  0xf0   :  { %v8576_v3 = vpop.permute.xlu0 %1689  ;;  %3911 = vperm.xlu0 %7931, %v8480_v27   ;;  %v8613_v27 = vadd.s32 512, %v8588_v20  ;;  %14766 = vst [vmem:[#allocation58_spill] sm:$0xff] %v8724_v0  ;;  %v8807_v47 = vsel %vm2329_vm11, 1.0, %v14370_v33  ;;  %vm2906_vm0 = vcmp.eq.s32.totalorder %v8544_v56, %v8597_v23  ;;  %vm657_vm1 = vcmp.eq.s32.totalorder %v8540_v55, %v8588_v20 }
  0xf1   :  { %14745 = vst [vmem:[#allocation37_spill] sm:$0xff] %v8576_v3  ;;  %v8579_v4 = vpop.permute.xlu1 %1680  ;;  %7888 = vset.pattern.permute.xlu1 %v14307_v1  ;;  %v8814_v54 = vsel %vm234_vm12, 1.0, %v14370_v33  ;;  %v8817_v60 = vsel %vm233_vm13, 1.0, %v14370_v33  ;;  %vm2882_vm3 = vcmp.eq.s32.totalorder %v8548_v57, %v8597_v23  ;;  %vm2914_vm5 = vcmp.eq.s32.totalorder %v8552_v58, %v8597_v23 }
  0xf2   :  { %14746 = vst [vmem:[#allocation38_spill] sm:$0xff] %v8579_v4  ;;  %530 = vperm.xlu1 %7888, %v8380_v13   ;;  %14753 = vst [vmem:[#allocation45_spill] sm:$0xff] %v8613_v27  ;;  %vm2269_vm15 = vcmp.eq.s32.totalorder %v8509_v46, %v8613_v27  ;;  %vm2890_vm6 = vcmp.eq.s32.totalorder %v8554_v59, %v8597_v23  ;;  %v8838_v46 = vsel %vm2906_vm0, 1.0, %v14370_v33 }
  0xf3   :  { %v8733_v39 = vsel %vm2269_vm15, 1.0, %v14370_v33  ;;  %vm658_vm15 = vcmp.eq.s32.totalorder %v8540_v55, %v8597_v23  ;;  %14781 = vst [vmem:[#allocation72_spill] sm:$0xff] %v8838_v46  ;;  %vm1770_vm11 = vcmp.eq.s32.totalorder %v8572_v2, %v8597_v23  ;;  %vm3441_vm0 = vcmp.eq.s32.totalorder %v8570_v63, %v8588_v20 }
  0xf4   :  { %v8583_v11 = vpop.permute.xlu0 %1692  ;;  %14769 = vst [vmem:[#allocation61_spill] sm:$0xff] %v8733_v39  ;;  %v8751_v39 = vsel %vm1761_vm2, 1.0, %v14370_v33  ;;  %vm2905_vm2 = vcmp.eq.s32.totalorder %v8544_v56, %v8588_v20  ;;  %v8829_v55 = vsel %vm658_vm15, 1.0, %v14370_v33  ;;  %v8889_v56 = vsel %vm2890_vm6, 1.0, %v14370_v33 }
  0xf5   :  { %14747 = vst [vmem:[#allocation39_spill] sm:$0xff] %v8583_v11  ;;  %v8585_v17 = vpop.permute.xlu1 %1683  ;;  %vm1769_vm15 = vcmp.eq.s32.totalorder %v8572_v2, %v8588_v20  ;;  %vm2332_vm6 = vcmp.eq.s32.totalorder %v8526_v51, %v8601_v24 }
  0xf6   :  { %14748 = vst [vmem:[#allocation40_spill] sm:$0xff] %v8585_v17  ;;  %7889 = vset.pattern.permute.xlu1 %v14305_v15  ;;  %v8685_v15 = vsel %vm652_vm7, 1.0, %v14370_v33  ;;  %vm3458_vm7 = vcmp.eq.s32.totalorder %v8524_v50, %v8597_v23 }
  0xf7   :  { %2812 = vperm.xlu1 %7889, %v8415_v18   ;;  %14762 = vst [vmem:[#allocation54_spill] sm:$0xff] %v8685_v15  ;;  %v8771_v15 = vsel %vm2322_vm4, 1.0, %v14370_v33  ;;  %vm2881_vm4 = vcmp.eq.s32.totalorder %v8548_v57, %v8588_v20 }
  0xf8   :  { %v8592_v21 = vpop.permute.xlu0 %1659 }
  0xf9   :  { %14749 = vst [vmem:[#allocation41_spill] sm:$0xff] %v8592_v21  ;;  %v8800_v21 = vsel %vm1212_vm9, 1.0, %v14370_v33  ;;  %vm1226_vm9 = vcmp.eq.s32.totalorder %v8562_v61, %v8597_v23 }
  0xfa   :  { %v8594_v22 = vpop.permute.xlu1 %3917  ;;  %14778 = vst [vmem:[#allocation69_spill] sm:$0xff] %v8800_v21 }
  0xfb   :  { %14750 = vst [vmem:[#allocation42_spill] sm:$0xff] %v8594_v22  ;;  %2815 = vperm.xlu1 %7889, %v8373_v12  }
  0xfc   :  { %v8603_v25 = vpop.permute.xlu0 %1662 }
  0xfd   :  { %14752 = vst [vmem:[#allocation44_spill] sm:$0xff] %v8603_v25  ;;  %v8794_v25 = vsel %vm3458_vm7, 1.0, %v14370_v33  ;;  %vm2913_vm7 = vcmp.eq.s32.totalorder %v8552_v58, %v8588_v20 }
  0xfe   :  { %14776 = vst [vmem:[#allocation67_spill] sm:$0xff] %v8794_v25  ;;  %v8892_v57 = vsel %vm2913_vm7, 1.0, %v14370_v33  ;;  %vm1810_vm7 = vcmp.eq.s32.totalorder %v8583_v11, %v8597_v23 }
  0xff   :  { %v8618_v29 = vpop.permute.xlu1 %2240  ;;  %7890 = vset.pattern.permute.xlu1 %v14303_v7  ;;  %14786 = vst [vmem:[#allocation76_spill] sm:$0xff] %v8892_v57 }
 0x100   :  { %14755 = vst [vmem:[#allocation47_spill] sm:$0xff] %v8618_v29  ;;  %1093 = vperm.xlu1 %7890, %v8354_v8  }
 0x101   :  { %v8638_v32 = vpop.permute.xlu0 %122 }
 0x102   :  { %14758 = vst [vmem:[#allocation50_spill] sm:$0xff] %v8638_v32 }
 0x104   :  { %v8675_v7 = vpop.permute.xlu1 %134  ;;  %7891 = vset.pattern.permute.xlu1 %v14309_v10  ;;  %v8698_v10 = vsel %vm1210_vm8, 1.0, %v14370_v33  ;;  %vm3457_vm8 = vcmp.eq.s32.totalorder %v8524_v50, %v8588_v20 }
 0x105   :  { %14761 = vst [vmem:[#allocation53_spill] sm:$0xff] %v8675_v7  ;;  %v8691_v1 = vpop.permute.xlu0 %125  ;;  %3372 = vperm.xlu1 %7891, %v8415_v18   ;;  %v8716_v18 = vsel %vm2354_vm10, 1.0, %v14370_v33  ;;  %vm2330_vm10 = vcmp.eq.s32.totalorder %v8526_v51, %v8597_v23  ;;  %v8797_v62 = vsel %vm3457_vm8, 1.0, %v14370_v33  ;;  %vm2889_vm8 = vcmp.eq.s32.totalorder %v8554_v59, %v8588_v20 }
 0x106   :  { %14763 = vst [vmem:[#allocation55_spill] sm:$0xff] %v8691_v1  ;;  %14764 = vst [vmem:[#allocation56_spill] sm:$0xff] %v8716_v18  ;;  %v8804_v53 = vsel %vm2330_vm10, 1.0, %v14370_v33  ;;  %vm1225_vm10 = vcmp.eq.s32.totalorder %v8562_v61, %v8588_v20  ;;  %v8858_v18 = vsel %vm2905_vm2, 1.0, %v14370_v33  ;;  %v8873_v61 = vsel %vm2881_vm4, 1.0, %v14370_v33 }
 0x107   :  { %14777 = vst [vmem:[#allocation68_spill] sm:$0xff] %v8797_v62  ;;  %14784 = vst [vmem:[#allocation74_spill] sm:$0xff] %v8858_v18  ;;  %v8867_v62 = vsel %vm2882_vm3, 1.0, %v14370_v33  ;;  %vm217_vm12 = vcmp.eq.s32.totalorder %v8691_v1, %v8588_v20  ;;  %vm218_vm13 = vcmp.eq.s32.totalorder %v8691_v1, %v8597_v23  ;;  %v8899_v58 = vsel %vm2889_vm8, 1.0, %v14370_v33 }
 0x108   :  { %v8735_v44 = vpop.permute.xlu1 %137  ;;  %v8905_v25 = vsel %vm1225_vm10, 1.0, %v14370_v33  ;;  %v6912_v59 = vsel %vm1770_vm11, 1.0, %v14370_v33  ;;  %v6528_v0 = vsel %vm218_vm13, 1.0, %v14370_v33  ;;  %v6527_v5 = vsel %vm217_vm12, 1.0, %v14370_v33 }
 0x109   :  { %14770 = vst [vmem:[#allocation62_spill] sm:$0xff] %v8735_v44  ;;  %v8744_v35 = vpop.permute.xlu0 %128  ;;  %7892 = vset.pattern.permute.xlu1 %v14773_v30  ;;  %vm1802_vm2 = vcmp.eq.s32.totalorder %v8576_v3, %v8597_v23  ;;  %vm1801_vm3 = vcmp.eq.s32.totalorder %v8576_v3, %v8588_v20  ;;  %vm1778_vm4 = vcmp.eq.s32.totalorder %v8579_v4, %v8597_v23  ;;  %v8940_v3 = vsel %vm3441_vm0, 1.0, %v14370_v33 }
 0x10a   :  { %14772 = vst [vmem:[#allocation64_spill] sm:$0xff] %v8744_v35  ;;  %1650 = vperm.xlu1 %7892, %v8380_v13   ;;  %14792 = vst [vmem:[#allocation81_spill] sm:$0xff] %v8940_v3  ;;  %v1033_v51 = vadd.f32 %v8665_v42, %v6527_v5  ;;  %v8953_v6 = vsel %vm1802_vm2, 1.0, %v14370_v33  ;;  %v8961_v46 = vsel %vm1778_vm4, 1.0, %v14370_v33  ;;  %vm1809_vm8 = vcmp.eq.s32.totalorder %v8583_v11, %v8588_v20 }
 0x10b   :  { %v14797_v5 = vmov 0   ;;  %vm1786_vm10 = vcmp.eq.s32.totalorder %v8585_v17, %v8597_v23  ;;  %vm1785_vm11 = vcmp.eq.s32.totalorder %v8585_v17, %v8588_v20  ;;  %vm210_vm12 = vcmp.eq.s32.totalorder %v8638_v32, %v8597_v23 }
 0x10c   :  { %vm4009_vm13 = vcmp.eq.s32.totalorder %v8594_v22, %v8588_v20  ;;  %vm209_vm0 = vcmp.eq.s32.totalorder %v8638_v32, %v8588_v20  ;;  %v14800_v17 = vmov 0.0   ;;  %vm212_vm2 = vcmp.eq.s32.totalorder %v8638_v32, %v8601_v24 }
 0x10d   :  { %v8787_v50 = vpop.permute.xlu1 %569  ;;  %v8789_v43 = vpop.permute.xlu0 %143  ;;  %v6519_v11 = vsel %vm209_vm0, 1.0, %v14800_v17  ;;  %vm224_vm4 = vcmp.eq.s32.totalorder %v8691_v1, %v8636_v31  ;;  %v9057_v1 = vsel %vm212_vm2, 1.0, %v14800_v17 }
 0x10e   :  { %14774 = vst [vmem:[#allocation65_spill] sm:$0xff] %v8787_v50  ;;  %14775 = vst [vmem:[#allocation66_spill] sm:$0xff] %v8789_v43  ;;  %1653 = vperm.xlu1 %7892, %v8354_v8   ;;  %v8822_v8 = vsel %vm1764_vm14, 1.0, %v14370_v33  ;;  %vm3442_vm14 = vcmp.eq.s32.totalorder %v8570_v63, %v8597_v23  ;;  %vm681_vm2 = vcmp.eq.s32.totalorder %v8787_v50, %v8588_v20 }
 0x10f   :  { %14779 = vst [vmem:[#allocation70_spill] sm:$0xff] %v8822_v8  ;;  %v8841_v8 = vsel %vm657_vm1, 1.0, %v14370_v33  ;;  %vm2324_vm1 = vcmp.eq.s32.totalorder %v8519_v49, %v8601_v24  ;;  %v8928_v63 = vsel %vm3442_vm14, 1.0, %v14370_v33  ;;  %vm2338_vm14 = vcmp.eq.s32.totalorder %v8618_v29, %v8597_v23  ;;  %14805 = vst [vmem:[#allocation92_spill] sm:$0xff] %v9057_v1 }
 0x110   :  { %14790 = vst [vmem:[#allocation79_spill] sm:$0xff] %v8928_v63  ;;  %v8956_v63 = vsel %vm1801_vm3, 1.0, %v14370_v33  ;;  %vm226_vm3 = vcmp.eq.s32.totalorder %v8744_v35, %v8597_v23 }
 0x111   :  { %v8833_v21 = vpop.permute.xlu0 %98  ;;  %14794 = vst [vmem:[#allocation83_spill] sm:$0xff] %v8956_v63 }
 0x112   :  { %14780 = vst [vmem:[#allocation71_spill] sm:$0xff] %v8833_v21  ;;  %v8845_v52 = vpop.permute.xlu1 %2800  ;;  %7893 = vset.pattern.permute.xlu1 %v14783_v9  ;;  %v14789_v9 = vmov 4   ;;  %vm151_vm0 = vcmp.eq.s32.totalorder %v8833_v21, %v8616_v28 }
 0x113   :  { %14782 = vst [vmem:[#allocation73_spill] sm:$0xff] %v8845_v52  ;;  %3935 = vperm.xlu1 %7893, %v8373_v12   ;;  %v8879_v12 = vsel %vm2914_vm5, 1.0, %v14370_v33  ;;  %vm1777_vm5 = vcmp.eq.s32.totalorder %v8579_v4, %v8588_v20  ;;  %v1034_v4 = vadd.f32 %v8655_v38, %v6528_v0  ;;  %v8969_v0 = vsel %vm2332_vm6, 1.0, %v14370_v33 }
 0x114   :  { %14785 = vst [vmem:[#allocation75_spill] sm:$0xff] %v8879_v12  ;;  %v8902_v12 = vsel %vm1226_vm9, 1.0, %v14370_v33  ;;  %v8964_v30 = vsel %vm1777_vm5, 1.0, %v14370_v33  ;;  %14796 = vst [vmem:[#allocation85_spill] sm:$0xff] %v8969_v0  ;;  %vm4010_vm9 = vcmp.eq.s32.totalorder %v8594_v22, %v8597_v23  ;;  %v8979_v38 = vsel %vm1810_vm7, 1.0, %v14370_v33 }
 0x115   :  { %v8894_v18 = vpop.permute.xlu0 %113  ;;  %14798 = vst [vmem:[#allocation86_spill] sm:$0xff] %v8979_v38  ;;  %v8999_v49 = vsel %vm4010_vm9, 1.0, %v14800_v17  ;;  %v9002_v22 = vsel %vm1786_vm10, 1.0, %v14800_v17  ;;  %v9005_v0 = vsel %vm1785_vm11, 1.0, %v14800_v17  ;;  %vm242_vm5 = vcmp.eq.s32.totalorder %v8675_v7, %v8597_v23 }
 0x116   :  { %14787 = vst [vmem:[#allocation77_spill] sm:$0xff] %v8894_v18  ;;  %vm225_vm6 = vcmp.eq.s32.totalorder %v8744_v35, %v8588_v20  ;;  %vm232_vm7 = vcmp.eq.s32.totalorder %v8744_v35, %v8636_v31  ;;  %vm241_vm9 = vcmp.eq.s32.totalorder %v8675_v7, %v8588_v20  ;;  %vm272_vm10 = vcmp.eq.s32.totalorder %v8789_v43, %v8636_v31 }
 0x117   :  { %v8914_v57 = vpop.permute.xlu1 %1126  ;;  %7894 = vset.pattern.permute.xlu1 %v14789_v9  ;;  %v6911_v9 = vsel %vm1769_vm15, 1.0, %v14370_v33  ;;  %vm2337_vm15 = vcmp.eq.s32.totalorder %v8618_v29, %v8588_v20  ;;  %vm249_vm11 = vcmp.eq.s32.totalorder %v8735_v44, %v8588_v20  ;;  %v6535_v1 = vsel %vm225_vm6, 1.0, %v14800_v17 }
 0x118   :  { %14788 = vst [vmem:[#allocation78_spill] sm:$0xff] %v8914_v57  ;;  %2210 = vperm.xlu1 %7894, %v8380_v13   ;;  %v8948_v13 = vsel %vm2324_vm1, 1.0, %v14370_v33  ;;  %vm216_vm1 = vcmp.eq.s32.totalorder %v8638_v32, %v8636_v31  ;;  %v1593_v33 = vadd.f32 %v8704_v14, %v1033_v51  ;;  %v6520_v14 = vsel %vm210_vm12, 1.0, %v14800_v17 }
 0x119   :  { %v8936_v2 = vpop.permute.xlu0 %116  ;;  %14793 = vst [vmem:[#allocation82_spill] sm:$0xff] %v8948_v13  ;;  %v9011_v13 = vsel %vm1809_vm8, 1.0, %v14800_v17  ;;  %v9019_v51 = vsel %vm4009_vm13, 1.0, %v14800_v17  ;;  %v9025_v38 = vsel %vm216_vm1, 1.0, %v14800_v17  ;;  %v9051_v29 = vadd.f32 %v8644_v36, %v6520_v14 }
 0x11a   :  { %14791 = vst [vmem:[#allocation80_spill] sm:$0xff] %v8936_v2  ;;  %14801 = vst [vmem:[#allocation88_spill] sm:$0xff] %v9011_v13  ;;  %v9038_v13 = vsel %vm2337_vm15, 1.0, %v14800_v17  ;;  %v2153_v63 = vadd.f32 %v6911_v9, %v1593_v33  ;;  %v9060_v9 = vadd.f32 %v8650_v37, %v6519_v11  ;;  %vm250_vm8 = vcmp.eq.s32.totalorder %v8735_v44, %v8597_v23 }
 0x11b   :  { %v8958_v3 = vpop.permute.xlu1 %1129  ;;  %14803 = vst [vmem:[#allocation90_spill] sm:$0xff] %v9025_v38  ;;  %v9068_v33 = vsel %vm224_vm4, 1.0, %v14800_v17  ;;  %v9076_v11 = vsel %vm242_vm5, 1.0, %v14800_v17  ;;  %v9081_v37 = vsel %vm232_vm7, 1.0, %v14800_v17  ;;  %vm266_vm13 = vcmp.eq.s32.totalorder %v8789_v43, %v8597_v23 }
 0x11c   :  { %14795 = vst [vmem:[#allocation84_spill] sm:$0xff] %v8958_v3  ;;  %7896 = vset.pattern.permute.xlu1 %v14797_v5  ;;  %14806 = vst [vmem:[#allocation93_spill] sm:$0xff] %v9068_v33  ;;  %v2713_v32 = vadd.f32 %v8807_v47, %v2153_v63  ;;  %v9105_v47 = vsel %vm241_vm9, 1.0, %v14800_v17  ;;  %vm149_vm15 = vcmp.eq.s32.totalorder %v8833_v21, %v8613_v27  ;;  %v6559_v63 = vsel %vm249_vm11, 1.0, %v14800_v17 }
 0x11d   :  { %104 = vperm.xlu1 %7896, %v8397_v16   ;;  %v1594_v16 = vadd.f32 %v8698_v10, %v1034_v4  ;;  %v9022_v4 = vsel %vm2338_vm14, 1.0, %v14800_v17  ;;  %14809 = vst [vmem:[#allocation95_spill] sm:$0xff] %v9081_v37  ;;  %v6560_v37 = vsel %vm250_vm8, 1.0, %v14800_v17  ;;  %vm147_vm14 = vcmp.eq.s32.totalorder %v8833_v21, %v8606_v26 }
 0x11e   :  { %v8994_v42 = vpop.permute.xlu0 %563  ;;  %vm682_vm1 = vcmp.eq.s32.totalorder %v8787_v50, %v8597_v23  ;;  %v3273_v35 = vadd.f32 %v8899_v58, %v2713_v32  ;;  %v9149_v44 = vsel %vm149_vm15, 1.0, %v14800_v17  ;;  %v9161_v58 = vsel %vm266_vm13, 1.0, %v14800_v17  ;;  %v7948_v32 = vld [vmem:[#allocation2 + $0xc0] sm:$0xff]  }
 0x11f   :  { %14799 = vst [vmem:[#allocation87_spill] sm:$0xff] %v8994_v42  ;;  %v2154_v5 = vadd.f32 %v6912_v59, %v1594_v16  ;;  %v6536_v59 = vsel %vm226_vm3, 1.0, %v14800_v17  ;;  %v14808_v16 = vmov 1   ;;  %vm666_vm12 = vcmp.eq.s32.totalorder %v8994_v42, %v8597_v23  ;;  %14816 = vst [vmem:[#allocation101_spill] sm:$0xff] %v9149_v44  ;;  %7694 = vmatprep.subr.bf16.mxu1 %v7948_v32 }
 0x120   :  { %v9015_v10 = vpop.permute.xlu1 %3363  ;;  %v9095_v24 = vadd.f32 %v8829_v55, %v6536_v59  ;;  %v9122_v55 = vadd.f32 %v8841_v8, %v6535_v1  ;;  %v14813_v59 = vmov 5   ;;  %v6672_v1 = vsel %vm666_vm12, 1.0, %v14800_v17  ;;  %14817 = vst [vmem:[#allocation102_spill] sm:$0xff] %v9161_v58 }
 0x121   :  { %14802 = vst [vmem:[#allocation89_spill] sm:$0xff] %v9015_v10  ;;  %107 = vperm.xlu1 %7896, %v8423_v19   ;;  %v2714_v33 = vadd.f32 %v8804_v53, %v2154_v5  ;;  %v9113_v53 = vsel %vm272_vm10, 1.0, %v14800_v17  ;;  %vm152_vm3 = vcmp.eq.s32.totalorder %v8833_v21, %v8636_v31  ;;  %v9146_v8 = vsel %vm147_vm14, 1.0, %v14800_v17 }
 0x122   :  { %v9042_v38 = vpop.permute.xlu0 %566  ;;  %14811 = vst [vmem:[#allocation97_spill] sm:$0xff] %v9113_v53  ;;  %14815 = vst [vmem:[#allocation100_spill] sm:$0xff] %v9146_v8  ;;  %vm192_vm4 = vcmp.eq.s32.totalorder %v8894_v18, %v8636_v31  ;;  %vm2898_vm5 = vcmp.eq.s32.totalorder %v8845_v52, %v8597_v23  ;;  %vm2897_vm6 = vcmp.eq.s32.totalorder %v8845_v52, %v8588_v20  ;;  %v6688_v8 = vsel %vm682_vm1, 1.0, %v14800_v17 }
 0x123   :  { %14804 = vst [vmem:[#allocation91_spill] sm:$0xff] %v9042_v38  ;;  %v3274_v7 = vadd.f32 %v8889_v56, %v2714_v33  ;;  %v9154_v56 = vld [vmem:[%s14293_s0] sm:$0xff]  ;;  %v9167_v33 = vsel %vm151_vm0, 1.0, %v14800_v17  ;;  %vm665_vm7 = vcmp.eq.s32.totalorder %v8994_v42, %v8588_v20  ;;  %v1050_v44 = vadd.f32 %v6672_v1, %v8814_v54 }
 0x124   :  { %14818 = vst [vmem:[#allocation103_spill] sm:$0xff] %v9167_v33  ;;  %vm1242_vm8 = vcmp.eq.s32.totalorder %v8958_v3, %v8597_v23  ;;  %vm200_vm9 = vcmp.eq.s32.totalorder %v8936_v2, %v8636_v31  ;;  %v3833_v54 = vadd.f32 %v8776_v48, %v3273_v35  ;;  %vm1234_vm10 = vcmp.eq.s32.totalorder %v8914_v57, %v8597_v23  ;;  %v9219_v35 = vld [vmem:[%s14293_s0 + $0x10] sm:$0xff] }
 0x125   :  { %v9072_v36 = vpop.permute.xlu1 %1686  ;;  %7897 = vset.pattern.permute.xlu1 %v14808_v16  ;;  %v9198_v1 = vsel %vm152_vm3, 1.0, %v14800_v17  ;;  %v9201_v32 = vsel %vm192_vm4, 1.0, %v14800_v17  ;;  %v14823_v16 = vmov 2   ;;  %vm672_vm11 = vcmp.eq.s32.totalorder %v8994_v42, %v8636_v31 }
 0x126   :  { %14807 = vst [vmem:[#allocation94_spill] sm:$0xff] %v9072_v36  ;;  %539 = vperm.xlu1 %7897, %v8423_v19   ;;  %v9084_v14 = vpop.permute.xlu0 %533  ;;  %14821 = vst [vmem:[#allocation106_spill] sm:$0xff] %v9198_v1  ;;  %v6671_v48 = vsel %vm665_vm7, 1.0, %v14800_v17  ;;  %v6816_v1 = vsel %vm1242_vm8, 1.0, %v14800_v17  ;;  %v9240_v50 = vsel %vm200_vm9, 1.0, %v14800_v17  ;;  %v1610_v42 = vadd.f32 %v8902_v12, %v1050_v44 }
 0x127   :  { %14810 = vst [vmem:[#allocation96_spill] sm:$0xff] %v9084_v14  ;;  %14822 = vst [vmem:[#allocation107_spill] sm:$0xff] %v9201_v32  ;;  %v9230_v32 = vsel %vm2897_vm6, 1.0, %v14800_v17  ;;  %v9244_v21 = vsel %vm1234_vm10, 1.0, %v14800_v17  ;;  %v9250_v58 = vadd.f32 %v9019_v51, %v3833_v54  ;;  %vm3466_vm12 = vcmp.eq.s32.totalorder %v9015_v10, %v8597_v23 }
 0x128   :  { %14824 = vst [vmem:[#allocation108_spill] sm:$0xff] %v9240_v50  ;;  %v9257_v2 = vsel %vm672_vm11, 1.0, %v14800_v17  ;;  %vm680_vm13 = vcmp.eq.s32.totalorder %v9042_v38, %v8636_v31  ;;  %vm674_vm14 = vcmp.eq.s32.totalorder %v9042_v38, %v8597_v23  ;;  %vm3465_vm1 = vcmp.eq.s32.totalorder %v9015_v10, %v8588_v20 }
 0x129   :  { %14825 = vst [vmem:[#allocation109_spill] sm:$0xff] %v9257_v2  ;;  %vm1233_vm3 = vcmp.eq.s32.totalorder %v8914_v57, %v8588_v20  ;;  %vm1794_vm4 = vcmp.eq.s32.totalorder %v9072_v36, %v8597_v23  ;;  %vm1241_vm7 = vcmp.eq.s32.totalorder %v8958_v3, %v8588_v20  ;;  %vm587_vm8 = vcmp.eq.s32.totalorder %v9084_v14, %v8606_v26  ;;  %v7957_v2 = vld [vmem:[#allocation2 + $0xa0] sm:$0xff]   ;;  %v14869_v3 = vld [vmem:[#allocation43_spill] sm:$0xff] }
 0x12a   :  { %v9130_v5 = vpop.permute.xlu1 %3920  ;;  %7898 = vset.pattern.permute.xlu1 %v14813_v59  ;;  %v9133_v53 = vpop.permute.xlu0 %536  ;;  %v3834_v59 = vadd.f32 %v8760_v34, %v3274_v7  ;;  %v9208_v7 = vsel %vm2898_vm5, 1.0, %v14800_v17  ;;  %v6687_v34 = vsel %vm681_vm2, 1.0, %v14800_v17  ;;  %vm673_vm2 = vcmp.eq.s32.totalorder %v9042_v38, %v8588_v20  ;;  %v14870_v57 = vld [vmem:[#allocation71_spill] sm:$0xff] }
 0x12b   :  { %14812 = vst [vmem:[#allocation98_spill] sm:$0xff] %v9130_v5  ;;  %14814 = vst [vmem:[#allocation99_spill] sm:$0xff] %v9133_v53  ;;  %2770 = vperm.xlu1 %7898, %v9154_v56   ;;  %vm4018_vm9 = vcmp.eq.s32.totalorder %v9130_v5, %v8597_v23  ;;  %vm589_vm10 = vcmp.eq.s32.totalorder %v9084_v14, %v8613_v27 }
 0x12c   :  { %v9247_v52 = vadd.f32 %v8999_v49, %v3834_v59  ;;  %v1049_v49 = vadd.f32 %v6671_v48, %v8817_v60  ;;  %v2170_v60 = vadd.f32 %v9002_v22, %v1610_v42  ;;  %v9295_v42 = vsel %vm3465_vm1, 1.0, %v14800_v17 }
 0x12d   :  { %vm265_vm1 = vcmp.eq.s32.totalorder %v8789_v43, %v8588_v20 }
 0x12e   :  { %v9186_v33 = vpop.permute.xlu1 %3923  ;;  %v9188_v18 = vpop.permute.xlu0 %551  ;;  %v1609_v22 = vadd.f32 %v8905_v25, %v1049_v49  ;;  %v9316_v49 = vld [vmem:[%s14293_s0 + $0x8] sm:$0xff] }
 0x12f   :  { %14819 = vst [vmem:[#allocation104_spill] sm:$0xff] %v9186_v33  ;;  %14820 = vst [vmem:[#allocation105_spill] sm:$0xff] %v9188_v18  ;;  %7899 = vset.pattern.permute.xlu1 %v14823_v16  ;;  %v1066_v16 = vadd.f32 %v6688_v8, %v6560_v37  ;;  %v9254_v18 = vadd.f32 %v6687_v34, %v6559_v63  ;;  %vm4026_vm11 = vcmp.eq.s32.totalorder %v9186_v33, %v8597_v23 }
 0x130   :  { %1096 = vperm.xlu1 %7899, %v9219_v35  }
 0x131   :  { %v1626_v37 = vadd.f32 %v6816_v1, %v1066_v16  ;;  %v9285_v16 = vsel %vm680_vm13, 1.0, %v14800_v17  ;;  %v6680_v1 = vsel %vm674_vm14, 1.0, %v14800_v17  ;;  %vm1793_vm13 = vcmp.eq.s32.totalorder %v9072_v36, %v8588_v20  ;;  %v7960_v36 = vld [vmem:[#allocation2 + $0xf0] sm:$0xff]  }
 0x132   :  { %14828 = vst [vmem:[#allocation112_spill] sm:$0xff] %v9285_v16  ;;  %vm4025_vm14 = vcmp.eq.s32.totalorder %v9186_v33, %v8588_v20 }
 0x133   :  { %v9261_v44 = vpop.permute.xlu1 %2249  ;;  %v9263_v12 = vpop.permute.xlu0 %1114  ;;  %v9311_v25 = vadd.f32 %v8953_v6, %v1626_v37 }
 0x134   :  { %14826 = vst [vmem:[#allocation110_spill] sm:$0xff] %v9261_v44  ;;  %14827 = vst [vmem:[#allocation111_spill] sm:$0xff] %v9263_v12  ;;  %1099 = vperm.xlu1 %7899, %v8423_v19   ;;  %vm1202_vm15 = vcmp.eq.s32.totalorder %v9263_v12, %v8597_v23  ;;  %vm1201_vm0 = vcmp.eq.s32.totalorder %v9263_v12, %v8588_v20  ;;  %v7312_v19 = vsel %vm3466_vm12, 1.0, %v14800_v17 }
 0x135   :  { %v6776_v51 = vsel %vm1202_vm15, 1.0, %v14800_v17  ;;  %v6775_v63 = vsel %vm1201_vm0, 1.0, %v14800_v17  ;;  %vm4017_vm12 = vcmp.eq.s32.totalorder %v9130_v5, %v8588_v20  ;;  %vm591_vm15 = vcmp.eq.s32.totalorder %v9084_v14, %v8616_v28  ;;  %v14878_v5 = vld [vmem:[#allocation32_spill] sm:$0xff] }
 0x136   :  { %v1586_v59 = vadd.f32 %v6776_v51, %v9051_v29  ;;  %v1585_v8 = vadd.f32 %v6775_v63, %v9060_v9  ;;  %v14831_v9 = vmov 6   ;;  %v2730_v63 = vadd.f32 %v8668_v45, %v2170_v60 }
 0x137   :  { %v9291_v54 = vpop.permute.xlu0 %1120  ;;  %v2169_v60 = vadd.f32 %v9005_v0, %v1609_v22  ;;  %v14835_v0 = vld [vmem:[#allocation72_spill] sm:$0xff]  ;;  %vm592_vm0 = vcmp.eq.s32.totalorder %v9084_v14, %v8636_v31 }
 0x138   :  { %14829 = vst [vmem:[#allocation113_spill] sm:$0xff] %v9291_v54  ;;  %v9303_v29 = vpop.permute.xlu1 %140  ;;  %7901 = vset.pattern.permute.xlu1 %v14831_v9  ;;  %v2146_v34 = vadd.f32 %v8748_v40, %v1586_v59  ;;  %v2145_v48 = vadd.f32 %v8751_v39, %v1585_v8  ;;  %vm1218_vm5 = vcmp.eq.s32.totalorder %v9291_v54, %v8597_v23  ;;  %v6679_v39 = vsel %vm673_vm2, 1.0, %v14800_v17 }
 0x139   :  { %14830 = vst [vmem:[#allocation114_spill] sm:$0xff] %v9303_v29  ;;  %3333 = vperm.xlu1 %7901, %v9316_v49   ;;  %v6792_v51 = vsel %vm1218_vm5, 1.0, %v14800_v17  ;;  %vm1217_vm6 = vcmp.eq.s32.totalorder %v9291_v54, %v8588_v20  ;;  %v1058_v8 = vadd.f32 %v6680_v1, %v9076_v11  ;;  %v3290_v11 = vadd.f32 %v14835_v0, %v2730_v63 }
 0x13a   :  { %v2706_v40 = vadd.f32 %v8771_v15, %v2146_v34  ;;  %v2705_v6 = vadd.f32 %v8779_v41, %v2145_v48  ;;  %v1602_v37 = vadd.f32 %v6792_v51, %v9095_v24  ;;  %v6791_v59 = vsel %vm1217_vm6, 1.0, %v14800_v17  ;;  %v14837_v48 = vld [vmem:[#allocation81_spill] sm:$0xff] }
 0x13b   :  { %v1601_v45 = vadd.f32 %v6791_v59, %v9122_v55  ;;  %v9338_v16 = vpop.permute.xlu0 %1135  ;;  %v14834_v55 = vmov 3   ;;  %v14840_v59 = vld [vmem:[#allocation58_spill] sm:$0xff]  ;;  %v6807_v0 = vsel %vm1233_vm3, 1.0, %v14800_v17  ;;  %vm600_vm2 = vcmp.eq.s32.totalorder %v9133_v53, %v8636_v31 }
 0x13c   :  { %14832 = vst [vmem:[#allocation115_spill] sm:$0xff] %v9338_v16  ;;  %v3266_v15 = vadd.f32 %v8867_v62, %v2706_v40  ;;  %v3265_v24 = vadd.f32 %v8873_v61, %v2705_v6  ;;  %v2162_v41 = vadd.f32 %v8961_v46, %v1602_v37  ;;  %v6936_v61 = vsel %vm1794_vm4, 1.0, %v14800_v17  ;;  %v14836_v62 = vld [vmem:[#allocation79_spill] sm:$0xff]  ;;  %v14838_v6 = vld [vmem:[#allocation52_spill] sm:$0xff] }
 0x13d   :  { %v9347_v34 = vpop.permute.xlu1 %572  ;;  %7902 = vset.pattern.permute.xlu1 %v14834_v55  ;;  %v2161_v22 = vadd.f32 %v8964_v30, %v1601_v45  ;;  %v1057_v46 = vadd.f32 %v6679_v39, %v9105_v47  ;;  %v7432_v30 = vsel %vm4018_vm9, 1.0, %v14800_v17  ;;  %v2729_v37 = vadd.f32 %v14838_v6, %v2169_v60  ;;  %v14839_v47 = vld [vmem:[#allocation57_spill] sm:$0xff] }
 0x13e   :  { %14833 = vst [vmem:[#allocation116_spill] sm:$0xff] %v9347_v34  ;;  %1656 = vperm.xlu1 %7902, %v9219_v35   ;;  %v3826_v1 = vadd.f32 %v14836_v62, %v3266_v15  ;;  %v3825_v51 = vadd.f32 %v14837_v48, %v3265_v24  ;;  %v2722_v40 = vadd.f32 %v9022_v4, %v2162_v41 }
 0x13f   :  { %v2721_v63 = vadd.f32 %v9038_v13, %v2161_v22  ;;  %v9371_v24 = vpop.permute.xlu0 %1090  ;;  %v3850_v41 = vadd.f32 %v7312_v19, %v3290_v11  ;;  %v7440_v13 = vsel %vm4026_vm11, 1.0, %v14800_v17  ;;  %v1618_v60 = vadd.f32 %v9244_v21, %v1058_v8  ;;  %v14845_v21 = vld [vmem:[#allocation74_spill] sm:$0xff] }
 0x140   :  { %v4386_v39 = vadd.f32 %v14839_v47, %v3826_v1  ;;  %v4385_v45 = vadd.f32 %v14840_v59, %v3825_v51  ;;  %v3282_v15 = vadd.f32 %v9208_v7, %v2722_v40  ;;  %14841 = vst [vmem:[#allocation72_spill] sm:$0xff] %v9371_v24  ;;  %v14843_v22 = vmov 7   ;;  %v14844_v1 = vld [vmem:[#allocation67_spill] sm:$0xff]  ;;  %v7949_v40 = vld [vmem:[#allocation2 + $0x80] sm:$0xff]  }
 0x141   :  { %v9375_v4 = vpop.permute.xlu1 %575  ;;  %v1617_v51 = vadd.f32 %v6807_v0, %v1057_v46  ;;  %v3281_v19 = vadd.f32 %v9230_v32, %v2721_v63  ;;  %v3289_v8 = vadd.f32 %v14845_v21, %v2729_v37  ;;  %v7950_v32 = vld [vmem:[#allocation2 + $0xc8] sm:$0xff]   ;;  %v9404_v11 = vsel %vm587_vm8, 1.0, %v14800_v17  ;;  %v14846_v46 = vld [vmem:[#allocation68_spill] sm:$0xff] }
 0x142   :  { %14842 = vst [vmem:[#allocation79_spill] sm:$0xff] %v9375_v4  ;;  %7903 = vset.pattern.permute.xlu1 %v14843_v22  ;;  %v4482_v7 = vpack.c.bf16 %v9247_v52, %v4386_v39  ;;  %v4481_v62 = vpack.c.bf16 %v9250_v58, %v4385_v45  ;;  %v3842_v48 = vadd.f32 %v14844_v1, %v3282_v15  ;;  %v6935_v52 = vsel %vm1793_vm13, 1.0, %v14800_v17  ;;  %v7951_v15 = vld [vmem:[#allocation2 + $0x88] sm:$0xff]  }
 0x143   :  { %3890 = vperm.xlu1 %7903, %v9154_v56   ;;  %v4410_v58 = vadd.f32 %v7440_v13, %v3850_v41  ;;  %v3841_v63 = vadd.f32 %v14846_v46, %v3281_v19  ;;  %v2178_v6 = vadd.f32 %v6936_v61, %v1618_v60  ;;  %v6815_v37 = vsel %vm1241_vm7, 1.0, %v14800_v17  ;;  %v9421_v45 = vpop.permute.xlu0 %1105  ;;  %v7952_v60 = vld [vmem:[#allocation2 + $0xd0] sm:$0xff]  }
 0x144   :  { %5106 = vmatprep.mubr.bf16.mxu1 %v4482_v7  ;;  %v4402_v56 = vadd.f32 %v7432_v30, %v3842_v48  ;;  %v7431_v39 = vsel %vm4017_vm12, 1.0, %v14800_v17  ;;  %v7439_v59 = vsel %vm4025_vm14, 1.0, %v14800_v17  ;;  %14848 = vst [vmem:[#allocation52_spill] sm:$0xff] %v9421_v45  ;;  %v2177_v61 = vadd.f32 %v6935_v52, %v1617_v51  ;;  %v14849_v7 = vld [vmem:[#allocation105_spill] sm:$0xff]  ;;  %v14851_v48 = vld [vmem:[#allocation56_spill] sm:$0xff]  ;;  %v14853_v19 = vld [vmem:[#allocation59_spill] sm:$0xff] }
 0x145   :  { %5107 = vmatmul.mubr.bf16.vlgmr.msra.gmra.mrb[0].mxu1 %v4481_v62  ;;  %v3849_v41 = vadd.f32 %v9295_v42, %v3289_v8  ;;  %v4401_v13 = vadd.f32 %v7431_v39, %v3841_v63  ;;  %vm2362_vm3 = vcmp.eq.s32.totalorder %v9261_v44, %v8597_v23  ;;  %v9435_v0 = vsel %vm589_vm10, 1.0, %v14800_v17  ;;  %v7953_v8 = vld [vmem:[#allocation2 + $0x90] sm:$0xff]   ;;  %v7954_v63 = vld [vmem:[#allocation2 + $0xd8] sm:$0xff]  }
 0x146   :  { %v9411_v47 = vpop.permute.xlu1 %2809  ;;  %v4490_v30 = vpack.c.bf16 %v4410_v58, %v4402_v56  ;;  %7695 = vmatpush3.bf16.msra.mxu1 %v7949_v40  ;;  %vm640_vm4 = vcmp.eq.s32.totalorder %v14849_v7, %v8636_v31  ;;  %v1625_v62 = vadd.f32 %v6815_v37, %v9254_v18  ;;  %vm2361_vm5 = vcmp.eq.s32.totalorder %v9261_v44, %v8588_v20 }
 0x147   :  { %14847 = vst [vmem:[#allocation81_spill] sm:$0xff] %v9411_v47  ;;  %3893 = vperm.xlu1 %7903, %v9316_v49   ;;  %7696 = vmatprep.subr.bf16.mxu1 %v7950_v32  ;;  %v9446_v42 = vsel %vm591_vm15, 1.0, %v14800_v17  ;;  %v9452_v49 = vsel %vm592_vm0, 1.0, %v14800_v17  ;;  %v4409_v1 = vadd.f32 %v7439_v59, %v3849_v41  ;;  %v2738_v51 = vadd.f32 %v14851_v48, %v2178_v6  ;;  %v9486_v6 = vld [vmem:[%s14293_s0 + $0x18] sm:$0xff]  ;;  %v9489_v37 = vpop.permute.xlu0 %1108 }
 0x148   :  { %5114 = vmatprep.mubr.bf16.mxu1 %v4490_v30  ;;  %14850 = vst [vmem:[#allocation57_spill] sm:$0xff] %v9452_v49  ;;  %v9459_v18 = vsel %vm600_vm2, 1.0, %v14800_v17  ;;  %v7072_v40 = vsel %vm2362_vm3, 1.0, %v14800_v17  ;;  %v2737_v21 = vadd.f32 %v14853_v19, %v2177_v61  ;;  %vm698_vm6 = vcmp.eq.s32.totalorder %v9375_v4, %v8597_v23  ;;  %14857 = vst [vmem:[#allocation68_spill] sm:$0xff] %v9489_v37  ;;  %v14858_v30 = vld [vmem:[#allocation83_spill] sm:$0xff]  ;;  %v7956_v19 = vld [vmem:[#allocation2 + $0xe0] sm:$0xff]  }
 0x149   :  { %14852 = vst [vmem:[#allocation58_spill] sm:$0xff] %v9459_v18  ;;  %v9466_v52 = vsel %vm640_vm4, 1.0, %v14800_v17  ;;  %v14856_v58 = vmov 4   ;;  %v4489_v32 = vpack.c.bf16 %v4409_v1, %v4401_v13  ;;  %v7071_v46 = vsel %vm2361_vm5, 1.0, %v14800_v17  ;;  %v14859_v61 = vld [vmem:[#allocation75_spill] sm:$0xff] }
 0x14a   :  { %7697 = vmatpush3.bf16.msra.mxu1 %v7951_v15  ;;  %14854 = vst [vmem:[#allocation67_spill] sm:$0xff] %v9466_v52  ;;  %vm258_vm7 = vcmp.eq.s32.totalorder %v9303_v29, %v8597_v23  ;;  %vm1139_vm8 = vcmp.eq.s32.totalorder %v9371_v24, %v8606_v26  ;;  %vm1141_vm9 = vcmp.eq.s32.totalorder %v9371_v24, %v8613_v27  ;;  %v6704_v41 = vsel %vm698_vm6, 1.0, %v14800_v17  ;;  %v7958_v49 = vld [vmem:[#allocation2 + $0xe8] sm:$0xff]  }
 0x14b   :  { %v9468_v56 = vpop.permute.xlu1 %1132  ;;  %7904 = vset.pattern.permute.xlu1 %v14856_v58  ;;  %7698 = vmatprep.subr.bf16.mxu1 %v7952_v60  ;;  %vm1143_vm10 = vcmp.eq.s32.totalorder %v9371_v24, %v8616_v28  ;;  %v2185_v39 = vadd.f32 %v14858_v30, %v1625_v62  ;;  %v2746_v59 = vadd.f32 %v7072_v40, %v9311_v25  ;;  %v14860_v60 = vld [vmem:[#allocation76_spill] sm:$0xff]  ;;  %v6568_v25 = vsel %vm258_vm7, 1.0, %v14800_v17 }
 0x14c   :  { %14855 = vst [vmem:[#allocation74_spill] sm:$0xff] %v9468_v56  ;;  %2219 = vperm.xlu1 %7904, %v9486_v6   ;;  %v9494_v15 = vadd.f32 %v14859_v61, %v2738_v51  ;;  %vm690_vm11 = vcmp.eq.s32.totalorder %v9347_v34, %v8597_v23  ;;  %v9503_v1 = vadd.f32 %v14860_v60, %v2737_v21  ;;  %v7955_v62 = vld [vmem:[#allocation2 + $0x98] sm:$0xff]   ;;  %v9515_v48 = vsel %vm1139_vm8, 1.0, %v14800_v17 }
 0x14d   :  { %5115 = vmatmul.mubr.bf16.gmra.mrb[4].mxu1 %v4489_v32  ;;  %v2745_v13 = vadd.f32 %v7071_v46, %v2185_v39  ;;  %vm1258_vm12 = vcmp.eq.s32.totalorder %v9338_v16, %v8597_v23  ;;  %v9521_v51 = vsel %vm1141_vm9, 1.0, %v14800_v17  ;;  %v9527_v40 = vsel %vm1143_vm10, 1.0, %v14800_v17  ;;  %v14863_v46 = vld [vmem:[#allocation102_spill] sm:$0xff]  ;;  %v14864_v39 = vld [vmem:[#allocation24_spill] sm:$0xff] }
 0x14e   :  { %7699 = vmatpush3.bf16.msra.mxu1 %v7953_v8  ;;  %vm697_vm13 = vcmp.eq.s32.totalorder %v9375_v4, %v8588_v20  ;;  %v14862_v8 = vmov 0   ;;  %v6696_v32 = vsel %vm690_vm11, 1.0, %v14800_v17  ;;  %v1082_v30 = vadd.f32 %v6704_v41, %v14863_v46  ;;  %v9559_v41 = vpop.permute.xlu0 %3929 }
 0x14f   :  { %7700 = vmatprep.subr.bf16.mxu1 %v7954_v63  ;;  %vm3498_vm14 = vcmp.eq.s32.totalorder %v14864_v39, %v8597_v23  ;;  %vm689_vm15 = vcmp.eq.s32.totalorder %v9347_v34, %v8588_v20  ;;  %v9546_v63 = vld [vmem:[%s14293_s0 + $0x20] sm:$0xff]  ;;  %vm2922_vm0 = vcmp.eq.s32.totalorder %v9411_v47, %v8597_v23  ;;  %vm2921_vm2 = vcmp.eq.s32.totalorder %v9411_v47, %v8588_v20 }
 0x150   :  { %v9531_v21 = vpop.permute.xlu1 %3366  ;;  %7905 = vset.pattern.permute.xlu1 %v14862_v8  ;;  %v6832_v61 = vsel %vm1258_vm12, 1.0, %v14800_v17  ;;  %vm257_vm3 = vcmp.eq.s32.totalorder %v9303_v29, %v8588_v20  ;;  %14865 = vst [vmem:[#allocation59_spill] sm:$0xff] %v9559_v41  ;;  %vm1250_vm4 = vcmp.eq.s32.totalorder %v9468_v56, %v8597_v23  ;;  %v6575_v60 = vsel %vm265_vm1, 1.0, %v14800_v17 }
 0x151   :  { %14861 = vst [vmem:[#allocation56_spill] sm:$0xff] %v9531_v21  ;;  %110 = vperm.xlu1 %7905, %v9546_v63   ;;  %v6703_v46 = vsel %vm697_vm13, 1.0, %v14800_v17  ;;  %vm1249_vm5 = vcmp.eq.s32.totalorder %v9468_v56, %v8588_v20  ;;  %v1074_v52 = vadd.f32 %v6696_v32, %v6568_v25  ;;  %v9577_v50 = vsel %vm3498_vm14, 1.0, %v14800_v17 }
 0x152   :  { %7701 = vmatpush3.bf16.msra.mxu1 %v7955_v62  ;;  %v6695_v18 = vsel %vm689_vm15, 1.0, %v14800_v17  ;;  %vm1257_vm1 = vcmp.eq.s32.totalorder %v9338_v16, %v8588_v20  ;;  %v7200_v25 = vsel %vm2922_vm0, 1.0, %v14800_v17  ;;  %v7199_v62 = vsel %vm2921_vm2, 1.0, %v14800_v17 }
 0x153   :  { %7702 = vmatprep.subr.bf16.mxu1 %v7956_v19  ;;  %v9595_v32 = vadd.f32 %v6832_v61, %v1082_v30  ;;  %v6567_v19 = vsel %vm257_vm3, 1.0, %v14800_v17  ;;  %v14867_v34 = vmov 1   ;;  %v6824_v43 = vsel %vm1250_vm4, 1.0, %v14800_v17  ;;  %v9617_v30 = vpop.permute.xlu0 %3932 }
 0x154   :  { %v9585_v4 = vpop.permute.xlu1 %3369  ;;  %v1081_v44 = vadd.f32 %v6703_v46, %v6575_v60  ;;  %v6823_v47 = vsel %vm1249_vm5, 1.0, %v14800_v17  ;;  %vm3497_vm6 = vcmp.eq.s32.totalorder %v14864_v39, %v8588_v20  ;;  %vm4042_vm7 = vcmp.eq.s32.totalorder %v9559_v41, %v8597_v23  ;;  %14868 = vst [vmem:[#allocation75_spill] sm:$0xff] %v9617_v30  ;;  %v7959_v46 = vld [vmem:[#allocation2 + $0xa8] sm:$0xff]  }
 0x155   :  { %14866 = vst [vmem:[#allocation83_spill] sm:$0xff] %v9585_v4  ;;  %7906 = vset.pattern.permute.xlu1 %v14867_v34  ;;  %vm4041_vm8 = vcmp.eq.s32.totalorder %v9559_v41, %v8588_v20  ;;  %v1073_v61 = vadd.f32 %v6695_v18, %v6567_v19  ;;  %v6831_v60 = vsel %vm1257_vm1, 1.0, %v14800_v17  ;;  %v3306_v56 = vadd.f32 %v7200_v25, %v2746_v59  ;;  %v7961_v19 = vld [vmem:[#allocation2 + $0xb0] sm:$0xff]   ;;  %v14873_v39 = vld [vmem:[#allocation86_spill] sm:$0xff] }
 0x156   :  { %542 = vperm.xlu1 %7906, %v9546_v63   ;;  %7703 = vmatpush3.bf16.msra.mxu1 %v7957_v2  ;;  %vm3482_vm9 = vcmp.eq.s32.totalorder %v9585_v4, %v8597_v23  ;;  %v3305_v29 = vadd.f32 %v7199_v62, %v2745_v13  ;;  %vm3481_vm10 = vcmp.eq.s32.totalorder %v9585_v4, %v8588_v20  ;;  %v7455_v13 = vsel %vm4041_vm8, 1.0, %v14800_v17  ;;  %v14874_v41 = vld [vmem:[#allocation88_spill] sm:$0xff] }
 0x157   :  { %7704 = vmatprep.subr.bf16.mxu1 %v7958_v49  ;;  %vm148_vm11 = vcmp.eq.s32.totalorder %v14870_v57, %v14869_v3  ;;  %vm3474_vm12 = vcmp.eq.s32.totalorder %v9531_v21, %v8597_v23  ;;  %vm3473_vm13 = vcmp.eq.s32.totalorder %v9531_v21, %v8588_v20  ;;  %v1634_v2 = vadd.f32 %v6824_v43, %v1074_v52  ;;  %v9667_v62 = vpop.permute.xlu0 %3899  ;;  %v14875_v21 = vld [vmem:[#allocation18_spill] sm:$0xff] }
 0x158   :  { %v1633_v18 = vadd.f32 %v6823_v47, %v1073_v61  ;;  %vm588_vm14 = vcmp.eq.s32.totalorder %v9084_v14, %v14869_v3  ;;  %v7456_v49 = vsel %vm4042_vm7, 1.0, %v14800_v17  ;;  %v9645_v25 = vadd.f32 %v6831_v60, %v1081_v44  ;;  %v9656_v47 = vld [vmem:[%s14293_s0 + $0x28] sm:$0xff]  ;;  %14872 = vst [vmem:[#allocation102_spill] sm:$0xff] %v9667_v62 }
 0x159   :  { %v9635_v59 = vpop.permute.xlu1 %1695  ;;  %v9651_v43 = vsel %vm3497_vm6, 1.0, %v14800_v17  ;;  %v7328_v52 = vsel %vm3482_vm9, 1.0, %v14800_v17  ;;  %v7327_v44 = vsel %vm3481_vm10, 1.0, %v14800_v17  ;;  %vm146_vm15 = vcmp.eq.s32.totalorder %v14870_v57, %v8597_v23 }
 0x15a   :  { %14871 = vst [vmem:[#allocation76_spill] sm:$0xff] %v9635_v59  ;;  %545 = vperm.xlu1 %7906, %v9656_v47   ;;  %7705 = vmatpush3.bf16.msra.mxu1 %v7959_v46  ;;  %vm586_vm0 = vcmp.eq.s32.totalorder %v9084_v14, %v8597_v23  ;;  %vm145_vm2 = vcmp.eq.s32.totalorder %v14870_v57, %v8588_v20  ;;  %v7320_v61 = vsel %vm3474_vm12, 1.0, %v14800_v17  ;;  %v7319_v60 = vsel %vm3473_vm13, 1.0, %v14800_v17  ;;  %v7962_v46 = vld [vmem:[#allocation2 + $0xf8] sm:$0xff]  }
 0x15b   :  { %vm4050_vm3 = vcmp.eq.s32.totalorder %v9617_v30, %v8597_v23  ;;  %vm4049_vm4 = vcmp.eq.s32.totalorder %v9617_v30, %v8588_v20  ;;  %7706 = vmatprep.subr.bf16.mxu1 %v7960_v36  ;;  %v9688_v16 = vadd.f32 %v14873_v39, %v1634_v2  ;;  %v9691_v4 = vadd.f32 %v14874_v41, %v1633_v18 }
 0x15c   :  { %vm1138_vm5 = vcmp.eq.s32.totalorder %v9371_v24, %v8597_v23  ;;  %vm2266_vm1 = vcmp.eq.s32.totalorder %v14875_v21, %v8597_v23  ;;  %vm585_vm6 = vcmp.eq.s32.totalorder %v9084_v14, %v8588_v20  ;;  %v3866_v38 = vadd.f32 %v7328_v52, %v3306_v56 }
 0x15d   :  { %v3865_v33 = vadd.f32 %v7327_v44, %v3305_v29  ;;  %v9703_v36 = vsel %vm146_vm15, 1.0, %v14800_v17  ;;  %v9709_v39 = vsel %vm586_vm0, 1.0, %v14800_v17  ;;  %v14877_v2 = vmov 5   ;;  %v7963_v44 = vld [vmem:[#allocation2 + $0xb8] sm:$0xff]  }
 0x15e   :  { %v9711_v41 = vpop.permute.xlu1 %3926  ;;  %7908 = vset.pattern.permute.xlu1 %v14877_v2  ;;  %v3858_v18 = vadd.f32 %v7320_v61, %v9494_v15  ;;  %v3857_v29 = vadd.f32 %v7319_v60, %v9503_v1  ;;  %v9720_v56 = vsel %vm4050_vm3, 1.0, %v14800_v17  ;;  %v9726_v52 = vsel %vm4049_vm4, 1.0, %v14800_v17  ;;  %7707 = vmatpush3.bf16.msra.mxu1 %v7961_v19  ;;  %v9751_v60 = vpop.permute.xlu0 %3902 }
 0x15f   :  { %14876 = vst [vmem:[#allocation43_spill] sm:$0xff] %v9711_v41  ;;  %vm2827_vm7 = vcmp.eq.s32.totalorder %v14878_v5, %v8606_v26  ;;  %2779 = vperm.xlu1 %7908, %v9486_v6   ;;  %vm4034_vm8 = vcmp.eq.s32.totalorder %v9711_v41, %v8597_v23  ;;  %vm4033_vm9 = vcmp.eq.s32.totalorder %v9711_v41, %v8588_v20  ;;  %v9739_v15 = vsel %vm1138_vm5, 1.0, %v14800_v17 }
 0x160   :  { %7708 = vmatprep.subr.bf16.mxu1 %v7962_v46  ;;  %v9745_v1 = vsel %vm2266_vm1, 1.0, %v14800_v17  ;;  %vm594_vm10 = vcmp.eq.s32.totalorder %v9133_v53, %v8597_v23  ;;  %v7448_v19 = vsel %vm4034_vm8, 1.0, %v14800_v17  ;;  %v7447_v61 = vsel %vm4033_vm9, 1.0, %v14800_v17  ;;  %14880 = vst [vmem:[#allocation88_spill] sm:$0xff] %v9751_v60  ;;  %v14881_v46 = vld [vmem:[#allocation26_spill] sm:$0xff] }
 0x161   :  { %14879 = vst [vmem:[#allocation86_spill] sm:$0xff] %v9745_v1  ;;  %vm2826_vm12 = vcmp.eq.s32.totalorder %v14878_v5, %v8597_v23  ;;  %vm3378_vm13 = vcmp.eq.s32.totalorder %v14881_v46, %v8597_v23  ;;  %vm596_vm15 = vcmp.eq.s32.totalorder %v9133_v53, %v14869_v3  ;;  %v4418_v30 = vadd.f32 %v7448_v19, %v3858_v18 }
 0x162   :  { %v4426_v41 = vadd.f32 %v7456_v49, %v3866_v38  ;;  %v4417_v10 = vadd.f32 %v7447_v61, %v3857_v29  ;;  %v4425_v54 = vadd.f32 %v7455_v13, %v3865_v33  ;;  %vm593_vm0 = vcmp.eq.s32.totalorder %v9133_v53, %v8588_v20  ;;  %7709 = vmatpush3.bf16.msra.mxu1 %v7963_v44  ;;  %v9819_v61 = vpop.permute.xlu0 %2216 }
 0x163   :  { %vm1818_vm3 = vcmp.eq.s32.totalorder %v9635_v59, %v8597_v23  ;;  %vm1140_vm4 = vcmp.eq.s32.totalorder %v9371_v24, %v14869_v3  ;;  %vm2268_vm5 = vcmp.eq.s32.totalorder %v14875_v21, %v14869_v3  ;;  %vm2828_vm1 = vcmp.eq.s32.totalorder %v14878_v5, %v14869_v3  ;;  %v9769_v18 = vpop.permute.xlu1 %2252  ;;  %5333 = vmatprep.subr.bf16.mxu1 %v14862_v8 }
 0x164   :  { %14882 = vst [vmem:[#allocation117_spill] sm:$0xff] %v9769_v18  ;;  %v14883_v38 = vmov 2   ;;  %v4498_v33 = vpack.c.bf16 %v4426_v41, %v4418_v30  ;;  %v4497_v49 = vpack.c.bf16 %v4425_v54, %v4417_v10  ;;  %vm1817_vm8 = vcmp.eq.s32.totalorder %v9635_v59, %v8588_v20  ;;  %14887 = vst [vmem:[#allocation121_spill] sm:$0xff] %v9819_v61 }
 0x165   :  { %7909 = vset.pattern.permute.xlu1 %v14883_v38  ;;  %v9778_v13 = vsel %vm148_vm11, 1.0, %v14800_v17  ;;  %v9786_v29 = vsel %vm2826_vm12, 1.0, %v14800_v17  ;;  %v9792_v10 = vsel %vm3378_vm13, 1.0, %v14800_v17  ;;  %v6594_v54 = vsel %vm588_vm14, 1.0, %v14800_v17 }
 0x166   :  { %1102 = vperm.xlu1 %7909, %v9546_v63   ;;  %14884 = vst [vmem:[#allocation118_spill] sm:$0xff] %v9786_v29  ;;  %14885 = vst [vmem:[#allocation119_spill] sm:$0xff] %v9792_v10  ;;  %vm3380_vm11 = vcmp.eq.s32.totalorder %v14881_v46, %v14869_v3  ;;  %5122 = vmatprep.mubr.bf16.mxu1 %v4498_v33  ;;  %v6960_v30 = vsel %vm1818_vm3, 1.0, %v14800_v17  ;;  %v9808_v41 = vsel %vm1140_vm4, 1.0, %v14800_v17  ;;  %v9814_v44 = vsel %vm2268_vm5, 1.0, %v14800_v17 }
 0x167   :  { %14886 = vst [vmem:[#allocation120_spill] sm:$0xff] %v9814_v44  ;;  %vm1137_vm14 = vcmp.eq.s32.totalorder %v9371_v24, %v8588_v20  ;;  %5123 = vmatmul.mubr.bf16.gmra.mrb[8].mxu1 %v4497_v49  ;;  %v6959_v19 = vsel %vm1817_vm8, 1.0, %v14800_v17  ;;  %v9825_v33 = vsel %vm2828_vm1, 1.0, %v14800_v17  ;;  %v9831_v59 = vsel %vm145_vm2, 1.0, %v14800_v17  ;;  %v9835_v49 = vpop.permute.xlu1 %2255 }
 0x168   :  { %14888 = vst [vmem:[#allocation122_spill] sm:$0xff] %v9825_v33  ;;  %vm2265_vm9 = vcmp.eq.s32.totalorder %v14875_v21, %v8588_v20  ;;  %14889 = vst [vmem:[#allocation123_spill] sm:$0xff] %v9835_v49  ;;  %v9838_v24 = vsel %vm3380_vm11, 1.0, %v14800_v17  ;;  %vm2825_vm12 = vcmp.eq.s32.totalorder %v14878_v5, %v8588_v20  ;;  %vm3377_vm13 = vcmp.eq.s32.totalorder %v14881_v46, %v8588_v20 }
 0x169   :  { %14890 = vst [vmem:[#allocation124_spill] sm:$0xff] %v9838_v24  ;;  %vm3379_vm3 = vcmp.eq.s32.totalorder %v14881_v46, %v8606_v26  ;;  %v9848_v57 = vadd.f32 %v6960_v30, %v9595_v32  ;;  %v9854_v21 = vsel %vm585_vm6, 1.0, %v14800_v17  ;;  %v9857_v60 = vsel %vm1137_vm14, 1.0, %v14800_v17  ;;  %v14891_v24 = vld [vmem:[#allocation41_spill] sm:$0xff]  ;;  %v14893_v30 = vld [vmem:[#allocation34_spill] sm:$0xff] }
 0x16a   :  { %7910 = vset.pattern.permute.xlu1 %v14831_v9  ;;  %vm1722_vm2 = vcmp.eq.s32.totalorder %v14891_v24, %v8597_v23  ;;  %v9863_v46 = vadd.f32 %v6959_v19, %v9645_v25  ;;  %v9866_v32 = vsel %vm2265_vm9, 1.0, %v14800_v17  ;;  %vm2274_vm4 = vcmp.eq.s32.totalorder %v9819_v61, %v8597_v23 }
 0x16b   :  { %3336 = vperm.xlu1 %7910, %v9219_v35   ;;  %14892 = vst [vmem:[#allocation125_spill] sm:$0xff] %v9866_v32  ;;  %vm2834_vm6 = vcmp.eq.s32.totalorder %v14893_v30, %v8597_v23  ;;  %v9873_v14 = vsel %vm2825_vm12, 1.0, %v14800_v17  ;;  %v9876_v10 = vsel %vm3377_vm13, 1.0, %v14800_v17  ;;  %v9882_v25 = vsel %vm2827_vm7, 1.0, %v14800_v17 }
 0x16c   :  { %14894 = vst [vmem:[#allocation126_spill] sm:$0xff] %v9873_v14  ;;  %14895 = vst [vmem:[#allocation127_spill] sm:$0xff] %v9876_v10  ;;  %v9885_v19 = vsel %vm3379_vm3, 1.0, %v14800_v17  ;;  %v9891_v37 = vsel %vm594_vm10, 1.0, %v14800_v17  ;;  %v9894_v14 = vsel %vm1722_vm2, 1.0, %v14800_v17  ;;  %vm1724_vm5 = vcmp.eq.s32.totalorder %v14891_v24, %v14869_v3  ;;  %v9900_v5 = vpop.permute.xlu1 %101 }
 0x16d   :  { %14896 = vst [vmem:[#allocation128_spill] sm:$0xff] %v9882_v25  ;;  %14897 = vst [vmem:[#allocation129_spill] sm:$0xff] %v9885_v19  ;;  %vm2276_vm1 = vcmp.eq.s32.totalorder %v9819_v61, %v14869_v3  ;;  %v9903_v10 = vsel %vm2274_vm4, 1.0, %v14800_v17  ;;  %v9906_v19 = vsel %vm2834_vm6, 1.0, %v14800_v17  ;;  %v9912_v25 = vsel %vm596_vm15, 1.0, %v14800_v17 }
 0x16e   :  { %14898 = vst [vmem:[#allocation130_spill] sm:$0xff] %v9891_v37  ;;  %14899 = vst [vmem:[#allocation131_spill] sm:$0xff] %v9894_v14  ;;  %vm2836_vm7 = vcmp.eq.s32.totalorder %v14893_v30, %v14869_v3  ;;  %vm155_vm10 = vcmp.eq.s32.totalorder %v9900_v5, %v8606_v26  ;;  %vm156_vm8 = vcmp.eq.s32.totalorder %v9900_v5, %v14869_v3  ;;  %v9933_v14 = vsel %vm1724_vm5, 1.0, %v14800_v17  ;;  %v14912_v37 = vld [vmem:[#allocation103_spill] sm:$0xff] }
 0x16f   :  { %14900 = vst [vmem:[#allocation132_spill] sm:$0xff] %v9900_v5  ;;  %14901 = vst [vmem:[#allocation133_spill] sm:$0xff] %v9903_v10  ;;  %vm157_vm11 = vcmp.eq.s32.totalorder %v9900_v5, %v8613_v27  ;;  %3339 = vperm.xlu1 %7910, %v9486_v6   ;;  %vm159_vm15 = vcmp.eq.s32.totalorder %v9900_v5, %v8616_v28  ;;  %v6465_v10 = vsel %vm155_vm10, 1.0, %v14800_v17  ;;  %v9936_v33 = vsel %vm2276_vm1, 1.0, %v14800_v17 }
 0x170   :  { %14902 = vst [vmem:[#allocation134_spill] sm:$0xff] %v9906_v19  ;;  %14903 = vst [vmem:[#allocation135_spill] sm:$0xff] %v9912_v25  ;;  %v9927_v19 = vsel %vm593_vm0, 1.0, %v14800_v17  ;;  %v6467_v12 = vsel %vm157_vm11, 1.0, %v14800_v17  ;;  %v6469_v6 = vsel %vm159_vm15, 1.0, %v14800_v17  ;;  %v9941_v32 = vadd.f32 %v9404_v11, %v6465_v10 }
 0x171   :  { %14904 = vst [vmem:[#allocation136_spill] sm:$0xff] %v9927_v19  ;;  %14905 = vst [vmem:[#allocation137_spill] sm:$0xff] %v9933_v14  ;;  %vm2370_vm0 = vcmp.eq.s32.totalorder %v9769_v18, %v8597_v23  ;;  %v9946_v29 = vadd.f32 %v9435_v0, %v6467_v12  ;;  %v9949_v19 = vadd.f32 %v9446_v42, %v6469_v6  ;;  %v9957_v11 = vpop.permute.xlu1 %530  ;;  %v9967_v0 = vsel %vm2836_vm7, 1.0, %v14800_v17 }
 0x172   :  { %14906 = vst [vmem:[#allocation138_spill] sm:$0xff] %v9936_v33  ;;  %vm154_vm14 = vcmp.eq.s32.totalorder %v9900_v5, %v8597_v23  ;;  %v6466_v33 = vsel %vm156_vm8, 1.0, %v14800_v17  ;;  %vm595_vm9 = vcmp.eq.s32.totalorder %v9133_v53, %v8606_v26  ;;  %14907 = vst [vmem:[#allocation139_spill] sm:$0xff] %v9957_v11  ;;  %vm2369_vm12 = vcmp.eq.s32.totalorder %v9769_v18, %v8588_v20 }
 0x173   :  { %7912 = vset.pattern.permute.xlu1 %v14834_v55  ;;  %v9961_v12 = vadd.f32 %v6594_v54, %v6466_v33  ;;  %14908 = vst [vmem:[#allocation140_spill] sm:$0xff] %v9967_v0  ;;  %vm1721_vm13 = vcmp.eq.s32.totalorder %v14891_v24, %v8588_v20  ;;  %vm153_vm3 = vcmp.eq.s32.totalorder %v9900_v5, %v8588_v20  ;;  %v6464_v42 = vsel %vm154_vm14, 1.0, %v14800_v17  ;;  %v14909_v54 = vld [vmem:[#allocation77_spill] sm:$0xff]  ;;  %v14910_v0 = vld [vmem:[#allocation100_spill] sm:$0xff] }
 0x174   :  { %vm579_vm2 = vcmp.eq.s32.totalorder %v9957_v11, %v8606_v26  ;;  %vm581_vm4 = vcmp.eq.s32.totalorder %v9957_v11, %v8613_v27  ;;  %1665 = vperm.xlu1 %7912, %v9656_v47   ;;  %vm577_vm6 = vcmp.eq.s32.totalorder %v9957_v11, %v8588_v20  ;;  %vm580_vm5 = vcmp.eq.s32.totalorder %v9957_v11, %v14869_v3  ;;  %v14911_v55 = vld [vmem:[#allocation101_spill] sm:$0xff] }
 0x175   :  { %vm583_vm1 = vcmp.eq.s32.totalorder %v9957_v11, %v8616_v28  ;;  %v6585_v10 = vsel %vm579_vm2, 1.0, %v14800_v17  ;;  %vm185_vm7 = vcmp.eq.s32.totalorder %v14909_v54, %v8588_v20  ;;  %vm186_vm10 = vcmp.eq.s32.totalorder %v14909_v54, %v8597_v23 }
 0x176   :  { %vm188_vm8 = vcmp.eq.s32.totalorder %v14909_v54, %v14869_v3  ;;  %v6587_v33 = vsel %vm581_vm4, 1.0, %v14800_v17  ;;  %v6589_v6 = vsel %vm583_vm1, 1.0, %v14800_v17  ;;  %v9995_v14 = vadd.f32 %v6585_v10, %v14910_v0  ;;  %v10009_v0 = vpop.permute.xlu1 %2812 }
 0x177   :  { %vm2378_vm11 = vcmp.eq.s32.totalorder %v9835_v49, %v8597_v23  ;;  %vm187_vm15 = vcmp.eq.s32.totalorder %v14909_v54, %v8606_v26  ;;  %v965_v25 = vadd.f32 %v6587_v33, %v14911_v55  ;;  %v967_v44 = vadd.f32 %v6589_v6, %v14912_v37  ;;  %14913 = vst [vmem:[#allocation100_spill] sm:$0xff] %v10009_v0 }
 0x178   :  { %vm578_vm14 = vcmp.eq.s32.totalorder %v9957_v11, %v8597_v23  ;;  %v10006_v1 = vadd.f32 %v9709_v39, %v6464_v42  ;;  %7913 = vset.pattern.permute.xlu1 %v14843_v22  ;;  %v6586_v9 = vsel %vm580_vm5, 1.0, %v14800_v17  ;;  %v6463_v55 = vsel %vm153_vm3, 1.0, %v14800_v17 }
 0x179   :  { %v6584_v10 = vsel %vm578_vm14, 1.0, %v14800_v17  ;;  %v6583_v37 = vsel %vm577_vm6, 1.0, %v14800_v17  ;;  %3896 = vperm.xlu1 %7913, %v9219_v35   ;;  %v7080_v39 = vsel %vm2370_vm0, 1.0, %v14800_v17  ;;  %vm2377_vm2 = vcmp.eq.s32.totalorder %v9835_v49, %v8588_v20 }
 0x17a   :  { %v7079_v42 = vsel %vm2369_vm12, 1.0, %v14800_v17  ;;  %vm2273_vm3 = vcmp.eq.s32.totalorder %v9819_v61, %v8588_v20  ;;  %v962_v33 = vadd.f32 %v6584_v10, %v9703_v36  ;;  %v10039_v35 = vadd.f32 %v6586_v9, %v9778_v13  ;;  %v10055_v9 = vpop.permute.xlu1 %2815 }
 0x17b   :  { %vm2833_vm4 = vcmp.eq.s32.totalorder %v14893_v30, %v8588_v20  ;;  %vm1723_vm0 = vcmp.eq.s32.totalorder %v14891_v24, %v8606_v26  ;;  %v7088_v6 = vsel %vm2378_vm11, 1.0, %v14800_v17  ;;  %v961_v18 = vadd.f32 %v6583_v37, %v9831_v59  ;;  %14914 = vst [vmem:[#allocation101_spill] sm:$0xff] %v10055_v9  ;;  %v14915_v59 = vld [vmem:[#allocation44_spill] sm:$0xff] }
 0x17c   :  { %v10051_v22 = vadd.f32 %v9854_v21, %v6463_v55  ;;  %vm2275_vm12 = vcmp.eq.s32.totalorder %v9819_v61, %v8606_v26  ;;  %v7087_v36 = vsel %vm2377_vm2, 1.0, %v14800_v17  ;;  %v10062_v13 = vsel %vm1721_vm13, 1.0, %v14800_v17 }
 0x17d   :  { %vm2835_vm6 = vcmp.eq.s32.totalorder %v14893_v30, %v8606_v26  ;;  %vm1730_vm5 = vcmp.eq.s32.totalorder %v14915_v59, %v8597_v23  ;;  %7914 = vset.pattern.permute.xlu1 %v14856_v58  ;;  %v2754_v21 = vadd.f32 %v7080_v39, %v9688_v16  ;;  %v2753_v10 = vadd.f32 %v7079_v42, %v9691_v4 }
 0x17e   :  { %v10075_v55 = vsel %vm2273_vm3, 1.0, %v14800_v17  ;;  %v10078_v37 = vsel %vm2833_vm4, 1.0, %v14800_v17  ;;  %2222 = vperm.xlu1 %7914, %v9546_v63   ;;  %v2762_v49 = vadd.f32 %v7088_v6, %v9848_v57  ;;  %v10086_v16 = vsel %vm595_vm9, 1.0, %v14800_v17 }
 0x17f   :  { %v10092_v4 = vsel %vm1723_vm0, 1.0, %v14800_v17  ;;  %v10095_v39 = vsel %vm2275_vm12, 1.0, %v14800_v17  ;;  %v2761_v42 = vadd.f32 %v7087_v36, %v9863_v46  ;;  %v10099_v30 = vsel %vm2835_vm6, 1.0, %v14800_v17  ;;  %v10116_v46 = vpop.permute.xlu1 %1093 }
 0x180   :  { %v10102_v57 = vsel %vm1730_vm5, 1.0, %v14800_v17  ;;  %vm1732_vm9 = vcmp.eq.s32.totalorder %v14915_v59, %v14869_v3  ;;  %vm160_vm13 = vcmp.eq.s32.totalorder %v9900_v5, %v8636_v31  ;;  %vm2930_vm1 = vcmp.eq.s32.totalorder %v10009_v0, %v8597_v23  ;;  %14917 = vst [vmem:[#allocation141_spill] sm:$0xff] %v10116_v46 }
 0x181   :  { %14916 = vst [vmem:[#allocation103_spill] sm:$0xff] %v10102_v57  ;;  %vm2929_vm11 = vcmp.eq.s32.totalorder %v10009_v0, %v8588_v20  ;;  %vm1729_vm14 = vcmp.eq.s32.totalorder %v14915_v59, %v8588_v20  ;;  %vm584_vm2 = vcmp.eq.s32.totalorder %v9957_v11, %v8636_v31  ;;  %v10122_v6 = vsel %vm186_vm10, 1.0, %v14800_v17 }
 0x182   :  { %v10128_v36 = vsel %vm188_vm8, 1.0, %v14800_v17  ;;  %v10134_v0 = vsel %vm185_vm7, 1.0, %v14800_v17  ;;  %2225 = vperm.xlu1 %7914, %v9656_v47   ;;  %vm2938_vm3 = vcmp.eq.s32.totalorder %v10055_v9, %v8597_v23  ;;  %vm2937_vm10 = vcmp.eq.s32.totalorder %v10055_v9, %v8588_v20 }
 0x183   :  { %14918 = vst [vmem:[#allocation142_spill] sm:$0xff] %v10134_v0  ;;  %v10142_v61 = vsel %vm1732_vm9, 1.0, %v14800_v17  ;;  %v10148_v24 = vsel %vm187_vm15, 1.0, %v14800_v17  ;;  %v10151_v53 = vsel %vm160_vm13, 1.0, %v14800_v17  ;;  %v7208_v11 = vsel %vm2930_vm1, 1.0, %v14800_v17 }
 0x184   :  { %14919 = vst [vmem:[#allocation143_spill] sm:$0xff] %v10142_v61  ;;  %14920 = vst [vmem:[#allocation144_spill] sm:$0xff] %v10148_v24  ;;  %v7207_v5 = vsel %vm2929_vm11, 1.0, %v14800_v17  ;;  %v10156_v57 = vsel %vm1729_vm14, 1.0, %v14800_v17  ;;  %v10159_v9 = vsel %vm584_vm2, 1.0, %v14800_v17  ;;  %v10163_v61 = vadd.f32 %v9515_v48, %v9995_v14  ;;  %v10178_v14 = vpop.permute.xlu1 %3372 }
 0x185   :  { %14921 = vst [vmem:[#allocation145_spill] sm:$0xff] %v10151_v53  ;;  %14922 = vst [vmem:[#allocation146_spill] sm:$0xff] %v10156_v57  ;;  %v10166_v54 = vadd.f32 %v9521_v51, %v965_v25  ;;  %v10169_v24 = vadd.f32 %v9527_v40, %v967_v44  ;;  %v7216_v53 = vsel %vm2938_vm3, 1.0, %v14800_v17  ;;  %v7215_v0 = vsel %vm2937_vm10, 1.0, %v14800_v17  ;;  %v14925_v40 = vld [vmem:[#allocation80_spill] sm:$0xff] }
 0x186   :  { %14923 = vst [vmem:[#allocation147_spill] sm:$0xff] %v10159_v9  ;;  %vm3962_vm7 = vcmp.eq.s32.totalorder %v9667_v62, %v8597_v23  ;;  %vm1178_vm8 = vcmp.eq.s32.totalorder %v9421_v45, %v8597_v23  ;;  %7916 = vset.pattern.permute.xlu1 %v14862_v8  ;;  %14924 = vst [vmem:[#allocation148_spill] sm:$0xff] %v10178_v14  ;;  %v3314_v48 = vadd.f32 %v7208_v11, %v2754_v21 }
 0x187   :  { %v3313_v51 = vadd.f32 %v7207_v5, %v2753_v10  ;;  %v10181_v25 = vadd.f32 %v9739_v15, %v962_v33  ;;  %vm3964_vm15 = vcmp.eq.s32.totalorder %v9667_v62, %v14869_v3  ;;  %vm1731_vm4 = vcmp.eq.s32.totalorder %v14915_v59, %v8606_v26  ;;  %v10198_v5 = vld [vmem:[%s14293_s0 + $0x38] sm:$0xff]  ;;  %v14928_v33 = vld [vmem:[#allocation55_spill] sm:$0xff] }
 0x188   :  { %vm193_vm0 = vcmp.eq.s32.totalorder %v14925_v40, %v8588_v20  ;;  %vm194_vm12 = vcmp.eq.s32.totalorder %v14925_v40, %v8597_v23  ;;  %vm196_vm6 = vcmp.eq.s32.totalorder %v14925_v40, %v14869_v3  ;;  %vm634_vm5 = vcmp.eq.s32.totalorder %v14849_v7, %v8597_v23  ;;  %119 = vperm.xlu1 %7916, %v10198_v5   ;;  %v10278_v10 = vld [vmem:[%s14293_s0 + $0x30] sm:$0xff] }
 0x189   :  { %v10203_v15 = vadd.f32 %v9808_v41, %v10039_v35  ;;  %v10206_v44 = vadd.f32 %v9857_v60, %v961_v18  ;;  %vm3961_vm9 = vcmp.eq.s32.totalorder %v9667_v62, %v8588_v20  ;;  %vm1180_vm13 = vcmp.eq.s32.totalorder %v9421_v45, %v14869_v3 }
 0x18a   :  { %v3322_v41 = vadd.f32 %v7216_v53, %v2762_v49  ;;  %v3321_v11 = vadd.f32 %v7215_v0, %v2761_v42  ;;  %v10222_v60 = vsel %vm3962_vm7, 1.0, %v14800_v17  ;;  %v10228_v18 = vsel %vm1178_vm8, 1.0, %v14800_v17  ;;  %v10259_v0 = vpop.permute.xlu1 %1650 }
 0x18b   :  { %14926 = vst [vmem:[#allocation149_spill] sm:$0xff] %v10222_v60  ;;  %14927 = vst [vmem:[#allocation150_spill] sm:$0xff] %v10228_v18  ;;  %vm1147_vm10 = vcmp.eq.s32.totalorder %v10116_v46, %v8606_v26  ;;  %vm1149_vm1 = vcmp.eq.s32.totalorder %v10116_v46, %v8613_v27  ;;  %vm3490_vm7 = vcmp.eq.s32.totalorder %v10178_v14, %v8597_v23  ;;  %v10244_v53 = vsel %vm3964_vm15, 1.0, %v14800_v17 }
 0x18c   :  { %14929 = vst [vmem:[#allocation151_spill] sm:$0xff] %v10244_v53  ;;  %vm1151_vm8 = vcmp.eq.s32.totalorder %v10116_v46, %v8616_v28  ;;  %vm3489_vm2 = vcmp.eq.s32.totalorder %v10178_v14, %v8588_v20  ;;  %vm1146_vm3 = vcmp.eq.s32.totalorder %v10116_v46, %v8597_v23  ;;  %v10256_v49 = vsel %vm3961_vm9, 1.0, %v14800_v17  ;;  %7917 = vset.pattern.permute.xlu1 %v14867_v34 }
 0x18d   :  { %14930 = vst [vmem:[#allocation152_spill] sm:$0xff] %v10256_v49  ;;  %14931 = vst [vmem:[#allocation153_spill] sm:$0xff] %v10259_v0  ;;  %vm1148_vm15 = vcmp.eq.s32.totalorder %v10116_v46, %v14869_v3  ;;  %vm1145_vm11 = vcmp.eq.s32.totalorder %v10116_v46, %v8588_v20  ;;  %vm3963_vm14 = vcmp.eq.s32.totalorder %v9667_v62, %v8606_v26  ;;  %v10271_v35 = vsel %vm1180_vm13, 1.0, %v14800_v17 }
 0x18e   :  { %14932 = vst [vmem:[#allocation154_spill] sm:$0xff] %v10271_v35  ;;  %v6721_v21 = vsel %vm1147_vm10, 1.0, %v14800_v17  ;;  %v6723_v34 = vsel %vm1149_vm1, 1.0, %v14800_v17  ;;  %548 = vperm.xlu1 %7917, %v10278_v10   ;;  %v7336_v42 = vsel %vm3490_vm7, 1.0, %v14800_v17  ;;  %v3882_v9 = vadd.f32 %v9577_v50, %v3322_v41  ;;  %v10311_v46 = vpop.permute.xlu1 %1653 }
 0x18f   :  { %v6725_v49 = vsel %vm1151_vm8, 1.0, %v14800_v17  ;;  %v7335_v53 = vsel %vm3489_vm2, 1.0, %v14800_v17  ;;  %v6720_v60 = vsel %vm1146_vm3, 1.0, %v14800_v17  ;;  %vm1177_vm9 = vcmp.eq.s32.totalorder %v9421_v45, %v8588_v20  ;;  %14933 = vst [vmem:[#allocation155_spill] sm:$0xff] %v10311_v46 }
 0x190   :  { %v3881_v50 = vadd.f32 %v9651_v43, %v3321_v11  ;;  %v6722_v41 = vsel %vm1148_vm15, 1.0, %v14800_v17  ;;  %v6719_v57 = vsel %vm1145_vm11, 1.0, %v14800_v17  ;;  %vm1179_vm13 = vcmp.eq.s32.totalorder %v9421_v45, %v8606_v26 }
 0x191   :  { %v10306_v14 = vadd.f32 %v6721_v21, %v9941_v32  ;;  %v10309_v35 = vadd.f32 %v6723_v34, %v9946_v29  ;;  %v3874_v18 = vadd.f32 %v7336_v42, %v3314_v48  ;;  %v10317_v43 = vsel %vm3963_vm14, 1.0, %v14800_v17 }
 0x192   :  { %v10320_v11 = vadd.f32 %v6725_v49, %v9949_v19  ;;  %7919 = vset.pattern.permute.xlu1 %v14877_v2  ;;  %v3873_v45 = vadd.f32 %v7335_v53, %v3313_v51  ;;  %v1530_v32 = vadd.f32 %v6720_v60, %v10006_v1  ;;  %v10325_v29 = vsel %vm1177_vm9, 1.0, %v14800_v17 }
 0x193   :  { %2782 = vperm.xlu1 %7919, %v9546_v63   ;;  %v1532_v48 = vadd.f32 %v6722_v41, %v9961_v12  ;;  %v10330_v21 = vadd.f32 %v6719_v57, %v10051_v22  ;;  %v10333_v34 = vsel %vm1179_vm13, 1.0, %v14800_v17  ;;  %v10339_v19 = vsel %vm1731_vm4, 1.0, %v14800_v17 }
 0x194   :  { %v10345_v1 = vsel %vm194_vm12, 1.0, %v14800_v17  ;;  %v10351_v22 = vsel %vm634_vm5, 1.0, %v14800_v17  ;;  %v10357_v12 = vsel %vm196_vm6, 1.0, %v14800_v17  ;;  %v10363_v57 = vsel %vm193_vm0, 1.0, %v14800_v17 }
 0x195   :  { %14934 = vst [vmem:[#allocation156_spill] sm:$0xff] %v10345_v1  ;;  %14935 = vst [vmem:[#allocation157_spill] sm:$0xff] %v10351_v22  ;;  %v4434_v51 = vadd.f32 %v9720_v56, %v3874_v18  ;;  %vm14938_vm4 = vcmp.eq.s32.totalorder %v14849_v7, %v14869_v3  ;;  %vm14940_vm12 = vcmp.eq.s32.totalorder %v14849_v7, %v8588_v20  ;;  %v10386_v56 = vpop.permute.xlu1 %3935 }
 0x196   :  { %14936 = vst [vmem:[#allocation158_spill] sm:$0xff] %v10357_v12  ;;  %14937 = vst [vmem:[#allocation159_spill] sm:$0xff] %v10363_v57  ;;  %v10370_v60 = vsel %vm14938_vm4, 1.0, %v14800_v17  ;;  %v10376_v53 = vsel %vm14940_vm12, 1.0, %v14800_v17  ;;  %vm14942_vm6 = vcmp.eq.s32.totalorder %v14925_v40, %v8606_v26  ;;  %vm1699_vm0 = vcmp.eq.s32.totalorder %v10259_v0, %v8606_v26  ;;  %v14952_v12 = vld [vmem:[#allocation51_spill] sm:$0xff] }
 0x197   :  { %14939 = vst [vmem:[#allocation160_spill] sm:$0xff] %v10370_v60  ;;  %14941 = vst [vmem:[#allocation161_spill] sm:$0xff] %v10376_v53  ;;  %v10382_v49 = vsel %vm14942_vm6, 1.0, %v14800_v17  ;;  %v4433_v18 = vadd.f32 %v9726_v52, %v3873_v45  ;;  %vm14945_vm5 = vcmp.eq.s32.totalorder %v14849_v7, %v8606_v26  ;;  %vm14947_vm1 = vcmp.eq.s32.totalorder %v14928_v33, %v14869_v3 }
 0x198   :  { %14943 = vst [vmem:[#allocation162_spill] sm:$0xff] %v10382_v49  ;;  %14944 = vst [vmem:[#allocation163_spill] sm:$0xff] %v10386_v56  ;;  %v10393_v42 = vsel %vm14945_vm5, 1.0, %v14800_v17  ;;  %v6530_v41 = vsel %vm14947_vm1, 1.0, %v14800_v17  ;;  %vm1701_vm11 = vcmp.eq.s32.totalorder %v10259_v0, %v8613_v27  ;;  %2785 = vperm.xlu1 %7919, %v9656_v47   ;;  %vm4058_vm14 = vcmp.eq.s32.totalorder %v10386_v56, %v8597_v23 }
 0x199   :  { %14946 = vst [vmem:[#allocation164_spill] sm:$0xff] %v10393_v42  ;;  %vm4057_vm2 = vcmp.eq.s32.totalorder %v10386_v56, %v8588_v20  ;;  %vm1706_vm3 = vcmp.eq.s32.totalorder %v10311_v46, %v8597_v23  ;;  %vm1703_vm10 = vcmp.eq.s32.totalorder %v10259_v0, %v8616_v28  ;;  %v7472_v45 = vsel %vm4058_vm14, 1.0, %v14800_v17  ;;  %v10425_v49 = vpop.permute.xlu1 %2210 }
 0x19a   :  { %v7471_v52 = vsel %vm4057_vm2, 1.0, %v14800_v17  ;;  %vm1698_vm7 = vcmp.eq.s32.totalorder %v10259_v0, %v8597_v23  ;;  %v6841_v7 = vsel %vm1699_vm0, 1.0, %v14800_v17  ;;  %v4442_v40 = vadd.f32 %v7472_v45, %v3882_v9  ;;  %14948 = vst [vmem:[#allocation165_spill] sm:$0xff] %v10425_v49 }
 0x19b   :  { %v4441_v59 = vadd.f32 %v7471_v52, %v3881_v50  ;;  %vm1708_vm8 = vcmp.eq.s32.totalorder %v10311_v46, %v14869_v3  ;;  %v6843_v56 = vsel %vm1701_vm11, 1.0, %v14800_v17  ;;  %vm1707_vm15 = vcmp.eq.s32.totalorder %v10311_v46, %v8606_v26 }
 0x19c   :  { %vm1709_vm9 = vcmp.eq.s32.totalorder %v10311_v46, %v8613_v27  ;;  %v6848_v62 = vsel %vm1706_vm3, 1.0, %v14800_v17  ;;  %v6845_v33 = vsel %vm1703_vm10, 1.0, %v14800_v17  ;;  %7921 = vset.pattern.permute.xlu1 %v14883_v38  ;;  %v4506_v9 = vpack.c.bf16 %v4442_v40, %v4434_v51 }
 0x19d   :  { %v4505_v50 = vpack.c.bf16 %v4441_v59, %v4433_v18  ;;  %v6840_v45 = vsel %vm1698_vm7, 1.0, %v14800_v17  ;;  %v10429_v52 = vadd.f32 %v6841_v7, %v10163_v61  ;;  %vm1711_vm13 = vcmp.eq.s32.totalorder %v10311_v46, %v8616_v28  ;;  %1111 = vperm.xlu1 %7921, %v10198_v5  }
 0x19e   :  { %v6850_v57 = vsel %vm1708_vm8, 1.0, %v14800_v17  ;;  %vm1705_vm4 = vcmp.eq.s32.totalorder %v10311_v46, %v8588_v20  ;;  %v6849_v38 = vsel %vm1707_vm15, 1.0, %v14800_v17  ;;  %v6851_v40 = vsel %vm1709_vm9, 1.0, %v14800_v17  ;;  %5130 = vmatprep.mubr.bf16.mxu1 %v4506_v9 }
 0x19f   :  { %v2090_v59 = vadd.f32 %v6848_v62, %v1530_v32  ;;  %vm1700_vm12 = vcmp.eq.s32.totalorder %v10259_v0, %v14869_v3  ;;  %v10442_v7 = vadd.f32 %v6843_v56, %v10166_v54  ;;  %v10445_v61 = vadd.f32 %v6845_v33, %v10169_v24  ;;  %5131 = vmatmul.mubr.bf16.gmra.mrb[12].mxu1 %v4505_v50  ;;  %v14951_v32 = vld [vmem:[#allocation92_spill] sm:$0xff]  ;;  %v14956_v50 = vld [vmem:[#allocation54_spill] sm:$0xff] }
 0x1a0   :  { %v10448_v51 = vadd.f32 %v6840_v45, %v10181_v25  ;;  %vm1697_vm6 = vcmp.eq.s32.totalorder %v10259_v0, %v8588_v20  ;;  %v6853_v18 = vsel %vm1711_vm13, 1.0, %v14800_v17  ;;  %v2092_v9 = vadd.f32 %v6850_v57, %v1532_v48  ;;  %v10463_v25 = vpop.permute.xlu1 %104 }
 0x1a1   :  { %14949 = vst [vmem:[#allocation166_spill] sm:$0xff] %v10442_v7  ;;  %14950 = vst [vmem:[#allocation167_spill] sm:$0xff] %v10445_v61  ;;  %v6847_v62 = vsel %vm1705_vm4, 1.0, %v14800_v17  ;;  %v10456_v1 = vadd.f32 %v14952_v12, %v14951_v32  ;;  %v2091_v54 = vadd.f32 %v6849_v38, %v10306_v14  ;;  %v10460_v24 = vadd.f32 %v6851_v40, %v10309_v35  ;;  %v14957_v14 = vld [vmem:[#allocation86_spill] sm:$0xff]  ;;  %v14963_v61 = vld [vmem:[#allocation136_spill] sm:$0xff] }
 0x1a2   :  { %v14954_v33 = vmov 6   ;;  %14955 = vst [vmem:[#allocation51_spill] sm:$0xff] %v10463_v25  ;;  %v6842_v56 = vsel %vm1700_vm12, 1.0, %v14800_v17  ;;  %v1036_v45 = vadd.f32 %v14956_v50, %v6530_v41  ;;  %vm161_vm0 = vcmp.eq.s32.totalorder %v10463_v25, %v8588_v20  ;;  %v14959_v41 = vld [vmem:[#allocation120_spill] sm:$0xff]  ;;  %v14961_v32 = vld [vmem:[#allocation130_spill] sm:$0xff] }
 0x1a3   :  { %14953 = vst [vmem:[#allocation92_spill] sm:$0xff] %v10460_v24  ;;  %7922 = vset.pattern.permute.xlu1 %v14954_v33  ;;  %vm162_vm5 = vcmp.eq.s32.totalorder %v10463_v25, %v8597_v23  ;;  %vm164_vm1 = vcmp.eq.s32.totalorder %v10463_v25, %v14869_v3  ;;  %v2650_v35 = vadd.f32 %v14957_v14, %v2090_v59  ;;  %v6839_v12 = vsel %vm1697_vm6, 1.0, %v14800_v17  ;;  %v14962_v14 = vld [vmem:[#allocation135_spill] sm:$0xff]  ;;  %v14966_v7 = vld [vmem:[#allocation60_spill] sm:$0xff] }
 0x1a4   :  { %3342 = vperm.xlu1 %7922, %v9546_v63   ;;  %v10476_v48 = vadd.f32 %v6853_v18, %v10320_v11  ;;  %vm163_vm11 = vcmp.eq.s32.totalorder %v10463_v25, %v8606_v26  ;;  %v2089_v57 = vadd.f32 %v6847_v62, %v10330_v21  ;;  %v2652_v38 = vadd.f32 %v14959_v41, %v2092_v9  ;;  %v10489_v11 = vpop.permute.xlu1 %107  ;;  %v14965_v62 = vld [vmem:[#allocation118_spill] sm:$0xff] }
 0x1a5   :  { %v6472_v40 = vsel %vm162_vm5, 1.0, %v14800_v17  ;;  %v6474_v63 = vsel %vm164_vm1, 1.0, %v14800_v17  ;;  %v6471_v59 = vsel %vm161_vm0, 1.0, %v14800_v17  ;;  %14960 = vst [vmem:[#allocation86_spill] sm:$0xff] %v10489_v11  ;;  %v2084_v18 = vadd.f32 %v6842_v56, %v10203_v15 }
 0x1a6   :  { %14958 = vst [vmem:[#allocation54_spill] sm:$0xff] %v10476_v48  ;;  %v10493_v50 = vadd.f32 %v14961_v32, %v6472_v40  ;;  %v10496_v48 = vadd.f32 %v14962_v14, %v6474_v63  ;;  %v10499_v21 = vadd.f32 %v14963_v61, %v6471_v59  ;;  %v14964_v9 = vmov 3   ;;  %v14967_v61 = vld [vmem:[#allocation125_spill] sm:$0xff]  ;;  %v14968_v40 = vld [vmem:[#allocation111_spill] sm:$0xff] }
 0x1a7   :  { %v10503_v41 = vadd.f32 %v14965_v62, %v2650_v35  ;;  %v2081_v24 = vadd.f32 %v6839_v12, %v10206_v44  ;;  %v2651_v42 = vadd.f32 %v14966_v7, %v2091_v54  ;;  %v6473_v15 = vsel %vm163_vm11, 1.0, %v14800_v17  ;;  %v14969_v35 = vld [vmem:[#allocation69_spill] sm:$0xff]  ;;  %v14970_v44 = vld [vmem:[#allocation122_spill] sm:$0xff] }
 0x1a8   :  { %7923 = vset.pattern.permute.xlu1 %v14964_v9  ;;  %vm2258_vm14 = vcmp.eq.s32.totalorder %v10425_v49, %v8597_v23  ;;  %v2649_v56 = vadd.f32 %v14967_v61, %v2089_v57  ;;  %vm1204_vm2 = vcmp.eq.s32.totalorder %v14968_v40, %v14869_v3  ;;  %v10518_v63 = vadd.f32 %v14969_v35, %v1036_v45  ;;  %v10540_v45 = vpop.permute.xlu1 %539 }
 0x1a9   :  { %1668 = vperm.xlu1 %7923, %v10278_v10   ;;  %vm2259_vm3 = vcmp.eq.s32.totalorder %v10425_v49, %v8606_v26  ;;  %vm2261_vm10 = vcmp.eq.s32.totalorder %v10425_v49, %v8613_v27  ;;  %vm2263_vm7 = vcmp.eq.s32.totalorder %v10425_v49, %v8616_v28  ;;  %v10527_v7 = vadd.f32 %v14970_v44, %v2652_v38 }
 0x1aa   :  { %vm169_vm8 = vcmp.eq.s32.totalorder %v10489_v11, %v8588_v20  ;;  %vm170_vm15 = vcmp.eq.s32.totalorder %v10489_v11, %v8597_v23  ;;  %vm172_vm9 = vcmp.eq.s32.totalorder %v10489_v11, %v14869_v3  ;;  %v10536_v54 = vadd.f32 %v10086_v16, %v6473_v15  ;;  %14971 = vst [vmem:[#allocation120_spill] sm:$0xff] %v10540_v45  ;;  %v14972_v16 = vld [vmem:[#allocation36_spill] sm:$0xff] }
 0x1ab   :  { %vm171_vm13 = vcmp.eq.s32.totalorder %v10489_v11, %v8606_v26  ;;  %v6968_v12 = vsel %vm2258_vm14, 1.0, %v14800_v17  ;;  %vm2260_vm4 = vcmp.eq.s32.totalorder %v10425_v49, %v14869_v3  ;;  %vm2257_vm12 = vcmp.eq.s32.totalorder %v10425_v49, %v8588_v20 }
 0x1ac   :  { %vm601_vm6 = vcmp.eq.s32.totalorder %v10540_v45, %v8588_v20  ;;  %vm602_vm0 = vcmp.eq.s32.totalorder %v10540_v45, %v8597_v23  ;;  %vm603_vm5 = vcmp.eq.s32.totalorder %v10540_v45, %v8606_v26  ;;  %vm604_vm1 = vcmp.eq.s32.totalorder %v10540_v45, %v14869_v3  ;;  %v10587_v22 = vpop.permute.xlu1 %2770 }
 0x1ad   :  { %1671 = vperm.xlu1 %7923, %v10198_v5   ;;  %vm1772_vm11 = vcmp.eq.s32.totalorder %v14972_v16, %v14869_v3  ;;  %v6480_v57 = vsel %vm170_vm15, 1.0, %v14800_v17  ;;  %v6482_v38 = vsel %vm172_vm9, 1.0, %v14800_v17  ;;  %v6479_v59 = vsel %vm169_vm8, 1.0, %v14800_v17  ;;  %14974 = vst [vmem:[#allocation130_spill] sm:$0xff] %v10587_v22 }
 0x1ae   :  { %v6778_v32 = vsel %vm1204_vm2, 1.0, %v14800_v17  ;;  %v6608_v14 = vsel %vm602_vm0, 1.0, %v14800_v17  ;;  %v6610_v9 = vsel %vm604_vm1, 1.0, %v14800_v17  ;;  %v6607_v62 = vsel %vm601_vm6, 1.0, %v14800_v17 }
 0x1af   :  { %v6481_v15 = vsel %vm171_vm13, 1.0, %v14800_v17  ;;  %v10575_v61 = vadd.f32 %v6608_v14, %v6480_v57  ;;  %v10577_v35 = vadd.f32 %v6610_v9, %v6482_v38  ;;  %v10579_v44 = vadd.f32 %v6607_v62, %v6479_v59  ;;  %v14975_v38 = vld [vmem:[#allocation128_spill] sm:$0xff] }
 0x1b0   :  { %v6609_v40 = vsel %vm603_vm5, 1.0, %v14800_v17  ;;  %v6969_v53 = vsel %vm2259_vm3, 1.0, %v14800_v17  ;;  %v14973_v60 = vmov 7   ;;  %v6970_v57 = vsel %vm2260_vm4, 1.0, %v14800_v17 }
 0x1b1   :  { %7925 = vset.pattern.permute.xlu1 %v14973_v60  ;;  %v10594_v14 = vadd.f32 %v14975_v38, %v2651_v42  ;;  %v10596_v59 = vadd.f32 %v6609_v40, %v6481_v15  ;;  %v10602_v9 = vsel %vm2261_vm10, 1.0, %v14800_v17  ;;  %vm2819_vm14 = vcmp.eq.s32.totalorder %v10587_v22, %v8606_v26  ;;  %v14978_v15 = vld [vmem:[#allocation126_spill] sm:$0xff] }
 0x1b2   :  { %14976 = vst [vmem:[#allocation135_spill] sm:$0xff] %v10602_v9  ;;  %3905 = vperm.xlu1 %7925, %v9656_v47   ;;  %vm2818_vm2 = vcmp.eq.s32.totalorder %v10587_v22, %v8597_v23  ;;  %v6967_v42 = vsel %vm2257_vm12, 1.0, %v14800_v17  ;;  %v10617_v40 = vsel %vm2263_vm7, 1.0, %v14800_v17  ;;  %v2642_v62 = vadd.f32 %v6968_v12, %v10448_v51  ;;  %v10633_v12 = vpop.permute.xlu0 %2231 }
 0x1b3   :  { %14977 = vst [vmem:[#allocation136_spill] sm:$0xff] %v10617_v40  ;;  %v10621_v38 = vadd.f32 %v14978_v15, %v2649_v56  ;;  %v1588_v47 = vadd.f32 %v6778_v32, %v10456_v1  ;;  %v2644_v9 = vadd.f32 %v6970_v57, %v2084_v18  ;;  %vm2820_vm3 = vcmp.eq.s32.totalorder %v10587_v22, %v14869_v3  ;;  %v10638_v1 = vpop.permute.xlu1 %1096  ;;  %v14981_v18 = vld [vmem:[#allocation68_spill] sm:$0xff] }
 0x1b4   :  { %vm2817_vm10 = vcmp.eq.s32.totalorder %v10587_v22, %v8588_v20  ;;  %v2643_v27 = vadd.f32 %v6969_v53, %v10429_v52  ;;  %vm168_vm7 = vcmp.eq.s32.totalorder %v10463_v25, %v8636_v31  ;;  %v7096_v40 = vsel %vm2818_vm2, 1.0, %v14800_v17  ;;  %14979 = vst [vmem:[#allocation118_spill] sm:$0xff] %v10633_v12  ;;  %14980 = vst [vmem:[#allocation60_spill] sm:$0xff] %v10638_v1  ;;  %v14982_v52 = vld [vmem:[#allocation70_spill] sm:$0xff] }
 0x1b5   :  { %v2641_v51 = vadd.f32 %v6967_v42, %v2081_v24  ;;  %v7097_v56 = vsel %vm2819_vm14, 1.0, %v14800_v17  ;;  %vm176_vm8 = vcmp.eq.s32.totalorder %v10489_v11, %v8636_v31  ;;  %vm1186_vm15 = vcmp.eq.s32.totalorder %v14981_v18, %v8597_v23 }
 0x1b6   :  { %7926 = vset.pattern.permute.xlu1 %v14856_v58  ;;  %vm1188_vm9 = vcmp.eq.s32.totalorder %v14981_v18, %v14869_v3  ;;  %vm1185_vm13 = vcmp.eq.s32.totalorder %v14981_v18, %v8588_v20  ;;  %vm608_vm4 = vcmp.eq.s32.totalorder %v10540_v45, %v8636_v31  ;;  %v7098_v58 = vsel %vm2820_vm3, 1.0, %v14800_v17  ;;  %v7964_v45 = vld [vmem:[#allocation2 + $0x140] sm:$0xff]  }
 0x1b7   :  { %2228 = vperm.xlu1 %7926, %v10278_v10   ;;  %v7095_v53 = vsel %vm2817_vm10, 1.0, %v14800_v17  ;;  %v2148_v24 = vadd.f32 %v14982_v52, %v1588_v47  ;;  %v10662_v32 = vsel %vm168_vm7, 1.0, %v14800_v17  ;;  %v3202_v57 = vadd.f32 %v7096_v40, %v2642_v62  ;;  %v10682_v40 = vpop.permute.xlu1 %1099  ;;  %7758 = vmatprep.subr.bf16.mxu0 %v7964_v45 }
 0x1b8   :  { %14983 = vst [vmem:[#allocation125_spill] sm:$0xff] %v10662_v32  ;;  %v3203_v42 = vadd.f32 %v7097_v56, %v2643_v27  ;;  %v6914_v15 = vsel %vm1772_vm11, 1.0, %v14800_v17  ;;  %v10669_v28 = vsel %vm176_vm8, 1.0, %v14800_v17  ;;  %v10672_v11 = vsel %vm1186_vm15, 1.0, %v14800_v17  ;;  %14987 = vst [vmem:[#allocation126_spill] sm:$0xff] %v10682_v40 }
 0x1b9   :  { %14984 = vst [vmem:[#allocation69_spill] sm:$0xff] %v10669_v28  ;;  %v10675_v47 = vsel %vm1188_vm9, 1.0, %v14800_v17  ;;  %vm1187_vm12 = vcmp.eq.s32.totalorder %v14981_v18, %v8606_v26  ;;  %v10680_v27 = vsel %vm608_vm4, 1.0, %v14800_v17  ;;  %v3204_v62 = vadd.f32 %v7098_v58, %v2644_v9  ;;  %v10695_v28 = vpop.permute.xlu0 %3345  ;;  %v14990_v9 = vld [vmem:[#allocation82_spill] sm:$0xff]  ;;  %v14991_v58 = vld [vmem:[#allocation119_spill] sm:$0xff]  ;;  %v14997_v18 = vld [vmem:[#allocation88_spill] sm:$0xff] }
 0x1ba   :  { %14985 = vst [vmem:[#allocation122_spill] sm:$0xff] %v10675_v47  ;;  %14986 = vst [vmem:[#allocation128_spill] sm:$0xff] %v10680_v27  ;;  %v3201_v56 = vadd.f32 %v7095_v53, %v2641_v51  ;;  %v10688_v52 = vsel %vm1185_vm13, 1.0, %v14800_v17  ;;  %vm1154_vm6 = vcmp.eq.s32.totalorder %v10638_v1, %v8597_v23  ;;  %vm1156_vm0 = vcmp.eq.s32.totalorder %v10638_v1, %v14869_v3 }
 0x1bb   :  { %14988 = vst [vmem:[#allocation70_spill] sm:$0xff] %v10688_v52  ;;  %7928 = vset.pattern.permute.xlu1 %v14877_v2  ;;  %14989 = vst [vmem:[#allocation168_spill] sm:$0xff] %v10695_v28  ;;  %v10698_v27 = vadd.f32 %v6914_v15, %v10518_v63  ;;  %v10701_v51 = vadd.f32 %v14990_v9, %v2148_v24  ;;  %v10705_v53 = vadd.f32 %v14991_v58, %v3202_v57  ;;  %v14992_v2 = vld [vmem:[#allocation129_spill] sm:$0xff]  ;;  %v10732_v57 = vpop.permute.xlu1 %3333  ;;  %v14996_v9 = vld [vmem:[#allocation127_spill] sm:$0xff] }
 0x1bc   :  { %2788 = vperm.xlu1 %7928, %v10278_v10   ;;  %v10708_v32 = vadd.f32 %v14992_v2, %v3203_v42  ;;  %vm1162_vm5 = vcmp.eq.s32.totalorder %v10682_v40, %v8597_v23  ;;  %v10716_v63 = vsel %vm1187_vm12, 1.0, %v14800_v17  ;;  %vm1164_vm1 = vcmp.eq.s32.totalorder %v10682_v40, %v14869_v3  ;;  %14994 = vst [vmem:[#allocation119_spill] sm:$0xff] %v10732_v57  ;;  %v14995_v42 = vld [vmem:[#allocation124_spill] sm:$0xff] }
 0x1bd   :  { %14993 = vst [vmem:[#allocation82_spill] sm:$0xff] %v10716_v63  ;;  %vm1153_vm11 = vcmp.eq.s32.totalorder %v10638_v1, %v8588_v20  ;;  %vm1161_vm14 = vcmp.eq.s32.totalorder %v10682_v40, %v8588_v20  ;;  %vm1155_vm2 = vcmp.eq.s32.totalorder %v10638_v1, %v8606_v26  ;;  %v6728_v45 = vsel %vm1154_vm6, 1.0, %v14800_v17 }
 0x1be   :  { %v6730_v24 = vsel %vm1156_vm0, 1.0, %v14800_v17  ;;  %vm1163_vm3 = vcmp.eq.s32.totalorder %v10682_v40, %v8606_v26  ;;  %vm3418_vm10 = vcmp.eq.s32.totalorder %v10695_v28, %v8597_v23  ;;  %v10735_v15 = vadd.f32 %v14995_v42, %v3204_v62 }
 0x1bf   :  { %v10738_v58 = vadd.f32 %v14996_v9, %v3201_v56  ;;  %v6736_v2 = vsel %vm1162_vm5, 1.0, %v14800_v17  ;;  %vm3970_vm7 = vcmp.eq.s32.totalorder %v14997_v18, %v8597_v23  ;;  %v6738_v40 = vsel %vm1164_vm1, 1.0, %v14800_v17 }
 0x1c0   :  { %2791 = vperm.xlu1 %7928, %v10198_v5   ;;  %v6727_v1 = vsel %vm1153_vm11, 1.0, %v14800_v17  ;;  %v6735_v25 = vsel %vm1161_vm14, 1.0, %v14800_v17  ;;  %v6729_v16 = vsel %vm1155_vm2, 1.0, %v14800_v17  ;;  %vm3386_vm8 = vcmp.eq.s32.totalorder %v10732_v57, %v8597_v23 }
 0x1c1   :  { %v1538_v62 = vadd.f32 %v6728_v45, %v10493_v50  ;;  %v1540_v56 = vadd.f32 %v6730_v24, %v10496_v48  ;;  %v6737_v42 = vsel %vm1163_vm3, 1.0, %v14800_v17  ;;  %vm3388_vm15 = vcmp.eq.s32.totalorder %v10732_v57, %v14869_v3  ;;  %v10765_v45 = vpop.permute.xlu1 %1656 }
 0x1c2   :  { %vm3385_vm9 = vcmp.eq.s32.totalorder %v10732_v57, %v8588_v20  ;;  %vm3387_vm13 = vcmp.eq.s32.totalorder %v10732_v57, %v8606_v26  ;;  %v1546_v9 = vadd.f32 %v6736_v2, %v10575_v61  ;;  %v1548_v63 = vadd.f32 %v6738_v40, %v10577_v35  ;;  %14998 = vst [vmem:[#allocation129_spill] sm:$0xff] %v10765_v45 }
 0x1c3   :  { %v1537_v52 = vadd.f32 %v6727_v1, %v10499_v21  ;;  %v1545_v50 = vadd.f32 %v6735_v25, %v10579_v44  ;;  %v1539_v48 = vadd.f32 %v6729_v16, %v10536_v54  ;;  %v7232_v24 = vsel %vm3386_vm8, 1.0, %v14800_v17  ;;  %v15000_v16 = vld [vmem:[#allocation131_spill] sm:$0xff]  ;;  %v15001_v44 = vld [vmem:[#allocation137_spill] sm:$0xff] }
 0x1c4   :  { %7929 = vset.pattern.permute.xlu1 %v14954_v33  ;;  %v1547_v47 = vadd.f32 %v6737_v42, %v10596_v59  ;;  %v10773_v61 = vsel %vm3418_vm10, 1.0, %v14800_v17  ;;  %vm3420_vm4 = vcmp.eq.s32.totalorder %v10695_v28, %v14869_v3  ;;  %v7234_v25 = vsel %vm3388_vm15, 1.0, %v14800_v17 }
 0x1c5   :  { %3351 = vperm.xlu1 %7929, %v10198_v5   ;;  %v7231_v33 = vsel %vm3385_vm9, 1.0, %v14800_v17  ;;  %v7233_v21 = vsel %vm3387_vm13, 1.0, %v14800_v17  ;;  %v10785_v54 = vsel %vm3970_vm7, 1.0, %v14800_v17  ;;  %vm1714_vm12 = vcmp.eq.s32.totalorder %v10765_v45, %v8597_v23 }
 0x1c6   :  { %14999 = vst [vmem:[#allocation124_spill] sm:$0xff] %v10785_v54  ;;  %v10790_v35 = vadd.f32 %v15000_v16, %v1546_v9  ;;  %vm1716_vm6 = vcmp.eq.s32.totalorder %v10765_v45, %v14869_v3  ;;  %vm1713_vm0 = vcmp.eq.s32.totalorder %v10765_v45, %v8588_v20  ;;  %v3770_v5 = vadd.f32 %v7232_v24, %v10503_v41  ;;  %v10813_v41 = vpop.permute.xlu1 %3890  ;;  %v15053_v54 = vld [vmem:[#allocation13_spill] sm:$0xff] }
 0x1c7   :  { %v10798_v59 = vadd.f32 %v15001_v44, %v1548_v63  ;;  %v10801_v1 = vadd.f32 %v10062_v13, %v1545_v50  ;;  %v10804_v40 = vsel %vm3420_vm4, 1.0, %v14800_v17  ;;  %v3772_v2 = vadd.f32 %v7234_v25, %v10527_v7  ;;  %15002 = vst [vmem:[#allocation127_spill] sm:$0xff] %v10813_v41 }
 0x1c8   :  { %v3769_v42 = vadd.f32 %v7231_v33, %v10621_v38  ;;  %v3771_v9 = vadd.f32 %v7233_v21, %v10594_v14  ;;  %v10810_v16 = vadd.f32 %v10092_v4, %v1547_v47  ;;  %v6856_v63 = vsel %vm1714_vm12, 1.0, %v14800_v17 }
 0x1c9   :  { %7930 = vset.pattern.permute.xlu1 %v14973_v60  ;;  %v6858_v13 = vsel %vm1716_vm6, 1.0, %v14800_v17  ;;  %v6855_v50 = vsel %vm1713_vm0, 1.0, %v14800_v17  ;;  %vm1715_vm5 = vcmp.eq.s32.totalorder %v10765_v45, %v8606_v26  ;;  %vm3972_vm1 = vcmp.eq.s32.totalorder %v14997_v18, %v14869_v3 }
 0x1ca   :  { %3908 = vperm.xlu1 %7930, %v10278_v10   ;;  %vm3938_vm11 = vcmp.eq.s32.totalorder %v10813_v41, %v8597_v23  ;;  %vm3940_vm14 = vcmp.eq.s32.totalorder %v10813_v41, %v14869_v3  ;;  %vm3937_vm2 = vcmp.eq.s32.totalorder %v10813_v41, %v8588_v20  ;;  %vm3939_vm3 = vcmp.eq.s32.totalorder %v10813_v41, %v8606_v26  ;;  %v10838_v25 = vpop.permute.xlu1 %3893 }
 0x1cb   :  { %vm3417_vm10 = vcmp.eq.s32.totalorder %v10695_v28, %v8588_v20  ;;  %v7352_v4 = vsel %vm3938_vm11, 1.0, %v14800_v17  ;;  %v7354_v60 = vsel %vm3940_vm14, 1.0, %v14800_v17  ;;  %v7351_v10 = vsel %vm3937_vm2, 1.0, %v14800_v17  ;;  %15003 = vst [vmem:[#allocation131_spill] sm:$0xff] %v10838_v25 }
 0x1cc   :  { %v7353_v7 = vsel %vm3939_vm3, 1.0, %v14800_v17  ;;  %v2098_v14 = vadd.f32 %v6856_v63, %v1538_v62  ;;  %v2100_v38 = vadd.f32 %v6858_v13, %v1540_v56  ;;  %v2097_v47 = vadd.f32 %v6855_v50, %v1537_v52 }
 0x1cd   :  { %v6857_v24 = vsel %vm1715_vm5, 1.0, %v14800_v17  ;;  %v4322_v33 = vadd.f32 %v7352_v4, %v10705_v53  ;;  %v4324_v21 = vadd.f32 %v7354_v60, %v10735_v15  ;;  %v4321_v44 = vadd.f32 %v7351_v10, %v10738_v58 }
 0x1ce   :  { %v4323_v45 = vadd.f32 %v7353_v7, %v10708_v32  ;;  %vm3946_vm7 = vcmp.eq.s32.totalorder %v10838_v25, %v8597_v23  ;;  %vm3948_vm8 = vcmp.eq.s32.totalorder %v10838_v25, %v14869_v3  ;;  %vm3945_vm15 = vcmp.eq.s32.totalorder %v10838_v25, %v8588_v20  ;;  %v10862_v50 = vpop.permute.xlu1 %2219 }
 0x1cf   :  { %vm3947_vm9 = vcmp.eq.s32.totalorder %v10838_v25, %v8606_v26  ;;  %v7360_v52 = vsel %vm3946_vm7, 1.0, %v14800_v17  ;;  %v7362_v53 = vsel %vm3948_vm8, 1.0, %v14800_v17  ;;  %v7359_v15 = vsel %vm3945_vm15, 1.0, %v14800_v17  ;;  %15004 = vst [vmem:[#allocation137_spill] sm:$0xff] %v10862_v50  ;;  %v7989_v25 = vld [vmem:[#allocation2 + $0x1c8] sm:$0xff]  }
 0x1d0   :  { %v7361_v32 = vsel %vm3947_vm9, 1.0, %v14800_v17  ;;  %v4330_v58 = vadd.f32 %v7360_v52, %v3770_v5  ;;  %v4332_v62 = vadd.f32 %v7362_v53, %v3772_v2  ;;  %v4329_v56 = vadd.f32 %v7359_v15, %v3769_v42  ;;  %v7965_v5 = vld [vmem:[#allocation2 + $0x180] sm:$0xff]   ;;  %v10864_v42 = vpop.permute.xlu0 %3348  ;;  %v7967_v15 = vld [vmem:[#allocation2 + $0x148] sm:$0xff]  }
 0x1d1   :  { %v4331_v63 = vadd.f32 %v7361_v32, %v3771_v9  ;;  %v2099_v13 = vadd.f32 %v6857_v24, %v1539_v48  ;;  %vm3969_vm13 = vcmp.eq.s32.totalorder %v14997_v18, %v8588_v20  ;;  %vm3419_vm4 = vcmp.eq.s32.totalorder %v10695_v28, %v8606_v26  ;;  %v7966_v2 = vld [vmem:[#allocation2 + $0x100] sm:$0xff]   ;;  %15005 = vst [vmem:[#allocation169_spill] sm:$0xff] %v10864_v42 }
 0x1d2   :  { %vm3971_vm12 = vcmp.eq.s32.totalorder %v14997_v18, %v8606_v26  ;;  %v4450_v4 = vpack.c.bf16 %v4330_v58, %v4322_v33  ;;  %v4452_v60 = vpack.c.bf16 %v4332_v62, %v4324_v21  ;;  %v4449_v10 = vpack.c.bf16 %v4329_v56, %v4321_v44  ;;  %v15006_v48 = vld [vmem:[#allocation133_spill] sm:$0xff]  ;;  %v15007_v24 = vld [vmem:[#allocation138_spill] sm:$0xff] }
 0x1d3   :  { %v4451_v7 = vpack.c.bf16 %v4331_v63, %v4323_v45  ;;  %vm2282_vm6 = vcmp.eq.s32.totalorder %v10862_v50, %v8597_v23  ;;  %v2658_v9 = vadd.f32 %v15006_v48, %v2098_v14  ;;  %v2660_v52 = vadd.f32 %v15007_v24, %v2100_v38  ;;  %v7968_v21 = vld [vmem:[#allocation2 + $0x108] sm:$0xff]   ;;  %v15012_v58 = vld [vmem:[#allocation85_spill] sm:$0xff]  ;;  %v10920_v63 = vpop.permute.xlu1 %110 }
 0x1d4   :  { %v2657_v53 = vadd.f32 %v10075_v55, %v2097_v47  ;;  %5074 = vmatprep.mubr.bf16.mxu0 %v4450_v4  ;;  %5171 = vmatprep.mubr.bf16.mxu1 %v4452_v60  ;;  %vm2284_vm0 = vcmp.eq.s32.totalorder %v10862_v50, %v14869_v3  ;;  %vm2281_vm5 = vcmp.eq.s32.totalorder %v10862_v50, %v8588_v20  ;;  %v10881_v45 = vsel %vm3972_vm1, 1.0, %v14800_v17  ;;  %v7969_v44 = vld [vmem:[#allocation2 + $0x188] sm:$0xff]   ;;  %v10912_v32 = vpop.permute.xlu0 %3911  ;;  %v15013_v56 = vld [vmem:[#allocation29_spill] sm:$0xff]  ;;  %v7970_v60 = vld [vmem:[#allocation2 + $0x150] sm:$0xff]  }
 0x1d5   :  { %vm2283_vm11 = vcmp.eq.s32.totalorder %v10862_v50, %v8606_v26  ;;  %15008 = vst [vmem:[#allocation133_spill] sm:$0xff] %v10881_v45  ;;  %5075 = vmatmul.mubr.bf16.vlgmr.msra.gmra.mrb[0].mxu0 %v4449_v10  ;;  %5172 = vmatmul.mubr.bf16.vlgmr.msra.gmra.mrb[16].mxu1 %v4451_v7  ;;  %v2659_v55 = vadd.f32 %v10095_v39, %v2099_v13  ;;  %v10888_v14 = vsel %vm3417_vm10, 1.0, %v14800_v17  ;;  %v10894_v38 = vsel %vm3969_vm13, 1.0, %v14800_v17  ;;  %v15015_v10 = vld [vmem:[#allocation134_spill] sm:$0xff] }
 0x1d6   :  { %15009 = vst [vmem:[#allocation138_spill] sm:$0xff] %v10894_v38  ;;  %v10900_v47 = vsel %vm3419_vm4, 1.0, %v14800_v17  ;;  %v6992_v39 = vsel %vm2282_vm6, 1.0, %v14800_v17  ;;  %v10910_v33 = vsel %vm3971_vm12, 1.0, %v14800_v17  ;;  %5334 = vmatpush1.bf16.msra.mxu1 %v7965_v5  ;;  %7759 = vmatpush3.bf16.msra.mxu0 %v7966_v2  ;;  %15011 = vst [vmem:[#allocation171_spill] sm:$0xff] %v10912_v32  ;;  %v10916_v62 = vadd.f32 %v15012_v58, %v10698_v27  ;;  %v15016_v5 = vld [vmem:[#allocation140_spill] sm:$0xff] }
 0x1d7   :  { %15010 = vst [vmem:[#allocation170_spill] sm:$0xff] %v10910_v33  ;;  %vm2884_vm1 = vcmp.eq.s32.totalorder %v15013_v56, %v14869_v3  ;;  %15014 = vst [vmem:[#allocation85_spill] sm:$0xff] %v10920_v63  ;;  %v6994_v13 = vsel %vm2284_vm0, 1.0, %v14800_v17  ;;  %v6991_v4 = vsel %vm2281_vm5, 1.0, %v14800_v17  ;;  %v6993_v27 = vsel %vm2283_vm11, 1.0, %v14800_v17  ;;  %7760 = vmatprep.subr.bf16.mxu0 %v7967_v15  ;;  %5335 = vmatprep.subr.bf16.mxu1 %v14862_v8  ;;  %v7976_v18 = vld [vmem:[#allocation2 + $0x160] sm:$0xff]  }
 0x1d8   :  { %vm2314_vm14 = vcmp.eq.s32.totalorder %v10633_v12, %v8597_v23  ;;  %v10938_v7 = vadd.f32 %v15015_v10, %v2658_v9  ;;  %v10941_v2 = vadd.f32 %v15016_v5, %v2660_v52  ;;  %v10944_v48 = vadd.f32 %v10078_v37, %v2657_v53  ;;  %v10983_v53 = vpop.permute.xlu1 %542  ;;  %v7975_v5 = vld [vmem:[#allocation2 + $0x198] sm:$0xff]  }
 0x1d9   :  { %vm3426_vm2 = vcmp.eq.s32.totalorder %v10864_v42, %v8597_v23  ;;  %v10949_v24 = vadd.f32 %v6992_v39, %v10790_v35  ;;  %v10952_v15 = vadd.f32 %v10099_v30, %v2659_v55  ;;  %vm3994_vm3 = vcmp.eq.s32.totalorder %v10912_v32, %v8597_v23  ;;  %v7971_v35 = vld [vmem:[#allocation2 + $0x110] sm:$0xff]   ;;  %15019 = vst [vmem:[#allocation172_spill] sm:$0xff] %v10983_v53 }
 0x1da   :  { %vm2316_vm10 = vcmp.eq.s32.totalorder %v10633_v12, %v14869_v3  ;;  %v10959_v9 = vadd.f32 %v6994_v13, %v10798_v59  ;;  %v10962_v37 = vadd.f32 %v6991_v4, %v10801_v1  ;;  %v10965_v52 = vadd.f32 %v6993_v27, %v10810_v16  ;;  %7761 = vmatpush3.bf16.msra.mxu0 %v7968_v21  ;;  %v7972_v59 = vld [vmem:[#allocation2 + $0x190] sm:$0xff]   ;;  %v7973_v1 = vld [vmem:[#allocation2 + $0x158] sm:$0xff]  }
 0x1db   :  { %5336 = vmatpush1.bf16.msra.mxu1 %v7969_v44  ;;  %v10968_v30 = vsel %vm2314_vm14, 1.0, %v14800_v17  ;;  %vm177_vm7 = vcmp.eq.s32.totalorder %v10920_v63, %v8588_v20  ;;  %vm178_vm8 = vcmp.eq.s32.totalorder %v10920_v63, %v8597_v23  ;;  %vm180_vm15 = vcmp.eq.s32.totalorder %v10920_v63, %v14869_v3  ;;  %7762 = vmatprep.subr.bf16.mxu0 %v7970_v60  ;;  %v7974_v4 = vld [vmem:[#allocation2 + $0x118] sm:$0xff]  }
 0x1dc   :  { %15017 = vst [vmem:[#allocation134_spill] sm:$0xff] %v10968_v30  ;;  %5337 = vmatprep.subr.bf16.mxu1 %v14862_v8  ;;  %v10981_v16 = vsel %vm3426_vm2, 1.0, %v14800_v17  ;;  %v10989_v55 = vsel %vm3994_vm3, 1.0, %v14800_v17  ;;  %v10995_v39 = vsel %vm2316_vm10, 1.0, %v14800_v17  ;;  %vm3428_vm9 = vcmp.eq.s32.totalorder %v10864_v42, %v14869_v3 }
 0x1dd   :  { %15018 = vst [vmem:[#allocation140_spill] sm:$0xff] %v10981_v16  ;;  %15020 = vst [vmem:[#allocation173_spill] sm:$0xff] %v10989_v55  ;;  %v11003_v21 = vsel %vm2884_vm1, 1.0, %v14800_v17  ;;  %vm184_vm13 = vcmp.eq.s32.totalorder %v10920_v63, %v8636_v31  ;;  %vm609_vm4 = vcmp.eq.s32.totalorder %v10983_v53, %v8588_v20  ;;  %vm610_vm12 = vcmp.eq.s32.totalorder %v10983_v53, %v8597_v23 }
 0x1de   :  { %15021 = vst [vmem:[#allocation174_spill] sm:$0xff] %v10995_v39  ;;  %vm612_vm6 = vcmp.eq.s32.totalorder %v10983_v53, %v14869_v3  ;;  %vm3996_vm0 = vcmp.eq.s32.totalorder %v10912_v32, %v14869_v3  ;;  %vm2313_vm5 = vcmp.eq.s32.totalorder %v10633_v12, %v8588_v20  ;;  %vm179_vm11 = vcmp.eq.s32.totalorder %v10920_v63, %v8606_v26 }
 0x1df   :  { %v6488_v44 = vsel %vm178_vm8, 1.0, %v14800_v17  ;;  %v6490_v58 = vsel %vm180_vm15, 1.0, %v14800_v17  ;;  %v6487_v13 = vsel %vm177_vm7, 1.0, %v14800_v17  ;;  %7763 = vmatpush3.bf16.msra.mxu0 %v7971_v35  ;;  %vm611_vm1 = vcmp.eq.s32.totalorder %v10983_v53, %v8606_v26  ;;  %5338 = vmatpush1.bf16.msra.mxu1 %v7972_v59  ;;  %v11042_v35 = vpop.permute.xlu1 %545 }
 0x1e0   :  { %v6616_v27 = vsel %vm610_vm12, 1.0, %v14800_v17  ;;  %v6618_v60 = vsel %vm612_vm6, 1.0, %v14800_v17  ;;  %v6615_v10 = vsel %vm609_vm4, 1.0, %v14800_v17  ;;  %7764 = vmatprep.subr.bf16.mxu0 %v7973_v1  ;;  %v11040_v28 = vsel %vm184_vm13, 1.0, %v14800_v17  ;;  %15023 = vst [vmem:[#allocation176_spill] sm:$0xff] %v11042_v35  ;;  %5339 = vmatprep.subr.bf16.mxu1 %v14862_v8 }
 0x1e1   :  { %15022 = vst [vmem:[#allocation175_spill] sm:$0xff] %v11040_v28  ;;  %v11044_v50 = vadd.f32 %v6616_v27, %v6488_v44  ;;  %v11046_v56 = vadd.f32 %v6618_v60, %v6490_v58  ;;  %v11048_v55 = vadd.f32 %v6615_v10, %v6487_v13  ;;  %vm617_vm14 = vcmp.eq.s32.totalorder %v11042_v35, %v8588_v20  ;;  %v7977_v44 = vld [vmem:[#allocation2 + $0x120] sm:$0xff]  }
 0x1e2   :  { %vm618_vm2 = vcmp.eq.s32.totalorder %v11042_v35, %v8597_v23  ;;  %vm619_vm3 = vcmp.eq.s32.totalorder %v11042_v35, %v8606_v26  ;;  %vm620_vm10 = vcmp.eq.s32.totalorder %v11042_v35, %v14869_v3  ;;  %v6489_v59 = vsel %vm179_vm11, 1.0, %v14800_v17  ;;  %v7978_v10 = vld [vmem:[#allocation2 + $0x1a0] sm:$0xff]  }
 0x1e3   :  { %v6617_v1 = vsel %vm611_vm1, 1.0, %v14800_v17  ;;  %7765 = vmatpush3.bf16.msra.mxu0 %v7974_v4  ;;  %v11071_v58 = vsel %vm3428_vm9, 1.0, %v14800_v17  ;;  %vm3425_vm7 = vcmp.eq.s32.totalorder %v10864_v42, %v8588_v20  ;;  %v6624_v13 = vsel %vm618_vm2, 1.0, %v14800_v17  ;;  %5340 = vmatpush1.bf16.msra.mxu1 %v7975_v5  ;;  %v7979_v4 = vld [vmem:[#allocation2 + $0x168] sm:$0xff]   ;;  %v15027_v5 = vld [vmem:[#allocation144_spill] sm:$0xff] }
 0x1e4   :  { %15024 = vst [vmem:[#allocation177_spill] sm:$0xff] %v11071_v58  ;;  %v6626_v27 = vsel %vm620_vm10, 1.0, %v14800_v17  ;;  %v6623_v60 = vsel %vm617_vm14, 1.0, %v14800_v17  ;;  %7766 = vmatprep.subr.bf16.mxu0 %v7976_v18  ;;  %vm3993_vm8 = vcmp.eq.s32.totalorder %v10912_v32, %v8588_v20  ;;  %v1002_v28 = vadd.f32 %v6624_v13, %v10122_v6  ;;  %v15025_v58 = vld [vmem:[#allocation142_spill] sm:$0xff]  ;;  %5341 = vmatprep.subr.bf16.mxu1 %v14862_v8  ;;  %v11092_v18 = vpop.permute.xlu1 %2779 }
 0x1e5   :  { %v1004_v63 = vadd.f32 %v6626_v27, %v10128_v36  ;;  %v1001_v16 = vadd.f32 %v6623_v60, %v15025_v58  ;;  %v6625_v39 = vsel %vm619_vm3, 1.0, %v14800_v17  ;;  %vm616_vm15 = vcmp.eq.s32.totalorder %v10983_v53, %v8636_v31  ;;  %15026 = vst [vmem:[#allocation142_spill] sm:$0xff] %v11092_v18  ;;  %v7980_v58 = vld [vmem:[#allocation2 + $0x128] sm:$0xff]  }
 0x1e6   :  { %vm624_vm9 = vcmp.eq.s32.totalorder %v11042_v35, %v8636_v31  ;;  %v995_v6 = vadd.f32 %v6617_v1, %v6489_v59  ;;  %v1003_v36 = vadd.f32 %v6625_v39, %v15027_v5  ;;  %vm2842_vm13 = vcmp.eq.s32.totalorder %v11092_v18, %v8597_v23  ;;  %v7981_v27 = vld [vmem:[#allocation2 + $0x1a8] sm:$0xff]  }
 0x1e7   :  { %vm2844_vm4 = vcmp.eq.s32.totalorder %v11092_v18, %v14869_v3  ;;  %vm2841_vm12 = vcmp.eq.s32.totalorder %v11092_v18, %v8588_v20  ;;  %vm2843_vm6 = vcmp.eq.s32.totalorder %v11092_v18, %v8606_v26  ;;  %7767 = vmatpush3.bf16.msra.mxu0 %v7977_v44  ;;  %v7120_v13 = vsel %vm2842_vm13, 1.0, %v14800_v17  ;;  %5342 = vmatpush1.bf16.msra.mxu1 %v7978_v10  ;;  %v7982_v10 = vld [vmem:[#allocation2 + $0x170] sm:$0xff]  }
 0x1e8   :  { %v7122_v59 = vsel %vm2844_vm4, 1.0, %v14800_v17  ;;  %v7119_v39 = vsel %vm2841_vm12, 1.0, %v14800_v17  ;;  %v7121_v1 = vsel %vm2843_vm6, 1.0, %v14800_v17  ;;  %7768 = vmatprep.subr.bf16.mxu0 %v7979_v4  ;;  %5343 = vmatprep.subr.bf16.mxu1 %v14862_v8  ;;  %v11112_v60 = vsel %vm3996_vm0, 1.0, %v14800_v17  ;;  %v11148_v53 = vpop.permute.xlu1 %1102 }
 0x1e9   :  { %15028 = vst [vmem:[#allocation144_spill] sm:$0xff] %v11112_v60  ;;  %v11118_v44 = vsel %vm2313_vm5, 1.0, %v14800_v17  ;;  %vm2315_vm11 = vcmp.eq.s32.totalorder %v10633_v12, %v8606_v26  ;;  %vm3427_vm1 = vcmp.eq.s32.totalorder %v10864_v42, %v8606_v26  ;;  %v11128_v4 = vsel %vm616_vm15, 1.0, %v14800_v17  ;;  %15034 = vst [vmem:[#allocation183_spill] sm:$0xff] %v11148_v53 }
 0x1ea   :  { %15029 = vst [vmem:[#allocation178_spill] sm:$0xff] %v11118_v44  ;;  %15030 = vst [vmem:[#allocation179_spill] sm:$0xff] %v11128_v4  ;;  %v11134_v5 = vsel %vm624_vm9, 1.0, %v14800_v17  ;;  %v11140_v18 = vsel %vm3425_vm7, 1.0, %v14800_v17  ;;  %v11146_v60 = vsel %vm3993_vm8, 1.0, %v14800_v17  ;;  %v11151_v4 = vadd.f32 %v7120_v13, %v10949_v24  ;;  %v7984_v24 = vld [vmem:[#allocation2 + $0x1b0] sm:$0xff]  }
 0x1eb   :  { %15031 = vst [vmem:[#allocation180_spill] sm:$0xff] %v11134_v5  ;;  %15032 = vst [vmem:[#allocation181_spill] sm:$0xff] %v11140_v18  ;;  %v11154_v35 = vadd.f32 %v7122_v59, %v10959_v9  ;;  %v11157_v5 = vadd.f32 %v7119_v39, %v10962_v37  ;;  %v11160_v44 = vadd.f32 %v7121_v1, %v10965_v52  ;;  %7769 = vmatpush3.bf16.msra.mxu0 %v7980_v58  ;;  %v7983_v18 = vld [vmem:[#allocation2 + $0x130] sm:$0xff]   ;;  %v15036_v13 = vld [vmem:[#allocation154_spill] sm:$0xff] }
 0x1ec   :  { %15033 = vst [vmem:[#allocation182_spill] sm:$0xff] %v11146_v60  ;;  %vm1170_vm0 = vcmp.eq.s32.totalorder %v11148_v53, %v8597_v23  ;;  %v15035_v60 = vld [vmem:[#allocation150_spill] sm:$0xff]  ;;  %vm1172_vm5 = vcmp.eq.s32.totalorder %v11148_v53, %v14869_v3  ;;  %vm1169_vm14 = vcmp.eq.s32.totalorder %v11148_v53, %v8588_v20  ;;  %5344 = vmatpush1.bf16.msra.mxu1 %v7981_v27 }
 0x1ed   :  { %v11165_v30 = vadd.f32 %v15035_v60, %v1002_v28  ;;  %v6744_v9 = vsel %vm1170_vm0, 1.0, %v14800_v17  ;;  %v6746_v37 = vsel %vm1172_vm5, 1.0, %v14800_v17  ;;  %v6743_v52 = vsel %vm1169_vm14, 1.0, %v14800_v17  ;;  %7770 = vmatprep.subr.bf16.mxu0 %v7982_v10  ;;  %5345 = vmatprep.subr.bf16.mxu1 %v14862_v8  ;;  %v7985_v28 = vld [vmem:[#allocation2 + $0x178] sm:$0xff]   ;;  %v15037_v10 = vld [vmem:[#allocation31_spill] sm:$0xff] }
 0x1ee   :  { %vm1171_vm2 = vcmp.eq.s32.totalorder %v11148_v53, %v8606_v26  ;;  %v1554_v58 = vadd.f32 %v6744_v9, %v11044_v50  ;;  %v11179_v59 = vadd.f32 %v15036_v13, %v1004_v63  ;;  %v11182_v39 = vadd.f32 %v10325_v29, %v1001_v16  ;;  %v7986_v50 = vld [vmem:[#allocation2 + $0x138] sm:$0xff]   ;;  %v11191_v9 = vpop.permute.xlu1 %3336  ;;  %v15047_v13 = vld [vmem:[#allocation139_spill] sm:$0xff] }
 0x1ef   :  { %v6745_v1 = vsel %vm1171_vm2, 1.0, %v14800_v17  ;;  %v1556_v27 = vadd.f32 %v6746_v37, %v11046_v56  ;;  %v1553_v60 = vadd.f32 %v6743_v52, %v11048_v55  ;;  %vm3995_vm3 = vcmp.eq.s32.totalorder %v10912_v32, %v8606_v26  ;;  %7771 = vmatpush3.bf16.msra.mxu0 %v7983_v18  ;;  %15038 = vst [vmem:[#allocation150_spill] sm:$0xff] %v11191_v9  ;;  %v7987_v55 = vld [vmem:[#allocation2 + $0x1b8] sm:$0xff]   ;;  %v15044_v52 = vld [vmem:[#allocation71_spill] sm:$0xff] }
 0x1f0   :  { %vm2892_vm10 = vcmp.eq.s32.totalorder %v15037_v10, %v14869_v3  ;;  %v11193_v63 = vadd.f32 %v6745_v1, %v995_v6  ;;  %v11196_v29 = vadd.f32 %v10333_v34, %v1003_v36  ;;  %v11202_v56 = vsel %vm2315_vm11, 1.0, %v14800_v17  ;;  %5346 = vmatpush1.bf16.msra.mxu1 %v7984_v24  ;;  %7772 = vmatprep.subr.bf16.mxu0 %v7985_v28  ;;  %v15041_v34 = vld [vmem:[#allocation103_spill] sm:$0xff]  ;;  %v15043_v37 = vld [vmem:[#allocation48_spill] sm:$0xff] }
 0x1f1   :  { %15039 = vst [vmem:[#allocation154_spill] sm:$0xff] %v11202_v56  ;;  %v11208_v16 = vsel %vm3427_vm1, 1.0, %v14800_v17  ;;  %vm3394_vm7 = vcmp.eq.s32.totalorder %v11191_v9, %v8597_v23  ;;  %vm3396_vm8 = vcmp.eq.s32.totalorder %v11191_v9, %v14869_v3  ;;  %vm3393_vm15 = vcmp.eq.s32.totalorder %v11191_v9, %v8588_v20  ;;  %5347 = vmatprep.subr.bf16.mxu1 %v14862_v8  ;;  %v15045_v28 = vld [vmem:[#allocation96_spill] sm:$0xff]  ;;  %v15048_v32 = vld [vmem:[#allocation143_spill] sm:$0xff] }
 0x1f2   :  { %15040 = vst [vmem:[#allocation184_spill] sm:$0xff] %v11208_v16  ;;  %vm3395_vm9 = vcmp.eq.s32.totalorder %v11191_v9, %v8606_v26  ;;  %v11219_v18 = vadd.f32 %v15041_v34, %v1554_v58  ;;  %v11225_v6 = vsel %vm3995_vm3, 1.0, %v14800_v17  ;;  %v7170_v36 = vsel %vm2892_vm10, 1.0, %v14800_v17  ;;  %v15046_v58 = vld [vmem:[#allocation132_spill] sm:$0xff]  ;;  %v11250_v12 = vpop.permute.xlu1 %3339 }
 0x1f3   :  { %15042 = vst [vmem:[#allocation103_spill] sm:$0xff] %v11225_v6  ;;  %v3268_v24 = vadd.f32 %v11003_v21, %v10701_v51  ;;  %vm150_vm13 = vcmp.eq.s32.totalorder %v15044_v52, %v15043_v37  ;;  %vm590_vm4 = vcmp.eq.s32.totalorder %v15045_v28, %v15043_v37  ;;  %vm158_vm12 = vcmp.eq.s32.totalorder %v15046_v58, %v15043_v37  ;;  %v15049_v21 = vld [vmem:[#allocation146_spill] sm:$0xff]  ;;  %v15051_v6 = vld [vmem:[#allocation35_spill] sm:$0xff] }
 0x1f4   :  { %vm582_vm6 = vcmp.eq.s32.totalorder %v15047_v13, %v15043_v37  ;;  %v7240_v1 = vsel %vm3394_vm7, 1.0, %v14800_v17  ;;  %v7242_v34 = vsel %vm3396_vm8, 1.0, %v14800_v17  ;;  %v11245_v51 = vadd.f32 %v15048_v32, %v1556_v27  ;;  %7773 = vmatpush3.bf16.msra.mxu0 %v7986_v50  ;;  %15050 = vst [vmem:[#allocation48_spill] sm:$0xff] %v11250_v12  ;;  %v15052_v32 = vld [vmem:[#allocation20_spill] sm:$0xff]  ;;  %5348 = vmatpush1.bf16.msra.mxu1 %v7987_v55  ;;  %v7988_v27 = vld [vmem:[#allocation2 + $0x1c0] sm:$0xff]  }
 0x1f5   :  { %v11248_v42 = vadd.f32 %v15049_v21, %v1553_v60  ;;  %v7239_v53 = vsel %vm3393_vm15, 1.0, %v14800_v17  ;;  %v7241_v10 = vsel %vm3395_vm9, 1.0, %v14800_v17  ;;  %vm3444_vm11 = vcmp.eq.s32.totalorder %v15051_v6, %v14869_v3  ;;  %5349 = vmatprep.subr.bf16.mxu1 %v14862_v8 }
 0x1f6   :  { %vm3452_vm1 = vcmp.eq.s32.totalorder %v15052_v32, %v14869_v3  ;;  %vm3402_vm0 = vcmp.eq.s32.totalorder %v11250_v12, %v8597_v23  ;;  %vm3404_vm5 = vcmp.eq.s32.totalorder %v11250_v12, %v14869_v3  ;;  %vm3401_vm14 = vcmp.eq.s32.totalorder %v11250_v12, %v8588_v20  ;;  %v11286_v41 = vpop.permute.xlu1 %1665 }
 0x1f7   :  { %vm3403_vm2 = vcmp.eq.s32.totalorder %v11250_v12, %v8606_v26  ;;  %v7248_v60 = vsel %vm3402_vm0, 1.0, %v14800_v17  ;;  %v7250_v50 = vsel %vm3404_vm5, 1.0, %v14800_v17  ;;  %v7247_v55 = vsel %vm3401_vm14, 1.0, %v14800_v17  ;;  %15054 = vst [vmem:[#allocation71_spill] sm:$0xff] %v11286_v41 }
 0x1f8   :  { %v7249_v21 = vsel %vm3403_vm2, 1.0, %v14800_v17  ;;  %v3786_v9 = vadd.f32 %v7248_v60, %v11151_v4  ;;  %v3788_v16 = vadd.f32 %v7250_v50, %v11154_v35  ;;  %v3785_v56 = vadd.f32 %v7247_v55, %v11157_v5  ;;  %5350 = vmatpush1.bf16.msra.mxu1 %v7988_v27  ;;  %v15058_v5 = vld [vmem:[#allocation152_spill] sm:$0xff] }
 0x1f9   :  { %v3276_v33 = vadd.f32 %v7170_v36, %v10916_v62  ;;  %v3778_v12 = vadd.f32 %v7240_v1, %v10938_v7  ;;  %v3780_v38 = vadd.f32 %v7242_v34, %v10941_v2  ;;  %v3787_v45 = vadd.f32 %v7249_v21, %v11160_v44  ;;  %5351 = vmatprep.subr.bf16.mxu1 %v14862_v8  ;;  %v15055_v2 = vld [vmem:[#allocation42_spill] sm:$0xff] }
 0x1fa   :  { %vm4004_vm3 = vcmp.eq.s32.totalorder %v15053_v54, %v14869_v3  ;;  %v3777_v4 = vadd.f32 %v7239_v53, %v10944_v48  ;;  %v3779_v35 = vadd.f32 %v7241_v10, %v10952_v15  ;;  %v7290_v62 = vsel %vm3444_vm11, 1.0, %v14800_v17  ;;  %v15056_v48 = vld [vmem:[#allocation149_spill] sm:$0xff]  ;;  %v15057_v53 = vld [vmem:[#allocation151_spill] sm:$0xff]  ;;  %v11322_v50 = vpop.permute.xlu1 %3896 }
 0x1fb   :  { %v7298_v7 = vsel %vm3452_vm1, 1.0, %v14800_v17  ;;  %vm1738_vm10 = vcmp.eq.s32.totalorder %v11286_v41, %v8597_v23  ;;  %vm1740_vm7 = vcmp.eq.s32.totalorder %v11286_v41, %v14869_v3  ;;  %vm1737_vm8 = vcmp.eq.s32.totalorder %v11286_v41, %v8588_v20  ;;  %15059 = vst [vmem:[#allocation96_spill] sm:$0xff] %v11322_v50 }
 0x1fc   :  { %vm4012_vm15 = vcmp.eq.s32.totalorder %v15055_v2, %v14869_v3  ;;  %v4346_v15 = vadd.f32 %v15056_v48, %v3786_v9  ;;  %v4348_v44 = vadd.f32 %v15057_v53, %v3788_v16  ;;  %v4345_v10 = vadd.f32 %v15058_v5, %v3785_v56  ;;  %5352 = vmatpush1.bf16.msra.mxu1 %v7989_v25  ;;  %v15060_v5 = vld [vmem:[#allocation72_spill] sm:$0xff] }
 0x1fd   :  { %v7418_v36 = vsel %vm4004_vm3, 1.0, %v14800_v17  ;;  %v4347_v1 = vadd.f32 %v10317_v43, %v3787_v45  ;;  %v6880_v34 = vsel %vm1738_vm10, 1.0, %v14800_v17  ;;  %v6882_v27 = vsel %vm1740_vm7, 1.0, %v14800_v17  ;;  %5353 = vmatprep.subr.bf16.mxu1 %v14862_v8 }
 0x1fe   :  { %vm1739_vm9 = vcmp.eq.s32.totalorder %v11286_v41, %v8606_v26  ;;  %v6879_v9 = vsel %vm1737_vm8, 1.0, %v14800_v17  ;;  %v3828_v16 = vadd.f32 %v7290_v62, %v3268_v24  ;;  %v3836_v60 = vadd.f32 %v7298_v7, %v3276_v33 }
 0x1ff   :  { %v7426_v56 = vsel %vm4012_vm15, 1.0, %v14800_v17  ;;  %v6460_v43 = vsel %vm150_vm13, 1.0, %v14800_v17  ;;  %v6468_v25 = vsel %vm158_vm12, 1.0, %v14800_v17  ;;  %v6588_v45 = vsel %vm582_vm6, 1.0, %v14800_v17 }
 0x200   :  { %v6596_v33 = vsel %vm590_vm4, 1.0, %v14800_v17  ;;  %vm3954_vm11 = vcmp.eq.s32.totalorder %v11322_v50, %v8597_v23  ;;  %vm3956_vm13 = vcmp.eq.s32.totalorder %v11322_v50, %v14869_v3  ;;  %vm3953_vm1 = vcmp.eq.s32.totalorder %v11322_v50, %v8588_v20 }
 0x201   :  { %vm3955_vm12 = vcmp.eq.s32.totalorder %v11322_v50, %v8606_v26  ;;  %v7368_v24 = vsel %vm3954_vm11, 1.0, %v14800_v17  ;;  %v7370_v52 = vsel %vm3956_vm13, 1.0, %v14800_v17  ;;  %v7367_v58 = vsel %vm3953_vm1, 1.0, %v14800_v17  ;;  %v11356_v50 = vpop.permute.xlu1 %2222 }
 0x202   :  { %v7369_v28 = vsel %vm3955_vm12, 1.0, %v14800_v17  ;;  %v4338_v13 = vadd.f32 %v7368_v24, %v3778_v12  ;;  %v4340_v55 = vadd.f32 %v7370_v52, %v3780_v38  ;;  %v4337_v21 = vadd.f32 %v7367_v58, %v3777_v4  ;;  %15061 = vst [vmem:[#allocation132_spill] sm:$0xff] %v11356_v50 }
 0x203   :  { %v4339_v62 = vadd.f32 %v7369_v28, %v3779_v35  ;;  %v11352_v7 = vadd.f32 %v7418_v36, %v3828_v16  ;;  %v966_v48 = vadd.f32 %v6588_v45, %v6460_v43  ;;  %v974_v53 = vadd.f32 %v6596_v33, %v6468_v25 }
 0x204   :  { %vm1142_vm4 = vcmp.eq.s32.totalorder %v15060_v5, %v15043_v37  ;;  %v4458_v2 = vpack.c.bf16 %v4346_v15, %v4338_v13  ;;  %v4460_v54 = vpack.c.bf16 %v4348_v44, %v4340_v55  ;;  %v4457_v32 = vpack.c.bf16 %v4345_v10, %v4337_v21  ;;  %v15065_v55 = vld [vmem:[#allocation18_spill] sm:$0xff] }
 0x205   :  { %v4459_v6 = vpack.c.bf16 %v4347_v1, %v4339_v62  ;;  %vm2290_vm6 = vcmp.eq.s32.totalorder %v11356_v50, %v8597_v23  ;;  %vm2292_vm0 = vcmp.eq.s32.totalorder %v11356_v50, %v14869_v3  ;;  %vm2289_vm5 = vcmp.eq.s32.totalorder %v11356_v50, %v8588_v20 }
 0x206   :  { %vm2291_vm14 = vcmp.eq.s32.totalorder %v11356_v50, %v8606_v26  ;;  %5082 = vmatprep.mubr.bf16.mxu0 %v4458_v2  ;;  %5179 = vmatprep.mubr.bf16.mxu1 %v4460_v54  ;;  %v2122_v12 = vadd.f32 %v6880_v34, %v11165_v30  ;;  %v6881_v38 = vsel %vm1739_vm9, 1.0, %v14800_v17  ;;  %v2115_v4 = vadd.f32 %v10339_v19, %v11193_v63  ;;  %v11379_v2 = vpop.permute.xlu1 %2225 }
 0x207   :  { %v11373_v35 = vadd.f32 %v7426_v56, %v3836_v60  ;;  %5083 = vmatmul.mubr.bf16.gmra.mrb[4].mxu0 %v4457_v32  ;;  %5180 = vmatmul.mubr.bf16.gmra.mrb[20].mxu1 %v4459_v6  ;;  %v7000_v15 = vsel %vm2290_vm6, 1.0, %v14800_v17  ;;  %v2124_v44 = vadd.f32 %v6882_v27, %v11179_v59  ;;  %v7002_v54 = vsel %vm2292_vm0, 1.0, %v14800_v17  ;;  %15062 = vst [vmem:[#allocation139_spill] sm:$0xff] %v11379_v2  ;;  %v15063_v32 = vld [vmem:[#allocation141_spill] sm:$0xff] }
 0x208   :  { %v2121_v30 = vadd.f32 %v6879_v9, %v11182_v39  ;;  %v6999_v10 = vsel %vm2289_vm5, 1.0, %v14800_v17  ;;  %v7001_v36 = vsel %vm2291_vm14, 1.0, %v14800_v17  ;;  %v6716_v63 = vsel %vm1142_vm4, 1.0, %v14800_v17 }
 0x209   :  { %vm2298_vm2 = vcmp.eq.s32.totalorder %v11379_v2, %v8597_v23  ;;  %vm2300_vm3 = vcmp.eq.s32.totalorder %v11379_v2, %v14869_v3  ;;  %vm2297_vm10 = vcmp.eq.s32.totalorder %v11379_v2, %v8588_v20  ;;  %vm2299_vm7 = vcmp.eq.s32.totalorder %v11379_v2, %v8606_v26 }
 0x20a   :  { %v7008_v59 = vsel %vm2298_vm2, 1.0, %v14800_v17  ;;  %v7010_v39 = vsel %vm2300_vm3, 1.0, %v14800_v17  ;;  %v2123_v6 = vadd.f32 %v6881_v38, %v11196_v29  ;;  %vm1150_vm8 = vcmp.eq.s32.totalorder %v15063_v32, %v15043_v37  ;;  %v11417_v43 = vpop.permute.xlu1 %119  ;;  %v15069_v38 = vld [vmem:[#allocation160_spill] sm:$0xff] }
 0x20b   :  { %v11403_v1 = vadd.f32 %v7000_v15, %v11219_v18  ;;  %v11406_v34 = vadd.f32 %v7002_v54, %v11245_v51  ;;  %v11409_v27 = vadd.f32 %v6999_v10, %v11248_v42  ;;  %v11411_v9 = vadd.f32 %v7001_v36, %v2115_v4  ;;  %15064 = vst [vmem:[#allocation143_spill] sm:$0xff] %v11417_v43 }
 0x20c   :  { %v11413_v16 = vadd.f32 %v7008_v59, %v2122_v12  ;;  %v7007_v60 = vsel %vm2297_vm10, 1.0, %v14800_v17  ;;  %v7009_v29 = vsel %vm2299_vm7, 1.0, %v14800_v17  ;;  %v1526_v56 = vadd.f32 %v6716_v63, %v966_v48  ;;  %v15068_v48 = vld [vmem:[#allocation157_spill] sm:$0xff] }
 0x20d   :  { %v11419_v25 = vadd.f32 %v7010_v39, %v2124_v44  ;;  %v6724_v18 = vsel %vm1150_vm8, 1.0, %v14800_v17  ;;  %vm1702_vm15 = vcmp.eq.s32.totalorder %v10259_v0, %v15043_v37  ;;  %vm1710_vm9 = vcmp.eq.s32.totalorder %v10311_v46, %v15043_v37  ;;  %v15071_v44 = vld [vmem:[#allocation164_spill] sm:$0xff] }
 0x20e   :  { %vm201_vm11 = vcmp.eq.s32.totalorder %v11417_v43, %v8588_v20  ;;  %vm202_vm13 = vcmp.eq.s32.totalorder %v11417_v43, %v8597_v23  ;;  %vm203_vm1 = vcmp.eq.s32.totalorder %v11417_v43, %v8606_v26  ;;  %vm204_vm12 = vcmp.eq.s32.totalorder %v11417_v43, %v14869_v3  ;;  %v11453_v62 = vpop.permute.xlu1 %548 }
 0x20f   :  { %vm208_vm4 = vcmp.eq.s32.totalorder %v11417_v43, %v8636_v31  ;;  %v11436_v42 = vadd.f32 %v7007_v60, %v2121_v30  ;;  %v11438_v51 = vadd.f32 %v7009_v29, %v2123_v6  ;;  %vm2262_vm6 = vcmp.eq.s32.totalorder %v10425_v49, %v15043_v37  ;;  %15067 = vst [vmem:[#allocation149_spill] sm:$0xff] %v11453_v62  ;;  %v15073_v60 = vld [vmem:[#allocation156_spill] sm:$0xff] }
 0x210   :  { %v6512_v45 = vsel %vm202_vm13, 1.0, %v14800_v17  ;;  %v6514_v33 = vsel %vm204_vm12, 1.0, %v14800_v17  ;;  %v6511_v24 = vsel %vm201_vm11, 1.0, %v14800_v17  ;;  %v1534_v52 = vadd.f32 %v6724_v18, %v974_v53  ;;  %v15070_v53 = vld [vmem:[#allocation161_spill] sm:$0xff]  ;;  %v15074_v18 = vld [vmem:[#allocation158_spill] sm:$0xff] }
 0x211   :  { %v6513_v58 = vsel %vm203_vm1, 1.0, %v14800_v17  ;;  %v6844_v28 = vsel %vm1702_vm15, 1.0, %v14800_v17  ;;  %v6852_v13 = vsel %vm1710_vm9, 1.0, %v14800_v17  ;;  %vm2270_vm0 = vcmp.eq.s32.totalorder %v15065_v55, %v15043_v37 }
 0x212   :  { %v11451_v21 = vsel %vm208_vm4, 1.0, %v14800_v17  ;;  %v11456_v12 = vadd.f32 %v15068_v48, %v6512_v45  ;;  %v11459_v4 = vadd.f32 %v15069_v38, %v6514_v33  ;;  %v11462_v15 = vadd.f32 %v15070_v53, %v6511_v24  ;;  %v11490_v33 = vpop.permute.xlu1 %2782  ;;  %v15076_v24 = vld [vmem:[#allocation159_spill] sm:$0xff] }
 0x213   :  { %15066 = vst [vmem:[#allocation146_spill] sm:$0xff] %v11451_v21  ;;  %vm625_vm5 = vcmp.eq.s32.totalorder %v11453_v62, %v8588_v20  ;;  %vm626_vm14 = vcmp.eq.s32.totalorder %v11453_v62, %v8597_v23  ;;  %vm627_vm2 = vcmp.eq.s32.totalorder %v11453_v62, %v8606_v26  ;;  %vm628_vm3 = vcmp.eq.s32.totalorder %v11453_v62, %v14869_v3  ;;  %v15089_v21 = vld [vmem:[#allocation127_spill] sm:$0xff] }
 0x214   :  { %vm632_vm10 = vcmp.eq.s32.totalorder %v11453_v62, %v8636_v31  ;;  %v11475_v54 = vadd.f32 %v15071_v44, %v6513_v58  ;;  %v2086_v30 = vadd.f32 %v6844_v28, %v1526_v56  ;;  %v6972_v10 = vsel %vm2262_vm6, 1.0, %v14800_v17  ;;  %15075 = vst [vmem:[#allocation152_spill] sm:$0xff] %v11490_v33  ;;  %v15077_v28 = vld [vmem:[#allocation162_spill] sm:$0xff] }
 0x215   :  { %v6632_v36 = vsel %vm626_vm14, 1.0, %v14800_v17  ;;  %v6634_v63 = vsel %vm628_vm3, 1.0, %v14800_v17  ;;  %v6631_v59 = vsel %vm625_vm5, 1.0, %v14800_v17  ;;  %v2094_v39 = vadd.f32 %v6852_v13, %v1534_v52 }
 0x216   :  { %v11485_v6 = vsel %vm632_vm10, 1.0, %v14800_v17  ;;  %v1010_v29 = vadd.f32 %v6632_v36, %v15073_v60  ;;  %v1012_v45 = vadd.f32 %v6634_v63, %v15074_v18  ;;  %v6633_v56 = vsel %vm627_vm2, 1.0, %v14800_v17 }
 0x217   :  { %15072 = vst [vmem:[#allocation151_spill] sm:$0xff] %v11485_v6  ;;  %v1009_v58 = vadd.f32 %v6631_v59, %v15076_v24  ;;  %v1011_v48 = vadd.f32 %v6633_v56, %v15077_v28  ;;  %v6980_v52 = vsel %vm2270_vm0, 1.0, %v14800_v17  ;;  %v2646_v13 = vadd.f32 %v6972_v10, %v2086_v30  ;;  %v11521_v59 = vpop.permute.xlu1 %2785  ;;  %v15079_v56 = vld [vmem:[#allocation122_spill] sm:$0xff]  ;;  %v15090_v6 = vld [vmem:[#allocation131_spill] sm:$0xff] }
 0x218   :  { %vm2850_vm7 = vcmp.eq.s32.totalorder %v11490_v33, %v8597_v23  ;;  %vm2852_vm8 = vcmp.eq.s32.totalorder %v11490_v33, %v14869_v3  ;;  %vm2849_vm15 = vcmp.eq.s32.totalorder %v11490_v33, %v8588_v20  ;;  %vm2851_vm9 = vcmp.eq.s32.totalorder %v11490_v33, %v8606_v26  ;;  %15078 = vst [vmem:[#allocation157_spill] sm:$0xff] %v11521_v59  ;;  %v15080_v24 = vld [vmem:[#allocation70_spill] sm:$0xff] }
 0x219   :  { %v7128_v38 = vsel %vm2850_vm7, 1.0, %v14800_v17  ;;  %v7130_v53 = vsel %vm2852_vm8, 1.0, %v14800_v17  ;;  %v7127_v44 = vsel %vm2849_vm15, 1.0, %v14800_v17  ;;  %v7129_v30 = vsel %vm2851_vm9, 1.0, %v14800_v17 }
 0x21a   :  { %v11511_v10 = vadd.f32 %v7128_v38, %v11403_v1  ;;  %v11514_v36 = vadd.f32 %v7130_v53, %v11406_v34  ;;  %v11517_v63 = vadd.f32 %v7127_v44, %v11409_v27  ;;  %vm2822_vm11 = vcmp.eq.s32.totalorder %v10587_v22, %v15043_v37  ;;  %v15081_v53 = vld [vmem:[#allocation82_spill] sm:$0xff] }
 0x21b   :  { %v11524_v60 = vadd.f32 %v7129_v30, %v11411_v9  ;;  %v11527_v18 = vadd.f32 %v10672_v11, %v1010_v29  ;;  %v11530_v1 = vadd.f32 %v15079_v56, %v1012_v45  ;;  %v11533_v34 = vadd.f32 %v15080_v24, %v1009_v58  ;;  %v15082_v56 = vld [vmem:[#allocation32_spill] sm:$0xff] }
 0x21c   :  { %vm2858_vm13 = vcmp.eq.s32.totalorder %v11521_v59, %v8597_v23  ;;  %vm2860_vm1 = vcmp.eq.s32.totalorder %v11521_v59, %v14869_v3  ;;  %vm2857_vm12 = vcmp.eq.s32.totalorder %v11521_v59, %v8588_v20  ;;  %vm2859_vm4 = vcmp.eq.s32.totalorder %v11521_v59, %v8606_v26  ;;  %v11560_v19 = vpop.permute.xlu1 %1111 }
 0x21d   :  { %v7136_v11 = vsel %vm2858_vm13, 1.0, %v14800_v17  ;;  %v7138_v27 = vsel %vm2860_vm1, 1.0, %v14800_v17  ;;  %v7135_v9 = vsel %vm2857_vm12, 1.0, %v14800_v17  ;;  %v7137_v29 = vsel %vm2859_vm4, 1.0, %v14800_v17 }
 0x21e   :  { %v3242_v45 = vadd.f32 %v7136_v11, %v11413_v16  ;;  %v3244_v58 = vadd.f32 %v7138_v27, %v11419_v25  ;;  %v3241_v28 = vadd.f32 %v7135_v9, %v11436_v42  ;;  %v3243_v38 = vadd.f32 %v7137_v29, %v11438_v51  ;;  %v15083_v51 = vld [vmem:[#allocation26_spill] sm:$0xff] }
 0x21f   :  { %v11552_v44 = vadd.f32 %v15081_v53, %v1011_v48  ;;  %v2654_v30 = vadd.f32 %v6980_v52, %v2094_v39  ;;  %vm2830_vm6 = vcmp.eq.s32.totalorder %v15082_v56, %v15043_v37  ;;  %v7100_v24 = vsel %vm2822_vm11, 1.0, %v14800_v17  ;;  %v7670_v39 = vpop.f32.mrb[0].mxu1 }
 0x220   :  { %v11563_v16 = vadd.f32 %v10773_v61, %v3242_v45  ;;  %v11566_v25 = vadd.f32 %v10804_v40, %v3244_v58  ;;  %v11569_v42 = vadd.f32 %v10888_v14, %v3241_v28  ;;  %vm3382_vm0 = vcmp.eq.s32.totalorder %v15083_v51, %v15043_v37  ;;  %v7671_v61 = vpop.f32.mrb[1].mxu1  ;;  %v7990_v45 = vld [vmem:[#allocation2 + $0x1d0] sm:$0xff]  }
 0x221   :  { %v11574_v48 = vadd.f32 %v10900_v47, %v3243_v38  ;;  %vm1194_vm5 = vcmp.eq.s32.totalorder %v11560_v19, %v8597_v23  ;;  %vm1196_vm14 = vcmp.eq.s32.totalorder %v11560_v19, %v14869_v3  ;;  %vm1193_vm2 = vcmp.eq.s32.totalorder %v11560_v19, %v8588_v20  ;;  %v7673_v11 = vpop.f32.mrb[2].mxu1  ;;  %5354 = vmatpush1.bf16.msra.mxu1 %v7990_v45 }
 0x222   :  { %v6768_v40 = vsel %vm1194_vm5, 1.0, %v14800_v17  ;;  %v6770_v14 = vsel %vm1196_vm14, 1.0, %v14800_v17  ;;  %v6767_v52 = vsel %vm1193_vm2, 1.0, %v14800_v17  ;;  %vm1195_vm3 = vcmp.eq.s32.totalorder %v11560_v19, %v8606_v26  ;;  %v7674_v58 = vpop.f32.mrb[3].mxu1  ;;  %5355 = vmatprep.subr.bf16.mxu1 %v14862_v8 }
 0x223   :  { %v11587_v47 = vadd.f32 %v7671_v61, %v7670_v39  ;;  %v11590_v27 = vadd.f32 %v6768_v40, %v11456_v12  ;;  %v11593_v9 = vadd.f32 %v6770_v14, %v11459_v4  ;;  %v11596_v29 = vadd.f32 %v6767_v52, %v11462_v15  ;;  %v11607_v4 = vpop.permute.xlu1 %3342  ;;  %v7991_v40 = vld [vmem:[#allocation2 + $0x1d8] sm:$0xff]   ;;  %v15088_v52 = vld [vmem:[#allocation55_spill] sm:$0xff] }
 0x224   :  { %v6769_v28 = vsel %vm1195_vm3, 1.0, %v14800_v17  ;;  %v7108_v38 = vsel %vm2830_vm6, 1.0, %v14800_v17  ;;  %v3206_v53 = vadd.f32 %v7100_v24, %v2646_v13  ;;  %vm3390_vm10 = vcmp.eq.s32.totalorder %v10732_v57, %v15043_v37  ;;  %15086 = vst [vmem:[#allocation164_spill] sm:$0xff] %v11607_v4 }
 0x225   :  { %15084 = vst [vmem:[#allocation160_spill] sm:$0xff] %v11587_v47  ;;  %v11605_v12 = vadd.f32 %v7674_v58, %v7673_v11  ;;  %v11610_v15 = vadd.f32 %v6769_v28, %v11475_v54  ;;  %v3214_v39 = vadd.f32 %v7108_v38, %v2654_v30  ;;  %v7228_v61 = vsel %vm3382_vm0, 1.0, %v14800_v17  ;;  %v15087_v54 = vld [vmem:[#allocation50_spill] sm:$0xff]  ;;  %v7676_v38 = vpop.f32.mrb[4].mxu1  ;;  %5356 = vmatpush1.bf16.msra.mxu1 %v7991_v40 }
 0x226   :  { %vm3410_vm7 = vcmp.eq.s32.totalorder %v11607_v4, %v8597_v23  ;;  %vm3412_vm8 = vcmp.eq.s32.totalorder %v11607_v4, %v14869_v3  ;;  %vm3409_vm15 = vcmp.eq.s32.totalorder %v11607_v4, %v8588_v20  ;;  %vm3411_vm9 = vcmp.eq.s32.totalorder %v11607_v4, %v8606_v26  ;;  %5357 = vmatprep.subr.bf16.mxu1 %v14862_v8 }
 0x227   :  { %15085 = vst [vmem:[#allocation161_spill] sm:$0xff] %v11605_v12  ;;  %vm211_vm11 = vcmp.eq.s32.totalorder %v15087_v54, %v8606_v26  ;;  %v7256_v13 = vsel %vm3410_vm7, 1.0, %v14800_v17  ;;  %v7258_v30 = vsel %vm3412_vm8, 1.0, %v14800_v17  ;;  %v7255_v24 = vsel %vm3409_vm15, 1.0, %v14800_v17  ;;  %v15163_v54 = vld [vmem:[#allocation41_spill] sm:$0xff] }
 0x228   :  { %v7257_v14 = vsel %vm3411_vm9, 1.0, %v14800_v17  ;;  %vm219_vm13 = vcmp.eq.s32.totalorder %v15088_v52, %v8606_v26  ;;  %v3794_v11 = vadd.f32 %v7256_v13, %v11511_v10  ;;  %v3796_v45 = vadd.f32 %v7258_v30, %v11514_v36  ;;  %v7677_v10 = vpop.f32.mrb[5].mxu1  ;;  %v11645_v36 = vpop.permute.xlu1 %1668  ;;  %v15162_v52 = vld [vmem:[#allocation129_spill] sm:$0xff] }
 0x229   :  { %v3793_v58 = vadd.f32 %v7255_v24, %v11517_v63  ;;  %v3795_v28 = vadd.f32 %v7257_v14, %v11524_v60  ;;  %v7236_v12 = vsel %vm3390_vm10, 1.0, %v14800_v17  ;;  %v3766_v47 = vadd.f32 %v7228_v61, %v3206_v53  ;;  %15091 = vst [vmem:[#allocation156_spill] sm:$0xff] %v11645_v36  ;;  %v15092_v63 = vld [vmem:[#allocation124_spill] sm:$0xff]  ;;  %v15093_v60 = vld [vmem:[#allocation133_spill] sm:$0xff]  ;;  %v15094_v24 = vld [vmem:[#allocation138_spill] sm:$0xff]  ;;  %v7679_v40 = vpop.f32.mrb[6].mxu1 }
 0x22a   :  { %vm3942_vm1 = vcmp.eq.s32.totalorder %v15089_v21, %v15043_v37  ;;  %vm3950_vm12 = vcmp.eq.s32.totalorder %v15090_v6, %v15043_v37  ;;  %v11648_v13 = vadd.f32 %v15092_v63, %v3794_v11  ;;  %v11651_v30 = vadd.f32 %v15093_v60, %v3796_v45  ;;  %v15095_v53 = vld [vmem:[#allocation170_spill] sm:$0xff]  ;;  %v7680_v11 = vpop.f32.mrb[7].mxu1 }
 0x22b   :  { %v11654_v14 = vadd.f32 %v15094_v24, %v3793_v58  ;;  %v11657_v61 = vadd.f32 %v15095_v53, %v3795_v28  ;;  %v11660_v55 = vadd.f32 %v7677_v10, %v7676_v38  ;;  %vm1746_vm4 = vcmp.eq.s32.totalorder %v11645_v36, %v8597_v23 }
 0x22c   :  { %vm1748_vm6 = vcmp.eq.s32.totalorder %v11645_v36, %v14869_v3  ;;  %vm1745_vm0 = vcmp.eq.s32.totalorder %v11645_v36, %v8588_v20  ;;  %v6888_v45 = vsel %vm1746_vm4, 1.0, %v14800_v17  ;;  %vm1747_vm5 = vcmp.eq.s32.totalorder %v11645_v36, %v8606_v26  ;;  %v11678_v24 = vpop.permute.xlu1 %1671 }
 0x22d   :  { %15096 = vst [vmem:[#allocation158_spill] sm:$0xff] %v11660_v55  ;;  %v6890_v58 = vsel %vm1748_vm6, 1.0, %v14800_v17  ;;  %v6887_v28 = vsel %vm1745_vm0, 1.0, %v14800_v17  ;;  %v11673_v38 = vadd.f32 %v7680_v11, %v7679_v40  ;;  %v2130_v10 = vadd.f32 %v6888_v45, %v11527_v18  ;;  %15098 = vst [vmem:[#allocation162_spill] sm:$0xff] %v11678_v24 }
 0x22e   :  { %v2132_v63 = vadd.f32 %v6890_v58, %v11530_v1  ;;  %v2129_v60 = vadd.f32 %v6887_v28, %v11533_v34  ;;  %v6889_v53 = vsel %vm1747_vm5, 1.0, %v14800_v17  ;;  %v3774_v55 = vadd.f32 %v7236_v12, %v3214_v39 }
 0x22f   :  { %15097 = vst [vmem:[#allocation159_spill] sm:$0xff] %v11673_v38  ;;  %v7356_v49 = vsel %vm3942_vm1, 1.0, %v14800_v17  ;;  %v7364_v40 = vsel %vm3950_vm12, 1.0, %v14800_v17  ;;  %vm1754_vm14 = vcmp.eq.s32.totalorder %v11678_v24, %v8597_v23  ;;  %vm1756_vm2 = vcmp.eq.s32.totalorder %v11678_v24, %v14869_v3 }
 0x230   :  { %vm1753_vm3 = vcmp.eq.s32.totalorder %v11678_v24, %v8588_v20  ;;  %vm1755_vm10 = vcmp.eq.s32.totalorder %v11678_v24, %v8606_v26  ;;  %v6896_v18 = vsel %vm1754_vm14, 1.0, %v14800_v17  ;;  %v6898_v1 = vsel %vm1756_vm2, 1.0, %v14800_v17 }
 0x231   :  { %v6895_v34 = vsel %vm1753_vm3, 1.0, %v14800_v17  ;;  %v6897_v12 = vsel %vm1755_vm10, 1.0, %v14800_v17  ;;  %v2138_v39 = vadd.f32 %v6896_v18, %v11590_v27  ;;  %v2140_v11 = vadd.f32 %v6898_v1, %v11593_v9  ;;  %v11714_v32 = vpop.permute.xlu1 %3905  ;;  %v15100_v27 = vld [vmem:[#allocation134_spill] sm:$0xff] }
 0x232   :  { %v2137_v45 = vadd.f32 %v6895_v34, %v11596_v29  ;;  %v2131_v58 = vadd.f32 %v6889_v53, %v11552_v44  ;;  %v2139_v28 = vadd.f32 %v6897_v12, %v11610_v15  ;;  %v11706_v38 = vadd.f32 %v7356_v49, %v3766_v47  ;;  %15099 = vst [vmem:[#allocation122_spill] sm:$0xff] %v11714_v32  ;;  %v15101_v9 = vld [vmem:[#allocation174_spill] sm:$0xff] }
 0x233   :  { %v11708_v46 = vadd.f32 %v7364_v40, %v3774_v55  ;;  %v6521_v0 = vsel %vm211_vm11, 1.0, %v14800_v17  ;;  %v11717_v18 = vadd.f32 %v15100_v27, %v2138_v39  ;;  %v11720_v29 = vadd.f32 %v15101_v9, %v2140_v11  ;;  %v15102_v44 = vld [vmem:[#allocation178_spill] sm:$0xff]  ;;  %v15104_v9 = vld [vmem:[#allocation12_spill] sm:$0xff] }
 0x234   :  { %v11723_v53 = vadd.f32 %v15102_v44, %v2137_v45  ;;  %v6529_v49 = vsel %vm219_vm13, 1.0, %v14800_v17  ;;  %vm3978_vm7 = vcmp.eq.s32.totalorder %v11714_v32, %v8597_v23  ;;  %vm3980_vm8 = vcmp.eq.s32.totalorder %v11714_v32, %v14869_v3  ;;  %v15103_v11 = vld [vmem:[#allocation154_spill] sm:$0xff] }
 0x235   :  { %vm3977_vm15 = vcmp.eq.s32.totalorder %v11714_v32, %v8588_v20  ;;  %vm3979_vm9 = vcmp.eq.s32.totalorder %v11714_v32, %v8606_v26  ;;  %v7392_v55 = vsel %vm3978_vm7, 1.0, %v14800_v17  ;;  %v7394_v47 = vsel %vm3980_vm8, 1.0, %v14800_v17  ;;  %v15105_v44 = vld [vmem:[#allocation14_spill] sm:$0xff] }
 0x236   :  { %v7391_v15 = vsel %vm3977_vm15, 1.0, %v14800_v17  ;;  %v7393_v40 = vsel %vm3979_vm9, 1.0, %v14800_v17  ;;  %v4362_v1 = vadd.f32 %v7392_v55, %v11563_v16  ;;  %v4364_v34 = vadd.f32 %v7394_v47, %v11566_v25  ;;  %v11754_v5 = vpop.permute.xlu1 %2228 }
 0x237   :  { %v4361_v12 = vadd.f32 %v7391_v15, %v11569_v42  ;;  %v4363_v39 = vadd.f32 %v7393_v40, %v11574_v48  ;;  %v11746_v45 = vadd.f32 %v15103_v11, %v2139_v28  ;;  %vm643_vm11 = vcmp.eq.s32.totalorder %v15104_v9, %v8606_v26  ;;  %15106 = vst [vmem:[#allocation70_spill] sm:$0xff] %v11754_v5  ;;  %v15110_v11 = vld [vmem:[#allocation19_spill] sm:$0xff] }
 0x238   :  { %vm651_vm13 = vcmp.eq.s32.totalorder %v15105_v44, %v8606_v26  ;;  %v4466_v16 = vpack.c.bf16 %v4362_v1, %v11648_v13  ;;  %v4468_v25 = vpack.c.bf16 %v4364_v34, %v11651_v30  ;;  %vm2306_vm1 = vcmp.eq.s32.totalorder %v11754_v5, %v8597_v23 }
 0x239   :  { %v4465_v42 = vpack.c.bf16 %v4361_v12, %v11654_v14  ;;  %v4467_v48 = vpack.c.bf16 %v4363_v39, %v11657_v61  ;;  %vm2308_vm12 = vcmp.eq.s32.totalorder %v11754_v5, %v14869_v3  ;;  %vm2305_vm4 = vcmp.eq.s32.totalorder %v11754_v5, %v8588_v20  ;;  %v15107_v12 = vld [vmem:[#allocation111_spill] sm:$0xff] }
 0x23a   :  { %vm2307_vm6 = vcmp.eq.s32.totalorder %v11754_v5, %v8606_v26  ;;  %5090 = vmatprep.mubr.bf16.mxu0 %v4466_v16  ;;  %5187 = vmatprep.mubr.bf16.mxu1 %v4468_v25  ;;  %v7016_v13 = vsel %vm2306_vm1, 1.0, %v14800_v17  ;;  %v7018_v30 = vsel %vm2308_vm12, 1.0, %v14800_v17  ;;  %v7015_v14 = vsel %vm2305_vm4, 1.0, %v14800_v17 }
 0x23b   :  { %v7017_v61 = vsel %vm2307_vm6, 1.0, %v14800_v17  ;;  %5091 = vmatmul.mubr.bf16.gmra.mrb[8].mxu0 %v4465_v42  ;;  %5188 = vmatmul.mubr.bf16.gmra.mrb[24].mxu1 %v4467_v48  ;;  %v2690_v28 = vadd.f32 %v7016_v13, %v2130_v10  ;;  %v2692_v55 = vadd.f32 %v7018_v30, %v2132_v63  ;;  %v2689_v47 = vadd.f32 %v7015_v14, %v2129_v60  ;;  %v11782_v39 = vpop.permute.xlu1 %2788  ;;  %v15109_v63 = vld [vmem:[#allocation16_spill] sm:$0xff] }
 0x23c   :  { %v6649_v15 = vsel %vm643_vm11, 1.0, %v14800_v17  ;;  %v2691_v40 = vadd.f32 %v7017_v61, %v2131_v58  ;;  %v6657_v1 = vsel %vm651_vm13, 1.0, %v14800_v17  ;;  %vm1203_vm0 = vcmp.eq.s32.totalorder %v15107_v12, %v8606_v26  ;;  %15108 = vst [vmem:[#allocation82_spill] sm:$0xff] %v11782_v39  ;;  %v15117_v12 = vld [vmem:[#allocation184_spill] sm:$0xff] }
 0x23d   :  { %v1027_v34 = vadd.f32 %v6649_v15, %v6521_v0  ;;  %v1035_v10 = vadd.f32 %v6657_v1, %v6529_v49  ;;  %vm1211_vm5 = vcmp.eq.s32.totalorder %v15109_v63, %v8606_v26  ;;  %v6777_v60 = vsel %vm1203_vm0, 1.0, %v14800_v17  ;;  %v15112_v15 = vld [vmem:[#allocation36_spill] sm:$0xff] }
 0x23e   :  { %vm1763_vm14 = vcmp.eq.s32.totalorder %v15110_v11, %v8606_v26  ;;  %vm2866_vm2 = vcmp.eq.s32.totalorder %v11782_v39, %v8597_v23  ;;  %vm2868_vm3 = vcmp.eq.s32.totalorder %v11782_v39, %v14869_v3  ;;  %vm2865_vm10 = vcmp.eq.s32.totalorder %v11782_v39, %v8588_v20 }
 0x23f   :  { %vm2867_vm7 = vcmp.eq.s32.totalorder %v11782_v39, %v8606_v26  ;;  %v7144_v0 = vsel %vm2866_vm2, 1.0, %v14800_v17  ;;  %v7146_v58 = vsel %vm2868_vm3, 1.0, %v14800_v17  ;;  %v7143_v49 = vsel %vm2865_vm10, 1.0, %v14800_v17  ;;  %v11801_v30 = vpop.permute.xlu1 %2791 }
 0x240   :  { %v7145_v16 = vsel %vm2867_vm7, 1.0, %v14800_v17  ;;  %v3250_v25 = vadd.f32 %v7144_v0, %v2690_v28  ;;  %v3252_v42 = vadd.f32 %v7146_v58, %v2692_v55  ;;  %v3249_v48 = vadd.f32 %v7143_v49, %v2689_v47  ;;  %15111 = vst [vmem:[#allocation124_spill] sm:$0xff] %v11801_v30  ;;  %v7682_v28 = vpop.f32.mrb[8].mxu1  ;;  %v15113_v55 = vld [vmem:[#allocation140_spill] sm:$0xff]  ;;  %v15115_v49 = vld [vmem:[#allocation181_spill] sm:$0xff] }
 0x241   :  { %v3251_v13 = vadd.f32 %v7145_v16, %v2691_v40  ;;  %v6785_v14 = vsel %vm1211_vm5, 1.0, %v14800_v17  ;;  %v1587_v61 = vadd.f32 %v6777_v60, %v1027_v34  ;;  %vm1771_vm8 = vcmp.eq.s32.totalorder %v15112_v15, %v8606_v26  ;;  %v15114_v40 = vld [vmem:[#allocation177_spill] sm:$0xff]  ;;  %v7683_v34 = vpop.f32.mrb[9].mxu1 }
 0x242   :  { %v6905_v1 = vsel %vm1763_vm14, 1.0, %v14800_v17  ;;  %vm2874_vm15 = vcmp.eq.s32.totalorder %v11801_v30, %v8597_v23  ;;  %v3810_v47 = vadd.f32 %v15113_v55, %v3250_v25  ;;  %vm2876_vm9 = vcmp.eq.s32.totalorder %v11801_v30, %v14869_v3  ;;  %v7685_v11 = vpop.f32.mrb[10].mxu1 }
 0x243   :  { %v3812_v0 = vadd.f32 %v15114_v40, %v3252_v42  ;;  %v7152_v60 = vsel %vm2874_vm15, 1.0, %v14800_v17  ;;  %v7154_v58 = vsel %vm2876_vm9, 1.0, %v14800_v17  ;;  %vm2873_vm11 = vcmp.eq.s32.totalorder %v11801_v30, %v8588_v20  ;;  %v7686_v42 = vpop.f32.mrb[11].mxu1 }
 0x244   :  { %v3809_v16 = vadd.f32 %v15115_v49, %v3249_v48  ;;  %v11824_v27 = vadd.f32 %v7683_v34, %v7682_v28  ;;  %v3258_v25 = vadd.f32 %v7152_v60, %v11717_v18  ;;  %v3260_v55 = vadd.f32 %v7154_v58, %v11720_v29  ;;  %v11835_v48 = vpop.permute.xlu1 %3351  ;;  %v15121_v60 = vld [vmem:[#allocation21_spill] sm:$0xff]  ;;  %v15122_v58 = vld [vmem:[#allocation23_spill] sm:$0xff] }
 0x245   :  { %v7151_v63 = vsel %vm2873_vm11, 1.0, %v14800_v17  ;;  %vm2875_vm13 = vcmp.eq.s32.totalorder %v11801_v30, %v8606_v26  ;;  %v3811_v44 = vadd.f32 %v15117_v12, %v3251_v13  ;;  %v1595_v31 = vadd.f32 %v6785_v14, %v1035_v10  ;;  %15119 = vst [vmem:[#allocation170_spill] sm:$0xff] %v11835_v48 }
 0x246   :  { %15116 = vst [vmem:[#allocation133_spill] sm:$0xff] %v11824_v27  ;;  %v3257_v40 = vadd.f32 %v7151_v63, %v11723_v53  ;;  %v11833_v9 = vadd.f32 %v7686_v42, %v7685_v11  ;;  %v7153_v28 = vsel %vm2875_vm13, 1.0, %v14800_v17  ;;  %v6913_v18 = vsel %vm1771_vm8, 1.0, %v14800_v17  ;;  %v15125_v42 = vld [vmem:[#allocation144_spill] sm:$0xff]  ;;  %v7992_v27 = vld [vmem:[#allocation2 + $0x1e0] sm:$0xff]  }
 0x247   :  { %v2147_v29 = vadd.f32 %v6905_v1, %v1587_v61  ;;  %vm3434_vm1 = vcmp.eq.s32.totalorder %v11835_v48, %v8597_v23  ;;  %vm3436_vm12 = vcmp.eq.s32.totalorder %v11835_v48, %v14869_v3  ;;  %vm3433_vm4 = vcmp.eq.s32.totalorder %v11835_v48, %v8588_v20  ;;  %v15120_v1 = vld [vmem:[#allocation45_spill] sm:$0xff]  ;;  %5358 = vmatpush1.bf16.msra.mxu1 %v7992_v27  ;;  %v15135_v27 = vld [vmem:[#allocation42_spill] sm:$0xff] }
 0x248   :  { %15118 = vst [vmem:[#allocation138_spill] sm:$0xff] %v11833_v9  ;;  %v3259_v53 = vadd.f32 %v7153_v28, %v11746_v45  ;;  %v7280_v12 = vsel %vm3434_vm1, 1.0, %v14800_v17  ;;  %v7282_v10 = vsel %vm3436_vm12, 1.0, %v14800_v17  ;;  %v7279_v63 = vsel %vm3433_vm4, 1.0, %v14800_v17  ;;  %v15126_v28 = vld [vmem:[#allocation182_spill] sm:$0xff]  ;;  %v15129_v9 = vld [vmem:[#allocation29_spill] sm:$0xff]  ;;  %5359 = vmatprep.subr.bf16.mxu1 %v14862_v8 }
 0x249   :  { %vm3435_vm6 = vcmp.eq.s32.totalorder %v11835_v48, %v8606_v26  ;;  %v3818_v11 = vadd.f32 %v7280_v12, %v3258_v25  ;;  %v3820_v13 = vadd.f32 %v7282_v10, %v3260_v55  ;;  %v3817_v14 = vadd.f32 %v7279_v63, %v3257_v40  ;;  %v11863_v49 = vpop.permute.xlu1 %3908  ;;  %v15124_v25 = vld [vmem:[#allocation173_spill] sm:$0xff] }
 0x24a   :  { %v7281_v61 = vsel %vm3435_vm6, 1.0, %v14800_v17  ;;  %vm2829_vm0 = vcmp.eq.s32.totalorder %v15082_v56, %v15120_v1  ;;  %vm2821_vm5 = vcmp.eq.s32.totalorder %v10587_v22, %v15120_v1  ;;  %v2155_v34 = vadd.f32 %v6913_v18, %v1595_v31  ;;  %15123 = vst [vmem:[#allocation134_spill] sm:$0xff] %v11863_v49 }
 0x24b   :  { %v3819_v45 = vadd.f32 %v7281_v61, %v3259_v53  ;;  %vm2323_vm14 = vcmp.eq.s32.totalorder %v15121_v60, %v8606_v26  ;;  %vm2331_vm2 = vcmp.eq.s32.totalorder %v15122_v58, %v8606_v26  ;;  %v4378_v55 = vadd.f32 %v15124_v25, %v3818_v11  ;;  %v15127_v61 = vld [vmem:[#allocation64_spill] sm:$0xff]  ;;  %v15128_v25 = vld [vmem:[#allocation103_spill] sm:$0xff] }
 0x24c   :  { %v4380_v40 = vadd.f32 %v15125_v42, %v3820_v13  ;;  %v4377_v12 = vadd.f32 %v15126_v28, %v3817_v14  ;;  %v7033_v10 = vsel %vm2323_vm14, 1.0, %v14800_v17  ;;  %vm3986_vm3 = vcmp.eq.s32.totalorder %v11863_v49, %v8597_v23 }
 0x24d   :  { %vm3988_vm10 = vcmp.eq.s32.totalorder %v11863_v49, %v14869_v3  ;;  %vm3985_vm7 = vcmp.eq.s32.totalorder %v11863_v49, %v8588_v20  ;;  %vm3987_vm8 = vcmp.eq.s32.totalorder %v11863_v49, %v8606_v26  ;;  %v7400_v31 = vsel %vm3986_vm3, 1.0, %v14800_v17 }
 0x24e   :  { %v7402_v18 = vsel %vm3988_vm10, 1.0, %v14800_v17  ;;  %v7399_v53 = vsel %vm3985_vm7, 1.0, %v14800_v17  ;;  %v7401_v63 = vsel %vm3987_vm8, 1.0, %v14800_v17  ;;  %v4370_v11 = vadd.f32 %v7400_v31, %v3810_v47  ;;  %v15130_v47 = vld [vmem:[#allocation87_spill] sm:$0xff] }
 0x24f   :  { %v4372_v13 = vadd.f32 %v7402_v18, %v3812_v0  ;;  %v4369_v23 = vadd.f32 %v7399_v53, %v3809_v16  ;;  %v4371_v14 = vadd.f32 %v7401_v63, %v3811_v44  ;;  %vm228_vm15 = vcmp.eq.s32.totalorder %v15127_v61, %v14869_v3  ;;  %v15132_v63 = vld [vmem:[#allocation35_spill] sm:$0xff] }
 0x250   :  { %v4379_v20 = vadd.f32 %v15128_v25, %v3819_v45  ;;  %v7041_v42 = vsel %vm2331_vm2, 1.0, %v14800_v17  ;;  %v2707_v28 = vadd.f32 %v7033_v10, %v2147_v29  ;;  %vm2883_vm9 = vcmp.eq.s32.totalorder %v15129_v9, %v8606_v26  ;;  %v15131_v45 = vld [vmem:[#allocation31_spill] sm:$0xff] }
 0x251   :  { %vm668_vm11 = vcmp.eq.s32.totalorder %v15130_v47, %v14869_v3  ;;  %v4474_v0 = vpack.c.bf16 %v4378_v55, %v4370_v11  ;;  %v4476_v44 = vpack.c.bf16 %v4380_v40, %v4372_v13  ;;  %v4473_v16 = vpack.c.bf16 %v4377_v12, %v4369_v23  ;;  %v15133_v55 = vld [vmem:[#allocation20_spill] sm:$0xff]  ;;  %v15134_v11 = vld [vmem:[#allocation13_spill] sm:$0xff] }
 0x252   :  { %v2715_v31 = vadd.f32 %v7041_v42, %v2155_v34  ;;  %v4475_v18 = vpack.c.bf16 %v4379_v20, %v4371_v14  ;;  %vm2891_vm13 = vcmp.eq.s32.totalorder %v15131_v45, %v8606_v26  ;;  %v7161_v53 = vsel %vm2883_vm9, 1.0, %v14800_v17  ;;  %v15138_v42 = vld [vmem:[#allocation166_spill] sm:$0xff]  ;;  %v15160_v45 = vld [vmem:[#allocation60_spill] sm:$0xff] }
 0x253   :  { %vm3443_vm1 = vcmp.eq.s32.totalorder %v15132_v63, %v8606_v26  ;;  %5098 = vmatprep.mubr.bf16.mxu0 %v4474_v0  ;;  %5195 = vmatprep.mubr.bf16.mxu1 %v4476_v44  ;;  %v7169_v29 = vsel %vm2891_vm13, 1.0, %v14800_v17  ;;  %v3267_v10 = vadd.f32 %v7161_v53, %v2707_v28  ;;  %vm3451_vm12 = vcmp.eq.s32.totalorder %v15133_v55, %v8606_v26  ;;  %v15139_v28 = vld [vmem:[#allocation135_spill] sm:$0xff] }
 0x254   :  { %v7289_v34 = vsel %vm3443_vm1, 1.0, %v14800_v17  ;;  %5099 = vmatmul.mubr.bf16.gmra.mrb[12].mxu0 %v4473_v16  ;;  %5196 = vmatmul.mubr.bf16.gmra.mrb[28].mxu1 %v4475_v18  ;;  %v3275_v40 = vadd.f32 %v7169_v29, %v2715_v31  ;;  %v7297_v12 = vsel %vm3451_vm12, 1.0, %v14800_v17  ;;  %vm4003_vm4 = vcmp.eq.s32.totalorder %v15134_v11, %v8606_v26  ;;  %v15140_v16 = vld [vmem:[#allocation92_spill] sm:$0xff]  ;;  %v15141_v31 = vld [vmem:[#allocation61_spill] sm:$0xff] }
 0x255   :  { %vm4011_vm6 = vcmp.eq.s32.totalorder %v15135_v27, %v8606_v26  ;;  %v15136_v13 = vpack.c.bf16 %v11373_v35, %v11352_v7  ;;  %v15137_v23 = vpack.c.bf16 %v11708_v46, %v11706_v38  ;;  %v3827_v14 = vadd.f32 %v7289_v34, %v3267_v10 }
 0x256   :  { %v7417_v25 = vsel %vm4003_vm4, 1.0, %v14800_v17  ;;  %v7425_v20 = vsel %vm4011_vm6, 1.0, %v14800_v17  ;;  %v2645_v0 = vadd.f32 %v15139_v28, %v15138_v42  ;;  %v3835_v44 = vadd.f32 %v7297_v12, %v3275_v40  ;;  %v15142_v40 = vld [vmem:[#allocation51_spill] sm:$0xff]  ;;  %v15143_v12 = vld [vmem:[#allocation86_spill] sm:$0xff] }
 0x257   :  { %5203 = vmatprep.mubr.bf16.mxu1 %v15136_v13  ;;  %5268 = vmatprep.mubr.bf16.mxu0 %v15137_v23  ;;  %v2653_v18 = vadd.f32 %v15141_v31, %v15140_v16  ;;  %v7099_v7 = vsel %vm2821_vm5, 1.0, %v14800_v17  ;;  %v7107_v46 = vsel %vm2829_vm0, 1.0, %v14800_v17  ;;  %v4387_v35 = vadd.f32 %v7417_v25, %v3827_v14  ;;  %v15144_v23 = vld [vmem:[#allocation25_spill] sm:$0xff]  ;;  %v15145_v28 = vld [vmem:[#allocation99_spill] sm:$0xff] }
 0x258   :  { %v3205_v38 = vadd.f32 %v7099_v7, %v2645_v0  ;;  %vm3381_vm14 = vcmp.eq.s32.totalorder %v15083_v51, %v15120_v1  ;;  %vm3389_vm2 = vcmp.eq.s32.totalorder %v10732_v57, %v15120_v1  ;;  %v4395_v53 = vadd.f32 %v7425_v20, %v3835_v44  ;;  %v15146_v0 = vld [vmem:[#allocation120_spill] sm:$0xff]  ;;  %v15156_v57 = vld [vmem:[#allocation22_spill] sm:$0xff]  ;;  %v15157_v51 = vld [vmem:[#allocation89_spill] sm:$0xff] }
 0x259   :  { %v3213_v29 = vadd.f32 %v7107_v46, %v2653_v18  ;;  %v7227_v10 = vsel %vm3381_vm14, 1.0, %v14800_v17  ;;  %v7235_v34 = vsel %vm3389_vm2, 1.0, %v14800_v17  ;;  %vm166_vm5 = vcmp.eq.s32.totalorder %v15142_v40, %v15043_v37  ;;  %v15147_v18 = vld [vmem:[#allocation27_spill] sm:$0xff] }
 0x25a   :  { %vm174_vm0 = vcmp.eq.s32.totalorder %v15143_v12, %v15043_v37  ;;  %v3765_v13 = vadd.f32 %v7227_v10, %v3205_v38  ;;  %vm3941_vm3 = vcmp.eq.s32.totalorder %v15089_v21, %v15120_v1  ;;  %vm3949_vm10 = vcmp.eq.s32.totalorder %v15090_v6, %v15120_v1  ;;  %v15148_v38 = vld [vmem:[#allocation113_spill] sm:$0xff] }
 0x25b   :  { %vm236_vm7 = vcmp.eq.s32.totalorder %v15144_v23, %v14869_v3  ;;  %v4483_v14 = vpack.c.bf16 %v4395_v53, %v4387_v35  ;;  %v3773_v25 = vadd.f32 %v7235_v34, %v3213_v29  ;;  %v7355_v20 = vsel %vm3941_vm3, 1.0, %v14800_v17  ;;  %v15149_v10 = vld [vmem:[#allocation33_spill] sm:$0xff] }
 0x25c   :  { %v7363_v42 = vsel %vm3949_vm10, 1.0, %v14800_v17  ;;  %vm598_vm8 = vcmp.eq.s32.totalorder %v15145_v28, %v15043_v37  ;;  %vm606_vm9 = vcmp.eq.s32.totalorder %v15146_v0, %v15043_v37  ;;  %v4325_v44 = vadd.f32 %v7355_v20, %v3765_v13  ;;  %v15151_v20 = vld [vmem:[#allocation40_spill] sm:$0xff] }
 0x25d   :  { %v6538_v16 = vsel %vm228_vm15, 1.0, %v14800_v17  ;;  %v6546_v31 = vsel %vm236_vm7, 1.0, %v14800_v17  ;;  %vm660_vm13 = vcmp.eq.s32.totalorder %v15147_v18, %v14869_v3  ;;  %5204 = vmatmul.mubr.bf16.gmra.mrb[32].mxu1 %v4483_v14  ;;  %v4333_v7 = vadd.f32 %v7363_v42, %v3773_v25  ;;  %v15150_v25 = vld [vmem:[#allocation38_spill] sm:$0xff] }
 0x25e   :  { %v6666_v46 = vsel %vm660_vm13, 1.0, %v14800_v17  ;;  %v6674_v35 = vsel %vm668_vm11, 1.0, %v14800_v17  ;;  %vm1220_vm1 = vcmp.eq.s32.totalorder %v15148_v38, %v14869_v3  ;;  %vm1228_vm15 = vcmp.eq.s32.totalorder %v15149_v10, %v14869_v3 }
 0x25f   :  { %v1044_v53 = vadd.f32 %v6666_v46, %v6538_v16  ;;  %v1052_v29 = vadd.f32 %v6674_v35, %v6546_v31  ;;  %v6794_v34 = vsel %vm1220_vm1, 1.0, %v14800_v17  ;;  %v4453_v13 = vpack.c.bf16 %v4333_v7, %v4325_v44  ;;  %v15152_v31 = vld [vmem:[#allocation47_spill] sm:$0xff]  ;;  %v15154_v7 = vld [vmem:[#allocation73_spill] sm:$0xff]  ;;  %v15155_v46 = vld [vmem:[#allocation28_spill] sm:$0xff] }
 0x260   :  { %v6802_v14 = vsel %vm1228_vm15, 1.0, %v14800_v17  ;;  %vm1780_vm12 = vcmp.eq.s32.totalorder %v15150_v25, %v14869_v3  ;;  %vm1788_vm4 = vcmp.eq.s32.totalorder %v15151_v20, %v14869_v3  ;;  %vm2340_vm11 = vcmp.eq.s32.totalorder %v15152_v31, %v14869_v3  ;;  %v15153_v44 = vld [vmem:[#allocation15_spill] sm:$0xff] }
 0x261   :  { %v1604_v42 = vadd.f32 %v6794_v34, %v1044_v53  ;;  %v1612_v6 = vadd.f32 %v6802_v14, %v1052_v29  ;;  %v6922_v21 = vsel %vm1780_vm12, 1.0, %v14800_v17  ;;  %v6930_v16 = vsel %vm1788_vm4, 1.0, %v14800_v17  ;;  %5269 = vmatmul.mubr.bf16.vlgmr.msra.gmra.mrb[16].mxu0 %v4453_v13 }
 0x262   :  { %vm2348_vm6 = vcmp.eq.s32.totalorder %v15153_v44, %v14869_v3  ;;  %vm2900_vm14 = vcmp.eq.s32.totalorder %v15154_v7, %v14869_v3  ;;  %vm2908_vm2 = vcmp.eq.s32.totalorder %v15155_v46, %v14869_v3  ;;  %v7050_v29 = vsel %vm2340_vm11, 1.0, %v14800_v17 }
 0x263   :  { %v2164_v35 = vadd.f32 %v6922_v21, %v1604_v42  ;;  %v2172_v53 = vadd.f32 %v6930_v16, %v1612_v6  ;;  %v7058_v34 = vsel %vm2348_vm6, 1.0, %v14800_v17  ;;  %v7178_v13 = vsel %vm2900_vm14, 1.0, %v14800_v17  ;;  %v15158_v6 = vld [vmem:[#allocation98_spill] sm:$0xff]  ;;  %v15159_v42 = vld [vmem:[#allocation104_spill] sm:$0xff] }
 0x264   :  { %v7186_v14 = vsel %vm2908_vm2, 1.0, %v14800_v17  ;;  %vm3460_vm3 = vcmp.eq.s32.totalorder %v15156_v57, %v14869_v3  ;;  %vm3468_vm10 = vcmp.eq.s32.totalorder %v15157_v51, %v14869_v3  ;;  %vm4020_vm7 = vcmp.eq.s32.totalorder %v15158_v6, %v14869_v3 }
 0x265   :  { %v2724_v56 = vadd.f32 %v7050_v29, %v2164_v35  ;;  %v2732_v22 = vadd.f32 %v7058_v34, %v2172_v53  ;;  %v7306_v27 = vsel %vm3460_vm3, 1.0, %v14800_v17  ;;  %v7314_v21 = vsel %vm3468_vm10, 1.0, %v14800_v17 }
 0x266   :  { %vm4028_vm13 = vcmp.eq.s32.totalorder %v15159_v42, %v14869_v3  ;;  %v6476_v16 = vsel %vm166_vm5, 1.0, %v14800_v17  ;;  %v6484_v35 = vsel %vm174_vm0, 1.0, %v14800_v17  ;;  %vm227_vm1 = vcmp.eq.s32.totalorder %v15127_v61, %v8606_v26 }
 0x267   :  { %v3284_v53 = vadd.f32 %v7178_v13, %v2724_v56  ;;  %v3292_v29 = vadd.f32 %v7186_v14, %v2732_v22  ;;  %v7434_v34 = vsel %vm4020_vm7, 1.0, %v14800_v17  ;;  %v7442_v11 = vsel %vm4028_vm13, 1.0, %v14800_v17  ;;  %v15161_v56 = vld [vmem:[#allocation126_spill] sm:$0xff] }
 0x268   :  { %v6604_v55 = vsel %vm598_vm8, 1.0, %v14800_v17  ;;  %v6612_v63 = vsel %vm606_vm9, 1.0, %v14800_v17  ;;  %vm1158_vm5 = vcmp.eq.s32.totalorder %v15160_v45, %v15043_v37  ;;  %vm1166_vm0 = vcmp.eq.s32.totalorder %v15161_v56, %v15043_v37  ;;  %v7993_v22 = vld [vmem:[#allocation2 + $0x1e8] sm:$0xff]  }
 0x269   :  { %vm667_vm15 = vcmp.eq.s32.totalorder %v15130_v47, %v8606_v26  ;;  %v3844_v13 = vadd.f32 %v7306_v27, %v3284_v53  ;;  %v3852_v14 = vadd.f32 %v7314_v21, %v3292_v29  ;;  %v982_v9 = vadd.f32 %v6604_v55, %v6476_v16  ;;  %5360 = vmatpush1.bf16.msra.mxu1 %v7993_v22  ;;  %v15164_v27 = vld [vmem:[#allocation121_spill] sm:$0xff]  ;;  %v15170_v22 = vld [vmem:[#allocation96_spill] sm:$0xff] }
 0x26a   :  { %v990_v58 = vadd.f32 %v6612_v63, %v6484_v35  ;;  %v6732_v60 = vsel %vm1158_vm5, 1.0, %v14800_v17  ;;  %v6740_v15 = vsel %vm1166_vm0, 1.0, %v14800_v17  ;;  %vm1718_vm8 = vcmp.eq.s32.totalorder %v15162_v52, %v15043_v37  ;;  %5361 = vmatprep.subr.bf16.mxu1 %v14862_v8  ;;  %v15165_v21 = vld [vmem:[#allocation137_spill] sm:$0xff] }
 0x26b   :  { %vm1726_vm9 = vcmp.eq.s32.totalorder %v15163_v54, %v15043_v37  ;;  %v4404_v49 = vadd.f32 %v7434_v34, %v3844_v13  ;;  %v4412_v48 = vadd.f32 %v7442_v11, %v3852_v14  ;;  %v1542_v30 = vadd.f32 %v6732_v60, %v982_v9  ;;  %v15167_v60 = vld [vmem:[#allocation142_spill] sm:$0xff] }
 0x26c   :  { %v1550_v39 = vadd.f32 %v6740_v15, %v990_v58  ;;  %v6860_v55 = vsel %vm1718_vm8, 1.0, %v14800_v17  ;;  %v6868_v63 = vsel %vm1726_vm9, 1.0, %v14800_v17  ;;  %vm2278_vm12 = vcmp.eq.s32.totalorder %v15164_v27, %v15043_v37  ;;  %v15166_v15 = vld [vmem:[#allocation34_spill] sm:$0xff] }
 0x26d   :  { %vm2286_vm4 = vcmp.eq.s32.totalorder %v15165_v21, %v15043_v37  ;;  %v4492_v16 = vpack.c.bf16 %v4412_v48, %v4404_v49  ;;  %v2102_v35 = vadd.f32 %v6860_v55, %v1542_v30  ;;  %v6988_v29 = vsel %vm2278_vm12, 1.0, %v14800_v17  ;;  %v15168_v58 = vld [vmem:[#allocation150_spill] sm:$0xff]  ;;  %v15169_v30 = vld [vmem:[#allocation48_spill] sm:$0xff] }
 0x26e   :  { %v2110_v53 = vadd.f32 %v6868_v63, %v1550_v39  ;;  %v6996_v9 = vsel %vm2286_vm4, 1.0, %v14800_v17  ;;  %vm2838_vm11 = vcmp.eq.s32.totalorder %v15166_v15, %v15043_v37  ;;  %vm2846_vm6 = vcmp.eq.s32.totalorder %v15167_v60, %v15043_v37  ;;  %v15171_v13 = vld [vmem:[#allocation102_spill] sm:$0xff] }
 0x26f   :  { %vm3398_vm14 = vcmp.eq.s32.totalorder %v15168_v58, %v15043_v37  ;;  %5211 = vmatprep.mubr.bf16.mxu1 %v4492_v16  ;;  %v2662_v11 = vadd.f32 %v6988_v29, %v2102_v35  ;;  %v7116_v48 = vsel %vm2838_vm11, 1.0, %v14800_v17  ;;  %v7124_v39 = vsel %vm2846_vm6, 1.0, %v14800_v17 }
 0x270   :  { %v2670_v34 = vadd.f32 %v6996_v9, %v2110_v53  ;;  %vm3406_vm2 = vcmp.eq.s32.totalorder %v15169_v30, %v15043_v37  ;;  %v7244_v49 = vsel %vm3398_vm14, 1.0, %v14800_v17  ;;  %vm3958_vm3 = vcmp.eq.s32.totalorder %v15170_v22, %v15043_v37 }
 0x271   :  { %vm3966_vm10 = vcmp.eq.s32.totalorder %v15171_v13, %v15043_v37  ;;  %v3222_v14 = vadd.f32 %v7116_v48, %v2662_v11  ;;  %v7252_v63 = vsel %vm3406_vm2, 1.0, %v14800_v17  ;;  %v7372_v16 = vsel %vm3958_vm3, 1.0, %v14800_v17 }
 0x272   :  { %v3230_v55 = vadd.f32 %v7124_v39, %v2670_v34  ;;  %vm165_vm7 = vcmp.eq.s32.totalorder %v15142_v40, %v15120_v1  ;;  %vm173_vm13 = vcmp.eq.s32.totalorder %v15143_v12, %v15120_v1  ;;  %v7380_v35 = vsel %vm3966_vm10, 1.0, %v14800_v17 }
 0x273   :  { %vm235_vm5 = vcmp.eq.s32.totalorder %v15144_v23, %v8606_v26  ;;  %v6537_v53 = vsel %vm227_vm1, 1.0, %v14800_v17  ;;  %vm659_vm0 = vcmp.eq.s32.totalorder %v15147_v18, %v8606_v26  ;;  %vm597_vm8 = vcmp.eq.s32.totalorder %v15145_v28, %v15120_v1 }
 0x274   :  { %vm605_vm9 = vcmp.eq.s32.totalorder %v15146_v0, %v15120_v1  ;;  %v3782_v29 = vadd.f32 %v7244_v49, %v3222_v14  ;;  %v3790_v9 = vadd.f32 %v7252_v63, %v3230_v55  ;;  %v6545_v11 = vsel %vm235_vm5, 1.0, %v14800_v17 }
 0x275   :  { %v6665_v34 = vsel %vm659_vm0, 1.0, %v14800_v17  ;;  %v6673_v48 = vsel %vm667_vm15, 1.0, %v14800_v17  ;;  %vm1219_vm1 = vcmp.eq.s32.totalorder %v15148_v38, %v8606_v26  ;;  %vm1227_vm12 = vcmp.eq.s32.totalorder %v15149_v10, %v8606_v26 }
 0x276   :  { %v1043_v39 = vadd.f32 %v6665_v34, %v6537_v53  ;;  %v4342_v8 = vadd.f32 %v7372_v16, %v3782_v29  ;;  %v4350_v18 = vadd.f32 %v7380_v35, %v3790_v9  ;;  %v1051_v49 = vadd.f32 %v6673_v48, %v6545_v11 }
 0x277   :  { %v6793_v14 = vsel %vm1219_vm1, 1.0, %v14800_v17  ;;  %v6801_v55 = vsel %vm1227_vm12, 1.0, %v14800_v17  ;;  %vm1779_vm4 = vcmp.eq.s32.totalorder %v15150_v25, %v8606_v26  ;;  %vm1787_vm15 = vcmp.eq.s32.totalorder %v15151_v20, %v8606_v26  ;;  %v15193_v20 = vld [vmem:[#allocation52_spill] sm:$0xff] }
 0x278   :  { %v1603_v63 = vadd.f32 %v6793_v14, %v1043_v39  ;;  %v4462_v53 = vpack.c.bf16 %v4350_v18, %v4342_v8  ;;  %v1611_v34 = vadd.f32 %v6801_v55, %v1051_v49  ;;  %v6921_v38 = vsel %vm1779_vm4, 1.0, %v14800_v17  ;;  %v12111_v14 = vpop.f32.mrb[12].mxu1 }
 0x279   :  { %v6929_v10 = vsel %vm1787_vm15, 1.0, %v14800_v17  ;;  %vm2339_vm11 = vcmp.eq.s32.totalorder %v15152_v31, %v8606_v26  ;;  %vm2347_vm6 = vcmp.eq.s32.totalorder %v15153_v44, %v8606_v26  ;;  %vm2899_vm14 = vcmp.eq.s32.totalorder %v15154_v7, %v8606_v26 }
 0x27a   :  { %v2163_v16 = vadd.f32 %v6921_v38, %v1603_v63  ;;  %5276 = vmatprep.mubr.bf16.mxu0 %v4462_v53  ;;  %v2171_v35 = vadd.f32 %v6929_v10, %v1611_v34  ;;  %v7049_v29 = vsel %vm2339_vm11, 1.0, %v14800_v17  ;;  %v7057_v8 = vsel %vm2347_vm6, 1.0, %v14800_v17 }
 0x27b   :  { %vm2907_vm2 = vcmp.eq.s32.totalorder %v15155_v46, %v8606_v26  ;;  %v7177_v38 = vsel %vm2899_vm14, 1.0, %v14800_v17  ;;  %vm3459_vm3 = vcmp.eq.s32.totalorder %v15156_v57, %v8606_v26  ;;  %vm3467_vm10 = vcmp.eq.s32.totalorder %v15157_v51, %v8606_v26 }
 0x27c   :  { %v2723_v18 = vadd.f32 %v7049_v29, %v2163_v16  ;;  %v7185_v9 = vsel %vm2907_vm2, 1.0, %v14800_v17  ;;  %v2731_v11 = vadd.f32 %v7057_v8, %v2171_v35  ;;  %v7305_v10 = vsel %vm3459_vm3, 1.0, %v14800_v17  ;;  %v12122_v16 = vpop.f32.mrb[13].mxu1 }
 0x27d   :  { %vm4019_vm5 = vcmp.eq.s32.totalorder %v15158_v6, %v8606_v26  ;;  %v7313_v39 = vsel %vm3467_vm10, 1.0, %v14800_v17  ;;  %vm4027_vm0 = vcmp.eq.s32.totalorder %v15159_v42, %v8606_v26  ;;  %v6475_v53 = vsel %vm165_vm7, 1.0, %v14800_v17 }
 0x27e   :  { %v3283_v48 = vadd.f32 %v7177_v38, %v2723_v18  ;;  %v7433_v49 = vsel %vm4019_vm5, 1.0, %v14800_v17  ;;  %v3291_v55 = vadd.f32 %v7185_v9, %v2731_v11  ;;  %v7441_v63 = vsel %vm4027_vm0, 1.0, %v14800_v17  ;;  %v12134_v18 = vpop.f32.mrb[14].mxu1  ;;  %v15172_v38 = vld [vmem:[#allocation91_spill] sm:$0xff] }
 0x27f   :  { %v6483_v34 = vsel %vm173_vm13, 1.0, %v14800_v17  ;;  %v6603_v29 = vsel %vm597_vm8, 1.0, %v14800_v17  ;;  %v6611_v8 = vsel %vm605_vm9, 1.0, %v14800_v17  ;;  %vm1157_vm7 = vcmp.eq.s32.totalorder %v15160_v45, %v15120_v1 }
 0x280   :  { %v3843_v35 = vadd.f32 %v7305_v10, %v3283_v48  ;;  %vm676_vm13 = vcmp.eq.s32.totalorder %v15172_v38, %v14869_v3  ;;  %v3851_v9 = vadd.f32 %v7313_v39, %v3291_v55  ;;  %v981_v11 = vadd.f32 %v6603_v29, %v6475_v53  ;;  %v12140_v48 = vpop.f32.mrb[15].mxu1 }
 0x281   :  { %v989_v10 = vadd.f32 %v6611_v8, %v6483_v34  ;;  %vm1165_vm1 = vcmp.eq.s32.totalorder %v15161_v56, %v15120_v1  ;;  %v6731_v0 = vsel %vm1157_vm7, 1.0, %v14800_v17  ;;  %vm1717_vm8 = vcmp.eq.s32.totalorder %v15162_v52, %v15120_v1  ;;  %v15194_v56 = vld [vmem:[#allocation44_spill] sm:$0xff] }
 0x282   :  { %v4403_v12 = vadd.f32 %v7433_v49, %v3843_v35  ;;  %v6739_v28 = vsel %vm1165_vm1, 1.0, %v14800_v17  ;;  %v4411_v40 = vadd.f32 %v7441_v63, %v3851_v9  ;;  %v1541_v42 = vadd.f32 %v6731_v0, %v981_v11 }
 0x283   :  { %v1549_v6 = vadd.f32 %v6739_v28, %v989_v10  ;;  %vm1725_vm9 = vcmp.eq.s32.totalorder %v15163_v54, %v15120_v1  ;;  %v6859_v39 = vsel %vm1717_vm8, 1.0, %v14800_v17  ;;  %vm2277_vm12 = vcmp.eq.s32.totalorder %v15164_v27, %v15120_v1 }
 0x284   :  { %v6867_v55 = vsel %vm1725_vm9, 1.0, %v14800_v17  ;;  %vm2285_vm4 = vcmp.eq.s32.totalorder %v15165_v21, %v15120_v1  ;;  %v4491_v49 = vpack.c.bf16 %v4411_v40, %v4403_v12  ;;  %v2101_v53 = vadd.f32 %v6859_v39, %v1541_v42  ;;  %v15173_v42 = vld [vmem:[#allocation85_spill] sm:$0xff] }
 0x285   :  { %v2109_v34 = vadd.f32 %v6867_v55, %v1549_v6  ;;  %v6987_v63 = vsel %vm2277_vm12, 1.0, %v14800_v17  ;;  %v6995_v28 = vsel %vm2285_vm4, 1.0, %v14800_v17  ;;  %vm2837_vm15 = vcmp.eq.s32.totalorder %v15166_v15, %v15120_v1  ;;  %v15174_v39 = vld [vmem:[#allocation53_spill] sm:$0xff]  ;;  %v15175_v55 = vld [vmem:[#allocation62_spill] sm:$0xff] }
 0x286   :  { %vm2845_vm11 = vcmp.eq.s32.totalorder %v15167_v60, %v15120_v1  ;;  %vm3397_vm6 = vcmp.eq.s32.totalorder %v15168_v58, %v15120_v1  ;;  %5212 = vmatmul.mubr.bf16.gmra.mrb[36].mxu1 %v4491_v49  ;;  %v2661_v0 = vadd.f32 %v6987_v63, %v2101_v53  ;;  %v7115_v40 = vsel %vm2837_vm15, 1.0, %v14800_v17  ;;  %v15176_v49 = vld [vmem:[#allocation65_spill] sm:$0xff]  ;;  %v15179_v63 = vld [vmem:[#allocation176_spill] sm:$0xff]  ;;  %v15182_v15 = vld [vmem:[#allocation94_spill] sm:$0xff] }
 0x287   :  { %v2669_v35 = vadd.f32 %v6995_v28, %v2109_v34  ;;  %v7123_v12 = vsel %vm2845_vm11, 1.0, %v14800_v17  ;;  %vm3405_vm14 = vcmp.eq.s32.totalorder %v15169_v30, %v15120_v1  ;;  %v7243_v6 = vsel %vm3397_vm6, 1.0, %v14800_v17  ;;  %v15177_v53 = vld [vmem:[#allocation77_spill] sm:$0xff]  ;;  %v15178_v34 = vld [vmem:[#allocation172_spill] sm:$0xff] }
 0x288   :  { %vm3957_vm2 = vcmp.eq.s32.totalorder %v15170_v22, %v15120_v1  ;;  %vm3965_vm3 = vcmp.eq.s32.totalorder %v15171_v13, %v15120_v1  ;;  %vm182_vm10 = vcmp.eq.s32.totalorder %v15173_v42, %v15043_v37  ;;  %v3221_v29 = vadd.f32 %v7115_v40, %v2661_v0  ;;  %v15180_v22 = vld [vmem:[#allocation78_spill] sm:$0xff]  ;;  %v15181_v30 = vld [vmem:[#allocation84_spill] sm:$0xff]  ;;  %v15183_v21 = vld [vmem:[#allocation37_spill] sm:$0xff] }
 0x289   :  { %v3229_v8 = vadd.f32 %v7123_v12, %v2669_v35  ;;  %v7251_v9 = vsel %vm3405_vm14, 1.0, %v14800_v17  ;;  %v7371_v11 = vsel %vm3957_vm2, 1.0, %v14800_v17  ;;  %v7379_v10 = vsel %vm3965_vm3, 1.0, %v14800_v17 }
 0x28a   :  { %vm244_vm5 = vcmp.eq.s32.totalorder %v15174_v39, %v14869_v3  ;;  %vm252_vm0 = vcmp.eq.s32.totalorder %v15175_v55, %v14869_v3  ;;  %vm684_vm7 = vcmp.eq.s32.totalorder %v15176_v49, %v14869_v3  ;;  %vm190_vm1 = vcmp.eq.s32.totalorder %v15177_v53, %v15043_v37 }
 0x28b   :  { %vm614_vm8 = vcmp.eq.s32.totalorder %v15178_v34, %v15043_v37  ;;  %vm622_vm9 = vcmp.eq.s32.totalorder %v15179_v63, %v15043_v37  ;;  %v3781_v28 = vadd.f32 %v7243_v6, %v3221_v29  ;;  %v3789_v0 = vadd.f32 %v7251_v9, %v3229_v8 }
 0x28c   :  { %v6554_v35 = vsel %vm244_vm5, 1.0, %v14800_v17  ;;  %v6562_v40 = vsel %vm252_vm0, 1.0, %v14800_v17  ;;  %v6682_v12 = vsel %vm676_vm13, 1.0, %v14800_v17  ;;  %v6690_v13 = vsel %vm684_vm7, 1.0, %v14800_v17 }
 0x28d   :  { %vm1236_vm12 = vcmp.eq.s32.totalorder %v15180_v22, %v14869_v3  ;;  %vm1244_vm4 = vcmp.eq.s32.totalorder %v15181_v30, %v14869_v3  ;;  %v4341_v58 = vadd.f32 %v7371_v11, %v3781_v28  ;;  %v4349_v6 = vadd.f32 %v7379_v10, %v3789_v0  ;;  %v15184_v10 = vld [vmem:[#allocation17_spill] sm:$0xff]  ;;  %v15186_v28 = vld [vmem:[#allocation30_spill] sm:$0xff] }
 0x28e   :  { %v1060_v29 = vadd.f32 %v6682_v12, %v6554_v35  ;;  %v1068_v8 = vadd.f32 %v6690_v13, %v6562_v40  ;;  %v6810_v9 = vsel %vm1236_vm12, 1.0, %v14800_v17  ;;  %v6818_v60 = vsel %vm1244_vm4, 1.0, %v14800_v17  ;;  %v15185_v13 = vld [vmem:[#allocation110_spill] sm:$0xff]  ;;  %v15187_v40 = vld [vmem:[#allocation81_spill] sm:$0xff] }
 0x28f   :  { %vm1796_vm15 = vcmp.eq.s32.totalorder %v15182_v15, %v14869_v3  ;;  %vm1804_vm13 = vcmp.eq.s32.totalorder %v15183_v21, %v14869_v3  ;;  %v4461_v27 = vpack.c.bf16 %v4349_v6, %v4341_v58  ;;  %vm2356_vm11 = vcmp.eq.s32.totalorder %v15184_v10, %v14869_v3  ;;  %v15188_v6 = vld [vmem:[#allocation56_spill] sm:$0xff] }
 0x290   :  { %v1620_v54 = vadd.f32 %v6810_v9, %v1060_v29  ;;  %v1628_v52 = vadd.f32 %v6818_v60, %v1068_v8  ;;  %v6938_v51 = vsel %vm1796_vm15, 1.0, %v14800_v17  ;;  %v6946_v11 = vsel %vm1804_vm13, 1.0, %v14800_v17  ;;  %v15189_v29 = vld [vmem:[#allocation83_spill] sm:$0xff] }
 0x291   :  { %vm2364_vm6 = vcmp.eq.s32.totalorder %v15185_v13, %v14869_v3  ;;  %vm2916_vm14 = vcmp.eq.s32.totalorder %v15186_v28, %v14869_v3  ;;  %5277 = vmatmul.mubr.bf16.gmra.mrb[20].mxu0 %v4461_v27  ;;  %v7066_v58 = vsel %vm2356_vm11, 1.0, %v14800_v17  ;;  %vm2924_vm2 = vcmp.eq.s32.totalorder %v15187_v40, %v14869_v3  ;;  %v15190_v27 = vld [vmem:[#allocation43_spill] sm:$0xff] }
 0x292   :  { %v2180_v0 = vadd.f32 %v6938_v51, %v1620_v54  ;;  %v2188_v35 = vadd.f32 %v6946_v11, %v1628_v52  ;;  %v7074_v60 = vsel %vm2364_vm6, 1.0, %v14800_v17  ;;  %v7194_v12 = vsel %vm2916_vm14, 1.0, %v14800_v17  ;;  %v15191_v11 = vld [vmem:[#allocation59_spill] sm:$0xff] }
 0x293   :  { %vm3476_vm3 = vcmp.eq.s32.totalorder %v15188_v6, %v14869_v3  ;;  %vm3484_vm5 = vcmp.eq.s32.totalorder %v15189_v29, %v14869_v3  ;;  %v7202_v51 = vsel %vm2924_vm2, 1.0, %v14800_v17  ;;  %vm4036_vm0 = vcmp.eq.s32.totalorder %v15190_v27, %v14869_v3 }
 0x294   :  { %v2740_v8 = vadd.f32 %v7066_v58, %v2180_v0  ;;  %v2748_v9 = vadd.f32 %v7074_v60, %v2188_v35  ;;  %v7322_v54 = vsel %vm3476_vm3, 1.0, %v14800_v17  ;;  %v7330_v52 = vsel %vm3484_vm5, 1.0, %v14800_v17 }
 0x295   :  { %vm4044_vm7 = vcmp.eq.s32.totalorder %v15191_v11, %v14869_v3  ;;  %v6492_v57 = vsel %vm182_vm10, 1.0, %v14800_v17  ;;  %v7450_v35 = vsel %vm4036_vm0, 1.0, %v14800_v17  ;;  %v6500_v60 = vsel %vm190_vm1, 1.0, %v14800_v17 }
 0x296   :  { %v3300_v46 = vadd.f32 %v7194_v12, %v2740_v8  ;;  %v3308_v0 = vadd.f32 %v7202_v51, %v2748_v9  ;;  %v7458_v58 = vsel %vm4044_vm7, 1.0, %v14800_v17  ;;  %v6620_v7 = vsel %vm614_vm8, 1.0, %v14800_v17  ;;  %v15192_v8 = vld [vmem:[#allocation183_spill] sm:$0xff] }
 0x297   :  { %v6628_v12 = vsel %vm622_vm9, 1.0, %v14800_v17  ;;  %vm1174_vm10 = vcmp.eq.s32.totalorder %v15192_v8, %v15043_v37  ;;  %vm675_vm12 = vcmp.eq.s32.totalorder %v15172_v38, %v8606_v26  ;;  %v998_v44 = vadd.f32 %v6620_v7, %v6492_v57 }
 0x298   :  { %v3860_v9 = vadd.f32 %v7322_v54, %v3300_v46  ;;  %v3868_v51 = vadd.f32 %v7330_v52, %v3308_v0  ;;  %v1006_v31 = vadd.f32 %v6628_v12, %v6500_v60  ;;  %vm1182_vm1 = vcmp.eq.s32.totalorder %v15193_v20, %v15043_v37 }
 0x299   :  { %v6748_v25 = vsel %vm1174_vm10, 1.0, %v14800_v17  ;;  %vm1734_vm8 = vcmp.eq.s32.totalorder %v15194_v56, %v15043_v37  ;;  %vm1742_vm9 = vcmp.eq.s32.totalorder %v11286_v41, %v15043_v37  ;;  %v6756_v47 = vsel %vm1182_vm1, 1.0, %v14800_v17 }
 0x29a   :  { %v4420_v23 = vadd.f32 %v7450_v35, %v3860_v9  ;;  %v4428_v45 = vadd.f32 %v7458_v58, %v3868_v51  ;;  %v1558_v61 = vadd.f32 %v6748_v25, %v998_v44  ;;  %v1566_v46 = vadd.f32 %v6756_v47, %v1006_v31  ;;  %v15196_v44 = vld [vmem:[#allocation88_spill] sm:$0xff] }
 0x29b   :  { %v6876_v57 = vsel %vm1734_vm8, 1.0, %v14800_v17  ;;  %v6884_v7 = vsel %vm1742_vm9, 1.0, %v14800_v17  ;;  %vm2294_vm4 = vcmp.eq.s32.totalorder %v11356_v50, %v15043_v37  ;;  %vm2302_vm15 = vcmp.eq.s32.totalorder %v11379_v2, %v15043_v37 }
 0x29c   :  { %v4500_v54 = vpack.c.bf16 %v4428_v45, %v4420_v23  ;;  %v2118_v52 = vadd.f32 %v6876_v57, %v1558_v61  ;;  %v7004_v0 = vsel %vm2294_vm4, 1.0, %v14800_v17  ;;  %v2126_v35 = vadd.f32 %v6884_v7, %v1566_v46  ;;  %v15195_v23 = vld [vmem:[#allocation168_spill] sm:$0xff] }
 0x29d   :  { %v7012_v58 = vsel %vm2302_vm15, 1.0, %v14800_v17  ;;  %vm2854_vm13 = vcmp.eq.s32.totalorder %v11490_v33, %v15043_v37  ;;  %vm2862_vm11 = vcmp.eq.s32.totalorder %v11521_v59, %v15043_v37  ;;  %vm3414_vm6 = vcmp.eq.s32.totalorder %v11607_v4, %v15043_v37 }
 0x29e   :  { %5219 = vmatprep.mubr.bf16.mxu1 %v4500_v54  ;;  %v2678_v47 = vadd.f32 %v7004_v0, %v2118_v52  ;;  %v7132_v25 = vsel %vm2854_vm13, 1.0, %v14800_v17  ;;  %v7140_v61 = vsel %vm2862_vm11, 1.0, %v14800_v17  ;;  %v2686_v45 = vadd.f32 %v7012_v58, %v2126_v35 }
 0x29f   :  { %vm3422_vm14 = vcmp.eq.s32.totalorder %v15195_v23, %v15043_v37  ;;  %v7260_v31 = vsel %vm3414_vm6, 1.0, %v14800_v17  ;;  %vm3974_vm2 = vcmp.eq.s32.totalorder %v15196_v44, %v15043_v37  ;;  %vm3982_vm3 = vcmp.eq.s32.totalorder %v11714_v32, %v15043_v37 }
 0x2a0   :  { %v3238_v60 = vadd.f32 %v7132_v25, %v2678_v47  ;;  %v7268_v12 = vsel %vm3422_vm14, 1.0, %v14800_v17  ;;  %v7388_v9 = vsel %vm3974_vm2, 1.0, %v14800_v17  ;;  %v3246_v51 = vadd.f32 %v7140_v61, %v2686_v45 }
 0x2a1   :  { %v7396_v46 = vsel %vm3982_vm3, 1.0, %v14800_v17  ;;  %vm243_vm5 = vcmp.eq.s32.totalorder %v15174_v39, %v8606_v26  ;;  %vm251_vm0 = vcmp.eq.s32.totalorder %v15175_v55, %v8606_v26  ;;  %vm189_vm7 = vcmp.eq.s32.totalorder %v15177_v53, %v15120_v1 }
 0x2a2   :  { %vm181_vm10 = vcmp.eq.s32.totalorder %v15173_v42, %v15120_v1  ;;  %vm613_vm1 = vcmp.eq.s32.totalorder %v15178_v34, %v15120_v1  ;;  %vm621_vm8 = vcmp.eq.s32.totalorder %v15179_v63, %v15120_v1  ;;  %v3798_v57 = vadd.f32 %v7260_v31, %v3238_v60  ;;  %v15203_v42 = vld [vmem:[#allocation74_spill] sm:$0xff] }
 0x2a3   :  { %v6553_v7 = vsel %vm243_vm5, 1.0, %v14800_v17  ;;  %v6561_v54 = vsel %vm251_vm0, 1.0, %v14800_v17  ;;  %vm683_vm9 = vcmp.eq.s32.totalorder %v15176_v49, %v8606_v26  ;;  %v3806_v52 = vadd.f32 %v7268_v12, %v3246_v51 }
 0x2a4   :  { %v6681_v0 = vsel %vm675_vm12, 1.0, %v14800_v17  ;;  %v6689_v35 = vsel %vm683_vm9, 1.0, %v14800_v17  ;;  %vm1235_vm4 = vcmp.eq.s32.totalorder %v15180_v22, %v8606_v26  ;;  %v4358_v58 = vadd.f32 %v7388_v9, %v3798_v57 }
 0x2a5   :  { %v1059_v47 = vadd.f32 %v6681_v0, %v6553_v7  ;;  %v1067_v25 = vadd.f32 %v6689_v35, %v6561_v54  ;;  %vm1243_vm15 = vcmp.eq.s32.totalorder %v15181_v30, %v8606_v26  ;;  %v4366_v61 = vadd.f32 %v7396_v46, %v3806_v52 }
 0x2a6   :  { %v6809_v45 = vsel %vm1235_vm4, 1.0, %v14800_v17  ;;  %v6817_v31 = vsel %vm1243_vm15, 1.0, %v14800_v17  ;;  %vm1795_vm13 = vcmp.eq.s32.totalorder %v15182_v15, %v8606_v26  ;;  %vm1803_vm12 = vcmp.eq.s32.totalorder %v15183_v21, %v8606_v26 }
 0x2a7   :  { %v1619_v60 = vadd.f32 %v6809_v45, %v1059_v47  ;;  %v1627_v12 = vadd.f32 %v6817_v31, %v1067_v25  ;;  %v6937_v9 = vsel %vm1795_vm13, 1.0, %v14800_v17  ;;  %v4470_v51 = vpack.c.bf16 %v4366_v61, %v4358_v58 }
 0x2a8   :  { %v6945_v57 = vsel %vm1803_vm12, 1.0, %v14800_v17  ;;  %vm2355_vm11 = vcmp.eq.s32.totalorder %v15184_v10, %v8606_v26  ;;  %vm2363_vm6 = vcmp.eq.s32.totalorder %v15185_v13, %v8606_v26  ;;  %vm2915_vm14 = vcmp.eq.s32.totalorder %v15186_v28, %v8606_v26 }
 0x2a9   :  { %v2179_v46 = vadd.f32 %v6937_v9, %v1619_v60  ;;  %v2187_v7 = vadd.f32 %v6945_v57, %v1627_v12  ;;  %v7065_v54 = vsel %vm2355_vm11, 1.0, %v14800_v17  ;;  %v7073_v52 = vsel %vm2363_vm6, 1.0, %v14800_v17  ;;  %5284 = vmatprep.mubr.bf16.mxu0 %v4470_v51  ;;  %v15197_v9 = vld [vmem:[#allocation66_spill] sm:$0xff] }
 0x2aa   :  { %vm2923_vm2 = vcmp.eq.s32.totalorder %v15187_v40, %v8606_v26  ;;  %vm3475_vm3 = vcmp.eq.s32.totalorder %v15188_v6, %v8606_v26  ;;  %vm3483_vm5 = vcmp.eq.s32.totalorder %v15189_v29, %v8606_v26  ;;  %v7193_v58 = vsel %vm2915_vm14, 1.0, %v14800_v17  ;;  %v15222_v6 = vld [vmem:[#allocation171_spill] sm:$0xff] }
 0x2ab   :  { %v2739_v0 = vadd.f32 %v7065_v54, %v2179_v46  ;;  %v2747_v35 = vadd.f32 %v7073_v52, %v2187_v7  ;;  %v7201_v47 = vsel %vm2923_vm2, 1.0, %v14800_v17  ;;  %v7321_v25 = vsel %vm3475_vm3, 1.0, %v14800_v17 }
 0x2ac   :  { %v7329_v61 = vsel %vm3483_vm5, 1.0, %v14800_v17  ;;  %vm4035_vm0 = vcmp.eq.s32.totalorder %v15190_v27, %v8606_v26  ;;  %vm4043_vm9 = vcmp.eq.s32.totalorder %v15191_v11, %v8606_v26  ;;  %vm268_vm4 = vcmp.eq.s32.totalorder %v15197_v9, %v14869_v3  ;;  %v15215_v11 = vld [vmem:[#allocation68_spill] sm:$0xff] }
 0x2ad   :  { %v3299_v45 = vadd.f32 %v7193_v58, %v2739_v0  ;;  %v3307_v31 = vadd.f32 %v7201_v47, %v2747_v35  ;;  %v7449_v60 = vsel %vm4035_vm0, 1.0, %v14800_v17  ;;  %v7457_v12 = vsel %vm4043_vm9, 1.0, %v14800_v17 }
 0x2ae   :  { %v6491_v51 = vsel %vm181_vm10, 1.0, %v14800_v17  ;;  %v6499_v57 = vsel %vm189_vm7, 1.0, %v14800_v17  ;;  %v6619_v46 = vsel %vm613_vm1, 1.0, %v14800_v17  ;;  %v6627_v7 = vsel %vm621_vm8, 1.0, %v14800_v17 }
 0x2af   :  { %v3859_v54 = vadd.f32 %v7321_v25, %v3299_v45  ;;  %v3867_v52 = vadd.f32 %v7329_v61, %v3307_v31  ;;  %v997_v0 = vadd.f32 %v6619_v46, %v6491_v51  ;;  %v1005_v35 = vadd.f32 %v6627_v7, %v6499_v57 }
 0x2b0   :  { %vm1173_vm10 = vcmp.eq.s32.totalorder %v15192_v8, %v15120_v1  ;;  %vm1181_vm7 = vcmp.eq.s32.totalorder %v15193_v20, %v15120_v1  ;;  %vm1733_vm15 = vcmp.eq.s32.totalorder %v15194_v56, %v15120_v1  ;;  %vm1741_vm1 = vcmp.eq.s32.totalorder %v11286_v41, %v15120_v1 }
 0x2b1   :  { %v4419_v58 = vadd.f32 %v7449_v60, %v3859_v54  ;;  %v4427_v47 = vadd.f32 %v7457_v12, %v3867_v52  ;;  %v6747_v63 = vsel %vm1173_vm10, 1.0, %v14800_v17  ;;  %v6755_v25 = vsel %vm1181_vm7, 1.0, %v14800_v17 }
 0x2b2   :  { %v1557_v61 = vadd.f32 %v6747_v63, %v997_v0  ;;  %v1565_v45 = vadd.f32 %v6755_v25, %v1005_v35  ;;  %v6875_v31 = vsel %vm1733_vm15, 1.0, %v14800_v17  ;;  %v6883_v51 = vsel %vm1741_vm1, 1.0, %v14800_v17 }
 0x2b3   :  { %v4499_v57 = vpack.c.bf16 %v4427_v47, %v4419_v58  ;;  %vm2293_vm8 = vcmp.eq.s32.totalorder %v11356_v50, %v15120_v1  ;;  %vm2301_vm13 = vcmp.eq.s32.totalorder %v11379_v2, %v15120_v1  ;;  %vm2853_vm12 = vcmp.eq.s32.totalorder %v11490_v33, %v15120_v1  ;;  %v15198_v47 = vld [vmem:[#allocation114_spill] sm:$0xff]  ;;  %v15214_v33 = vld [vmem:[#allocation163_spill] sm:$0xff] }
 0x2b4   :  { %v2117_v60 = vadd.f32 %v6875_v31, %v1557_v61  ;;  %v2125_v12 = vadd.f32 %v6883_v51, %v1565_v45  ;;  %v7003_v46 = vsel %vm2293_vm8, 1.0, %v14800_v17  ;;  %v7011_v63 = vsel %vm2301_vm13, 1.0, %v14800_v17  ;;  %v15199_v51 = vld [vmem:[#allocation80_spill] sm:$0xff] }
 0x2b5   :  { %5220 = vmatmul.mubr.bf16.gmra.mrb[40].mxu1 %v4499_v57  ;;  %vm2861_vm11 = vcmp.eq.s32.totalorder %v11521_v59, %v15120_v1  ;;  %v7131_v7 = vsel %vm2853_vm12, 1.0, %v14800_v17  ;;  %vm3413_vm6 = vcmp.eq.s32.totalorder %v11607_v4, %v15120_v1  ;;  %vm3421_vm14 = vcmp.eq.s32.totalorder %v15195_v23, %v15120_v1 }
 0x2b6   :  { %v2677_v54 = vadd.f32 %v7003_v46, %v2117_v60  ;;  %v2685_v52 = vadd.f32 %v7011_v63, %v2125_v12  ;;  %v7139_v0 = vsel %vm2861_vm11, 1.0, %v14800_v17  ;;  %v7259_v35 = vsel %vm3413_vm6, 1.0, %v14800_v17  ;;  %v15200_v12 = vld [vmem:[#allocation116_spill] sm:$0xff]  ;;  %v15201_v46 = vld [vmem:[#allocation79_spill] sm:$0xff]  ;;  %v15202_v63 = vld [vmem:[#allocation105_spill] sm:$0xff] }
 0x2b7   :  { %v7267_v58 = vsel %vm3421_vm14, 1.0, %v14800_v17  ;;  %vm3973_vm2 = vcmp.eq.s32.totalorder %v15196_v44, %v15120_v1  ;;  %vm3981_vm3 = vcmp.eq.s32.totalorder %v11714_v32, %v15120_v1  ;;  %vm260_vm5 = vcmp.eq.s32.totalorder %v15198_v47, %v14869_v3  ;;  %v15204_v32 = vld [vmem:[#allocation115_spill] sm:$0xff] }
 0x2b8   :  { %v3237_v25 = vadd.f32 %v7131_v7, %v2677_v54  ;;  %v3245_v61 = vadd.f32 %v7139_v0, %v2685_v52  ;;  %v7387_v45 = vsel %vm3973_vm2, 1.0, %v14800_v17  ;;  %v7395_v31 = vsel %vm3981_vm3, 1.0, %v14800_v17 }
 0x2b9   :  { %vm198_vm0 = vcmp.eq.s32.totalorder %v15199_v51, %v15043_v37  ;;  %vm206_vm9 = vcmp.eq.s32.totalorder %v11417_v43, %v15043_v37  ;;  %vm630_vm10 = vcmp.eq.s32.totalorder %v11453_v62, %v15043_v37  ;;  %v6570_v57 = vsel %vm260_vm5, 1.0, %v14800_v17 }
 0x2ba   :  { %v6578_v60 = vsel %vm268_vm4, 1.0, %v14800_v17  ;;  %vm692_vm7 = vcmp.eq.s32.totalorder %v15200_v12, %v14869_v3  ;;  %vm700_vm15 = vcmp.eq.s32.totalorder %v15201_v46, %v14869_v3  ;;  %vm638_vm1 = vcmp.eq.s32.totalorder %v15202_v63, %v15043_v37 }
 0x2bb   :  { %v3797_v7 = vadd.f32 %v7259_v35, %v3237_v25  ;;  %v3805_v54 = vadd.f32 %v7267_v58, %v3245_v61  ;;  %v6698_v52 = vsel %vm692_vm7, 1.0, %v14800_v17  ;;  %v6706_v0 = vsel %vm700_vm15, 1.0, %v14800_v17  ;;  %v15205_v25 = vld [vmem:[#allocation39_spill] sm:$0xff]  ;;  %v15206_v61 = vld [vmem:[#allocation76_spill] sm:$0xff] }
 0x2bc   :  { %v1076_v34 = vadd.f32 %v6698_v52, %v6570_v57  ;;  %v1084_v53 = vadd.f32 %v6706_v0, %v6578_v60  ;;  %vm1252_vm4 = vcmp.eq.s32.totalorder %v15203_v42, %v14869_v3  ;;  %vm1260_vm8 = vcmp.eq.s32.totalorder %v15204_v32, %v14869_v3 }
 0x2bd   :  { %v4357_v44 = vadd.f32 %v7387_v45, %v3797_v7  ;;  %v4365_v23 = vadd.f32 %v7395_v31, %v3805_v54  ;;  %v6826_v4 = vsel %vm1252_vm4, 1.0, %v14800_v17  ;;  %v6834_v59 = vsel %vm1260_vm8, 1.0, %v14800_v17  ;;  %v15207_v45 = vld [vmem:[#allocation117_spill] sm:$0xff]  ;;  %v15208_v54 = vld [vmem:[#allocation123_spill] sm:$0xff] }
 0x2be   :  { %v1636_v35 = vadd.f32 %v6826_v4, %v1076_v34  ;;  %v1644_v58 = vadd.f32 %v6834_v59, %v1084_v53  ;;  %vm1812_vm13 = vcmp.eq.s32.totalorder %v15205_v25, %v14869_v3  ;;  %vm1820_vm12 = vcmp.eq.s32.totalorder %v15206_v61, %v14869_v3  ;;  %v15209_v53 = vld [vmem:[#allocation100_spill] sm:$0xff]  ;;  %v15210_v34 = vld [vmem:[#allocation101_spill] sm:$0xff] }
 0x2bf   :  { %v4469_v57 = vpack.c.bf16 %v4365_v23, %v4357_v44  ;;  %v6954_v60 = vsel %vm1812_vm13, 1.0, %v14800_v17  ;;  %v6962_v52 = vsel %vm1820_vm12, 1.0, %v14800_v17  ;;  %vm2372_vm11 = vcmp.eq.s32.totalorder %v15207_v45, %v14869_v3  ;;  %v15211_v23 = vld [vmem:[#allocation148_spill] sm:$0xff] }
 0x2c0   :  { %v2196_v31 = vadd.f32 %v6954_v60, %v1636_v35  ;;  %v2204_v7 = vadd.f32 %v6962_v52, %v1644_v58  ;;  %vm2380_vm6 = vcmp.eq.s32.totalorder %v15208_v54, %v14869_v3  ;;  %v7082_v59 = vsel %vm2372_vm11, 1.0, %v14800_v17  ;;  %v15212_v60 = vld [vmem:[#allocation24_spill] sm:$0xff]  ;;  %v15213_v52 = vld [vmem:[#allocation75_spill] sm:$0xff] }
 0x2c1   :  { %5285 = vmatmul.mubr.bf16.gmra.mrb[24].mxu0 %v4469_v57  ;;  %v7090_v4 = vsel %vm2380_vm6, 1.0, %v14800_v17  ;;  %vm2932_vm14 = vcmp.eq.s32.totalorder %v15209_v53, %v14869_v3  ;;  %vm2940_vm2 = vcmp.eq.s32.totalorder %v15210_v34, %v14869_v3  ;;  %vm3492_vm3 = vcmp.eq.s32.totalorder %v15211_v23, %v14869_v3 }
 0x2c2   :  { %v2756_v44 = vadd.f32 %v7082_v59, %v2196_v31  ;;  %v2764_v0 = vadd.f32 %v7090_v4, %v2204_v7  ;;  %v7210_v35 = vsel %vm2932_vm14, 1.0, %v14800_v17  ;;  %v7218_v58 = vsel %vm2940_vm2, 1.0, %v14800_v17 }
 0x2c3   :  { %vm3500_vm5 = vcmp.eq.s32.totalorder %v15212_v60, %v14869_v3  ;;  %v7338_v57 = vsel %vm3492_vm3, 1.0, %v14800_v17  ;;  %vm4052_vm7 = vcmp.eq.s32.totalorder %v15213_v52, %v14869_v3  ;;  %vm4060_vm15 = vcmp.eq.s32.totalorder %v15214_v33, %v14869_v3 }
 0x2c4   :  { %v3316_v2 = vadd.f32 %v7210_v35, %v2756_v44  ;;  %v3324_v50 = vadd.f32 %v7218_v58, %v2764_v0  ;;  %v7346_v31 = vsel %vm3500_vm5, 1.0, %v14800_v17  ;;  %v7466_v7 = vsel %vm4052_vm7, 1.0, %v14800_v17 }
 0x2c5   :  { %vm267_vm4 = vcmp.eq.s32.totalorder %v15197_v9, %v8606_v26  ;;  %v7474_v59 = vsel %vm4060_vm15, 1.0, %v14800_v17  ;;  %v6508_v4 = vsel %vm198_vm0, 1.0, %v14800_v17  ;;  %v6516_v3 = vsel %vm206_vm9, 1.0, %v14800_v17 }
 0x2c6   :  { %v6636_v44 = vsel %vm630_vm10, 1.0, %v14800_v17  ;;  %v3876_v0 = vadd.f32 %v7338_v57, %v3316_v2  ;;  %v3884_v35 = vadd.f32 %v7346_v31, %v3324_v50  ;;  %v6644_v58 = vsel %vm638_vm1, 1.0, %v14800_v17 }
 0x2c7   :  { %v1014_v41 = vadd.f32 %v6636_v44, %v6508_v4  ;;  %v1022_v56 = vadd.f32 %v6644_v58, %v6516_v3  ;;  %vm1190_vm0 = vcmp.eq.s32.totalorder %v15215_v11, %v15043_v37  ;;  %vm1198_vm9 = vcmp.eq.s32.totalorder %v11560_v19, %v15043_v37  ;;  %v15220_v58 = vld [vmem:[#allocation170_spill] sm:$0xff] }
 0x2c8   :  { %vm1750_vm8 = vcmp.eq.s32.totalorder %v11645_v36, %v15043_v37  ;;  %v4436_v27 = vadd.f32 %v7466_v7, %v3876_v0  ;;  %v4444_v29 = vadd.f32 %v7474_v59, %v3884_v35  ;;  %v6764_v50 = vsel %vm1190_vm0, 1.0, %v14800_v17  ;;  %v15216_v7 = vld [vmem:[#allocation118_spill] sm:$0xff] }
 0x2c9   :  { %v6772_v2 = vsel %vm1198_vm9, 1.0, %v14800_v17  ;;  %v1574_v57 = vadd.f32 %v6764_v50, %v1014_v41  ;;  %vm1758_vm10 = vcmp.eq.s32.totalorder %v11678_v24, %v15043_v37  ;;  %v6892_v4 = vsel %vm1750_vm8, 1.0, %v14800_v17 }
 0x2ca   :  { %v1582_v31 = vadd.f32 %v6772_v2, %v1022_v56  ;;  %v4508_v3 = vpack.c.bf16 %v4444_v29, %v4436_v27  ;;  %v6900_v44 = vsel %vm1758_vm10, 1.0, %v14800_v17  ;;  %vm2310_vm1 = vcmp.eq.s32.totalorder %v11754_v5, %v15043_v37  ;;  %v15217_v56 = vld [vmem:[#allocation82_spill] sm:$0xff]  ;;  %v15218_v29 = vld [vmem:[#allocation124_spill] sm:$0xff]  ;;  %v15219_v27 = vld [vmem:[#allocation169_spill] sm:$0xff] }
 0x2cb   :  { %vm2318_vm13 = vcmp.eq.s32.totalorder %v15216_v7, %v15043_v37  ;;  %v2134_v59 = vadd.f32 %v6892_v4, %v1574_v57  ;;  %v7020_v35 = vsel %vm2310_vm1, 1.0, %v14800_v17  ;;  %vm2870_vm12 = vcmp.eq.s32.totalorder %v15217_v56, %v15043_v37 }
 0x2cc   :  { %v2142_v0 = vadd.f32 %v6900_v44, %v1582_v31  ;;  %v7028_v41 = vsel %vm2318_vm13, 1.0, %v14800_v17  ;;  %5227 = vmatprep.mubr.bf16.mxu1 %v4508_v3  ;;  %vm2878_vm11 = vcmp.eq.s32.totalorder %v15218_v29, %v15043_v37  ;;  %vm3430_vm6 = vcmp.eq.s32.totalorder %v15219_v27, %v15043_v37  ;;  %v15221_v44 = vld [vmem:[#allocation134_spill] sm:$0xff] }
 0x2cd   :  { %vm3438_vm14 = vcmp.eq.s32.totalorder %v15220_v58, %v15043_v37  ;;  %v2694_v50 = vadd.f32 %v7020_v35, %v2134_v59  ;;  %v7148_v57 = vsel %vm2870_vm12, 1.0, %v14800_v17  ;;  %v7156_v31 = vsel %vm2878_vm11, 1.0, %v14800_v17 }
 0x2ce   :  { %v2702_v2 = vadd.f32 %v7028_v41, %v2142_v0  ;;  %v7276_v4 = vsel %vm3430_vm6, 1.0, %v14800_v17  ;;  %v7284_v3 = vsel %vm3438_vm14, 1.0, %v14800_v17  ;;  %vm3990_vm2 = vcmp.eq.s32.totalorder %v15221_v44, %v15043_v37 }
 0x2cf   :  { %vm3998_vm3 = vcmp.eq.s32.totalorder %v15222_v6, %v15043_v37  ;;  %v3254_v40 = vadd.f32 %v7148_v57, %v2694_v50  ;;  %v7404_v13 = vsel %vm3990_vm2, 1.0, %v14800_v17  ;;  %vm197_vm5 = vcmp.eq.s32.totalorder %v15199_v51, %v15120_v1  ;;  %v15231_v51 = vld [vmem:[#allocation16_spill] sm:$0xff] }
 0x2d0   :  { %v3262_v28 = vadd.f32 %v7156_v31, %v2702_v2  ;;  %v7412_v59 = vsel %vm3998_vm3, 1.0, %v14800_v17  ;;  %vm205_vm7 = vcmp.eq.s32.totalorder %v11417_v43, %v15120_v1  ;;  %vm259_vm15 = vcmp.eq.s32.totalorder %v15198_v47, %v8606_v26 }
 0x2d1   :  { %v6577_v0 = vsel %vm267_vm4, 1.0, %v14800_v17  ;;  %vm691_vm0 = vcmp.eq.s32.totalorder %v15200_v12, %v8606_v26  ;;  %vm699_vm9 = vcmp.eq.s32.totalorder %v15201_v46, %v8606_v26  ;;  %vm637_vm8 = vcmp.eq.s32.totalorder %v15202_v63, %v15120_v1  ;;  %v15230_v63 = vld [vmem:[#allocation111_spill] sm:$0xff] }
 0x2d2   :  { %vm629_vm10 = vcmp.eq.s32.totalorder %v11453_v62, %v15120_v1  ;;  %v3814_v35 = vadd.f32 %v7276_v4, %v3254_v40  ;;  %v3822_v41 = vadd.f32 %v7284_v3, %v3262_v28  ;;  %v6569_v50 = vsel %vm259_vm15, 1.0, %v14800_v17 }
 0x2d3   :  { %v6697_v2 = vsel %vm691_vm0, 1.0, %v14800_v17  ;;  %v6705_v57 = vsel %vm699_vm9, 1.0, %v14800_v17  ;;  %vm1251_vm4 = vcmp.eq.s32.totalorder %v15203_v42, %v8606_v26  ;;  %vm1259_vm1 = vcmp.eq.s32.totalorder %v15204_v32, %v8606_v26 }
 0x2d4   :  { %v1075_v31 = vadd.f32 %v6697_v2, %v6569_v50  ;;  %v4374_v46 = vadd.f32 %v7404_v13, %v3814_v35  ;;  %v4382_v12 = vadd.f32 %v7412_v59, %v3822_v41  ;;  %v1083_v47 = vadd.f32 %v6705_v57, %v6577_v0 }
 0x2d5   :  { %v6825_v9 = vsel %vm1251_vm4, 1.0, %v14800_v17  ;;  %v6833_v28 = vsel %vm1259_vm1, 1.0, %v14800_v17  ;;  %vm1811_vm13 = vcmp.eq.s32.totalorder %v15205_v25, %v8606_v26  ;;  %vm1819_vm12 = vcmp.eq.s32.totalorder %v15206_v61, %v8606_v26 }
 0x2d6   :  { %v1635_v40 = vadd.f32 %v6825_v9, %v1075_v31  ;;  %v4478_v4 = vpack.c.bf16 %v4382_v12, %v4374_v46  ;;  %v1643_v3 = vadd.f32 %v6833_v28, %v1083_v47  ;;  %v6953_v50 = vsel %vm1811_vm13, 1.0, %v14800_v17 }
 0x2d7   :  { %v6961_v2 = vsel %vm1819_vm12, 1.0, %v14800_v17  ;;  %vm2371_vm11 = vcmp.eq.s32.totalorder %v15207_v45, %v8606_v26  ;;  %vm2379_vm6 = vcmp.eq.s32.totalorder %v15208_v54, %v8606_v26  ;;  %vm2931_vm14 = vcmp.eq.s32.totalorder %v15209_v53, %v8606_v26  ;;  %v15249_v54 = vld [vmem:[#allocation18_spill] sm:$0xff] }
 0x2d8   :  { %v2195_v13 = vadd.f32 %v6953_v50, %v1635_v40  ;;  %5292 = vmatprep.mubr.bf16.mxu0 %v4478_v4  ;;  %v2203_v9 = vadd.f32 %v6961_v2, %v1643_v3  ;;  %v7081_v59 = vsel %vm2371_vm11, 1.0, %v14800_v17  ;;  %v7089_v47 = vsel %vm2379_vm6, 1.0, %v14800_v17  ;;  %v15223_v40 = vld [vmem:[#allocation50_spill] sm:$0xff]  ;;  %v15224_v4 = vld [vmem:[#allocation55_spill] sm:$0xff] }
 0x2d9   :  { %vm2939_vm2 = vcmp.eq.s32.totalorder %v15210_v34, %v8606_v26  ;;  %v7209_v46 = vsel %vm2931_vm14, 1.0, %v14800_v17  ;;  %vm3491_vm3 = vcmp.eq.s32.totalorder %v15211_v23, %v8606_v26  ;;  %vm3499_vm15 = vcmp.eq.s32.totalorder %v15212_v60, %v8606_v26 }
 0x2da   :  { %v2755_v12 = vadd.f32 %v7081_v59, %v2195_v13  ;;  %v7217_v0 = vsel %vm2939_vm2, 1.0, %v14800_v17  ;;  %v2763_v35 = vadd.f32 %v7089_v47, %v2203_v9  ;;  %v7337_v41 = vsel %vm3491_vm3, 1.0, %v14800_v17 }
 0x2db   :  { %vm4051_vm0 = vcmp.eq.s32.totalorder %v15213_v52, %v8606_v26  ;;  %v7345_v31 = vsel %vm3499_vm15, 1.0, %v14800_v17  ;;  %vm4059_vm9 = vcmp.eq.s32.totalorder %v15214_v33, %v8606_v26  ;;  %vm214_vm4 = vcmp.eq.s32.totalorder %v15223_v40, %v15043_v37 }
 0x2dc   :  { %v3315_v57 = vadd.f32 %v7209_v46, %v2755_v12  ;;  %v7465_v28 = vsel %vm4051_vm0, 1.0, %v14800_v17  ;;  %vm222_vm1 = vcmp.eq.s32.totalorder %v15224_v4, %v15043_v37  ;;  %v3323_v3 = vadd.f32 %v7217_v0, %v2763_v35 }
 0x2dd   :  { %v7473_v50 = vsel %vm4059_vm9, 1.0, %v14800_v17  ;;  %v6507_v2 = vsel %vm197_vm5, 1.0, %v14800_v17  ;;  %v6515_v26 = vsel %vm205_vm7, 1.0, %v14800_v17  ;;  %v6635_v9 = vsel %vm629_vm10, 1.0, %v14800_v17 }
 0x2de   :  { %v3875_v13 = vadd.f32 %v7337_v41, %v3315_v57  ;;  %v6643_v59 = vsel %vm637_vm8, 1.0, %v14800_v17  ;;  %vm1189_vm13 = vcmp.eq.s32.totalorder %v15215_v11, %v15120_v1  ;;  %v3883_v47 = vadd.f32 %v7345_v31, %v3323_v3 }
 0x2df   :  { %v1013_v12 = vadd.f32 %v6635_v9, %v6507_v2  ;;  %v1021_v46 = vadd.f32 %v6643_v59, %v6515_v26  ;;  %vm1197_vm5 = vcmp.eq.s32.totalorder %v11560_v19, %v15120_v1  ;;  %v6763_v35 = vsel %vm1189_vm13, 1.0, %v14800_v17 }
 0x2e0   :  { %v4435_v0 = vadd.f32 %v7465_v28, %v3875_v13  ;;  %v6771_v41 = vsel %vm1197_vm5, 1.0, %v14800_v17  ;;  %vm1749_vm7 = vcmp.eq.s32.totalorder %v11645_v36, %v15120_v1  ;;  %v4443_v57 = vadd.f32 %v7473_v50, %v3883_v47 }
 0x2e1   :  { %v1573_v62 = vadd.f32 %v6763_v35, %v1013_v12  ;;  %v1581_v43 = vadd.f32 %v6771_v41, %v1021_v46  ;;  %vm1757_vm8 = vcmp.eq.s32.totalorder %v11678_v24, %v15120_v1  ;;  %v6891_v31 = vsel %vm1749_vm7, 1.0, %v14800_v17  ;;  %v15243_v24 = vld [vmem:[#allocation147_spill] sm:$0xff] }
 0x2e2   :  { %v6899_v3 = vsel %vm1757_vm8, 1.0, %v14800_v17  ;;  %vm2309_vm10 = vcmp.eq.s32.totalorder %v11754_v5, %v15120_v1  ;;  %vm2317_vm12 = vcmp.eq.s32.totalorder %v15216_v7, %v15120_v1  ;;  %v4507_v28 = vpack.c.bf16 %v4443_v57, %v4435_v0  ;;  %v15242_v5 = vld [vmem:[#allocation106_spill] sm:$0xff] }
 0x2e3   :  { %v2133_v2 = vadd.f32 %v6891_v31, %v1573_v62  ;;  %v2141_v26 = vadd.f32 %v6899_v3, %v1581_v43  ;;  %v7019_v50 = vsel %vm2309_vm10, 1.0, %v14800_v17  ;;  %v7027_v13 = vsel %vm2317_vm12, 1.0, %v14800_v17  ;;  %v15225_v3 = vld [vmem:[#allocation12_spill] sm:$0xff] }
 0x2e4   :  { %vm2869_vm11 = vcmp.eq.s32.totalorder %v15217_v56, %v15120_v1  ;;  %vm2877_vm6 = vcmp.eq.s32.totalorder %v15218_v29, %v15120_v1  ;;  %vm3429_vm14 = vcmp.eq.s32.totalorder %v15219_v27, %v15120_v1  ;;  %5228 = vmatmul.mubr.bf16.gmra.mrb[44].mxu1 %v4507_v28  ;;  %vm3437_vm2 = vcmp.eq.s32.totalorder %v15220_v58, %v15120_v1  ;;  %v15226_v28 = vld [vmem:[#allocation49_spill] sm:$0xff]  ;;  %v15233_v27 = vld [vmem:[#allocation36_spill] sm:$0xff] }
 0x2e5   :  { %v2693_v9 = vadd.f32 %v7019_v50, %v2133_v2  ;;  %v2701_v59 = vadd.f32 %v7027_v13, %v2141_v26  ;;  %v7147_v47 = vsel %vm2869_vm11, 1.0, %v14800_v17  ;;  %v7155_v43 = vsel %vm2877_vm6, 1.0, %v14800_v17  ;;  %v15227_v2 = vld [vmem:[#allocation72_spill] sm:$0xff]  ;;  %v15228_v26 = vld [vmem:[#allocation141_spill] sm:$0xff] }
 0x2e6   :  { %v7275_v62 = vsel %vm3429_vm14, 1.0, %v14800_v17  ;;  %vm3989_vm3 = vcmp.eq.s32.totalorder %v15221_v44, %v15120_v1  ;;  %vm3997_vm15 = vcmp.eq.s32.totalorder %v15222_v6, %v15120_v1  ;;  %v7283_v0 = vsel %vm3437_vm2, 1.0, %v14800_v17 }
 0x2e7   :  { %v3253_v12 = vadd.f32 %v7147_v47, %v2693_v9  ;;  %v3261_v46 = vadd.f32 %v7155_v43, %v2701_v59  ;;  %v7403_v35 = vsel %vm3989_vm3, 1.0, %v14800_v17  ;;  %v7411_v41 = vsel %vm3997_vm15, 1.0, %v14800_v17  ;;  %v15229_v9 = vld [vmem:[#allocation14_spill] sm:$0xff] }
 0x2e8   :  { %v6524_v57 = vsel %vm214_vm4, 1.0, %v14800_v17  ;;  %v6532_v31 = vsel %vm222_vm1, 1.0, %v14800_v17  ;;  %vm646_vm0 = vcmp.eq.s32.totalorder %v15225_v3, %v15043_v37  ;;  %vm1144_vm9 = vcmp.eq.s32.totalorder %v15227_v2, %v15226_v28 }
 0x2e9   :  { %vm1152_vm13 = vcmp.eq.s32.totalorder %v15228_v26, %v15226_v28  ;;  %v3813_v50 = vadd.f32 %v7275_v62, %v3253_v12  ;;  %v3821_v13 = vadd.f32 %v7283_v0, %v3261_v46  ;;  %vm654_vm5 = vcmp.eq.s32.totalorder %v15229_v9, %v15043_v37  ;;  %v15232_v0 = vld [vmem:[#allocation19_spill] sm:$0xff] }
 0x2ea   :  { %v6652_v59 = vsel %vm646_vm0, 1.0, %v14800_v17  ;;  %v6660_v47 = vsel %vm654_vm5, 1.0, %v14800_v17  ;;  %vm1206_vm4 = vcmp.eq.s32.totalorder %v15230_v63, %v15043_v37  ;;  %vm1214_vm1 = vcmp.eq.s32.totalorder %v15231_v51, %v15043_v37 }
 0x2eb   :  { %v1030_v43 = vadd.f32 %v6652_v59, %v6524_v57  ;;  %v4373_v6 = vadd.f32 %v7403_v35, %v3813_v50  ;;  %v4381_v44 = vadd.f32 %v7411_v41, %v3821_v13  ;;  %v1038_v58 = vadd.f32 %v6660_v47, %v6532_v31  ;;  %v15234_v41 = vld [vmem:[#allocation21_spill] sm:$0xff]  ;;  %v15235_v31 = vld [vmem:[#allocation23_spill] sm:$0xff] }
 0x2ec   :  { %v6780_v62 = vsel %vm1206_vm4, 1.0, %v14800_v17  ;;  %v6788_v12 = vsel %vm1214_vm1, 1.0, %v14800_v17  ;;  %vm1766_vm7 = vcmp.eq.s32.totalorder %v15232_v0, %v15043_v37  ;;  %vm1774_vm8 = vcmp.eq.s32.totalorder %v15233_v27, %v15043_v37  ;;  %v15236_v50 = vld [vmem:[#allocation29_spill] sm:$0xff] }
 0x2ed   :  { %v1590_v46 = vadd.f32 %v6780_v62, %v1030_v43  ;;  %v4477_v57 = vpack.c.bf16 %v4381_v44, %v4373_v6  ;;  %v1598_v59 = vadd.f32 %v6788_v12, %v1038_v58  ;;  %v6908_v29 = vsel %vm1766_vm7, 1.0, %v14800_v17  ;;  %v15237_v58 = vld [vmem:[#allocation31_spill] sm:$0xff] }
 0x2ee   :  { %v6916_v56 = vsel %vm1774_vm8, 1.0, %v14800_v17  ;;  %vm2326_vm10 = vcmp.eq.s32.totalorder %v15234_v41, %v15043_v37  ;;  %vm2334_vm12 = vcmp.eq.s32.totalorder %v15235_v31, %v15043_v37  ;;  %vm2886_vm11 = vcmp.eq.s32.totalorder %v15236_v50, %v15043_v37  ;;  %v15238_v62 = vld [vmem:[#allocation35_spill] sm:$0xff] }
 0x2ef   :  { %v2150_v35 = vadd.f32 %v6908_v29, %v1590_v46  ;;  %5293 = vmatmul.mubr.bf16.gmra.mrb[28].mxu0 %v4477_v57  ;;  %v2158_v13 = vadd.f32 %v6916_v56, %v1598_v59  ;;  %v7036_v47 = vsel %vm2326_vm10, 1.0, %v14800_v17  ;;  %v7044_v6 = vsel %vm2334_vm12, 1.0, %v14800_v17  ;;  %v15239_v46 = vld [vmem:[#allocation20_spill] sm:$0xff]  ;;  %v15240_v57 = vld [vmem:[#allocation13_spill] sm:$0xff] }
 0x2f0   :  { %vm2894_vm6 = vcmp.eq.s32.totalorder %v15237_v58, %v15043_v37  ;;  %v7164_v29 = vsel %vm2886_vm11, 1.0, %v14800_v17  ;;  %vm3446_vm14 = vcmp.eq.s32.totalorder %v15238_v62, %v15043_v37  ;;  %vm3454_vm2 = vcmp.eq.s32.totalorder %v15239_v46, %v15043_v37 }
 0x2f1   :  { %v2710_v44 = vadd.f32 %v7036_v47, %v2150_v35  ;;  %v7172_v43 = vsel %vm2894_vm6, 1.0, %v14800_v17  ;;  %v2718_v12 = vadd.f32 %v7044_v6, %v2158_v13  ;;  %v7292_v56 = vsel %vm3446_vm14, 1.0, %v14800_v17  ;;  %v15241_v35 = vld [vmem:[#allocation42_spill] sm:$0xff] }
 0x2f2   :  { %vm4006_vm3 = vcmp.eq.s32.totalorder %v15240_v57, %v15043_v37  ;;  %v7300_v7 = vsel %vm3454_vm2, 1.0, %v14800_v17  ;;  %vm4014_vm15 = vcmp.eq.s32.totalorder %v15241_v35, %v15043_v37  ;;  %vm213_vm0 = vcmp.eq.s32.totalorder %v15223_v40, %v15120_v1 }
 0x2f3   :  { %v3270_v59 = vadd.f32 %v7164_v29, %v2710_v44  ;;  %v7420_v47 = vsel %vm4006_vm3, 1.0, %v14800_v17  ;;  %vm221_vm5 = vcmp.eq.s32.totalorder %v15224_v4, %v15120_v1  ;;  %v3278_v13 = vadd.f32 %v7172_v43, %v2718_v12  ;;  %v15244_v44 = vld [vmem:[#allocation145_spill] sm:$0xff] }
 0x2f4   :  { %v7428_v6 = vsel %vm4014_vm15, 1.0, %v14800_v17  ;;  %v968_v36 = vadd.f32 %v15243_v24, %v15242_v5  ;;  %v15245_v29 = vld [vmem:[#allocation57_spill] sm:$0xff]  ;;  %v6718_v60 = vsel %vm1144_vm9, 1.0, %v14800_v17  ;;  %v6726_v23 = vsel %vm1152_vm13, 1.0, %v14800_v17  ;;  %v15247_v24 = vld [vmem:[#allocation155_spill] sm:$0xff] }
 0x2f5   :  { %v976_v33 = vadd.f32 %v15245_v29, %v15244_v44  ;;  %v3830_v52 = vadd.f32 %v7292_v56, %v3270_v59  ;;  %v15246_v43 = vld [vmem:[#allocation153_spill] sm:$0xff]  ;;  %v3838_v12 = vadd.f32 %v7300_v7, %v3278_v13  ;;  %vm1712_vm1 = vcmp.eq.s32.totalorder %v15247_v24, %v15226_v28 }
 0x2f6   :  { %vm1704_vm4 = vcmp.eq.s32.totalorder %v15246_v43, %v15226_v28  ;;  %v1528_v34 = vadd.f32 %v6718_v60, %v968_v36  ;;  %v6854_v2 = vsel %vm1712_vm1, 1.0, %v14800_v17  ;;  %v15248_v44 = vld [vmem:[#allocation165_spill] sm:$0xff]  ;;  %vm2272_vm13 = vcmp.eq.s32.totalorder %v15249_v54, %v15226_v28  ;;  %v15251_v60 = vld [vmem:[#allocation32_spill] sm:$0xff]  ;;  %v15253_v54 = vld [vmem:[#allocation119_spill] sm:$0xff] }
 0x2f7   :  { %v1536_v5 = vadd.f32 %v6726_v23, %v976_v33  ;;  %v4390_v56 = vadd.f32 %v7420_v47, %v3830_v52  ;;  %v6846_v59 = vsel %vm1704_vm4, 1.0, %v14800_v17  ;;  %vm2264_vm9 = vcmp.eq.s32.totalorder %v15248_v44, %v15226_v28  ;;  %v15250_v23 = vld [vmem:[#allocation130_spill] sm:$0xff]  ;;  %v15254_v43 = vld [vmem:[#allocation127_spill] sm:$0xff]  ;;  %v15288_v4 = vld [vmem:[#allocation137_spill] sm:$0xff] }
 0x2f8   :  { %v4398_v29 = vadd.f32 %v7428_v6, %v3838_v12  ;;  %v2088_v26 = vadd.f32 %v6846_v59, %v1528_v34  ;;  %v6974_v36 = vsel %vm2264_vm9, 1.0, %v14800_v17  ;;  %v6982_v33 = vsel %vm2272_vm13, 1.0, %v14800_v17  ;;  %v15252_v6 = vld [vmem:[#allocation26_spill] sm:$0xff]  ;;  %v7994_v12 = vld [vmem:[#allocation2 + $0x1f0] ss:$0 sps:$4 sm:$0xff]  }
 0x2f9   :  { %v2096_v53 = vadd.f32 %v6854_v2, %v1536_v5  ;;  %vm2824_vm7 = vcmp.eq.s32.totalorder %v15250_v23, %v15226_v28  ;;  %vm2832_vm8 = vcmp.eq.s32.totalorder %v15251_v60, %v15226_v28  ;;  %vm3384_vm10 = vcmp.eq.s32.totalorder %v15252_v6, %v15226_v28  ;;  %v15255_v59 = vld [vmem:[#allocation131_spill] sm:$0xff] }
 0x2fa   :  { %v4486_v52 = vpack.c.bf16 %v4398_v29, %v4390_v56  ;;  %v2648_v7 = vadd.f32 %v6974_v36, %v2088_v26  ;;  %v7102_v13 = vsel %vm2824_vm7, 1.0, %v14800_v17  ;;  %v7110_v34 = vsel %vm2832_vm8, 1.0, %v14800_v17 }
 0x2fb   :  { %v2656_v47 = vadd.f32 %v6982_v33, %v2096_v53  ;;  %vm3392_vm12 = vcmp.eq.s32.totalorder %v15253_v54, %v15226_v28  ;;  %vm3944_vm11 = vcmp.eq.s32.totalorder %v15254_v43, %v15226_v28  ;;  %v7230_v56 = vsel %vm3384_vm10, 1.0, %v14800_v17  ;;  %v15257_v33 = vld [vmem:[#allocation46_spill] sm:$0xff] }
 0x2fc   :  { %5300 = vmatprep.mubr.bf16.mxu0 %v4486_v52  ;;  %v3208_v5 = vadd.f32 %v7102_v13, %v2648_v7  ;;  %v7238_v53 = vsel %vm3392_vm12, 1.0, %v14800_v17  ;;  %vm3952_vm6 = vcmp.eq.s32.totalorder %v15255_v59, %v15226_v28  ;;  %v7358_v2 = vsel %vm3944_vm11, 1.0, %v14800_v17 }
 0x2fd   :  { %v3216_v24 = vadd.f32 %v7110_v34, %v2656_v47  ;;  %vm5013_vm14 = vcmask 850944   ;;  %v12721_v44 = vadd.f32 %v12122_v16, %v12111_v14  ;;  %v7366_v36 = vsel %vm3952_vm6, 1.0, %v14800_v17 }
 0x2fe   :  { %v3768_v29 = vadd.f32 %v7230_v56, %v3208_v5  ;;  %vm5038_vm2 = vcmask 1043456   ;;  %vm2823_vm3 = vcmp.eq.s32.totalorder %v15250_v23, %v15257_v33  ;;  %v12728_v7 = vadd.f32 %v12140_v48, %v12134_v18 }
 0x2ff   :  { %15256 = vst [vmem:[#allocation174_spill] sm:$0xff] %v12721_v44  ;;  %v3776_v26 = vadd.f32 %v7238_v53, %v3216_v24  ;;  %v5040_v52 = vsel %vm5038_vm2, %v7994_v12, 0  ;;  %v6523_v47 = vsel %vm213_vm0, 1.0, %v14800_v17  ;;  %v6531_v14 = vsel %vm221_vm5, 1.0, %v14800_v17  ;;  %v15259_v53 = vld [vmem:[#allocation64_spill] sm:$0xff] }
 0x300   :  { %15258 = vst [vmem:[#allocation178_spill] sm:$0xff] %v12728_v7  ;;  %vm2831_vm15 = vcmp.eq.s32.totalorder %v15251_v60, %v15257_v33  ;;  %v4328_v16 = vadd.f32 %v7358_v2, %v3768_v29  ;;  %5362 = vmatpush1.bf16.msra.mxu1 %v5040_v52  ;;  %vm645_vm4 = vcmp.eq.s32.totalorder %v15225_v3, %v15120_v1  ;;  %v15264_v7 = vld [vmem:[#allocation63_spill] sm:$0xff]  ;;  %v15287_v3 = vld [vmem:[#allocation121_spill] sm:$0xff] }
 0x301   :  { %v4336_v13 = vadd.f32 %v7366_v36, %v3776_v26  ;;  %vm653_vm1 = vcmp.eq.s32.totalorder %v15229_v9, %v15120_v1  ;;  %v6651_v18 = vsel %vm645_vm4, 1.0, %v14800_v17  ;;  %vm1205_vm0 = vcmp.eq.s32.totalorder %v15230_v63, %v15120_v1 }
 0x302   :  { %v6659_v48 = vsel %vm653_vm1, 1.0, %v14800_v17  ;;  %vm1213_vm5 = vcmp.eq.s32.totalorder %v15231_v51, %v15120_v1  ;;  %v1029_v12 = vadd.f32 %v6651_v18, %v6523_v47  ;;  %v6779_v24 = vsel %vm1205_vm0, 1.0, %v14800_v17  ;;  %v15260_v47 = vld [vmem:[#allocation87_spill] sm:$0xff] }
 0x303   :  { %v4456_v34 = vpack.c.bf16 %v4336_v13, %v4328_v16  ;;  %v1037_v5 = vadd.f32 %v6659_v48, %v6531_v14  ;;  %v6787_v56 = vsel %vm1213_vm5, 1.0, %v14800_v17  ;;  %vm1765_vm9 = vcmp.eq.s32.totalorder %v15232_v0, %v15120_v1 }
 0x304   :  { %vm1773_vm13 = vcmp.eq.s32.totalorder %v15233_v27, %v15120_v1  ;;  %vm2325_vm7 = vcmp.eq.s32.totalorder %v15234_v41, %v15120_v1  ;;  %vm230_vm8 = vcmp.eq.s32.totalorder %v15259_v53, %v15043_v37  ;;  %v1589_v2 = vadd.f32 %v6779_v24, %v1029_v12  ;;  %v15283_v41 = vld [vmem:[#allocation69_spill] sm:$0xff]  ;;  %v15284_v27 = vld [vmem:[#allocation128_spill] sm:$0xff] }
 0x305   :  { %7542 = vmatprep.mubr.msk.bf16.mxu1 %vm5013_vm14, %v4456_v34  ;;  %v1597_v29 = vadd.f32 %v6787_v56, %v1037_v5  ;;  %v6907_v26 = vsel %vm1765_vm9, 1.0, %v14800_v17  ;;  %v6915_v36 = vsel %vm1773_vm13, 1.0, %v14800_v17  ;;  %vm2333_vm10 = vcmp.eq.s32.totalorder %v15235_v31, %v15120_v1 }
 0x306   :  { %v7035_v52 = vsel %vm2325_vm7, 1.0, %v14800_v17  ;;  %vm2885_vm12 = vcmp.eq.s32.totalorder %v15236_v50, %v15120_v1  ;;  %vm2893_vm11 = vcmp.eq.s32.totalorder %v15237_v58, %v15120_v1  ;;  %vm670_vm6 = vcmp.eq.s32.totalorder %v15260_v47, %v15043_v37  ;;  %v15281_v58 = vld [vmem:[#allocation125_spill] sm:$0xff]  ;;  %v15282_v50 = vld [vmem:[#allocation58_spill] sm:$0xff] }
 0x307   :  { %v2149_v14 = vadd.f32 %v6907_v26, %v1589_v2  ;;  %v2157_v16 = vadd.f32 %v6915_v36, %v1597_v29  ;;  %v7043_v13 = vsel %vm2333_vm10, 1.0, %v14800_v17  ;;  %v7163_v18 = vsel %vm2885_vm12, 1.0, %v14800_v17  ;;  %v15261_v2 = vld [vmem:[#allocation167_spill] sm:$0xff]  ;;  %v15262_v29 = vld [vmem:[#allocation136_spill] sm:$0xff]  ;;  %v15263_v36 = vld [vmem:[#allocation54_spill] sm:$0xff] }
 0x308   :  { %v7171_v48 = vsel %vm2893_vm11, 1.0, %v14800_v17  ;;  %vm3445_vm2 = vcmp.eq.s32.totalorder %v15238_v62, %v15120_v1  ;;  %vm3453_vm4 = vcmp.eq.s32.totalorder %v15239_v46, %v15120_v1  ;;  %vm4005_vm1 = vcmp.eq.s32.totalorder %v15240_v57, %v15120_v1 }
 0x309   :  { %v2709_v34 = vadd.f32 %v7035_v52, %v2149_v14  ;;  %v2717_v12 = vadd.f32 %v7043_v13, %v2157_v16  ;;  %v7291_v5 = vsel %vm3445_vm2, 1.0, %v14800_v17  ;;  %v7299_v24 = vsel %vm3453_vm4, 1.0, %v14800_v17 }
 0x30a   :  { %vm4013_vm0 = vcmp.eq.s32.totalorder %v15241_v35, %v15120_v1  ;;  %v7419_v56 = vsel %vm4005_vm1, 1.0, %v14800_v17  ;;  %v2647_v26 = vadd.f32 %v15262_v29, %v15261_v2  ;;  %v2655_v44 = vadd.f32 %v15264_v7, %v15263_v36 }
 0x30b   :  { %v3269_v46 = vadd.f32 %v7163_v18, %v2709_v34  ;;  %v3277_v62 = vadd.f32 %v7171_v48, %v2717_v12  ;;  %v7427_v52 = vsel %vm4013_vm0, 1.0, %v14800_v17  ;;  %v7101_v14 = vsel %vm2823_vm3, 1.0, %v14800_v17 }
 0x30c   :  { %v7109_v16 = vsel %vm2831_vm15, 1.0, %v14800_v17  ;;  %v3207_v13 = vadd.f32 %v7101_v14, %v2647_v26  ;;  %vm3383_vm5 = vcmp.eq.s32.totalorder %v15252_v6, %v15257_v33  ;;  %vm3391_vm9 = vcmp.eq.s32.totalorder %v15253_v54, %v15257_v33  ;;  %v15268_v26 = vld [vmem:[#allocation27_spill] sm:$0xff]  ;;  %v15269_v14 = vld [vmem:[#allocation113_spill] sm:$0xff] }
 0x30d   :  { %v3829_v7 = vadd.f32 %v7291_v5, %v3269_v46  ;;  %v3837_v18 = vadd.f32 %v7299_v24, %v3277_v62  ;;  %v3215_v48 = vadd.f32 %v7109_v16, %v2655_v44  ;;  %v7229_v34 = vsel %vm3383_vm5, 1.0, %v14800_v17  ;;  %v15265_v46 = vld [vmem:[#allocation60_spill] sm:$0xff]  ;;  %v15266_v44 = vld [vmem:[#allocation25_spill] sm:$0xff] }
 0x30e   :  { %v7237_v23 = vsel %vm3391_vm9, 1.0, %v14800_v17  ;;  %v3767_v12 = vadd.f32 %v7229_v34, %v3207_v13  ;;  %vm3943_vm3 = vcmp.eq.s32.totalorder %v15254_v43, %v15257_v33  ;;  %vm3951_vm15 = vcmp.eq.s32.totalorder %v15255_v59, %v15257_v33  ;;  %v15267_v59 = vld [vmem:[#allocation126_spill] sm:$0xff]  ;;  %v15270_v16 = vld [vmem:[#allocation33_spill] sm:$0xff] }
 0x30f   :  { %v4389_v60 = vadd.f32 %v7419_v56, %v3829_v7  ;;  %v4397_v2 = vadd.f32 %v7427_v52, %v3837_v18  ;;  %v3775_v6 = vadd.f32 %v7237_v23, %v3215_v48  ;;  %v7357_v29 = vsel %vm3943_vm3, 1.0, %v14800_v17  ;;  %v15271_v23 = vld [vmem:[#allocation38_spill] sm:$0xff] }
 0x310   :  { %vm1160_vm13 = vcmp.eq.s32.totalorder %v15265_v46, %v15226_v28  ;;  %v7365_v62 = vsel %vm3951_vm15, 1.0, %v14800_v17  ;;  %v4327_v54 = vadd.f32 %v7357_v29, %v3767_v12  ;;  %vm238_vm7 = vcmp.eq.s32.totalorder %v15266_v44, %v15043_v37  ;;  %v15272_v12 = vld [vmem:[#allocation40_spill] sm:$0xff] }
 0x311   :  { %v6540_v43 = vsel %vm230_vm8, 1.0, %v14800_v17  ;;  %vm1168_vm10 = vcmp.eq.s32.totalorder %v15267_v59, %v15226_v28  ;;  %v4485_v5 = vpack.c.bf16 %v4397_v2, %v4389_v60  ;;  %v4335_v24 = vadd.f32 %v7365_v62, %v3775_v6  ;;  %v15273_v60 = vld [vmem:[#allocation47_spill] sm:$0xff] }
 0x312   :  { %v6548_v56 = vsel %vm238_vm7, 1.0, %v14800_v17  ;;  %vm662_vm12 = vcmp.eq.s32.totalorder %v15268_v26, %v15043_v37  ;;  %v6676_v52 = vsel %vm670_vm6, 1.0, %v14800_v17  ;;  %vm1222_vm8 = vcmp.eq.s32.totalorder %v15269_v14, %v15043_v37 }
 0x313   :  { %v6668_v36 = vsel %vm662_vm12, 1.0, %v14800_v17  ;;  %vm1230_vm11 = vcmp.eq.s32.totalorder %v15270_v16, %v15043_v37  ;;  %5301 = vmatmul.mubr.bf16.gmra.mrb[32].mxu0 %v4485_v5  ;;  %v4455_v13 = vpack.c.bf16 %v4335_v24, %v4327_v54  ;;  %v1054_v18 = vadd.f32 %v6676_v52, %v6548_v56  ;;  %v15274_v54 = vld [vmem:[#allocation15_spill] sm:$0xff]  ;;  %v15275_v5 = vld [vmem:[#allocation73_spill] sm:$0xff]  ;;  %v15276_v24 = vld [vmem:[#allocation28_spill] sm:$0xff] }
 0x314   :  { %v1046_v7 = vadd.f32 %v6668_v36, %v6540_v43  ;;  %v6796_v48 = vsel %vm1222_vm8, 1.0, %v14800_v17  ;;  %v6804_v34 = vsel %vm1230_vm11, 1.0, %v14800_v17  ;;  %vm1782_vm2 = vcmp.eq.s32.totalorder %v15271_v23, %v15043_v37 }
 0x315   :  { %vm1790_vm6 = vcmp.eq.s32.totalorder %v15272_v12, %v15043_v37  ;;  %vm2342_vm4 = vcmp.eq.s32.totalorder %v15273_v60, %v15043_v37  ;;  %5366 = vmatmul.mubr.bf16.vlgmr.msra.gmra.mrb[48].mxu1 %v4455_v13  ;;  %v1614_v6 = vadd.f32 %v6804_v34, %v1054_v18  ;;  %v6924_v29 = vsel %vm1782_vm2, 1.0, %v14800_v17  ;;  %v15277_v18 = vld [vmem:[#allocation22_spill] sm:$0xff] }
 0x316   :  { %v1606_v2 = vadd.f32 %v6796_v48, %v1046_v7  ;;  %v6932_v62 = vsel %vm1790_vm6, 1.0, %v14800_v17  ;;  %vm2350_vm1 = vcmp.eq.s32.totalorder %v15274_v54, %v15043_v37  ;;  %v7052_v43 = vsel %vm2342_vm4, 1.0, %v14800_v17  ;;  %v15278_v48 = vld [vmem:[#allocation89_spill] sm:$0xff]  ;;  %v15279_v34 = vld [vmem:[#allocation98_spill] sm:$0xff] }
 0x317   :  { %vm2902_vm0 = vcmp.eq.s32.totalorder %v15275_v5, %v15043_v37  ;;  %vm2910_vm5 = vcmp.eq.s32.totalorder %v15276_v24, %v15043_v37  ;;  %v2174_v36 = vadd.f32 %v6932_v62, %v1614_v6  ;;  %v7060_v52 = vsel %vm2350_vm1, 1.0, %v14800_v17 }
 0x318   :  { %v2166_v56 = vadd.f32 %v6924_v29, %v1606_v2  ;;  %v7180_v13 = vsel %vm2902_vm0, 1.0, %v14800_v17  ;;  %v7188_v7 = vsel %vm2910_vm5, 1.0, %v14800_v17  ;;  %vm3462_vm9 = vcmp.eq.s32.totalorder %v15277_v18, %v15043_v37  ;;  %v15280_v29 = vld [vmem:[#allocation104_spill] sm:$0xff] }
 0x319   :  { %vm3470_vm3 = vcmp.eq.s32.totalorder %v15278_v48, %v15043_v37  ;;  %vm4022_vm15 = vcmp.eq.s32.totalorder %v15279_v34, %v15043_v37  ;;  %v2734_v57 = vadd.f32 %v7060_v52, %v2174_v36  ;;  %v7308_v2 = vsel %vm3462_vm9, 1.0, %v14800_v17 }
 0x31a   :  { %v2726_v35 = vadd.f32 %v7052_v43, %v2166_v56  ;;  %v7316_v6 = vsel %vm3470_vm3, 1.0, %v14800_v17  ;;  %vm229_vm7 = vcmp.eq.s32.totalorder %v15259_v53, %v15120_v1  ;;  %vm4030_vm12 = vcmp.eq.s32.totalorder %v15280_v29, %v15043_v37 }
 0x31b   :  { %v7436_v62 = vsel %vm4022_vm15, 1.0, %v14800_v17  ;;  %v984_v31 = vadd.f32 %v15282_v50, %v15281_v58  ;;  %v992_v0 = vadd.f32 %v15284_v27, %v15283_v41  ;;  %vm669_vm8 = vcmp.eq.s32.totalorder %v15260_v47, %v15120_v1  ;;  %v15285_v27 = vld [vmem:[#allocation129_spill] sm:$0xff] }
 0x31c   :  { %v3286_v43 = vadd.f32 %v7180_v13, %v2726_v35  ;;  %v3294_v56 = vadd.f32 %v7188_v7, %v2734_v57  ;;  %v7444_v36 = vsel %vm4030_vm12, 1.0, %v14800_v17  ;;  %v6734_v52 = vsel %vm1160_vm13, 1.0, %v14800_v17  ;;  %v15286_v41 = vld [vmem:[#allocation41_spill] sm:$0xff] }
 0x31d   :  { %v6742_v50 = vsel %vm1168_vm10, 1.0, %v14800_v17  ;;  %v1544_v58 = vadd.f32 %v6734_v52, %v984_v31  ;;  %vm1720_vm11 = vcmp.eq.s32.totalorder %v15285_v27, %v15226_v28  ;;  %vm1728_vm2 = vcmp.eq.s32.totalorder %v15286_v41, %v15226_v28 }
 0x31e   :  { %v3846_v57 = vadd.f32 %v7308_v2, %v3286_v43  ;;  %v3854_v35 = vadd.f32 %v7316_v6, %v3294_v56  ;;  %v1552_v13 = vadd.f32 %v6742_v50, %v992_v0  ;;  %v6862_v7 = vsel %vm1720_vm11, 1.0, %v14800_v17  ;;  %v15289_v0 = vld [vmem:[#allocation34_spill] sm:$0xff] }
 0x31f   :  { %v6870_v51 = vsel %vm1728_vm2, 1.0, %v14800_v17  ;;  %v2104_v9 = vadd.f32 %v6862_v7, %v1544_v58  ;;  %vm2280_vm13 = vcmp.eq.s32.totalorder %v15287_v3, %v15226_v28  ;;  %vm2288_vm10 = vcmp.eq.s32.totalorder %v15288_v4, %v15226_v28  ;;  %v15290_v43 = vld [vmem:[#allocation142_spill] sm:$0xff] }
 0x320   :  { %v4406_v31 = vadd.f32 %v7436_v62, %v3846_v57  ;;  %v4414_v52 = vadd.f32 %v7444_v36, %v3854_v35  ;;  %v2112_v40 = vadd.f32 %v6870_v51, %v1552_v13  ;;  %v6990_v63 = vsel %vm2280_vm13, 1.0, %v14800_v17  ;;  %v15291_v51 = vld [vmem:[#allocation150_spill] sm:$0xff]  ;;  %v15292_v36 = vld [vmem:[#allocation48_spill] sm:$0xff] }
 0x321   :  { %v6998_v2 = vsel %vm2288_vm10, 1.0, %v14800_v17  ;;  %v2664_v6 = vadd.f32 %v6990_v63, %v2104_v9  ;;  %vm2840_vm6 = vcmp.eq.s32.totalorder %v15289_v0, %v15226_v28  ;;  %vm2848_vm4 = vcmp.eq.s32.totalorder %v15290_v43, %v15226_v28  ;;  %v15293_v63 = vld [vmem:[#allocation96_spill] sm:$0xff]  ;;  %v15294_v9 = vld [vmem:[#allocation51_spill] sm:$0xff]  ;;  %v15295_v13 = vld [vmem:[#allocation102_spill] sm:$0xff] }
 0x322   :  { %v4494_v56 = vpack.c.bf16 %v4414_v52, %v4406_v31  ;;  %v2672_v50 = vadd.f32 %v6998_v2, %v2112_v40  ;;  %v7118_v58 = vsel %vm2840_vm6, 1.0, %v14800_v17  ;;  %v7126_v7 = vsel %vm2848_vm4, 1.0, %v14800_v17 }
 0x323   :  { %v3224_v62 = vadd.f32 %v7118_v58, %v2664_v6  ;;  %vm3400_vm1 = vcmp.eq.s32.totalorder %v15291_v51, %v15226_v28  ;;  %vm3408_vm0 = vcmp.eq.s32.totalorder %v15292_v36, %v15226_v28  ;;  %vm3960_vm5 = vcmp.eq.s32.totalorder %v15293_v63, %v15226_v28  ;;  %v15296_v6 = vld [vmem:[#allocation99_spill] sm:$0xff] }
 0x324   :  { %vm167_vm9 = vcmp.eq.s32.totalorder %v15294_v9, %v15257_v33  ;;  %5308 = vmatprep.mubr.bf16.mxu0 %v4494_v56  ;;  %v3232_v57 = vadd.f32 %v7126_v7, %v2672_v50  ;;  %v7246_v40 = vsel %vm3400_vm1, 1.0, %v14800_v17  ;;  %v7254_v35 = vsel %vm3408_vm0, 1.0, %v14800_v17  ;;  %v15297_v56 = vld [vmem:[#allocation86_spill] sm:$0xff]  ;;  %v15298_v50 = vld [vmem:[#allocation120_spill] sm:$0xff] }
 0x325   :  { %vm3968_vm3 = vcmp.eq.s32.totalorder %v15295_v13, %v15226_v28  ;;  %v3784_v31 = vadd.f32 %v7246_v40, %v3224_v62  ;;  %v7374_v52 = vsel %vm3960_vm5, 1.0, %v14800_v17  ;;  %vm237_vm15 = vcmp.eq.s32.totalorder %v15266_v44, %v15120_v1 }
 0x326   :  { %v7382_v2 = vsel %vm3968_vm3, 1.0, %v14800_v17  ;;  %vm599_vm12 = vcmp.eq.s32.totalorder %v15296_v6, %v15257_v33  ;;  %vm175_vm11 = vcmp.eq.s32.totalorder %v15297_v56, %v15257_v33  ;;  %vm607_vm2 = vcmp.eq.s32.totalorder %v15298_v50, %v15257_v33 }
 0x327   :  { %v3792_v58 = vadd.f32 %v7254_v35, %v3232_v57  ;;  %v6539_v7 = vsel %vm229_vm7, 1.0, %v14800_v17  ;;  %v6547_v62 = vsel %vm237_vm15, 1.0, %v14800_v17  ;;  %vm661_vm13 = vcmp.eq.s32.totalorder %v15268_v26, %v15120_v1 }
 0x328   :  { %v4344_v40 = vadd.f32 %v7374_v52, %v3784_v31  ;;  %v6667_v44 = vsel %vm661_vm13, 1.0, %v14800_v17  ;;  %v6675_v45 = vsel %vm669_vm8, 1.0, %v14800_v17  ;;  %vm1221_vm10 = vcmp.eq.s32.totalorder %v15269_v14, %v15120_v1 }
 0x329   :  { %v4352_v57 = vadd.f32 %v7382_v2, %v3792_v58  ;;  %v1045_v35 = vadd.f32 %v6667_v44, %v6539_v7  ;;  %v1053_v53 = vadd.f32 %v6675_v45, %v6547_v62  ;;  %vm1229_vm7 = vcmp.eq.s32.totalorder %v15270_v16, %v15120_v1 }
 0x32a   :  { %v6795_v61 = vsel %vm1221_vm10, 1.0, %v14800_v17  ;;  %v6803_v31 = vsel %vm1229_vm7, 1.0, %v14800_v17  ;;  %vm1781_vm6 = vcmp.eq.s32.totalorder %v15271_v23, %v15120_v1  ;;  %vm1789_vm4 = vcmp.eq.s32.totalorder %v15272_v12, %v15120_v1 }
 0x32b   :  { %v4464_v52 = vpack.c.bf16 %v4352_v57, %v4344_v40  ;;  %v1605_v26 = vadd.f32 %v6795_v61, %v1045_v35  ;;  %v1613_v47 = vadd.f32 %v6803_v31, %v1053_v53  ;;  %v6923_v2 = vsel %vm1781_vm6, 1.0, %v14800_v17 }
 0x32c   :  { %v6931_v45 = vsel %vm1789_vm4, 1.0, %v14800_v17  ;;  %vm2341_vm8 = vcmp.eq.s32.totalorder %v15273_v60, %v15120_v1  ;;  %vm2349_vm1 = vcmp.eq.s32.totalorder %v15274_v54, %v15120_v1  ;;  %vm2901_vm0 = vcmp.eq.s32.totalorder %v15275_v5, %v15120_v1 }
 0x32d   :  { %7543 = vmatprep.mubr.msk.bf16.mxu1 %vm5013_vm14, %v4464_v52  ;;  %v2165_v44 = vadd.f32 %v6923_v2, %v1605_v26  ;;  %v2173_v58 = vadd.f32 %v6931_v45, %v1613_v47  ;;  %v7051_v61 = vsel %vm2341_vm8, 1.0, %v14800_v17  ;;  %v7059_v53 = vsel %vm2349_vm1, 1.0, %v14800_v17 }
 0x32e   :  { %vm2909_vm5 = vcmp.eq.s32.totalorder %v15276_v24, %v15120_v1  ;;  %v7179_v7 = vsel %vm2901_vm0, 1.0, %v14800_v17  ;;  %vm3461_vm3 = vcmp.eq.s32.totalorder %v15277_v18, %v15120_v1  ;;  %vm3469_vm15 = vcmp.eq.s32.totalorder %v15278_v48, %v15120_v1 }
 0x32f   :  { %v2725_v62 = vadd.f32 %v7051_v61, %v2165_v44  ;;  %v2733_v40 = vadd.f32 %v7059_v53, %v2173_v58  ;;  %v7187_v26 = vsel %vm2909_vm5, 1.0, %v14800_v17  ;;  %v7307_v47 = vsel %vm3461_vm3, 1.0, %v14800_v17 }
 0x330   :  { %v7315_v57 = vsel %vm3469_vm15, 1.0, %v14800_v17  ;;  %vm4021_vm13 = vcmp.eq.s32.totalorder %v15279_v34, %v15120_v1  ;;  %vm4029_vm10 = vcmp.eq.s32.totalorder %v15280_v29, %v15120_v1  ;;  %v6477_v35 = vsel %vm167_vm9, 1.0, %v14800_v17 }
 0x331   :  { %v3285_v31 = vadd.f32 %v7179_v7, %v2725_v62  ;;  %v3293_v52 = vadd.f32 %v7187_v26, %v2733_v40  ;;  %v7435_v2 = vsel %vm4021_vm13, 1.0, %v14800_v17  ;;  %v7443_v45 = vsel %vm4029_vm10, 1.0, %v14800_v17 }
 0x332   :  { %v6485_v44 = vsel %vm175_vm11, 1.0, %v14800_v17  ;;  %v6605_v58 = vsel %vm599_vm12, 1.0, %v14800_v17  ;;  %v6613_v9 = vsel %vm607_vm2, 1.0, %v14800_v17  ;;  %vm1159_vm9 = vcmp.eq.s32.totalorder %v15265_v46, %v15257_v33 }
 0x333   :  { %vm678_vm7 = vcmp.eq.s32.totalorder %v15172_v38, %v15043_v37  ;;  %v3845_v61 = vadd.f32 %v7307_v47, %v3285_v31  ;;  %v3853_v53 = vadd.f32 %v7315_v57, %v3293_v52  ;;  %v983_v56 = vadd.f32 %v6605_v58, %v6477_v35 }
 0x334   :  { %v991_v7 = vadd.f32 %v6613_v9, %v6485_v44  ;;  %vm1167_vm11 = vcmp.eq.s32.totalorder %v15267_v59, %v15257_v33  ;;  %v6733_v6 = vsel %vm1159_vm9, 1.0, %v14800_v17  ;;  %vm1719_vm12 = vcmp.eq.s32.totalorder %v15285_v27, %v15257_v33 }
 0x335   :  { %vm1727_vm2 = vcmp.eq.s32.totalorder %v15286_v41, %v15257_v33  ;;  %v4405_v50 = vadd.f32 %v7435_v2, %v3845_v61  ;;  %v4413_v46 = vadd.f32 %v7443_v45, %v3853_v53  ;;  %v6741_v62 = vsel %vm1167_vm11, 1.0, %v14800_v17 }
 0x336   :  { %v1543_v40 = vadd.f32 %v6733_v6, %v983_v56  ;;  %v1551_v26 = vadd.f32 %v6741_v62, %v991_v7  ;;  %v6861_v47 = vsel %vm1719_vm12, 1.0, %v14800_v17  ;;  %v6869_v57 = vsel %vm1727_vm2, 1.0, %v14800_v17 }
 0x337   :  { %vm2279_vm6 = vcmp.eq.s32.totalorder %v15287_v3, %v15257_v33  ;;  %v4493_v59 = vpack.c.bf16 %v4413_v46, %v4405_v50  ;;  %vm2287_vm4 = vcmp.eq.s32.totalorder %v15288_v4, %v15257_v33  ;;  %vm2839_vm8 = vcmp.eq.s32.totalorder %v15289_v0, %v15257_v33 }
 0x338   :  { %v2103_v35 = vadd.f32 %v6861_v47, %v1543_v40  ;;  %v6989_v27 = vsel %vm2279_vm6, 1.0, %v14800_v17  ;;  %v2111_v41 = vadd.f32 %v6869_v57, %v1551_v26  ;;  %v6997_v31 = vsel %vm2287_vm4, 1.0, %v14800_v17 }
 0x339   :  { %vm2847_vm1 = vcmp.eq.s32.totalorder %v15290_v43, %v15257_v33  ;;  %5309 = vmatmul.mubr.bf16.gmra.mrb[36].mxu0 %v4493_v59  ;;  %v7117_v3 = vsel %vm2839_vm8, 1.0, %v14800_v17  ;;  %vm3399_vm0 = vcmp.eq.s32.totalorder %v15291_v51, %v15257_v33  ;;  %vm3407_vm5 = vcmp.eq.s32.totalorder %v15292_v36, %v15257_v33 }
 0x33a   :  { %v2663_v52 = vadd.f32 %v6989_v27, %v2103_v35  ;;  %v7125_v2 = vsel %vm2847_vm1, 1.0, %v14800_v17  ;;  %v2671_v4 = vadd.f32 %v6997_v31, %v2111_v41  ;;  %v7245_v45 = vsel %vm3399_vm0, 1.0, %v14800_v17  ;;  %v15299_v35 = vld [vmem:[#allocation110_spill] sm:$0xff] }
 0x33b   :  { %vm3959_vm3 = vcmp.eq.s32.totalorder %v15293_v63, %v15257_v33  ;;  %v7253_v43 = vsel %vm3407_vm5, 1.0, %v14800_v17  ;;  %vm3967_vm15 = vcmp.eq.s32.totalorder %v15295_v13, %v15257_v33  ;;  %vm246_vm13 = vcmp.eq.s32.totalorder %v15174_v39, %v15043_v37 }
 0x33c   :  { %v3223_v0 = vadd.f32 %v7117_v3, %v2663_v52  ;;  %v7373_v44 = vsel %vm3959_vm3, 1.0, %v14800_v17  ;;  %v3231_v58 = vadd.f32 %v7125_v2, %v2671_v4  ;;  %v7381_v51 = vsel %vm3967_vm15, 1.0, %v14800_v17  ;;  %v15300_v3 = vld [vmem:[#allocation30_spill] sm:$0xff]  ;;  %v15301_v2 = vld [vmem:[#allocation81_spill] sm:$0xff]  ;;  %v15302_v4 = vld [vmem:[#allocation56_spill] sm:$0xff] }
 0x33d   :  { %vm254_vm10 = vcmp.eq.s32.totalorder %v15175_v55, %v15043_v37  ;;  %vm1184_vm9 = vcmp.eq.s32.totalorder %v15193_v20, %v15226_v28  ;;  %vm1176_vm11 = vcmp.eq.s32.totalorder %v15192_v8, %v15226_v28  ;;  %v6556_v63 = vsel %vm246_vm13, 1.0, %v14800_v17 }
 0x33e   :  { %v3783_v36 = vadd.f32 %v7245_v45, %v3223_v0  ;;  %v6564_v13 = vsel %vm254_vm10, 1.0, %v14800_v17  ;;  %vm686_vm12 = vcmp.eq.s32.totalorder %v15176_v49, %v15043_v37  ;;  %v3791_v9 = vadd.f32 %v7253_v43, %v3231_v58  ;;  %v15303_v45 = vld [vmem:[#allocation83_spill] sm:$0xff] }
 0x33f   :  { %v6684_v61 = vsel %vm678_vm7, 1.0, %v14800_v17  ;;  %v6692_v53 = vsel %vm686_vm12, 1.0, %v14800_v17  ;;  %vm1238_vm2 = vcmp.eq.s32.totalorder %v15180_v22, %v15043_v37  ;;  %vm1246_vm6 = vcmp.eq.s32.totalorder %v15181_v30, %v15043_v37 }
 0x340   :  { %v4343_v56 = vadd.f32 %v7373_v44, %v3783_v36  ;;  %v1062_v7 = vadd.f32 %v6684_v61, %v6556_v63  ;;  %v1070_v6 = vadd.f32 %v6692_v53, %v6564_v13  ;;  %v4351_v50 = vadd.f32 %v7381_v51, %v3791_v9  ;;  %v15304_v63 = vld [vmem:[#allocation43_spill] sm:$0xff] }
 0x341   :  { %v6812_v46 = vsel %vm1238_vm2, 1.0, %v14800_v17  ;;  %v6820_v62 = vsel %vm1246_vm6, 1.0, %v14800_v17  ;;  %vm1798_vm4 = vcmp.eq.s32.totalorder %v15182_v15, %v15043_v37  ;;  %vm1806_vm7 = vcmp.eq.s32.totalorder %v15183_v21, %v15043_v37  ;;  %v15305_v13 = vld [vmem:[#allocation59_spill] sm:$0xff] }
 0x342   :  { %v1622_v40 = vadd.f32 %v6812_v46, %v1062_v7  ;;  %v1630_v26 = vadd.f32 %v6820_v62, %v1070_v6  ;;  %v6940_v47 = vsel %vm1798_vm4, 1.0, %v14800_v17  ;;  %v4463_v57 = vpack.c.bf16 %v4351_v50, %v4343_v56  ;;  %v15306_v7 = vld [vmem:[#allocation175_spill] sm:$0xff]  ;;  %v15309_v62 = vld [vmem:[#allocation180_spill] sm:$0xff] }
 0x343   :  { %v6948_v59 = vsel %vm1806_vm7, 1.0, %v14800_v17  ;;  %vm2358_vm8 = vcmp.eq.s32.totalorder %v15184_v10, %v15043_v37  ;;  %vm2366_vm1 = vcmp.eq.s32.totalorder %v15299_v35, %v15043_v37  ;;  %vm2918_vm0 = vcmp.eq.s32.totalorder %v15300_v3, %v15043_v37  ;;  %v15307_v6 = vld [vmem:[#allocation179_spill] sm:$0xff] }
 0x344   :  { %v2182_v27 = vadd.f32 %v6940_v47, %v1622_v40  ;;  %v2190_v41 = vadd.f32 %v6948_v59, %v1630_v26  ;;  %v7068_v31 = vsel %vm2358_vm8, 1.0, %v14800_v17  ;;  %v7076_v52 = vsel %vm2366_vm1, 1.0, %v14800_v17  ;;  %5374 = vmatmul.mubr.bf16.gmra.mrb[52].mxu1 %v4463_v57  ;;  %v15308_v46 = vld [vmem:[#allocation107_spill] sm:$0xff] }
 0x345   :  { %vm2926_vm5 = vcmp.eq.s32.totalorder %v15301_v2, %v15043_v37  ;;  %vm3478_vm3 = vcmp.eq.s32.totalorder %v15302_v4, %v15043_v37  ;;  %vm3486_vm15 = vcmp.eq.s32.totalorder %v15303_v45, %v15043_v37  ;;  %v7196_v44 = vsel %vm2918_vm0, 1.0, %v14800_v17 }
 0x346   :  { %v2742_v0 = vadd.f32 %v7068_v31, %v2182_v27  ;;  %v2750_v43 = vadd.f32 %v7076_v52, %v2190_v41  ;;  %v7204_v58 = vsel %vm2926_vm5, 1.0, %v14800_v17  ;;  %v7324_v51 = vsel %vm3478_vm3, 1.0, %v14800_v17  ;;  %v15310_v27 = vld [vmem:[#allocation44_spill] sm:$0xff]  ;;  %v15311_v41 = vld [vmem:[#allocation71_spill] sm:$0xff] }
 0x347   :  { %v7332_v36 = vsel %vm3486_vm15, 1.0, %v14800_v17  ;;  %vm4038_vm13 = vcmp.eq.s32.totalorder %v15304_v63, %v15043_v37  ;;  %vm4046_vm10 = vcmp.eq.s32.totalorder %v15305_v13, %v15043_v37  ;;  %vm677_vm12 = vcmp.eq.s32.totalorder %v15172_v38, %v15120_v1 }
 0x348   :  { %v3302_v9 = vadd.f32 %v7196_v44, %v2742_v0  ;;  %v3310_v61 = vadd.f32 %v7204_v58, %v2750_v43  ;;  %v7452_v53 = vsel %vm4038_vm13, 1.0, %v14800_v17  ;;  %v7460_v56 = vsel %vm4046_vm10, 1.0, %v14800_v17 }
 0x349   :  { %v1000_v50 = vadd.f32 %v15307_v6, %v15306_v7  ;;  %v1008_v40 = vadd.f32 %v15309_v62, %v15308_v46  ;;  %v6750_v26 = vsel %vm1176_vm11, 1.0, %v14800_v17  ;;  %v6758_v47 = vsel %vm1184_vm9, 1.0, %v14800_v17  ;;  %v15312_v7 = vld [vmem:[#allocation132_spill] sm:$0xff]  ;;  %v15315_v62 = vld [vmem:[#allocation157_spill] sm:$0xff] }
 0x34a   :  { %v3862_v57 = vadd.f32 %v7324_v51, %v3302_v9  ;;  %v3870_v59 = vadd.f32 %v7332_v36, %v3310_v61  ;;  %vm1736_vm2 = vcmp.eq.s32.totalorder %v15310_v27, %v15226_v28  ;;  %vm1744_vm6 = vcmp.eq.s32.totalorder %v15311_v41, %v15226_v28  ;;  %v15313_v51 = vld [vmem:[#allocation139_spill] sm:$0xff]  ;;  %v15314_v46 = vld [vmem:[#allocation152_spill] sm:$0xff] }
 0x34b   :  { %v1560_v31 = vadd.f32 %v6750_v26, %v1000_v50  ;;  %v1568_v52 = vadd.f32 %v6758_v47, %v1008_v40  ;;  %v6878_v0 = vsel %vm1736_vm2, 1.0, %v14800_v17  ;;  %v6886_v43 = vsel %vm1744_vm6, 1.0, %v14800_v17 }
 0x34c   :  { %v4422_v44 = vadd.f32 %v7452_v53, %v3862_v57  ;;  %v4430_v58 = vadd.f32 %v7460_v56, %v3870_v59  ;;  %vm2296_vm11 = vcmp.eq.s32.totalorder %v15312_v7, %v15226_v28  ;;  %vm2304_vm9 = vcmp.eq.s32.totalorder %v15313_v51, %v15226_v28  ;;  %v15316_v53 = vld [vmem:[#allocation164_spill] sm:$0xff] }
 0x34d   :  { %v2120_v36 = vadd.f32 %v6878_v0, %v1560_v31  ;;  %v2128_v9 = vadd.f32 %v6886_v43, %v1568_v52  ;;  %v7006_v61 = vsel %vm2296_vm11, 1.0, %v14800_v17  ;;  %v7014_v6 = vsel %vm2304_vm9, 1.0, %v14800_v17  ;;  %v15317_v57 = vld [vmem:[#allocation168_spill] sm:$0xff]  ;;  %v15319_v52 = vld [vmem:[#allocation122_spill] sm:$0xff]  ;;  %v15320_v0 = vld [vmem:[#allocation85_spill] sm:$0xff] }
 0x34e   :  { %v4502_v50 = vpack.c.bf16 %v4430_v58, %v4422_v44  ;;  %vm2856_vm4 = vcmp.eq.s32.totalorder %v15314_v46, %v15226_v28  ;;  %vm2864_vm7 = vcmp.eq.s32.totalorder %v15315_v62, %v15226_v28  ;;  %vm3416_vm8 = vcmp.eq.s32.totalorder %v15316_v53, %v15226_v28  ;;  %v15318_v31 = vld [vmem:[#allocation88_spill] sm:$0xff] }
 0x34f   :  { %v2680_v56 = vadd.f32 %v7006_v61, %v2120_v36  ;;  %v2688_v40 = vadd.f32 %v7014_v6, %v2128_v9  ;;  %v7134_v26 = vsel %vm2856_vm4, 1.0, %v14800_v17  ;;  %v7142_v47 = vsel %vm2864_vm7, 1.0, %v14800_v17  ;;  %v13129_v61 = vpop.f32.mrb[0].mxu0  ;;  %v13131_v6 = vpop.f32.mrb[16].mxu1 }
 0x350   :  { %5316 = vmatprep.mubr.bf16.mxu0 %v4502_v50  ;;  %vm3424_vm1 = vcmp.eq.s32.totalorder %v15317_v57, %v15226_v28  ;;  %v7262_v59 = vsel %vm3416_vm8, 1.0, %v14800_v17  ;;  %vm3976_vm0 = vcmp.eq.s32.totalorder %v15318_v31, %v15226_v28  ;;  %vm3984_vm5 = vcmp.eq.s32.totalorder %v15319_v52, %v15226_v28  ;;  %15321 = vst [vmem:[#allocation154_spill] sm:$0xff] %v13129_v61  ;;  %v15323_v50 = vld [vmem:[#allocation77_spill] sm:$0xff]  ;;  %v13143_v61 = vpop.f32.mrb[17].mxu1 }
 0x351   :  { %vm183_vm3 = vcmp.eq.s32.totalorder %v15320_v0, %v15257_v33  ;;  %v3240_v43 = vadd.f32 %v7134_v26, %v2680_v56  ;;  %v3248_v44 = vadd.f32 %v7142_v47, %v2688_v40  ;;  %v7270_v58 = vsel %vm3424_vm1, 1.0, %v14800_v17  ;;  %15322 = vst [vmem:[#allocation140_spill] sm:$0xff] %v13131_v6  ;;  %v15324_v56 = vld [vmem:[#allocation172_spill] sm:$0xff]  ;;  %15327 = vst [vmem:[#allocation181_spill] sm:$0xff] %v13143_v61 }
 0x352   :  { %v7390_v36 = vsel %vm3976_vm0, 1.0, %v14800_v17  ;;  %v7398_v9 = vsel %vm3984_vm5, 1.0, %v14800_v17  ;;  %vm245_vm15 = vcmp.eq.s32.totalorder %v15174_v39, %v15120_v1  ;;  %vm253_vm13 = vcmp.eq.s32.totalorder %v15175_v55, %v15120_v1  ;;  %v15325_v40 = vld [vmem:[#allocation176_spill] sm:$0xff] }
 0x353   :  { %vm685_vm10 = vcmp.eq.s32.totalorder %v15176_v49, %v15120_v1  ;;  %vm191_vm2 = vcmp.eq.s32.totalorder %v15323_v50, %v15257_v33  ;;  %vm615_vm6 = vcmp.eq.s32.totalorder %v15324_v56, %v15257_v33  ;;  %vm623_vm11 = vcmp.eq.s32.totalorder %v15325_v40, %v15257_v33  ;;  %v13141_v49 = vpop.f32.mrb[1].mxu0 }
 0x354   :  { %v3800_v26 = vadd.f32 %v7262_v59, %v3240_v43  ;;  %v3808_v47 = vadd.f32 %v7270_v58, %v3248_v44  ;;  %v6555_v55 = vsel %vm245_vm15, 1.0, %v14800_v17  ;;  %v6563_v39 = vsel %vm253_vm13, 1.0, %v14800_v17  ;;  %15326 = vst [vmem:[#allocation177_spill] sm:$0xff] %v13141_v49 }
 0x355   :  { %v6683_v6 = vsel %vm677_vm12, 1.0, %v14800_v17  ;;  %v6691_v29 = vsel %vm685_vm10, 1.0, %v14800_v17  ;;  %vm1237_vm9 = vcmp.eq.s32.totalorder %v15180_v22, %v15120_v1  ;;  %vm1245_vm4 = vcmp.eq.s32.totalorder %v15181_v30, %v15120_v1 }
 0x356   :  { %v4360_v59 = vadd.f32 %v7390_v36, %v3800_v26  ;;  %v4368_v43 = vadd.f32 %v7398_v9, %v3808_v47  ;;  %v1061_v44 = vadd.f32 %v6683_v6, %v6555_v55  ;;  %v1069_v58 = vadd.f32 %v6691_v29, %v6563_v39  ;;  %v15328_v26 = vld [vmem:[#allocation66_spill] sm:$0xff] }
 0x357   :  { %v6811_v49 = vsel %vm1237_vm9, 1.0, %v14800_v17  ;;  %v6819_v61 = vsel %vm1245_vm4, 1.0, %v14800_v17  ;;  %vm1797_vm7 = vcmp.eq.s32.totalorder %v15182_v15, %v15120_v1  ;;  %vm1805_vm12 = vcmp.eq.s32.totalorder %v15183_v21, %v15120_v1 }
 0x358   :  { %v4472_v38 = vpack.c.bf16 %v4368_v43, %v4360_v59  ;;  %v1621_v34 = vadd.f32 %v6811_v49, %v1061_v44  ;;  %v1629_v22 = vadd.f32 %v6819_v61, %v1069_v58  ;;  %v6939_v48 = vsel %vm1797_vm7, 1.0, %v14800_v17 }
 0x359   :  { %v6947_v36 = vsel %vm1805_vm12, 1.0, %v14800_v17  ;;  %vm2357_vm8 = vcmp.eq.s32.totalorder %v15184_v10, %v15120_v1  ;;  %vm2365_vm1 = vcmp.eq.s32.totalorder %v15299_v35, %v15120_v1  ;;  %vm2917_vm0 = vcmp.eq.s32.totalorder %v15300_v3, %v15120_v1 }
 0x35a   :  { %7544 = vmatprep.mubr.msk.bf16.mxu1 %vm5013_vm14, %v4472_v38  ;;  %v2181_v39 = vadd.f32 %v6939_v48, %v1621_v34  ;;  %v2189_v55 = vadd.f32 %v6947_v36, %v1629_v22  ;;  %v7067_v49 = vsel %vm2357_vm8, 1.0, %v14800_v17  ;;  %v7075_v29 = vsel %vm2365_vm1, 1.0, %v14800_v17 }
 0x35b   :  { %vm2925_vm5 = vcmp.eq.s32.totalorder %v15301_v2, %v15120_v1  ;;  %v7195_v9 = vsel %vm2917_vm0, 1.0, %v14800_v17  ;;  %vm3477_vm15 = vcmp.eq.s32.totalorder %v15302_v4, %v15120_v1  ;;  %vm3485_vm13 = vcmp.eq.s32.totalorder %v15303_v45, %v15120_v1 }
 0x35c   :  { %v2741_v61 = vadd.f32 %v7067_v49, %v2181_v39  ;;  %v2749_v6 = vadd.f32 %v7075_v29, %v2189_v55  ;;  %v7203_v38 = vsel %vm2925_vm5, 1.0, %v14800_v17  ;;  %v7323_v22 = vsel %vm3477_vm15, 1.0, %v14800_v17  ;;  %v13207_v39 = vpop.f32.mrb[2].mxu0  ;;  %v13209_v55 = vpop.f32.mrb[18].mxu1 }
 0x35d   :  { %v7331_v48 = vsel %vm3485_vm13, 1.0, %v14800_v17  ;;  %vm4037_vm10 = vcmp.eq.s32.totalorder %v15304_v63, %v15120_v1  ;;  %vm4045_vm9 = vcmp.eq.s32.totalorder %v15305_v13, %v15120_v1  ;;  %v6493_v34 = vsel %vm183_vm3, 1.0, %v14800_v17  ;;  %15329 = vst [vmem:[#allocation184_spill] sm:$0xff] %v13207_v39  ;;  %15330 = vst [vmem:[#allocation45_spill] sm:$0xff] %v13209_v55  ;;  %v15356_v39 = vld [vmem:[#allocation118_spill] sm:$0xff] }
 0x35e   :  { %vm270_vm4 = vcmp.eq.s32.totalorder %v15328_v26, %v15043_v37  ;;  %v3301_v47 = vadd.f32 %v7195_v9, %v2741_v61  ;;  %v3309_v59 = vadd.f32 %v7203_v38, %v2749_v6  ;;  %v7451_v43 = vsel %vm4037_vm10, 1.0, %v14800_v17 }
 0x35f   :  { %v7459_v44 = vsel %vm4045_vm9, 1.0, %v14800_v17  ;;  %v6501_v58 = vsel %vm191_vm2, 1.0, %v14800_v17  ;;  %v6621_v0 = vsel %vm615_vm6, 1.0, %v14800_v17  ;;  %v6629_v36 = vsel %vm623_vm11, 1.0, %v14800_v17 }
 0x360   :  { %vm1175_vm3 = vcmp.eq.s32.totalorder %v15192_v8, %v15257_v33  ;;  %v3861_v49 = vadd.f32 %v7323_v22, %v3301_v47  ;;  %v3869_v50 = vadd.f32 %v7331_v48, %v3309_v59  ;;  %v999_v29 = vadd.f32 %v6621_v0, %v6493_v34 }
 0x361   :  { %v1007_v9 = vadd.f32 %v6629_v36, %v6501_v58  ;;  %vm1183_vm2 = vcmp.eq.s32.totalorder %v15193_v20, %v15257_v33  ;;  %v6749_v56 = vsel %vm1175_vm3, 1.0, %v14800_v17  ;;  %vm1735_vm6 = vcmp.eq.s32.totalorder %v15310_v27, %v15257_v33  ;;  %v15331_v36 = vld [vmem:[#allocation114_spill] sm:$0xff] }
 0x362   :  { %vm1743_vm11 = vcmp.eq.s32.totalorder %v15311_v41, %v15257_v33  ;;  %v4421_v8 = vadd.f32 %v7451_v43, %v3861_v49  ;;  %v4429_v40 = vadd.f32 %v7459_v44, %v3869_v50  ;;  %v6757_v61 = vsel %vm1183_vm2, 1.0, %v14800_v17  ;;  %v15332_v49 = vld [vmem:[#allocation116_spill] sm:$0xff]  ;;  %v15333_v50 = vld [vmem:[#allocation79_spill] sm:$0xff] }
 0x363   :  { %v1559_v6 = vadd.f32 %v6749_v56, %v999_v29  ;;  %v1567_v38 = vadd.f32 %v6757_v61, %v1007_v9  ;;  %v6877_v22 = vsel %vm1735_vm6, 1.0, %v14800_v17  ;;  %v6885_v48 = vsel %vm1743_vm11, 1.0, %v14800_v17  ;;  %v13260_v29 = vpop.f32.mrb[3].mxu0  ;;  %v13262_v9 = vpop.f32.mrb[19].mxu1 }
 0x364   :  { %vm2295_vm7 = vcmp.eq.s32.totalorder %v15312_v7, %v15257_v33  ;;  %v4501_v20 = vpack.c.bf16 %v4429_v40, %v4421_v8  ;;  %vm2303_vm12 = vcmp.eq.s32.totalorder %v15313_v51, %v15257_v33  ;;  %vm2855_vm8 = vcmp.eq.s32.totalorder %v15314_v46, %v15257_v33  ;;  %15334 = vst [vmem:[#allocation173_spill] sm:$0xff] %v13260_v29  ;;  %v15355_v29 = vld [vmem:[#allocation70_spill] sm:$0xff] }
 0x365   :  { %v2119_v34 = vadd.f32 %v6877_v22, %v1559_v6  ;;  %v7005_v27 = vsel %vm2295_vm7, 1.0, %v14800_v17  ;;  %v2127_v41 = vadd.f32 %v6885_v48, %v1567_v38  ;;  %v7013_v47 = vsel %vm2303_vm12, 1.0, %v14800_v17  ;;  %15335 = vst [vmem:[#allocation144_spill] sm:$0xff] %v13262_v9 }
 0x366   :  { %vm2863_vm1 = vcmp.eq.s32.totalorder %v15315_v62, %v15257_v33  ;;  %5317 = vmatmul.mubr.bf16.gmra.mrb[40].mxu0 %v4501_v20  ;;  %v7133_v7 = vsel %vm2855_vm8, 1.0, %v14800_v17  ;;  %vm3415_vm0 = vcmp.eq.s32.totalorder %v15316_v53, %v15257_v33  ;;  %vm3423_vm5 = vcmp.eq.s32.totalorder %v15317_v57, %v15257_v33 }
 0x367   :  { %v2679_v59 = vadd.f32 %v7005_v27, %v2119_v34  ;;  %v7141_v43 = vsel %vm2863_vm1, 1.0, %v14800_v17  ;;  %v2687_v51 = vadd.f32 %v7013_v47, %v2127_v41  ;;  %v7261_v44 = vsel %vm3415_vm0, 1.0, %v14800_v17  ;;  %v15336_v41 = vld [vmem:[#allocation76_spill] sm:$0xff] }
 0x368   :  { %vm3975_vm15 = vcmp.eq.s32.totalorder %v15318_v31, %v15257_v33  ;;  %v7269_v62 = vsel %vm3423_vm5, 1.0, %v14800_v17  ;;  %vm3983_vm13 = vcmp.eq.s32.totalorder %v15319_v52, %v15257_v33  ;;  %vm262_vm10 = vcmp.eq.s32.totalorder %v15331_v36, %v15043_v37 }
 0x369   :  { %v3239_v46 = vadd.f32 %v7133_v7, %v2679_v59  ;;  %v7389_v58 = vsel %vm3975_vm15, 1.0, %v14800_v17  ;;  %v3247_v0 = vadd.f32 %v7141_v43, %v2687_v51  ;;  %v7397_v53 = vsel %vm3983_vm13, 1.0, %v14800_v17  ;;  %v15337_v43 = vld [vmem:[#allocation117_spill] sm:$0xff]  ;;  %v15338_v51 = vld [vmem:[#allocation123_spill] sm:$0xff] }
 0x36a   :  { %v6580_v57 = vsel %vm270_vm4, 1.0, %v14800_v17  ;;  %vm1192_vm9 = vcmp.eq.s32.totalorder %v15215_v11, %v15226_v28  ;;  %vm1200_vm3 = vcmp.eq.s32.totalorder %v11560_v19, %v15226_v28  ;;  %v6572_v52 = vsel %vm262_vm10, 1.0, %v14800_v17 }
 0x36b   :  { %v3799_v31 = vadd.f32 %v7261_v44, %v3239_v46  ;;  %vm694_vm2 = vcmp.eq.s32.totalorder %v15332_v49, %v15043_v37  ;;  %vm702_vm6 = vcmp.eq.s32.totalorder %v15333_v50, %v15043_v37  ;;  %v3807_v56 = vadd.f32 %v7269_v62, %v3247_v0  ;;  %v15339_v0 = vld [vmem:[#allocation100_spill] sm:$0xff] }
 0x36c   :  { %v6700_v8 = vsel %vm694_vm2, 1.0, %v14800_v17  ;;  %v6708_v40 = vsel %vm702_vm6, 1.0, %v14800_v17  ;;  %vm1254_vm4 = vcmp.eq.s32.totalorder %v15203_v42, %v15043_v37  ;;  %vm1262_vm11 = vcmp.eq.s32.totalorder %v15204_v32, %v15043_v37 }
 0x36d   :  { %v4359_v61 = vadd.f32 %v7389_v58, %v3799_v31  ;;  %v1078_v6 = vadd.f32 %v6700_v8, %v6572_v52  ;;  %v1086_v38 = vadd.f32 %v6708_v40, %v6580_v57  ;;  %v4367_v22 = vadd.f32 %v7397_v53, %v3807_v56  ;;  %v15340_v53 = vld [vmem:[#allocation101_spill] sm:$0xff]  ;;  %v15341_v57 = vld [vmem:[#allocation148_spill] sm:$0xff] }
 0x36e   :  { %v6828_v48 = vsel %vm1254_vm4, 1.0, %v14800_v17  ;;  %v6836_v20 = vsel %vm1262_vm11, 1.0, %v14800_v17  ;;  %vm1814_vm7 = vcmp.eq.s32.totalorder %v15205_v25, %v15043_v37  ;;  %vm1822_vm12 = vcmp.eq.s32.totalorder %v15336_v41, %v15043_v37  ;;  %v15342_v31 = vld [vmem:[#allocation24_spill] sm:$0xff] }
 0x36f   :  { %v1638_v34 = vadd.f32 %v6828_v48, %v1078_v6  ;;  %v1646_v27 = vadd.f32 %v6836_v20, %v1086_v38  ;;  %v6956_v47 = vsel %vm1814_vm7, 1.0, %v14800_v17  ;;  %v4471_v59 = vpack.c.bf16 %v4367_v22, %v4359_v61  ;;  %v15343_v38 = vld [vmem:[#allocation75_spill] sm:$0xff] }
 0x370   :  { %v6964_v7 = vsel %vm1822_vm12, 1.0, %v14800_v17  ;;  %vm2374_vm8 = vcmp.eq.s32.totalorder %v15337_v43, %v15043_v37  ;;  %vm2382_vm1 = vcmp.eq.s32.totalorder %v15338_v51, %v15043_v37  ;;  %vm2934_vm0 = vcmp.eq.s32.totalorder %v15339_v0, %v15043_v37  ;;  %v15344_v22 = vld [vmem:[#allocation163_spill] sm:$0xff] }
 0x371   :  { %v2198_v44 = vadd.f32 %v6956_v47, %v1638_v34  ;;  %v2206_v46 = vadd.f32 %v6964_v7, %v1646_v27  ;;  %v7084_v62 = vsel %vm2374_vm8, 1.0, %v14800_v17  ;;  %v7092_v58 = vsel %vm2382_vm1, 1.0, %v14800_v17  ;;  %5382 = vmatmul.mubr.bf16.gmra.mrb[56].mxu1 %v4471_v59  ;;  %v15345_v47 = vld [vmem:[#allocation108_spill] sm:$0xff]  ;;  %v15346_v59 = vld [vmem:[#allocation151_spill] sm:$0xff] }
 0x372   :  { %vm2942_vm5 = vcmp.eq.s32.totalorder %v15340_v53, %v15043_v37  ;;  %vm3494_vm15 = vcmp.eq.s32.totalorder %v15341_v57, %v15043_v37  ;;  %vm3502_vm13 = vcmp.eq.s32.totalorder %v15342_v31, %v15043_v37  ;;  %v7212_v8 = vsel %vm2934_vm0, 1.0, %v14800_v17 }
 0x373   :  { %v2758_v52 = vadd.f32 %v7084_v62, %v2198_v44  ;;  %v2766_v56 = vadd.f32 %v7092_v58, %v2206_v46  ;;  %v7220_v40 = vsel %vm2942_vm5, 1.0, %v14800_v17  ;;  %vm269_vm10 = vcmp.eq.s32.totalorder %v15328_v26, %v15120_v1  ;;  %v15347_v44 = vld [vmem:[#allocation146_spill] sm:$0xff]  ;;  %v15348_v46 = vld [vmem:[#allocation67_spill] sm:$0xff] }
 0x374   :  { %v7340_v61 = vsel %vm3494_vm15, 1.0, %v14800_v17  ;;  %v7348_v6 = vsel %vm3502_vm13, 1.0, %v14800_v17  ;;  %vm4054_vm2 = vcmp.eq.s32.totalorder %v15343_v38, %v15043_v37  ;;  %vm4062_vm6 = vcmp.eq.s32.totalorder %v15344_v22, %v15043_v37 }
 0x375   :  { %v3318_v48 = vadd.f32 %v7212_v8, %v2758_v52  ;;  %v3326_v20 = vadd.f32 %v7220_v40, %v2766_v56  ;;  %v7468_v34 = vsel %vm4054_vm2, 1.0, %v14800_v17  ;;  %v7476_v27 = vsel %vm4062_vm6, 1.0, %v14800_v17  ;;  %v15349_v8 = vld [vmem:[#allocation156_spill] sm:$0xff]  ;;  %v15350_v40 = vld [vmem:[#allocation162_spill] sm:$0xff] }
 0x376   :  { %v1016_v7 = vadd.f32 %v15346_v59, %v15345_v47  ;;  %v1024_v62 = vadd.f32 %v15348_v46, %v15347_v44  ;;  %v6766_v58 = vsel %vm1192_vm9, 1.0, %v14800_v17  ;;  %v6774_v37 = vsel %vm1200_vm3, 1.0, %v14800_v17  ;;  %v13320_v47 = vpop.f32.mrb[4].mxu0  ;;  %v13322_v59 = vpop.f32.mrb[20].mxu1  ;;  %v7995_v44 = vld [vmem:[%s14295_s2] ss:$8 sps:$4 sm:$0xff]  }
 0x377   :  { %v3878_v52 = vadd.f32 %v7340_v61, %v3318_v48  ;;  %v3886_v56 = vadd.f32 %v7348_v6, %v3326_v20  ;;  %vm1752_vm4 = vcmp.eq.s32.totalorder %v15349_v8, %v15226_v28  ;;  %vm1760_vm11 = vcmp.eq.s32.totalorder %v15350_v40, %v15226_v28  ;;  %15351 = vst [vmem:[#allocation182_spill] sm:$0xff] %v13320_v47  ;;  %v7997_v46 = vld [vmem:[%s14295_s2 + $0x4] ss:$8 sps:$4 sm:$0xff]   ;;  %v13332_v9 = vpop.f32.mrb[5].mxu0  ;;  %v13334_v55 = vpop.f32.mrb[21].mxu1 }
 0x378   :  { %15352 = vst [vmem:[#allocation103_spill] sm:$0xff] %v13322_v59  ;;  %v1576_v61 = vadd.f32 %v6766_v58, %v1016_v7  ;;  %v1584_v6 = vadd.f32 %v6774_v37, %v1024_v62  ;;  %v6894_v48 = vsel %vm1752_vm4, 1.0, %v14800_v17  ;;  %v6902_v20 = vsel %vm1760_vm11, 1.0, %v14800_v17  ;;  %15353 = vst [vmem:[#allocation166_spill] sm:$0xff] %v13332_v9  ;;  %v13340_v13 = vpop.f32.mrb[6].mxu0  ;;  %v13342_v7 = vpop.f32.mrb[22].mxu1  ;;  %5562 = vmatprep.subr.bf16.mxu0 %v7997_v46 }
 0x379   :  { %15354 = vst [vmem:[#allocation135_spill] sm:$0xff] %v13334_v55  ;;  %v4438_v47 = vadd.f32 %v7468_v34, %v3878_v52  ;;  %v4446_v59 = vadd.f32 %v7476_v27, %v3886_v56  ;;  %vm2312_vm9 = vcmp.eq.s32.totalorder %v15355_v29, %v15226_v28  ;;  %vm2320_vm3 = vcmp.eq.s32.totalorder %v15356_v39, %v15226_v28  ;;  %v8000_v62 = vld [vmem:[%s14295_s2 + $0x14] ss:$8 sps:$4 sm:$0xff]   ;;  %v13349_v52 = vpop.f32.mrb[7].mxu0  ;;  %v13351_v56 = vpop.f32.mrb[23].mxu1 }
 0x37a   :  { %15357 = vst [vmem:[#allocation92_spill] sm:$0xff] %v13340_v13  ;;  %15358 = vst [vmem:[#allocation61_spill] sm:$0xff] %v13342_v7  ;;  %v2136_v58 = vadd.f32 %v6894_v48, %v1576_v61  ;;  %v2144_v37 = vadd.f32 %v6902_v20, %v1584_v6  ;;  %v7022_v34 = vsel %vm2312_vm9, 1.0, %v14800_v17  ;;  %v7030_v27 = vsel %vm2320_vm3, 1.0, %v14800_v17  ;;  %5563 = vmatpush1.bf16.msra.mxu0 %v7995_v44  ;;  %v7998_v7 = vld [vmem:[%s14295_s2 + $0x10] ss:$8 sps:$4 sm:$0xff]  }
 0x37b   :  { %15359 = vst [vmem:[#allocation84_spill] sm:$0xff] %v13349_v52  ;;  %15360 = vst [vmem:[#allocation94_spill] sm:$0xff] %v13351_v56  ;;  %v4510_v46 = vpack.c.bf16 %v4446_v59, %v4438_v47  ;;  %v15361_v13 = vld [vmem:[#allocation82_spill] sm:$0xff]  ;;  %v15362_v61 = vld [vmem:[#allocation124_spill] sm:$0xff]  ;;  %v13362_v48 = vpop.f32.mrb[8].mxu0  ;;  %v13364_v20 = vpop.f32.mrb[24].mxu1  ;;  %5564 = vmatprep.subr.bf16.mxu0 %v8000_v62  ;;  %vm261_vm13 = vcmp.eq.s32.totalorder %v15331_v36, %v15120_v1  ;;  %vm693_vm2 = vcmp.eq.s32.totalorder %v15332_v49, %v15120_v1 }
 0x37c   :  { %vm2872_vm7 = vcmp.eq.s32.totalorder %v15361_v13, %v15226_v28  ;;  %vm2880_vm12 = vcmp.eq.s32.totalorder %v15362_v61, %v15226_v28  ;;  %v15363_v6 = vld [vmem:[#allocation169_spill] sm:$0xff]  ;;  %15364 = vst [vmem:[#allocation37_spill] sm:$0xff] %v13362_v48  ;;  %15365 = vst [vmem:[#allocation17_spill] sm:$0xff] %v13364_v20  ;;  %v8003_v44 = vld [vmem:[%s14295_s2 + $0x24] ss:$8 sps:$4 sm:$0xff]   ;;  %v2696_v56 = vadd.f32 %v7022_v34, %v2136_v58  ;;  %v13371_v55 = vpop.f32.mrb[9].mxu0 }
 0x37d   :  { %vm3432_vm8 = vcmp.eq.s32.totalorder %v15363_v6, %v15226_v28  ;;  %v2704_v47 = vadd.f32 %v7030_v27, %v2144_v37  ;;  %v7150_v59 = vsel %vm2872_vm7, 1.0, %v14800_v17  ;;  %v7158_v52 = vsel %vm2880_vm12, 1.0, %v14800_v17  ;;  %15366 = vst [vmem:[#allocation183_spill] sm:$0xff] %v13371_v55  ;;  %v13373_v9 = vpop.f32.mrb[25].mxu1  ;;  %5324 = vmatprep.mubr.bf16.mxu0 %v4510_v46  ;;  %v15368_v48 = vld [vmem:[#allocation170_spill] sm:$0xff]  ;;  %v15370_v58 = vld [vmem:[#allocation171_spill] sm:$0xff] }
 0x37e   :  { %15367 = vst [vmem:[#allocation52_spill] sm:$0xff] %v13373_v9  ;;  %vm3440_vm1 = vcmp.eq.s32.totalorder %v15368_v48, %v15226_v28  ;;  %v7278_v62 = vsel %vm3432_vm8, 1.0, %v14800_v17  ;;  %v15369_v20 = vld [vmem:[#allocation134_spill] sm:$0xff]  ;;  %vm4000_vm5 = vcmp.eq.s32.totalorder %v15370_v58, %v15226_v28  ;;  %v13382_v37 = vpop.f32.mrb[10].mxu0  ;;  %v13384_v34 = vpop.f32.mrb[26].mxu1  ;;  %v15373_v27 = vld [vmem:[#allocation80_spill] sm:$0xff]  ;;  %v3256_v9 = vadd.f32 %v7150_v59, %v2696_v56  ;;  %5565 = vmatpush1.bf16.msra.mxu0 %v7998_v7 }
 0x37f   :  { %vm3992_vm0 = vcmp.eq.s32.totalorder %v15369_v20, %v15226_v28  ;;  %15371 = vst [vmem:[#allocation39_spill] sm:$0xff] %v13382_v37  ;;  %15372 = vst [vmem:[#allocation68_spill] sm:$0xff] %v13384_v34  ;;  %vm199_vm15 = vcmp.eq.s32.totalorder %v15373_v27, %v15257_v33  ;;  %v3264_v46 = vadd.f32 %v7158_v52, %v2704_v47  ;;  %v7286_v55 = vsel %vm3440_vm1, 1.0, %v14800_v17  ;;  %v13390_v45 = vpop.f32.mrb[11].mxu0  ;;  %v13392_v4 = vpop.f32.mrb[27].mxu1  ;;  %v15378_v59 = vld [vmem:[#allocation105_spill] sm:$0xff] }
 0x380   :  { %v7406_v63 = vsel %vm3992_vm0, 1.0, %v14800_v17  ;;  %15374 = vst [vmem:[#allocation49_spill] sm:$0xff] %v13390_v45  ;;  %15375 = vst [vmem:[#allocation72_spill] sm:$0xff] %v13392_v4  ;;  %v8001_v37 = vld [vmem:[%s14295_s2 + $0x20] ss:$8 sps:$4 sm:$0xff]   ;;  %v7414_v34 = vsel %vm4000_vm5, 1.0, %v14800_v17  ;;  %5566 = vmatprep.subr.bf16.mxu0 %v8003_v44  ;;  %vm639_vm6 = vcmp.eq.s32.totalorder %v15378_v59, %v15257_v33  ;;  %v3816_v26 = vadd.f32 %v7278_v62, %v3256_v9 }
 0x381   :  { %v6579_v52 = vsel %vm269_vm10, 1.0, %v14800_v17  ;;  %v13406_v56 = vpop.f32.mrb[12].mxu0  ;;  %v13408_v7 = vpop.f32.mrb[28].mxu1  ;;  %v8006_v47 = vld [vmem:[%s14295_s2 + $0x34] ss:$8 sps:$4 sm:$0xff]   ;;  %v15379_v4 = vld [vmem:[#allocation143_spill] sm:$0xff]  ;;  %v3824_v49 = vadd.f32 %v7286_v55, %v3264_v46  ;;  %vm701_vm11 = vcmp.eq.s32.totalorder %v15333_v50, %v15120_v1  ;;  %vm1253_vm9 = vcmp.eq.s32.totalorder %v15203_v42, %v15120_v1 }
 0x382   :  { %15376 = vst [vmem:[#allocation141_spill] sm:$0xff] %v13406_v56  ;;  %15377 = vst [vmem:[#allocation106_spill] sm:$0xff] %v13408_v7  ;;  %vm207_vm4 = vcmp.eq.s32.totalorder %v15379_v4, %v15257_v33  ;;  %v15380_v45 = vld [vmem:[#allocation149_spill] sm:$0xff]  ;;  %v6571_v56 = vsel %vm261_vm13, 1.0, %v14800_v17  ;;  %v13422_v44 = vpop.f32.mrb[13].mxu0  ;;  %v13424_v7 = vpop.f32.mrb[29].mxu1  ;;  %vm1261_vm3 = vcmp.eq.s32.totalorder %v15204_v32, %v15120_v1  ;;  %v4376_v62 = vadd.f32 %v7406_v63, %v3816_v26 }
 0x383   :  { %vm631_vm10 = vcmp.eq.s32.totalorder %v15380_v45, %v15257_v33  ;;  %15381 = vst [vmem:[#allocation147_spill] sm:$0xff] %v13422_v44  ;;  %15382 = vst [vmem:[#allocation145_spill] sm:$0xff] %v13424_v7  ;;  %v6699_v36 = vsel %vm693_vm2, 1.0, %v14800_v17  ;;  %v6707_v2 = vsel %vm701_vm11, 1.0, %v14800_v17  ;;  %v13432_v55 = vpop.f32.mrb[14].mxu0  ;;  %v13434_v9 = vpop.f32.mrb[30].mxu1  ;;  %v4384_v46 = vadd.f32 %v7414_v34, %v3824_v49  ;;  %5567 = vmatpush1.bf16.msra.mxu0 %v8001_v37 }
 0x384   :  { %v1077_v50 = vadd.f32 %v6699_v36, %v6571_v56  ;;  %v1085_v44 = vadd.f32 %v6707_v2, %v6579_v52  ;;  %v13436_v7 = vpop.f32.mrb[15].mxu0  ;;  %v13438_v3 = vpop.f32.mrb[31].mxu1  ;;  %v8004_v42 = vld [vmem:[%s14295_s2 + $0x30] ss:$8 sps:$4 sm:$0xff]   ;;  %v6827_v35 = vsel %vm1253_vm9, 1.0, %v14800_v17  ;;  %v6835_v32 = vsel %vm1261_vm3, 1.0, %v14800_v17  ;;  %5568 = vmatprep.subr.bf16.mxu0 %v8006_v47 }
 0x385   :  { %15383 = vst [vmem:[#allocation57_spill] sm:$0xff] %v13438_v3  ;;  %vm1813_vm7 = vcmp.eq.s32.totalorder %v15205_v25, %v15120_v1  ;;  %vm1821_vm12 = vcmp.eq.s32.totalorder %v15336_v41, %v15120_v1  ;;  %v13449_v2 = vpop.f32.mrb[32].mxu1  ;;  %v13451_v63 = vpop.f32.mrb[16].mxu0  ;;  %v8009_v26 = vld [vmem:[%s14295_s2 + $0x44] ss:$8 sps:$4 sm:$0xff]   ;;  %v4480_v36 = vpack.c.bf16 %v4384_v46, %v4376_v62  ;;  %vm2373_vm8 = vcmp.eq.s32.totalorder %v15337_v43, %v15120_v1 }
 0x386   :  { %15384 = vst [vmem:[#allocation153_spill] sm:$0xff] %v13451_v63  ;;  %v1637_v49 = vadd.f32 %v6827_v35, %v1077_v50  ;;  %v1645_v37 = vadd.f32 %v6835_v32, %v1085_v44  ;;  %v6955_v34 = vsel %vm1813_vm7, 1.0, %v14800_v17  ;;  %v13457_v52 = vpop.f32.mrb[33].mxu1  ;;  %v13459_v56 = vpop.f32.mrb[17].mxu0  ;;  %v6963_v3 = vsel %vm1821_vm12, 1.0, %v14800_v17  ;;  %v15398_v4 = vld [vmem:[#allocation111_spill] sm:$0xff] }
 0x387   :  { %15385 = vst [vmem:[#allocation155_spill] sm:$0xff] %v13457_v52  ;;  %15386 = vst [vmem:[#allocation165_spill] sm:$0xff] %v13459_v56  ;;  %vm2381_vm1 = vcmp.eq.s32.totalorder %v15338_v51, %v15120_v1  ;;  %vm2933_vm0 = vcmp.eq.s32.totalorder %v15339_v0, %v15120_v1  ;;  %v13468_v47 = vpop.f32.mrb[34].mxu1  ;;  %v13470_v32 = vpop.f32.mrb[18].mxu0  ;;  %7545 = vmatprep.mubr.msk.bf16.mxu1 %vm5013_vm14, %v4480_v36  ;;  %v7083_v44 = vsel %vm2373_vm8, 1.0, %v14800_v17  ;;  %5569 = vmatpush1.bf16.msra.mxu0 %v8004_v42 }
 0x388   :  { %15387 = vst [vmem:[#allocation18_spill] sm:$0xff] %v13468_v47  ;;  %15388 = vst [vmem:[#allocation130_spill] sm:$0xff] %v13470_v32  ;;  %v2197_v35 = vadd.f32 %v6955_v34, %v1637_v49  ;;  %v2205_v50 = vadd.f32 %v6963_v3, %v1645_v37  ;;  %v7091_v62 = vsel %vm2381_vm1, 1.0, %v14800_v17  ;;  %v13475_v46 = vpop.f32.mrb[35].mxu1  ;;  %v13477_v56 = vpop.f32.mrb[19].mxu0  ;;  %vm2941_vm5 = vcmp.eq.s32.totalorder %v15340_v53, %v15120_v1 }
 0x389   :  { %15389 = vst [vmem:[#allocation32_spill] sm:$0xff] %v13475_v46  ;;  %15390 = vst [vmem:[#allocation26_spill] sm:$0xff] %v13477_v56  ;;  %v8007_v63 = vld [vmem:[%s14295_s2 + $0x40] ss:$8 sps:$4 sm:$0xff]   ;;  %v7211_v36 = vsel %vm2933_vm0, 1.0, %v14800_v17  ;;  %vm3493_vm13 = vcmp.eq.s32.totalorder %v15341_v57, %v15120_v1  ;;  %vm3501_vm2 = vcmp.eq.s32.totalorder %v15342_v31, %v15120_v1  ;;  %v13489_v42 = vpop.f32.mrb[36].mxu1  ;;  %5570 = vmatprep.subr.bf16.mxu0 %v8009_v26 }
 0x38a   :  { %15391 = vst [vmem:[#allocation119_spill] sm:$0xff] %v13489_v42  ;;  %v13491_v3 = vpop.f32.mrb[20].mxu0  ;;  %v8012_v49 = vld [vmem:[%s14295_s2 + $0x54] ss:$8 sps:$4 sm:$0xff]   ;;  %v2757_v37 = vadd.f32 %v7083_v44, %v2197_v35  ;;  %v2765_v34 = vadd.f32 %v7091_v62, %v2205_v50  ;;  %v7219_v56 = vsel %vm2941_vm5, 1.0, %v14800_v17  ;;  %v7339_v32 = vsel %vm3493_vm13, 1.0, %v14800_v17 }
 0x38b   :  { %15392 = vst [vmem:[#allocation127_spill] sm:$0xff] %v13491_v3  ;;  %v13498_v46 = vpop.f32.mrb[37].mxu1  ;;  %v13500_v47 = vpop.f32.mrb[21].mxu0  ;;  %v7347_v52 = vsel %vm3501_vm2, 1.0, %v14800_v17  ;;  %vm4053_vm11 = vcmp.eq.s32.totalorder %v15343_v38, %v15120_v1  ;;  %vm4061_vm9 = vcmp.eq.s32.totalorder %v15344_v22, %v15120_v1  ;;  %v6509_v26 = vsel %vm199_vm15, 1.0, %v14800_v17  ;;  %5571 = vmatpush1.bf16.msra.mxu0 %v8007_v63 }
 0x38c   :  { %15393 = vst [vmem:[#allocation131_spill] sm:$0xff] %v13498_v46  ;;  %15394 = vst [vmem:[#allocation46_spill] sm:$0xff] %v13500_v47  ;;  %v13511_v35 = vpop.f32.mrb[38].mxu1  ;;  %v13513_v50 = vpop.f32.mrb[22].mxu0  ;;  %v3317_v44 = vadd.f32 %v7211_v36, %v2757_v37  ;;  %v3325_v62 = vadd.f32 %v7219_v56, %v2765_v34  ;;  %v7467_v47 = vsel %vm4053_vm11, 1.0, %v14800_v17  ;;  %v7475_v3 = vsel %vm4061_vm9, 1.0, %v14800_v17  ;;  %5572 = vmatprep.subr.bf16.mxu0 %v8012_v49 }
 0x38d   :  { %15395 = vst [vmem:[#allocation167_spill] sm:$0xff] %v13513_v50  ;;  %v13517_v46 = vpop.f32.mrb[39].mxu1  ;;  %v13519_v42 = vpop.f32.mrb[23].mxu0  ;;  %v8010_v1 = vld [vmem:[%s14295_s2 + $0x50] ss:$8 sps:$4 sm:$0xff]   ;;  %v6517_v27 = vsel %vm207_vm4, 1.0, %v14800_v17  ;;  %vm1191_vm15 = vcmp.eq.s32.totalorder %v15215_v11, %v15257_v33  ;;  %vm1208_vm4 = vcmp.eq.s32.totalorder %v15398_v4, %v15226_v28  ;;  %vm1759_vm3 = vcmp.eq.s32.totalorder %v15350_v40, %v15257_v33 }
 0x38e   :  { %15396 = vst [vmem:[#allocation136_spill] sm:$0xff] %v13517_v46  ;;  %15397 = vst [vmem:[#allocation54_spill] sm:$0xff] %v13519_v42  ;;  %v6637_v56 = vsel %vm631_vm10, 1.0, %v14800_v17  ;;  %v6645_v63 = vsel %vm639_vm6, 1.0, %v14800_v17  ;;  %v8015_v36 = vld [vmem:[%s14295_s2 + $0x64] ss:$8 sps:$4 sm:$0xff]   ;;  %v3877_v37 = vadd.f32 %v7339_v32, %v3317_v44  ;;  %v3885_v34 = vadd.f32 %v7347_v52, %v3325_v62 }
 0x38f   :  { %v1015_v45 = vadd.f32 %v6637_v56, %v6509_v26  ;;  %v1023_v42 = vadd.f32 %v6645_v63, %v6517_v27  ;;  %vm1199_vm10 = vcmp.eq.s32.totalorder %v11560_v19, %v15257_v33  ;;  %v6765_v59 = vsel %vm1191_vm15, 1.0, %v14800_v17  ;;  %5573 = vmatpush1.bf16.msra.mxu0 %v8010_v1  ;;  %v8013_v19 = vld [vmem:[%s14295_s2 + $0x60] ss:$8 sps:$4 sm:$0xff]   ;;  %v13573_v44 = vpop.f32.mrb[40].mxu1  ;;  %v8016_v1 = vld [vmem:[%s14295_s2 + $0x70] ss:$8 sps:$4 sm:$0xff]  }
 0x390   :  { %vm1751_vm6 = vcmp.eq.s32.totalorder %v15349_v8, %v15257_v33  ;;  %v4437_v11 = vadd.f32 %v7467_v47, %v3877_v37  ;;  %v4445_v49 = vadd.f32 %v7475_v3, %v3885_v34  ;;  %v6773_v50 = vsel %vm1199_vm10, 1.0, %v14800_v17  ;;  %5574 = vmatprep.subr.bf16.mxu0 %v8015_v36  ;;  %v15402_v36 = vld [vmem:[#allocation55_spill] sm:$0xff] }
 0x391   :  { %v1575_v46 = vadd.f32 %v6765_v59, %v1015_v45  ;;  %v1583_v52 = vadd.f32 %v6773_v50, %v1023_v42  ;;  %v6893_v32 = vsel %vm1751_vm6, 1.0, %v14800_v17  ;;  %v6901_v26 = vsel %vm1759_vm3, 1.0, %v14800_v17  ;;  %v8018_v42 = vld [vmem:[%s14295_s2 + $0x74] ss:$8 sps:$4 sm:$0xff]   ;;  %v15404_v59 = vld [vmem:[#allocation14_spill] sm:$0xff] }
 0x392   :  { %vm2311_vm7 = vcmp.eq.s32.totalorder %v15355_v29, %v15257_v33  ;;  %v4509_v8 = vpack.c.bf16 %v4445_v49, %v4437_v11  ;;  %vm2319_vm12 = vcmp.eq.s32.totalorder %v15356_v39, %v15257_v33  ;;  %vm2871_vm8 = vcmp.eq.s32.totalorder %v15361_v13, %v15257_v33  ;;  %v15403_v45 = vld [vmem:[#allocation12_spill] sm:$0xff] }
 0x393   :  { %v2135_v40 = vadd.f32 %v6893_v32, %v1575_v46  ;;  %v7021_v47 = vsel %vm2311_vm7, 1.0, %v14800_v17  ;;  %v2143_v3 = vadd.f32 %v6901_v26, %v1583_v52  ;;  %v7029_v50 = vsel %vm2319_vm12, 1.0, %v14800_v17  ;;  %5575 = vmatpush1.bf16.msra.mxu0 %v8013_v19  ;;  %v15406_v32 = vld [vmem:[#allocation16_spill] sm:$0xff]  ;;  %v15407_v19 = vld [vmem:[#allocation90_spill] sm:$0xff] }
 0x394   :  { %vm2879_vm1 = vcmp.eq.s32.totalorder %v15362_v61, %v15257_v33  ;;  %5325 = vmatmul.mubr.bf16.gmra.mrb[44].mxu0 %v4509_v8  ;;  %v7149_v46 = vsel %vm2871_vm8, 1.0, %v14800_v17  ;;  %vm3431_vm0 = vcmp.eq.s32.totalorder %v15363_v6, %v15257_v33  ;;  %vm3439_vm5 = vcmp.eq.s32.totalorder %v15368_v48, %v15257_v33  ;;  %v13580_v61 = vpop.f32.mrb[41].mxu1  ;;  %5576 = vmatprep.subr.bf16.mxu0 %v8018_v42 }
 0x395   :  { %v2695_v29 = vadd.f32 %v7021_v47, %v2135_v40  ;;  %v7157_v39 = vsel %vm2879_vm1, 1.0, %v14800_v17  ;;  %v2703_v62 = vadd.f32 %v7029_v50, %v2143_v3  ;;  %v7277_v13 = vsel %vm3431_vm0, 1.0, %v14800_v17  ;;  %v13590_v63 = vpop.f32.mrb[42].mxu1  ;;  %v15408_v40 = vld [vmem:[#allocation93_spill] sm:$0xff] }
 0x396   :  { %vm3991_vm13 = vcmp.eq.s32.totalorder %v15369_v20, %v15257_v33  ;;  %v15399_v27 = vmov 0   ;;  %v7285_v56 = vsel %vm3439_vm5, 1.0, %v14800_v17  ;;  %vm3999_vm2 = vcmp.eq.s32.totalorder %v15370_v58, %v15257_v33  ;;  %15400 = vst [vmem:[#allocation63_spill] sm:$0xff] %v13590_v63  ;;  %v15401_v20 = vld [vmem:[#allocation50_spill] sm:$0xff]  ;;  %v13601_v58 = vpop.f32.mrb[43].mxu1 }
 0x397   :  { %5594 = vmatprep.mubr.bf16.mxu0 %v15399_v27  ;;  %v3255_v6 = vadd.f32 %v7149_v46, %v2695_v29  ;;  %v7405_v48 = vsel %vm3991_vm13, 1.0, %v14800_v17  ;;  %vm215_vm11 = vcmp.eq.s32.totalorder %v15401_v20, %v15257_v33  ;;  %vm223_vm9 = vcmp.eq.s32.totalorder %v15402_v36, %v15257_v33  ;;  %15405 = vst [vmem:[#allocation60_spill] sm:$0xff] %v13601_v58  ;;  %v15409_v29 = vld [vmem:[#allocation19_spill] sm:$0xff]  ;;  %v15410_v46 = vld [vmem:[#allocation36_spill] sm:$0xff] }
 0x398   :  { %v3263_v37 = vadd.f32 %v7157_v39, %v2703_v62  ;;  %v7413_v34 = vsel %vm3999_vm2, 1.0, %v14800_v17  ;;  %vm648_vm15 = vcmp.eq.s32.totalorder %v15403_v45, %v15226_v28  ;;  %vm656_vm10 = vcmp.eq.s32.totalorder %v15404_v59, %v15226_v28  ;;  %5577 = vmatpush1.bf16.msra.mxu0 %v8016_v1  ;;  %v15412_v1 = vld [vmem:[#allocation23_spill] sm:$0xff] }
 0x399   :  { %v3815_v11 = vadd.f32 %v7277_v13, %v3255_v6  ;;  %v6654_v49 = vsel %vm648_vm15, 1.0, %v14800_v17  ;;  %v6662_v52 = vsel %vm656_vm10, 1.0, %v14800_v17  ;;  %vm1216_vm6 = vcmp.eq.s32.totalorder %v15406_v32, %v15226_v28 }
 0x39a   :  { %v3823_v26 = vadd.f32 %v7285_v56, %v3263_v37  ;;  %v1032_v8 = vadd.f32 %v6654_v49, %v15407_v19  ;;  %v1040_v47 = vadd.f32 %v6662_v52, %v15408_v40  ;;  %v6782_v42 = vsel %vm1208_vm4, 1.0, %v14800_v17  ;;  %v15411_v37 = vld [vmem:[#allocation21_spill] sm:$0xff]  ;;  %v15414_v19 = vld [vmem:[#allocation31_spill] sm:$0xff] }
 0x39b   :  { %v4375_v3 = vadd.f32 %v7405_v48, %v3815_v11  ;;  %v6790_v50 = vsel %vm1216_vm6, 1.0, %v14800_v17  ;;  %vm1768_vm3 = vcmp.eq.s32.totalorder %v15409_v29, %v15226_v28  ;;  %vm1776_vm7 = vcmp.eq.s32.totalorder %v15410_v46, %v15226_v28  ;;  %v15413_v48 = vld [vmem:[#allocation29_spill] sm:$0xff]  ;;  %v15415_v40 = vld [vmem:[#allocation35_spill] sm:$0xff] }
 0x39c   :  { %v4383_v39 = vadd.f32 %v7413_v34, %v3823_v26  ;;  %v1592_v62 = vadd.f32 %v6782_v42, %v1032_v8  ;;  %v1600_v13 = vadd.f32 %v6790_v50, %v1040_v47  ;;  %v6910_v6 = vsel %vm1768_vm3, 1.0, %v14800_v17 }
 0x39d   :  { %v6918_v56 = vsel %vm1776_vm7, 1.0, %v14800_v17  ;;  %vm2328_vm4 = vcmp.eq.s32.totalorder %v15411_v37, %v15226_v28  ;;  %vm2336_vm12 = vcmp.eq.s32.totalorder %v15412_v1, %v15226_v28  ;;  %vm2888_vm8 = vcmp.eq.s32.totalorder %v15413_v48, %v15226_v28 }
 0x39e   :  { %v4479_v11 = vpack.c.bf16 %v4383_v39, %v4375_v3  ;;  %v2152_v49 = vadd.f32 %v6910_v6, %v1592_v62  ;;  %v2160_v52 = vadd.f32 %v6918_v56, %v1600_v13  ;;  %v7038_v34 = vsel %vm2328_vm4, 1.0, %v14800_v17  ;;  %v15416_v3 = vld [vmem:[#allocation20_spill] sm:$0xff]  ;;  %v13636_v39 = vpop.f32.mrb[24].mxu0  ;;  %v15417_v6 = vld [vmem:[#allocation13_spill] sm:$0xff]  ;;  %v15418_v56 = vld [vmem:[#allocation42_spill] sm:$0xff] }
 0x39f   :  { %v7046_v26 = vsel %vm2336_vm12, 1.0, %v14800_v17  ;;  %vm2896_vm1 = vcmp.eq.s32.totalorder %v15414_v19, %v15226_v28  ;;  %v7166_v8 = vsel %vm2888_vm8, 1.0, %v14800_v17  ;;  %vm3448_vm0 = vcmp.eq.s32.totalorder %v15415_v40, %v15226_v28 }
 0x3a0   :  { %5390 = vmatmul.mubr.bf16.gmra.mrb[60].mxu1 %v4479_v11  ;;  %v2712_v47 = vadd.f32 %v7038_v34, %v2152_v49  ;;  %v2720_v42 = vadd.f32 %v7046_v26, %v2160_v52  ;;  %v7174_v50 = vsel %vm2896_vm1, 1.0, %v14800_v17  ;;  %vm3456_vm5 = vcmp.eq.s32.totalorder %v15416_v3, %v15226_v28  ;;  %v13644_v11 = vpop.f32.mrb[25].mxu0 }
 0x3a1   :  { %v7294_v62 = vsel %vm3448_vm0, 1.0, %v14800_v17  ;;  %v7302_v13 = vsel %vm3456_vm5, 1.0, %v14800_v17  ;;  %vm4008_vm13 = vcmp.eq.s32.totalorder %v15417_v6, %v15226_v28  ;;  %vm4016_vm2 = vcmp.eq.s32.totalorder %v15418_v56, %v15226_v28  ;;  %v13648_v27 = vpop.f32.mrb[26].mxu0 }
 0x3a2   :  { %v3272_v49 = vadd.f32 %v7166_v8, %v2712_v47  ;;  %v3280_v52 = vadd.f32 %v7174_v50, %v2720_v42  ;;  %v7422_v34 = vsel %vm4008_vm13, 1.0, %v14800_v17  ;;  %v7430_v26 = vsel %vm4016_vm2, 1.0, %v14800_v17  ;;  %15419 = vst [vmem:[#allocation126_spill] sm:$0xff] %v13648_v27  ;;  %v13662_v8 = vpop.f32.mrb[27].mxu0 }
 0x3a3   :  { %v6525_v58 = vsel %vm215_vm11, 1.0, %v14800_v17  ;;  %v6533_v63 = vsel %vm223_vm9, 1.0, %v14800_v17  ;;  %vm647_vm15 = vcmp.eq.s32.totalorder %v15403_v45, %v15257_v33  ;;  %vm655_vm10 = vcmp.eq.s32.totalorder %v15404_v59, %v15257_v33 }
 0x3a4   :  { %v3832_v47 = vadd.f32 %v7294_v62, %v3272_v49  ;;  %v3840_v42 = vadd.f32 %v7302_v13, %v3280_v52  ;;  %v6653_v50 = vsel %vm647_vm15, 1.0, %v14800_v17  ;;  %v6661_v20 = vsel %vm655_vm10, 1.0, %v14800_v17 }
 0x3a5   :  { %vm1224_vm11 = vcmp.eq.s32.totalorder %v15269_v14, %v15226_v28  ;;  %v1031_v27 = vadd.f32 %v6653_v50, %v6525_v58  ;;  %v1039_v36 = vadd.f32 %v6661_v20, %v6533_v63  ;;  %vm1207_vm9 = vcmp.eq.s32.totalorder %v15398_v4, %v15257_v33  ;;  %v15420_v50 = vld [vmem:[#allocation64_spill] sm:$0xff]  ;;  %v15421_v20 = vld [vmem:[#allocation87_spill] sm:$0xff] }
 0x3a6   :  { %vm1215_vm6 = vcmp.eq.s32.totalorder %v15406_v32, %v15257_v33  ;;  %v4392_v45 = vadd.f32 %v7422_v34, %v3832_v47  ;;  %v4400_v59 = vadd.f32 %v7430_v26, %v3840_v42  ;;  %v6781_v62 = vsel %vm1207_vm9, 1.0, %v14800_v17 }
 0x3a7   :  { %v6789_v13 = vsel %vm1215_vm6, 1.0, %v14800_v17  ;;  %v1591_v49 = vadd.f32 %v6781_v62, %v1031_v27  ;;  %vm1767_vm3 = vcmp.eq.s32.totalorder %v15409_v29, %v15257_v33  ;;  %vm1775_vm7 = vcmp.eq.s32.totalorder %v15410_v46, %v15257_v33 }
 0x3a8   :  { %v1599_v52 = vadd.f32 %v6789_v13, %v1039_v36  ;;  %v4488_v63 = vpack.c.bf16 %v4400_v59, %v4392_v45  ;;  %v6909_v4 = vsel %vm1767_vm3, 1.0, %v14800_v17  ;;  %v6917_v58 = vsel %vm1775_vm7, 1.0, %v14800_v17  ;;  %v15422_v36 = vld [vmem:[#allocation25_spill] sm:$0xff]  ;;  %v15424_v13 = vld [vmem:[#allocation95_spill] sm:$0xff] }
 0x3a9   :  { %vm2327_vm4 = vcmp.eq.s32.totalorder %v15411_v37, %v15257_v33  ;;  %v2151_v32 = vadd.f32 %v6909_v4, %v1591_v49  ;;  %vm2335_vm12 = vcmp.eq.s32.totalorder %v15412_v1, %v15257_v33  ;;  %vm2887_vm8 = vcmp.eq.s32.totalorder %v15413_v48, %v15257_v33 }
 0x3aa   :  { %v2159_v34 = vadd.f32 %v6917_v58, %v1599_v52  ;;  %v7037_v27 = vsel %vm2327_vm4, 1.0, %v14800_v17  ;;  %7546 = vmatprep.mubr.msk.bf16.mxu1 %vm5013_vm14, %v4488_v63  ;;  %v7045_v29 = vsel %vm2335_vm12, 1.0, %v14800_v17  ;;  %vm2895_vm1 = vcmp.eq.s32.totalorder %v15414_v19, %v15257_v33  ;;  %v15425_v52 = vld [vmem:[#allocation109_spill] sm:$0xff] }
 0x3ab   :  { %vm3447_vm0 = vcmp.eq.s32.totalorder %v15415_v40, %v15257_v33  ;;  %v2711_v46 = vadd.f32 %v7037_v27, %v2151_v32  ;;  %v7165_v26 = vsel %vm2887_vm8, 1.0, %v14800_v17  ;;  %v7173_v1 = vsel %vm2895_vm1, 1.0, %v14800_v17 }
 0x3ac   :  { %v2719_v37 = vadd.f32 %v7045_v29, %v2159_v34  ;;  %vm3455_vm5 = vcmp.eq.s32.totalorder %v15416_v3, %v15257_v33  ;;  %v7293_v47 = vsel %vm3447_vm0, 1.0, %v14800_v17  ;;  %vm4007_vm13 = vcmp.eq.s32.totalorder %v15417_v6, %v15257_v33  ;;  %v15423_v6 = vld [vmem:[#allocation27_spill] sm:$0xff] }
 0x3ad   :  { %vm4015_vm2 = vcmp.eq.s32.totalorder %v15418_v56, %v15257_v33  ;;  %v3271_v48 = vadd.f32 %v7165_v26, %v2711_v46  ;;  %v7301_v40 = vsel %vm3455_vm5, 1.0, %v14800_v17  ;;  %v7421_v42 = vsel %vm4007_vm13, 1.0, %v14800_v17 }
 0x3ae   :  { %v3279_v19 = vadd.f32 %v7173_v1, %v2719_v37  ;;  %vm231_vm15 = vcmp.eq.s32.totalorder %v15420_v50, %v15257_v33  ;;  %vm671_vm10 = vcmp.eq.s32.totalorder %v15421_v20, %v15257_v33  ;;  %v7429_v3 = vsel %vm4015_vm2, 1.0, %v14800_v17 }
 0x3af   :  { %vm240_vm9 = vcmp.eq.s32.totalorder %v15422_v36, %v15226_v28  ;;  %vm664_vm6 = vcmp.eq.s32.totalorder %v15423_v6, %v15226_v28  ;;  %vm1232_vm3 = vcmp.eq.s32.totalorder %v15270_v16, %v15226_v28  ;;  %v3831_v56 = vadd.f32 %v7293_v47, %v3271_v48 }
 0x3b0   :  { %v3839_v45 = vadd.f32 %v7301_v40, %v3279_v19  ;;  %v6550_v59 = vsel %vm240_vm9, 1.0, %v14800_v17  ;;  %v6670_v62 = vsel %vm664_vm6, 1.0, %v14800_v17  ;;  %v6798_v4 = vsel %vm1224_vm11, 1.0, %v14800_v17 }
 0x3b1   :  { %v1048_v49 = vadd.f32 %v6670_v62, %v15424_v13  ;;  %v1056_v63 = vadd.f32 %v15425_v52, %v6550_v59  ;;  %v6806_v58 = vsel %vm1232_vm3, 1.0, %v14800_v17  ;;  %v4391_v32 = vadd.f32 %v7421_v42, %v3831_v56  ;;  %v15426_v42 = vld [vmem:[#allocation89_spill] sm:$0xff]  ;;  %v15427_v13 = vld [vmem:[#allocation98_spill] sm:$0xff] }
 0x3b2   :  { %v4399_v34 = vadd.f32 %v7429_v3, %v3839_v45  ;;  %vm1784_vm7 = vcmp.eq.s32.totalorder %v15271_v23, %v15226_v28  ;;  %vm1792_vm4 = vcmp.eq.s32.totalorder %v15272_v12, %v15226_v28  ;;  %vm2344_vm11 = vcmp.eq.s32.totalorder %v15273_v60, %v15226_v28 }
 0x3b3   :  { %v1608_v27 = vadd.f32 %v6798_v4, %v1048_v49  ;;  %v1616_v29 = vadd.f32 %v6806_v58, %v1056_v63  ;;  %v6926_v46 = vsel %vm1784_vm7, 1.0, %v14800_v17  ;;  %v6934_v37 = vsel %vm1792_vm4, 1.0, %v14800_v17  ;;  %v15428_v49 = vld [vmem:[#allocation104_spill] sm:$0xff] }
 0x3b4   :  { %v4487_v26 = vpack.c.bf16 %v4399_v34, %v4391_v32  ;;  %vm2352_vm12 = vcmp.eq.s32.totalorder %v15274_v54, %v15226_v28  ;;  %vm2904_vm8 = vcmp.eq.s32.totalorder %v15275_v5, %v15226_v28  ;;  %v7054_v48 = vsel %vm2344_vm11, 1.0, %v14800_v17 }
 0x3b5   :  { %v2168_v1 = vadd.f32 %v6926_v46, %v1608_v27  ;;  %v2176_v47 = vadd.f32 %v6934_v37, %v1616_v29  ;;  %v7062_v19 = vsel %vm2352_vm12, 1.0, %v14800_v17  ;;  %vm2912_vm1 = vcmp.eq.s32.totalorder %v15276_v24, %v15226_v28 }
 0x3b6   :  { %5398 = vmatmul.mubr.bf16.gmra.mrb[64].mxu1 %v4487_v26  ;;  %v7182_v40 = vsel %vm2904_vm8, 1.0, %v14800_v17  ;;  %vm3464_vm0 = vcmp.eq.s32.totalorder %v15277_v18, %v15226_v28  ;;  %vm3472_vm5 = vcmp.eq.s32.totalorder %v15426_v42, %v15226_v28  ;;  %v7190_v45 = vsel %vm2912_vm1, 1.0, %v14800_v17 }
 0x3b7   :  { %v2728_v3 = vadd.f32 %v7054_v48, %v2168_v1  ;;  %v2736_v56 = vadd.f32 %v7062_v19, %v2176_v47  ;;  %v7310_v59 = vsel %vm3464_vm0, 1.0, %v14800_v17  ;;  %v7318_v62 = vsel %vm3472_vm5, 1.0, %v14800_v17 }
 0x3b8   :  { %vm4024_vm13 = vcmp.eq.s32.totalorder %v15427_v13, %v15226_v28  ;;  %vm4032_vm2 = vcmp.eq.s32.totalorder %v15428_v49, %v15226_v28  ;;  %vm239_vm9 = vcmp.eq.s32.totalorder %v15422_v36, %v15257_v33  ;;  %v6541_v32 = vsel %vm231_vm15, 1.0, %v14800_v17 }
 0x3b9   :  { %v3288_v52 = vadd.f32 %v7182_v40, %v2728_v3  ;;  %v3296_v63 = vadd.f32 %v7190_v45, %v2736_v56  ;;  %v7438_v4 = vsel %vm4024_vm13, 1.0, %v14800_v17  ;;  %v7446_v58 = vsel %vm4032_vm2, 1.0, %v14800_v17 }
 0x3ba   :  { %v6549_v34 = vsel %vm239_vm9, 1.0, %v14800_v17  ;;  %vm663_vm6 = vcmp.eq.s32.totalorder %v15423_v6, %v15257_v33  ;;  %v6677_v36 = vsel %vm671_vm10, 1.0, %v14800_v17  ;;  %vm1223_vm3 = vcmp.eq.s32.totalorder %v15269_v14, %v15257_v33 }
 0x3bb   :  { %v3848_v27 = vadd.f32 %v7310_v59, %v3288_v52  ;;  %v3856_v29 = vadd.f32 %v7318_v62, %v3296_v63  ;;  %v6669_v46 = vsel %vm663_vm6, 1.0, %v14800_v17  ;;  %v1055_v37 = vadd.f32 %v6677_v36, %v6549_v34 }
 0x3bc   :  { %v1047_v26 = vadd.f32 %v6669_v46, %v6541_v32  ;;  %vm1231_vm15 = vcmp.eq.s32.totalorder %v15270_v16, %v15257_v33  ;;  %vm1783_vm7 = vcmp.eq.s32.totalorder %v15271_v23, %v15257_v33  ;;  %v6797_v20 = vsel %vm1223_vm3, 1.0, %v14800_v17 }
 0x3bd   :  { %v4408_v50 = vadd.f32 %v7438_v4, %v3848_v27  ;;  %v4416_v6 = vadd.f32 %v7446_v58, %v3856_v29  ;;  %v6805_v1 = vsel %vm1231_vm15, 1.0, %v14800_v17  ;;  %vm1791_vm10 = vcmp.eq.s32.totalorder %v15272_v12, %v15257_v33  ;;  %v15429_v4 = vld [vmem:[#allocation53_spill] sm:$0xff]  ;;  %v15430_v58 = vld [vmem:[#allocation62_spill] sm:$0xff] }
 0x3be   :  { %v1607_v47 = vadd.f32 %v6797_v20, %v1047_v26  ;;  %v1615_v48 = vadd.f32 %v6805_v1, %v1055_v37  ;;  %v6925_v19 = vsel %vm1783_vm7, 1.0, %v14800_v17  ;;  %v6933_v40 = vsel %vm1791_vm10, 1.0, %v14800_v17  ;;  %v15433_v37 = vld [vmem:[#allocation91_spill] sm:$0xff] }
 0x3bf   :  { %v4496_v14 = vpack.c.bf16 %v4416_v6, %v4408_v50  ;;  %vm2343_vm4 = vcmp.eq.s32.totalorder %v15273_v60, %v15257_v33  ;;  %vm2351_vm11 = vcmp.eq.s32.totalorder %v15274_v54, %v15257_v33  ;;  %vm2903_vm12 = vcmp.eq.s32.totalorder %v15275_v5, %v15257_v33  ;;  %v13803_v5 = vpop.f32.mrb[44].mxu1  ;;  %v15434_v50 = vld [vmem:[#allocation112_spill] sm:$0xff] }
 0x3c0   :  { %v2167_v16 = vadd.f32 %v6925_v19, %v1607_v47  ;;  %v2175_v23 = vadd.f32 %v6933_v40, %v1615_v48  ;;  %v7053_v3 = vsel %vm2343_vm4, 1.0, %v14800_v17  ;;  %v7061_v56 = vsel %vm2351_vm11, 1.0, %v14800_v17  ;;  %v13807_v63 = vpop.f32.mrb[45].mxu1 }
 0x3c1   :  { %7547 = vmatprep.mubr.msk.bf16.mxu1 %vm5013_vm14, %v4496_v14  ;;  %vm2911_vm8 = vcmp.eq.s32.totalorder %v15276_v24, %v15257_v33  ;;  %vm3463_vm1 = vcmp.eq.s32.totalorder %v15277_v18, %v15257_v33  ;;  %vm3471_vm0 = vcmp.eq.s32.totalorder %v15426_v42, %v15257_v33  ;;  %v7181_v54 = vsel %vm2903_vm12, 1.0, %v14800_v17  ;;  %v13817_v32 = vpop.f32.mrb[46].mxu1 }
 0x3c2   :  { %v2727_v12 = vadd.f32 %v7053_v3, %v2167_v16  ;;  %v2735_v60 = vadd.f32 %v7061_v56, %v2175_v23  ;;  %v7189_v45 = vsel %vm2911_vm8, 1.0, %v14800_v17  ;;  %v7309_v59 = vsel %vm3463_vm1, 1.0, %v14800_v17  ;;  %v13821_v46 = vpop.f32.mrb[47].mxu1 }
 0x3c3   :  { %v7317_v62 = vsel %vm3471_vm0, 1.0, %v14800_v17  ;;  %vm4023_vm5 = vcmp.eq.s32.totalorder %v15427_v13, %v15257_v33  ;;  %vm4031_vm13 = vcmp.eq.s32.totalorder %v15428_v49, %v15257_v33  ;;  %vm248_vm2 = vcmp.eq.s32.totalorder %v15429_v4, %v15226_v28  ;;  %v15431_v13 = vld [vmem:[#allocation65_spill] sm:$0xff]  ;;  %v15432_v49 = vld [vmem:[#allocation78_spill] sm:$0xff] }
 0x3c4   :  { %v3287_v24 = vadd.f32 %v7181_v54, %v2727_v12  ;;  %v3295_v18 = vadd.f32 %v7189_v45, %v2735_v60  ;;  %v7437_v42 = vsel %vm4023_vm5, 1.0, %v14800_v17  ;;  %v7445_v52 = vsel %vm4031_vm13, 1.0, %v14800_v17  ;;  %v15435_v12 = vld [vmem:[#allocation110_spill] sm:$0xff] }
 0x3c5   :  { %vm256_vm9 = vcmp.eq.s32.totalorder %v15430_v58, %v15226_v28  ;;  %vm688_vm6 = vcmp.eq.s32.totalorder %v15431_v13, %v15226_v28  ;;  %vm1240_vm3 = vcmp.eq.s32.totalorder %v15432_v49, %v15226_v28  ;;  %v6558_v27 = vsel %vm248_vm2, 1.0, %v14800_v17  ;;  %v15436_v54 = vld [vmem:[#allocation30_spill] sm:$0xff] }
 0x3c6   :  { %v3847_v34 = vadd.f32 %v7309_v59, %v3287_v24  ;;  %v3855_v36 = vadd.f32 %v7317_v62, %v3295_v18  ;;  %v6566_v29 = vsel %vm256_vm9, 1.0, %v14800_v17  ;;  %vm679_vm15 = vcmp.eq.s32.totalorder %v15433_v37, %v15257_v33  ;;  %v15437_v62 = vld [vmem:[#allocation81_spill] sm:$0xff] }
 0x3c7   :  { %v6694_v26 = vsel %vm688_vm6, 1.0, %v14800_v17  ;;  %v1064_v6 = vadd.f32 %v15434_v50, %v6558_v27  ;;  %vm1248_vm7 = vcmp.eq.s32.totalorder %v15181_v30, %v15226_v28  ;;  %v6814_v20 = vsel %vm1240_vm3, 1.0, %v14800_v17  ;;  %v15440_v50 = vld [vmem:[#allocation43_spill] sm:$0xff] }
 0x3c8   :  { %v4407_v1 = vadd.f32 %v7437_v42, %v3847_v34  ;;  %v4415_v47 = vadd.f32 %v7445_v52, %v3855_v36  ;;  %v1072_v48 = vadd.f32 %v6694_v26, %v6566_v29  ;;  %v6822_v19 = vsel %vm1248_vm7, 1.0, %v14800_v17  ;;  %v15438_v52 = vld [vmem:[#allocation56_spill] sm:$0xff]  ;;  %v15439_v34 = vld [vmem:[#allocation83_spill] sm:$0xff]  ;;  %v13853_v36 = vpop.f32.mrb[28].mxu0 }
 0x3c9   :  { %v1624_v14 = vadd.f32 %v6814_v20, %v1064_v6  ;;  %vm1800_vm10 = vcmp.eq.s32.totalorder %v15182_v15, %v15226_v28  ;;  %vm1808_vm4 = vcmp.eq.s32.totalorder %v15183_v21, %v15226_v28  ;;  %vm2360_vm11 = vcmp.eq.s32.totalorder %v15184_v10, %v15226_v28  ;;  %v13859_v6 = vpop.f32.mrb[29].mxu0 }
 0x3ca   :  { %v4495_v40 = vpack.c.bf16 %v4415_v47, %v4407_v1  ;;  %v1632_v16 = vadd.f32 %v6822_v19, %v1072_v48  ;;  %v6942_v23 = vsel %vm1800_vm10, 1.0, %v14800_v17  ;;  %v6950_v3 = vsel %vm1808_vm4, 1.0, %v14800_v17  ;;  %v15441_v1 = vld [vmem:[#allocation59_spill] sm:$0xff]  ;;  %v15442_v48 = vld [vmem:[#allocation154_spill] sm:$0xff]  ;;  %v15443_v19 = vld [vmem:[#allocation177_spill] sm:$0xff] }
 0x3cb   :  { %v2184_v56 = vadd.f32 %v6942_v23, %v1624_v14  ;;  %vm2368_vm12 = vcmp.eq.s32.totalorder %v15435_v12, %v15226_v28  ;;  %v7070_v60 = vsel %vm2360_vm11, 1.0, %v14800_v17  ;;  %vm2920_vm8 = vcmp.eq.s32.totalorder %v15436_v54, %v15226_v28 }
 0x3cc   :  { %5406 = vmatmul.mubr.bf16.gmra.mrb[68].mxu1 %v4495_v40  ;;  %v2192_v45 = vadd.f32 %v6950_v3, %v1632_v16  ;;  %v7078_v59 = vsel %vm2368_vm12, 1.0, %v14800_v17  ;;  %vm2928_vm1 = vcmp.eq.s32.totalorder %v15437_v62, %v15226_v28  ;;  %v7198_v24 = vsel %vm2920_vm8, 1.0, %v14800_v17  ;;  %v13866_v40 = vpop.f32.mrb[30].mxu0  ;;  %v15444_v3 = vld [vmem:[#allocation140_spill] sm:$0xff] }
 0x3cd   :  { %v2744_v18 = vadd.f32 %v7070_v60, %v2184_v56  ;;  %v7206_v42 = vsel %vm2928_vm1, 1.0, %v14800_v17  ;;  %vm3480_vm0 = vcmp.eq.s32.totalorder %v15438_v52, %v15226_v28  ;;  %vm3488_vm5 = vcmp.eq.s32.totalorder %v15439_v34, %v15226_v28  ;;  %v15445_v56 = vld [vmem:[#allocation181_spill] sm:$0xff] }
 0x3ce   :  { %v2752_v27 = vadd.f32 %v7078_v59, %v2192_v45  ;;  %v7326_v29 = vsel %vm3480_vm0, 1.0, %v14800_v17  ;;  %v7334_v26 = vsel %vm3488_vm5, 1.0, %v14800_v17  ;;  %vm4040_vm13 = vcmp.eq.s32.totalorder %v15440_v50, %v15226_v28  ;;  %v13873_v45 = vpop.f32.mrb[31].mxu0 }
 0x3cf   :  { %v3304_v20 = vadd.f32 %v7198_v24, %v2744_v18  ;;  %vm4048_vm2 = vcmp.eq.s32.totalorder %v15441_v1, %v15226_v28  ;;  %v7454_v47 = vsel %vm4040_vm13, 1.0, %v14800_v17  ;;  %v7648_v14 = vadd.f32 %v15443_v19, %v15442_v48 }
 0x3d0   :  { %v3312_v16 = vadd.f32 %v7206_v42, %v2752_v27  ;;  %v7462_v23 = vsel %vm4048_vm2, 1.0, %v14800_v17  ;;  %v7712_v60 = vadd.f32 %v15445_v56, %v15444_v3  ;;  %vm247_vm9 = vcmp.eq.s32.totalorder %v15429_v4, %v15257_v33 }
 0x3d1   :  { %v3864_v59 = vadd.f32 %v7326_v29, %v3304_v20  ;;  %vm255_vm6 = vcmp.eq.s32.totalorder %v15430_v58, %v15257_v33  ;;  %v6557_v24 = vsel %vm247_vm9, 1.0, %v14800_v17  ;;  %vm687_vm3 = vcmp.eq.s32.totalorder %v15431_v13, %v15257_v33  ;;  %v15446_v58 = vld [vmem:[#allocation115_spill] sm:$0xff] }
 0x3d2   :  { %v3872_v18 = vadd.f32 %v7334_v26, %v3312_v16  ;;  %v13880_v42 = vadd.f32 %v7712_v60, %v7648_v14  ;;  %v6565_v27 = vsel %vm255_vm6, 1.0, %v14800_v17  ;;  %v6685_v4 = vsel %vm679_vm15, 1.0, %v14800_v17 }
 0x3d3   :  { %v4424_v48 = vadd.f32 %v7454_v47, %v3864_v59  ;;  %v6693_v29 = vsel %vm687_vm3, 1.0, %v14800_v17  ;;  %v1063_v20 = vadd.f32 %v6685_v4, %v6557_v24  ;;  %vm1239_vm7 = vcmp.eq.s32.totalorder %v15432_v49, %v15257_v33  ;;  %v15449_v4 = vld [vmem:[#allocation66_spill] sm:$0xff] }
 0x3d4   :  { %vm1264_vm10 = vcmp.eq.s32.totalorder %v15446_v58, %v15226_v28  ;;  %v4432_v13 = vadd.f32 %v7462_v23, %v3872_v18  ;;  %v1071_v26 = vadd.f32 %v6693_v29, %v6565_v27  ;;  %vm1247_vm4 = vcmp.eq.s32.totalorder %v15181_v30, %v15257_v33  ;;  %v15447_v27 = vld [vmem:[#allocation114_spill] sm:$0xff]  ;;  %v15450_v29 = vld [vmem:[#allocation79_spill] sm:$0xff] }
 0x3d5   :  { %v6813_v19 = vsel %vm1239_vm7, 1.0, %v14800_v17  ;;  %v6821_v37 = vsel %vm1247_vm4, 1.0, %v14800_v17  ;;  %vm1799_vm15 = vcmp.eq.s32.totalorder %v15182_v15, %v15257_v33  ;;  %vm1807_vm11 = vcmp.eq.s32.totalorder %v15183_v21, %v15257_v33 }
 0x3d6   :  { %v1623_v14 = vadd.f32 %v6813_v19, %v1063_v20  ;;  %v4504_v49 = vpack.c.bf16 %v4432_v13, %v4424_v48  ;;  %v1631_v47 = vadd.f32 %v6821_v37, %v1071_v26  ;;  %v6941_v16 = vsel %vm1799_vm15, 1.0, %v14800_v17  ;;  %v15451_v19 = vld [vmem:[#allocation74_spill] sm:$0xff] }
 0x3d7   :  { %v6949_v23 = vsel %vm1807_vm11, 1.0, %v14800_v17  ;;  %vm2359_vm12 = vcmp.eq.s32.totalorder %v15184_v10, %v15257_v33  ;;  %vm2367_vm8 = vcmp.eq.s32.totalorder %v15435_v12, %v15257_v33  ;;  %vm2919_vm1 = vcmp.eq.s32.totalorder %v15436_v54, %v15257_v33 }
 0x3d8   :  { %v2183_v3 = vadd.f32 %v6941_v16, %v1623_v14  ;;  %7548 = vmatprep.mubr.msk.bf16.mxu1 %vm5013_vm14, %v4504_v49  ;;  %v2191_v15 = vadd.f32 %v6949_v23, %v1631_v47  ;;  %v7069_v21 = vsel %vm2359_vm12, 1.0, %v14800_v17  ;;  %v7077_v30 = vsel %vm2367_vm8, 1.0, %v14800_v17  ;;  %v15452_v14 = vld [vmem:[#allocation97_spill] sm:$0xff] }
 0x3d9   :  { %vm2927_vm0 = vcmp.eq.s32.totalorder %v15437_v62, %v15257_v33  ;;  %v7197_v60 = vsel %vm2919_vm1, 1.0, %v14800_v17  ;;  %vm3479_vm5 = vcmp.eq.s32.totalorder %v15438_v52, %v15257_v33  ;;  %vm3487_vm13 = vcmp.eq.s32.totalorder %v15439_v34, %v15257_v33  ;;  %v15448_v34 = vld [vmem:[#allocation116_spill] sm:$0xff] }
 0x3da   :  { %v2743_v56 = vadd.f32 %v7069_v21, %v2183_v3  ;;  %v7205_v10 = vsel %vm2927_vm0, 1.0, %v14800_v17  ;;  %v2751_v12 = vadd.f32 %v7077_v30, %v2191_v15  ;;  %v7325_v54 = vsel %vm3479_vm5, 1.0, %v14800_v17 }
 0x3db   :  { %vm4039_vm2 = vcmp.eq.s32.totalorder %v15440_v50, %v15257_v33  ;;  %v7333_v62 = vsel %vm3487_vm13, 1.0, %v14800_v17  ;;  %vm4047_vm9 = vcmp.eq.s32.totalorder %v15441_v1, %v15257_v33  ;;  %vm264_vm6 = vcmp.eq.s32.totalorder %v15447_v27, %v15226_v28 }
 0x3dc   :  { %v3303_v59 = vadd.f32 %v7197_v60, %v2743_v56  ;;  %v7453_v24 = vsel %vm4039_vm2, 1.0, %v14800_v17  ;;  %v3311_v18 = vadd.f32 %v7205_v10, %v2751_v12  ;;  %v7461_v52 = vsel %vm4047_vm9, 1.0, %v14800_v17 }
 0x3dd   :  { %vm696_vm3 = vcmp.eq.s32.totalorder %v15448_v34, %v15226_v28  ;;  %vm271_vm7 = vcmp.eq.s32.totalorder %v15449_v4, %v15257_v33  ;;  %v6574_v48 = vsel %vm264_vm6, 1.0, %v14800_v17  ;;  %vm704_vm4 = vcmp.eq.s32.totalorder %v15450_v29, %v15226_v28 }
 0x3de   :  { %v3863_v50 = vadd.f32 %v7325_v54, %v3303_v59  ;;  %v6702_v1 = vsel %vm696_vm3, 1.0, %v14800_v17  ;;  %v3871_v20 = vadd.f32 %v7333_v62, %v3311_v18  ;;  %v6710_v13 = vsel %vm704_vm4, 1.0, %v14800_v17 }
 0x3df   :  { %v1080_v26 = vadd.f32 %v6702_v1, %v6574_v48  ;;  %vm1256_vm15 = vcmp.eq.s32.totalorder %v15451_v19, %v15226_v28  ;;  %v1088_v49 = vadd.f32 %v6710_v13, %v15452_v14  ;;  %v6838_v16 = vsel %vm1264_vm10, 1.0, %v14800_v17 }
 0x3e0   :  { %v4423_v37 = vadd.f32 %v7453_v24, %v3863_v50  ;;  %v6830_v47 = vsel %vm1256_vm15, 1.0, %v14800_v17  ;;  %v4431_v23 = vadd.f32 %v7461_v52, %v3871_v20  ;;  %vm1816_vm11 = vcmp.eq.s32.totalorder %v15205_v25, %v15226_v28 }
 0x3e1   :  { %v1640_v3 = vadd.f32 %v6830_v47, %v1080_v26  ;;  %vm1824_vm12 = vcmp.eq.s32.totalorder %v15336_v41, %v15226_v28  ;;  %v1648_v15 = vadd.f32 %v6838_v16, %v1088_v49  ;;  %v6958_v21 = vsel %vm1816_vm11, 1.0, %v14800_v17  ;;  %v15453_v26 = vld [vmem:[#allocation184_spill] sm:$0xff]  ;;  %v15455_v49 = vld [vmem:[#allocation45_spill] sm:$0xff] }
 0x3e2   :  { %v6966_v30 = vsel %vm1824_vm12, 1.0, %v14800_v17  ;;  %vm2376_vm8 = vcmp.eq.s32.totalorder %v15337_v43, %v15226_v28  ;;  %v4503_v56 = vpack.c.bf16 %v4431_v23, %v4423_v37  ;;  %vm2384_vm10 = vcmp.eq.s32.totalorder %v15338_v51, %v15226_v28  ;;  %v15454_v37 = vld [vmem:[#allocation173_spill] sm:$0xff]  ;;  %v15456_v47 = vld [vmem:[#allocation144_spill] sm:$0xff] }
 0x3e3   :  { %v2200_v60 = vadd.f32 %v6958_v21, %v1640_v3  ;;  %v7086_v10 = vsel %vm2376_vm8, 1.0, %v14800_v17  ;;  %v2208_v12 = vadd.f32 %v6966_v30, %v1648_v15  ;;  %v7094_v54 = vsel %vm2384_vm10, 1.0, %v14800_v17 }
 0x3e4   :  { %vm2936_vm1 = vcmp.eq.s32.totalorder %v15339_v0, %v15226_v28  ;;  %vm2944_vm0 = vcmp.eq.s32.totalorder %v15340_v53, %v15226_v28  ;;  %5414 = vmatmul.mubr.bf16.gmra.mrb[72].mxu1 %v4503_v56  ;;  %vm3496_vm5 = vcmp.eq.s32.totalorder %v15341_v57, %v15226_v28  ;;  %vm3504_vm13 = vcmp.eq.s32.totalorder %v15342_v31, %v15226_v28 }
 0x3e5   :  { %v2760_v59 = vadd.f32 %v7086_v10, %v2200_v60  ;;  %v7214_v62 = vsel %vm2936_vm1, 1.0, %v14800_v17  ;;  %v7222_v24 = vsel %vm2944_vm0, 1.0, %v14800_v17  ;;  %v2768_v18 = vadd.f32 %v7094_v54, %v2208_v12 }
 0x3e6   :  { %v7342_v52 = vsel %vm3496_vm5, 1.0, %v14800_v17  ;;  %vm4056_vm2 = vcmp.eq.s32.totalorder %v15343_v38, %v15226_v28  ;;  %v7350_v48 = vsel %vm3504_vm13, 1.0, %v14800_v17  ;;  %vm4064_vm9 = vcmp.eq.s32.totalorder %v15344_v22, %v15226_v28 }
 0x3e7   :  { %v3320_v50 = vadd.f32 %v7214_v62, %v2760_v59  ;;  %v7470_v1 = vsel %vm4056_vm2, 1.0, %v14800_v17  ;;  %v3328_v20 = vadd.f32 %v7222_v24, %v2768_v18  ;;  %v7478_v13 = vsel %vm4064_vm9, 1.0, %v14800_v17  ;;  %v14016_v18 = vpop.f32.mrb[32].mxu0 }
 0x3e8   :  { %v7651_v14 = vadd.f32 %v15454_v37, %v15453_v26  ;;  %v7715_v16 = vadd.f32 %v15456_v47, %v15455_v49  ;;  %vm263_vm6 = vcmp.eq.s32.totalorder %v15447_v27, %v15257_v33  ;;  %v6581_v28 = vsel %vm271_vm7, 1.0, %v14800_v17 }
 0x3e9   :  { %v3880_v23 = vadd.f32 %v7342_v52, %v3320_v50  ;;  %vm695_vm3 = vcmp.eq.s32.totalorder %v15448_v34, %v15257_v33  ;;  %v3888_v3 = vadd.f32 %v7350_v48, %v3328_v20  ;;  %v6573_v21 = vsel %vm263_vm6, 1.0, %v14800_v17 }
 0x3ea   :  { %v13988_v15 = vadd.f32 %v7715_v16, %v7651_v14  ;;  %vm703_vm4 = vcmp.eq.s32.totalorder %v15450_v29, %v15257_v33  ;;  %v6701_v56 = vsel %vm695_vm3, 1.0, %v14800_v17  ;;  %vm1255_vm15 = vcmp.eq.s32.totalorder %v15451_v19, %v15257_v33 }
 0x3eb   :  { %v4440_v30 = vadd.f32 %v7470_v1, %v3880_v23  ;;  %v6709_v27 = vsel %vm703_vm4, 1.0, %v14800_v17  ;;  %v4448_v4 = vadd.f32 %v7478_v13, %v3888_v3  ;;  %v1079_v60 = vadd.f32 %v6701_v56, %v6573_v21  ;;  %v14029_v1 = vpop.f32.mrb[48].mxu1  ;;  %v15460_v3 = vld [vmem:[#allocation135_spill] sm:$0xff] }
 0x3ec   :  { %v1087_v10 = vadd.f32 %v6709_v27, %v6581_v28  ;;  %vm1263_vm7 = vcmp.eq.s32.totalorder %v15446_v58, %v15257_v33  ;;  %v6829_v34 = vsel %vm1255_vm15, 1.0, %v14800_v17  ;;  %vm1815_vm11 = vcmp.eq.s32.totalorder %v15205_v25, %v15257_v33  ;;  %v5369_v26 = vpop.f32.mrb[49].mxu1  ;;  %v15459_v28 = vld [vmem:[#allocation103_spill] sm:$0xff]  ;;  %v15463_v27 = vld [vmem:[#allocation61_spill] sm:$0xff] }
 0x3ed   :  { %v6837_v12 = vsel %vm1263_vm7, 1.0, %v14800_v17  ;;  %vm1823_vm12 = vcmp.eq.s32.totalorder %v15336_v41, %v15257_v33  ;;  %v4512_v29 = vpack.c.bf16 %v4448_v4, %v4440_v30  ;;  %v1639_v54 = vadd.f32 %v6829_v34, %v1079_v60  ;;  %v5370_v23 = vpop.f32.mrb[50].mxu1  ;;  %v15461_v30 = vld [vmem:[#allocation92_spill] sm:$0xff]  ;;  %v15465_v4 = vld [vmem:[#allocation37_spill] sm:$0xff]  ;;  %v15466_v60 = vld [vmem:[#allocation183_spill] sm:$0xff] }
 0x3ee   :  { %v1647_v59 = vadd.f32 %v6837_v12, %v1087_v10  ;;  %v6957_v19 = vsel %vm1815_vm11, 1.0, %v14800_v17  ;;  %v6965_v62 = vsel %vm1823_vm12, 1.0, %v14800_v17  ;;  %vm2375_vm8 = vcmp.eq.s32.totalorder %v15337_v43, %v15257_v33  ;;  %v5372_v34 = vpop.f32.mrb[51].mxu1 }
 0x3ef   :  { %vm2383_vm10 = vcmp.eq.s32.totalorder %v15338_v51, %v15257_v33  ;;  %vm2935_vm1 = vcmp.eq.s32.totalorder %v15339_v0, %v15257_v33  ;;  %7549 = vmatprep.mubr.msk.bf16.mxu1 %vm5013_vm14, %v4512_v29  ;;  %v2199_v25 = vadd.f32 %v6957_v19, %v1639_v54  ;;  %v7085_v58 = vsel %vm2375_vm8, 1.0, %v14800_v17  ;;  %v14025_v51 = vpop.f32.mrb[33].mxu0  ;;  %v15467_v54 = vld [vmem:[#allocation17_spill] sm:$0xff]  ;;  %v15483_v34 = vld [vmem:[#allocation160_spill] sm:$0xff] }
 0x3f0   :  { %v2207_v41 = vadd.f32 %v6965_v62, %v1647_v59  ;;  %v7093_v24 = vsel %vm2383_vm10, 1.0, %v14800_v17  ;;  %vm2943_vm0 = vcmp.eq.s32.totalorder %v15340_v53, %v15257_v33  ;;  %v7213_v43 = vsel %vm2935_vm1, 1.0, %v14800_v17  ;;  %v14031_v20 = vpop.f32.mrb[34].mxu0  ;;  %v15468_v59 = vld [vmem:[#allocation52_spill] sm:$0xff]  ;;  %v15470_v62 = vld [vmem:[#allocation49_spill] sm:$0xff] }
 0x3f1   :  { %vm3495_vm5 = vcmp.eq.s32.totalorder %v15341_v57, %v15257_v33  ;;  %vm3503_vm13 = vcmp.eq.s32.totalorder %v15342_v31, %v15257_v33  ;;  %v2759_v0 = vadd.f32 %v7085_v58, %v2199_v25  ;;  %v7221_v50 = vsel %vm2943_vm0, 1.0, %v14800_v17  ;;  %v15457_v57 = vld [vmem:[#allocation182_spill] sm:$0xff]  ;;  %v7802_v37 = vpop.f32.mrb[35].mxu0 }
 0x3f2   :  { %v2767_v52 = vadd.f32 %v7093_v24, %v2207_v41  ;;  %v7341_v48 = vsel %vm3495_vm5, 1.0, %v14800_v17  ;;  %v7349_v53 = vsel %vm3503_vm13, 1.0, %v14800_v17  ;;  %vm4055_vm14 = vcmp.eq.s32.totalorder %v15343_v38, %v15257_v33  ;;  %v15458_v31 = vld [vmem:[#allocation166_spill] sm:$0xff]  ;;  %v15462_v38 = vld [vmem:[#allocation84_spill] sm:$0xff] }
 0x3f3   :  { %vm4063_vm2 = vcmp.eq.s32.totalorder %v15344_v22, %v15257_v33  ;;  %v7654_v13 = vadd.f32 %v15458_v31, %v15457_v57  ;;  %v3319_v14 = vadd.f32 %v7213_v43, %v2759_v0  ;;  %v7469_v47 = vsel %vm4055_vm14, 1.0, %v14800_v17  ;;  %v15464_v33 = vld [vmem:[#allocation94_spill] sm:$0xff]  ;;  %v15471_v24 = vld [vmem:[#allocation68_spill] sm:$0xff] }
 0x3f4   :  { %v3327_v49 = vadd.f32 %v7221_v50, %v2767_v52  ;;  %v7477_v16 = vsel %vm4063_vm2, 1.0, %v14800_v17  ;;  %v7718_v21 = vadd.f32 %v15460_v3, %v15459_v28  ;;  %v7657_v56 = vadd.f32 %v15462_v38, %v15461_v30  ;;  %v15469_v17 = vld [vmem:[#allocation39_spill] sm:$0xff]  ;;  %v15472_v43 = vld [vmem:[#allocation72_spill] sm:$0xff]  ;;  %v15473_v52 = vld [vmem:[#allocation141_spill] sm:$0xff] }
 0x3f5   :  { %v7721_v22 = vadd.f32 %v15464_v33, %v15463_v27  ;;  %v7660_v10 = vadd.f32 %v15466_v60, %v15465_v4  ;;  %v3879_v12 = vadd.f32 %v7341_v48, %v3319_v14  ;;  %v7724_v19 = vadd.f32 %v15468_v59, %v15467_v54  ;;  %v15474_v50 = vld [vmem:[#allocation147_spill] sm:$0xff]  ;;  %v15475_v3 = vld [vmem:[#allocation106_spill] sm:$0xff]  ;;  %v15476_v48 = vld [vmem:[#allocation145_spill] sm:$0xff] }
 0x3f6   :  { %v3887_v29 = vadd.f32 %v7349_v53, %v3327_v49  ;;  %v7663_v25 = vadd.f32 %v15470_v62, %v15469_v17  ;;  %v5182_v41 = vadd.f32 %v7718_v21, %v7654_v13  ;;  %v7727_v0 = vadd.f32 %v15472_v43, %v15471_v24  ;;  %v15477_v30 = vld [vmem:[#allocation57_spill] sm:$0xff]  ;;  %v15478_v21 = vld [vmem:[#allocation155_spill] sm:$0xff]  ;;  %v15482_v4 = vld [vmem:[#allocation32_spill] sm:$0xff] }
 0x3f7   :  { %v5185_v58 = vadd.f32 %v7721_v22, %v7657_v56  ;;  %v7666_v57 = vadd.f32 %v15474_v50, %v15473_v52  ;;  %v4439_v31 = vadd.f32 %v7469_v47, %v3879_v12  ;;  %v5190_v28 = vadd.f32 %v7724_v19, %v7660_v10  ;;  %v15479_v33 = vld [vmem:[#allocation153_spill] sm:$0xff]  ;;  %v15485_v54 = vld [vmem:[#allocation26_spill] sm:$0xff]  ;;  %v15487_v59 = vld [vmem:[#allocation131_spill] sm:$0xff] }
 0x3f8   :  { %v4447_v26 = vadd.f32 %v7477_v16, %v3887_v29  ;;  %v7730_v53 = vadd.f32 %v15476_v48, %v15475_v3  ;;  %v5193_v14 = vadd.f32 %v7727_v0, %v7663_v25  ;;  %v7669_v49 = vadd.f32 %v13436_v7, %v13432_v55  ;;  %v15480_v22 = vld [vmem:[#allocation165_spill] sm:$0xff]  ;;  %v15481_v16 = vld [vmem:[#allocation18_spill] sm:$0xff]  ;;  %v15486_v55 = vld [vmem:[#allocation119_spill] sm:$0xff] }
 0x3f9   :  { %v7733_v13 = vadd.f32 %v15477_v30, %v13434_v9  ;;  %v7736_v38 = vadd.f32 %v15478_v21, %v13449_v2  ;;  %v7776_v47 = vadd.f32 %v15480_v22, %v15479_v33  ;;  %v7739_v60 = vadd.f32 %v15482_v4, %v15481_v16  ;;  %v15484_v29 = vld [vmem:[#allocation130_spill] sm:$0xff]  ;;  %v15488_v19 = vld [vmem:[#allocation161_spill] sm:$0xff]  ;;  %v15489_v17 = vld [vmem:[#allocation127_spill] sm:$0xff] }
 0x3fa   :  { %v4511_v56 = vpack.c.bf16 %v4447_v26, %v4439_v31  ;;  %v5198_v27 = vadd.f32 %v7730_v53, %v7666_v57  ;;  %v7779_v7 = vadd.f32 %v15485_v54, %v15484_v29  ;;  %v7742_v9 = vadd.f32 %v15487_v59, %v15486_v55  ;;  %v15490_v62 = vld [vmem:[#allocation46_spill] sm:$0xff]  ;;  %v15491_v24 = vld [vmem:[#allocation136_spill] sm:$0xff]  ;;  %v15492_v0 = vld [vmem:[#allocation167_spill] sm:$0xff] }
 0x3fb   :  { %v5201_v10 = vadd.f32 %v7733_v13, %v7669_v49  ;;  %v5206_v12 = vadd.f32 %v7736_v38, %v15483_v34  ;;  %v5209_v2 = vadd.f32 %v7739_v60, %v15488_v19  ;;  %v7782_v25 = vadd.f32 %v15490_v62, %v15489_v17  ;;  %v15493_v52 = vld [vmem:[#allocation54_spill] sm:$0xff]  ;;  %v15495_v48 = vld [vmem:[#allocation63_spill] sm:$0xff]  ;;  %v15496_v53 = vld [vmem:[#allocation60_spill] sm:$0xff] }
 0x3fc   :  { %5422 = vmatmul.mubr.bf16.gmra.mrb[76].mxu1 %v4511_v56  ;;  %v7745_v43 = vadd.f32 %v15491_v24, %v13511_v35  ;;  %v7785_v50 = vadd.f32 %v15493_v52, %v15492_v0  ;;  %v15494_v57 = vld [vmem:[#allocation158_spill] sm:$0xff]  ;;  %v7748_v26 = vadd.f32 %v13580_v61, %v13573_v44  ;;  %v7788_v3 = vadd.f32 %v13644_v11, %v13636_v39  ;;  %v15497_v30 = vld [vmem:[#allocation159_spill] sm:$0xff]  ;;  %v15499_v33 = vld [vmem:[#allocation133_spill] sm:$0xff] }
 0x3fd   :  { %v5214_v31 = vadd.f32 %v7742_v9, %v15494_v57  ;;  %v7751_v49 = vadd.f32 %v15496_v53, %v15495_v48  ;;  %v15498_v21 = vld [vmem:[#allocation126_spill] sm:$0xff]  ;;  %v7754_v35 = vadd.f32 %v13807_v63, %v13803_v5  ;;  %v7794_v56 = vadd.f32 %v13859_v6, %v13853_v36 }
 0x3fe   :  { %v5217_v13 = vadd.f32 %v7745_v43, %v15497_v30  ;;  %v7791_v38 = vadd.f32 %v13662_v8, %v15498_v21  ;;  %v5222_v22 = vadd.f32 %v7748_v26, %v15499_v33  ;;  %v15500_v44 = vld [vmem:[#allocation138_spill] sm:$0xff]  ;;  %v7757_v39 = vadd.f32 %v13821_v46, %v13817_v32 }
 0x3ff   :  { %v5225_v61 = vadd.f32 %v7751_v49, %v15500_v44  ;;  %v7797_v11 = vadd.f32 %v13873_v45, %v13866_v40  ;;  %v15501_v16 = vld [vmem:[#allocation174_spill] sm:$0xff]  ;;  %v5271_v8 = vadd.f32 %v7776_v47, %v13880_v42  ;;  %v7800_v5 = vadd.f32 %v14025_v51, %v14016_v18  ;;  %v8027_v44 = vld [vmem:[#allocation5 + $0x24] ss:$8 sps:$4 sm:$0xff]  }
 0x400   :  { %v14103_v4 = vadd.f32 %v7754_v35, %v15501_v16  ;;  %v5274_v63 = vadd.f32 %v7779_v7, %v13988_v15  ;;  %v15502_v36 = vld [vmem:[#allocation178_spill] sm:$0xff]  ;;  %v7803_v60 = vadd.f32 %v7802_v37, %v14031_v20  ;;  %v5279_v34 = vadd.f32 %v7782_v25, %v5182_v41  ;;  %v8019_v35 = vld [vmem:[#allocation5] ss:$8 sps:$4 sm:$0xff]   ;;  %v8033_v16 = vld [vmem:[#allocation5 + $0x44] ss:$8 sps:$4 sm:$0xff]  }
 0x401   :  { %v14110_v6 = vadd.f32 %v7757_v39, %v15502_v36  ;;  %v5282_v32 = vadd.f32 %v7785_v50, %v5185_v58  ;;  %v5368_v46 = vadd.f32 %v14029_v1, %v5271_v8  ;;  %v5287_v45 = vadd.f32 %v7788_v3, %v5190_v28  ;;  %v8024_v33 = vld [vmem:[#allocation5 + $0x14] ss:$8 sps:$4 sm:$0xff]   ;;  %v8031_v8 = vld [vmem:[#allocation5 + $0x40] ss:$8 sps:$4 sm:$0xff]  }
 0x402   :  { %v5371_v40 = vadd.f32 %v5370_v23, %v5274_v63  ;;  %v5290_v29 = vadd.f32 %v7791_v38, %v5193_v14  ;;  %v14114_v54 = vadd.f32 %v7794_v56, %v5198_v27  ;;  %v14116_v42 = vadd.f32 %v7797_v11, %v5201_v10  ;;  %v8021_v56 = vld [vmem:[#allocation5 + $0x4] ss:$8 sps:$4 sm:$0xff]   ;;  %v8030_v39 = vld [vmem:[#allocation5 + $0x34] ss:$8 sps:$4 sm:$0xff]   ;;  %v8028_v11 = vld [vmem:[#allocation5 + $0x30] ss:$8 sps:$4 sm:$0xff]  }
 0x403   :  { %v14118_v47 = vadd.f32 %v7800_v5, %v5206_v12  ;;  %v5430_v18 = vmul.f32 0.125, %v5368_v46  ;;  %v15503_v7 = vmov 0   ;;  %v14121_v20 = vadd.f32 %v7803_v60, %v5209_v2  ;;  %5927 = vmatprep.subr.bf16.mxu1 %v8021_v56  ;;  %v8036_v5 = vld [vmem:[#allocation5 + $0x54] ss:$8 sps:$4 sm:$0xff]   ;;  %v8034_v60 = vld [vmem:[#allocation5 + $0x50] ss:$8 sps:$4 sm:$0xff]  }
 0x404   :  { %v5431_v15 = vmul.f32 0.125, %v5371_v40  ;;  %5928 = vmatpush1.bf16.msra.mxu1 %v8019_v35  ;;  %v8039_v46 = vld [vmem:[#allocation5 + $0x64] ss:$8 sps:$4 sm:$0xff]   ;;  %v8064_v35 = vld [vmem:[#allocation5 + $0xf0] ss:$8 sps:$4 sm:$0xff]  }
 0x405   :  { %5929 = vmatprep.subr.bf16.mxu1 %v8024_v33 }
 0x406   :  { %v5446_v51 = vpack.c.bf16 %v5431_v15, %v5430_v18  ;;  %v8037_v18 = vld [vmem:[#allocation5 + $0x60] ss:$8 sps:$4 sm:$0xff]  }
 0x408   :  { %5595 = vmatmul.mubr.bf16.vlgmr.msra.gmra.mrb[48].mxu0 %v5446_v51  ;;  %v8042_v51 = vld [vmem:[#allocation5 + $0x74] ss:$8 sps:$4 sm:$0xff]  }
 0x409   :  { %5604 = vmatprep.mubr.bf16.mxu0 %v15503_v7 }
 0x40c   :  { %v7804_v37 = vpop.f32.mrb[36].mxu0 }
 0x40d   :  { %v7805_v41 = vpop.f32.mrb[37].mxu0 }
 0x40e   :  { %v7806_v1 = vadd.f32 %v7805_v41, %v7804_v37  ;;  %v7807_v23 = vpop.f32.mrb[38].mxu0  ;;  %v8040_v37 = vld [vmem:[#allocation5 + $0x70] ss:$8 sps:$4 sm:$0xff]   ;;  %v8045_v41 = vld [vmem:[#allocation5 + $0x84] ss:$8 sps:$4 sm:$0xff]  }
 0x40f   :  { %v7808_v58 = vpop.f32.mrb[39].mxu0 }
 0x410   :  { %v7809_v28 = vadd.f32 %v7808_v58, %v7807_v23  ;;  %v14123_v14 = vadd.f32 %v7806_v1, %v5214_v31 }
 0x412   :  { %v14125_v19 = vadd.f32 %v7809_v28, %v5217_v13 }
 0x417   :  { %v5375_v27 = vpop.f32.mrb[52].mxu1 }
 0x418   :  { %v5376_v10 = vadd.f32 %v5375_v27, %v5279_v34  ;;  %v5377_v12 = vpop.f32.mrb[53].mxu1  ;;  %v8043_v27 = vld [vmem:[#allocation5 + $0x80] ss:$8 sps:$4 sm:$0xff]  }
 0x419   :  { %v5378_v55 = vpop.f32.mrb[54].mxu1  ;;  %v8048_v12 = vld [vmem:[#allocation5 + $0x94] ss:$8 sps:$4 sm:$0xff]  }
 0x41a   :  { %v5379_v59 = vadd.f32 %v5378_v55, %v5282_v32  ;;  %v5380_v9 = vpop.f32.mrb[55].mxu1  ;;  %v5432_v17 = vmul.f32 0.125, %v5376_v10 }
 0x41c   :  { %v5433_v62 = vmul.f32 0.125, %v5379_v59  ;;  %v8046_v59 = vld [vmem:[#allocation5 + $0x90] ss:$8 sps:$4 sm:$0xff]  }
 0x41e   :  { %v5447_v2 = vpack.c.bf16 %v5433_v62, %v5432_v17  ;;  %v8051_v17 = vld [vmem:[#allocation5 + $0xa4] ss:$8 sps:$4 sm:$0xff]   ;;  %v8054_v62 = vld [vmem:[#allocation5 + $0xb4] ss:$8 sps:$4 sm:$0xff]  }
 0x420   :  { %5605 = vmatmul.mubr.bf16.gmra.mrb[52].mxu0 %v5447_v2  ;;  %v8052_v2 = vld [vmem:[#allocation5 + $0xb0] ss:$8 sps:$4 sm:$0xff]  }
 0x421   :  { %5614 = vmatprep.mubr.bf16.mxu0 %v15503_v7 }
 0x439   :  { %v7810_v25 = vpop.f32.mrb[40].mxu0 }
 0x43a   :  { %v7811_v24 = vpop.f32.mrb[41].mxu0 }
 0x43b   :  { %v7812_v43 = vadd.f32 %v7811_v24, %v7810_v25  ;;  %v7813_v0 = vpop.f32.mrb[42].mxu0  ;;  %v8055_v25 = vld [vmem:[#allocation5 + $0xc0] ss:$8 sps:$4 sm:$0xff]   ;;  %v8060_v24 = vld [vmem:[#allocation5 + $0xd4] ss:$8 sps:$4 sm:$0xff]  }
 0x43c   :  { %v7814_v52 = vpop.f32.mrb[43].mxu0 }
 0x43d   :  { %v7815_v50 = vadd.f32 %v7814_v52, %v7813_v0  ;;  %v14128_v57 = vadd.f32 %v7812_v43, %v5222_v22  ;;  %v8022_v22 = vld [vmem:[#allocation5 + $0x10] ss:$8 sps:$4 sm:$0xff]  }
 0x43e   :  { %5930 = vmatpush1.bf16.msra.mxu1 %v8022_v22 }
 0x43f   :  { %v14130_v31 = vadd.f32 %v7815_v50, %v5225_v61  ;;  %v8025_v61 = vld [vmem:[#allocation5 + $0x20] ss:$8 sps:$4 sm:$0xff]   ;;  %5931 = vmatprep.subr.bf16.mxu1 %v8027_v44  ;;  %v8058_v50 = vld [vmem:[#allocation5 + $0xd0] ss:$8 sps:$4 sm:$0xff]  }
 0x442   :  { %5932 = vmatpush1.bf16.msra.mxu1 %v8025_v61 }
 0x443   :  { %5933 = vmatprep.subr.bf16.mxu1 %v8030_v39 }
 0x444   :  { %v5383_v26 = vpop.f32.mrb[56].mxu1 }
 0x445   :  { %v5384_v3 = vadd.f32 %v5383_v26, %v5287_v45  ;;  %v5385_v48 = vpop.f32.mrb[57].mxu1 }
 0x446   :  { %v5386_v53 = vpop.f32.mrb[58].mxu1  ;;  %5934 = vmatpush1.bf16.msra.mxu1 %v8028_v11 }
 0x447   :  { %v5387_v49 = vadd.f32 %v5386_v53, %v5290_v29  ;;  %v5388_v30 = vpop.f32.mrb[59].mxu1  ;;  %v5434_v13 = vmul.f32 0.125, %v5384_v3  ;;  %5935 = vmatprep.subr.bf16.mxu1 %v8033_v16  ;;  %v8063_v3 = vld [vmem:[#allocation5 + $0xe4] ss:$8 sps:$4 sm:$0xff]  }
 0x449   :  { %v5435_v21 = vmul.f32 0.125, %v5387_v49 }
 0x44a   :  { %5936 = vmatpush1.bf16.msra.mxu1 %v8031_v8 }
 0x44b   :  { %v5448_v38 = vpack.c.bf16 %v5435_v21, %v5434_v13  ;;  %5937 = vmatprep.subr.bf16.mxu1 %v8036_v5  ;;  %v8061_v13 = vld [vmem:[#allocation5 + $0xe0] ss:$8 sps:$4 sm:$0xff]   ;;  %v8066_v21 = vld [vmem:[#allocation5 + $0xf4] ss:$8 sps:$4 sm:$0xff]  }
 0x44d   :  { %5615 = vmatmul.mubr.bf16.gmra.mrb[56].mxu0 %v5448_v38 }
 0x44e   :  { %5624 = vmatprep.mubr.bf16.mxu0 %v15503_v7  ;;  %5938 = vmatpush1.bf16.msra.mxu1 %v8034_v60 }
 0x44f   :  { %5939 = vmatprep.subr.bf16.mxu1 %v8039_v46 }
 0x452   :  { %5940 = vmatpush1.bf16.msra.mxu1 %v8037_v18 }
 0x453   :  { %5941 = vmatprep.subr.bf16.mxu1 %v8042_v51 }
 0x456   :  { %5942 = vmatpush1.bf16.msra.mxu1 %v8040_v37 }
 0x457   :  { %5943 = vmatprep.subr.bf16.mxu1 %v8045_v41 }
 0x45a   :  { %5944 = vmatpush1.bf16.msra.mxu1 %v8043_v27 }
 0x45b   :  { %5945 = vmatprep.subr.bf16.mxu1 %v8048_v12 }
 0x45e   :  { %5946 = vmatpush1.bf16.msra.mxu1 %v8046_v59 }
 0x45f   :  { %5947 = vmatprep.subr.bf16.mxu1 %v8051_v17 }
 0x467   :  { %v7816_v63 = vpop.f32.mrb[44].mxu0 }
 0x468   :  { %v7817_v36 = vpop.f32.mrb[45].mxu0 }
 0x469   :  { %v7818_v34 = vadd.f32 %v7817_v36, %v7816_v63  ;;  %v7819_v32 = vpop.f32.mrb[46].mxu0 }
 0x46a   :  { %v7820_v40 = vpop.f32.mrb[47].mxu0 }
 0x46b   :  { %v7821_v45 = vadd.f32 %v7820_v40, %v7819_v32  ;;  %v14134_v29 = vadd.f32 %v7818_v34, %v14103_v4 }
 0x46d   :  { %v14137_v15 = vadd.f32 %v7821_v45, %v14110_v6  ;;  %v15504_v45 = vlaneseq }
 0x46f   :  { %v5473_v18 = vshrl.u32 %v15504_v45, 7  ;;  %v8079_v45 = vld [vmem:[#allocation7 + $0x40] ss:$8 sps:$4 sm:$0xff]  }
 0x473   :  { %v5391_v1 = vpop.f32.mrb[60].mxu1 }
 0x474   :  { %v5392_v23 = vadd.f32 %v5391_v1, %v14114_v54  ;;  %v5393_v58 = vpop.f32.mrb[61].mxu1  ;;  %v8049_v54 = vld [vmem:[#allocation5 + $0xa0] ss:$8 sps:$4 sm:$0xff]  }
 0x475   :  { %v5394_v28 = vpop.f32.mrb[62].mxu1  ;;  %5948 = vmatpush1.bf16.msra.mxu1 %v8049_v54  ;;  %v14159_v58 = vsub.s32 1, %v5473_v18 }
 0x476   :  { %v5395_v4 = vadd.f32 %v5394_v28, %v14116_v42  ;;  %v5396_v10 = vpop.f32.mrb[63].mxu1  ;;  %v5436_v6 = vmul.f32 0.125, %v5392_v23  ;;  %5949 = vmatprep.subr.bf16.mxu1 %v8054_v62  ;;  %v8057_v42 = vld [vmem:[#allocation5 + $0xc4] ss:$8 sps:$4 sm:$0xff]  }
 0x477   :  { %v5470_v23 = vld [vmem:[%s14296_s3] sm:$0x3] }
 0x478   :  { %v5437_v55 = vmul.f32 0.125, %v5395_v4  ;;  %v14165_v28 = vrot.slane %v5470_v23, %v14159_v58 }
 0x479   :  { %5950 = vmatpush1.bf16.msra.mxu1 %v8052_v2 }
 0x47a   :  { %v5449_v9 = vpack.c.bf16 %v5437_v55, %v5436_v6  ;;  %5951 = vmatprep.subr.bf16.mxu1 %v8057_v42 }
 0x47c   :  { %5625 = vmatmul.mubr.bf16.gmra.mrb[60].mxu0 %v5449_v9 }
 0x47d   :  { %5634 = vmatprep.mubr.bf16.mxu0 %v15503_v7  ;;  %5952 = vmatpush1.bf16.msra.mxu1 %v8055_v25 }
 0x47e   :  { %5953 = vmatprep.subr.bf16.mxu1 %v8060_v24 }
 0x481   :  { %5954 = vmatpush1.bf16.msra.mxu1 %v8058_v50 }
 0x482   :  { %5955 = vmatprep.subr.bf16.mxu1 %v8063_v3 }
 0x485   :  { %5956 = vmatpush1.bf16.msra.mxu1 %v8061_v13 }
 0x486   :  { %5957 = vmatprep.subr.bf16.mxu1 %v8066_v21 }
 0x489   :  { %v5399_v43 = vpop.f32.mrb[64].mxu1  ;;  %5958 = vmatpush1.bf16.msra.mxu1 %v8064_v35 }
 0x48a   :  { %v5400_v0 = vadd.f32 %v5399_v43, %v14118_v47  ;;  %v5401_v52 = vpop.f32.mrb[65].mxu1 }
 0x48b   :  { %v5402_v26 = vpop.f32.mrb[66].mxu1 }
 0x48c   :  { %v5403_v48 = vadd.f32 %v5402_v26, %v14121_v20  ;;  %v5404_v53 = vpop.f32.mrb[67].mxu1  ;;  %v5438_v49 = vmul.f32 0.125, %v5400_v0 }
 0x48e   :  { %v5439_v30 = vmul.f32 0.125, %v5403_v48 }
 0x490   :  { %v5450_v38 = vpack.c.bf16 %v5439_v30, %v5438_v49 }
 0x492   :  { %5635 = vmatmul.mubr.bf16.gmra.mrb[64].mxu0 %v5450_v38 }
 0x493   :  { %5644 = vmatprep.mubr.bf16.mxu0 %v15503_v7 }
 0x49f   :  { %v5407_v47 = vpop.f32.mrb[68].mxu1 }
 0x4a0   :  { %v5408_v56 = vadd.f32 %v5407_v47, %v14123_v14  ;;  %v5409_v33 = vpop.f32.mrb[69].mxu1 }
 0x4a1   :  { %v5410_v20 = vpop.f32.mrb[70].mxu1 }
 0x4a2   :  { %v5411_v22 = vadd.f32 %v5410_v20, %v14125_v19  ;;  %v5412_v44 = vpop.f32.mrb[71].mxu1  ;;  %v5440_v61 = vmul.f32 0.125, %v5408_v56 }
 0x4a4   :  { %v5441_v39 = vmul.f32 0.125, %v5411_v22 }
 0x4a6   :  { %v5451_v11 = vpack.c.bf16 %v5441_v39, %v5440_v61 }
 0x4a8   :  { %5645 = vmatmul.mubr.bf16.gmra.mrb[68].mxu0 %v5451_v11 }
 0x4a9   :  { %5654 = vmatprep.mubr.bf16.mxu0 %v15503_v7 }
 0x4b7   :  { %v5415_v16 = vpop.f32.mrb[72].mxu1 }
 0x4b8   :  { %v5416_v8 = vadd.f32 %v5415_v16, %v14128_v57  ;;  %v5417_v5 = vpop.f32.mrb[73].mxu1 }
 0x4b9   :  { %v5418_v63 = vpop.f32.mrb[74].mxu1 }
 0x4ba   :  { %v5419_v36 = vadd.f32 %v5418_v63, %v14130_v31  ;;  %v5420_v60 = vpop.f32.mrb[75].mxu1  ;;  %v5442_v14 = vmul.f32 0.125, %v5416_v8  ;;  %v14154_v31 = vsub.s32 0, %v5473_v18  ;;  %v8067_v63 = vld [vmem:[#allocation7] ss:$8 sps:$4 sm:$0xff]  }
 0x4bb   :  { %v8072_v60 = vld [vmem:[#allocation7 + $0x14] ss:$8 sps:$4 sm:$0xff]  }
 0x4bc   :  { %v5443_v34 = vmul.f32 0.125, %v5419_v36  ;;  %v8069_v36 = vld [vmem:[#allocation7 + $0x4] ss:$8 sps:$4 sm:$0xff]   ;;  %v8084_v18 = vld [vmem:[#allocation7 + $0x54] ss:$8 sps:$4 sm:$0xff]  }
 0x4bd   :  { %6292 = vmatprep.subr.bf16.mxu0 %v8069_v36 }
 0x4be   :  { %v5452_v32 = vpack.c.bf16 %v5443_v34, %v5442_v14  ;;  %6293 = vmatpush1.bf16.msra.mxu0 %v8067_v63  ;;  %v8070_v14 = vld [vmem:[#allocation7 + $0x10] ss:$8 sps:$4 sm:$0xff]   ;;  %v8075_v34 = vld [vmem:[#allocation7 + $0x24] ss:$8 sps:$4 sm:$0xff]  }
 0x4bf   :  { %6294 = vmatprep.subr.bf16.mxu0 %v8072_v60 }
 0x4c0   :  { %5655 = vmatmul.mubr.bf16.gmra.mrb[72].mxu0 %v5452_v32  ;;  %v8073_v32 = vld [vmem:[#allocation7 + $0x20] ss:$8 sps:$4 sm:$0xff]  }
 0x4c1   :  { %5664 = vmatprep.mubr.bf16.mxu0 %v15503_v7 }
 0x4c2   :  { %6295 = vmatpush1.bf16.msra.mxu0 %v8070_v14 }
 0x4c3   :  { %6296 = vmatprep.subr.bf16.mxu0 %v8075_v34 }
 0x4c6   :  { %6297 = vmatpush1.bf16.msra.mxu0 %v8073_v32 }
 0x4cf   :  { %v5423_v19 = vpop.f32.mrb[76].mxu1 }
 0x4d0   :  { %v5424_v46 = vadd.f32 %v5423_v19, %v14134_v29  ;;  %v5425_v40 = vpop.f32.mrb[77].mxu1  ;;  %v14162_v29 = vrot.slane %v5470_v23, %v14154_v31  ;;  %v8078_v19 = vld [vmem:[#allocation7 + $0x34] ss:$8 sps:$4 sm:$0xff]   ;;  %v8088_v23 = vld [vmem:[#allocation7 + $0x70] ss:$8 sps:$4 sm:$0xff]  }
 0x4d1   :  { %v5426_v51 = vpop.f32.mrb[78].mxu1  ;;  %6298 = vmatprep.subr.bf16.mxu0 %v8078_v19  ;;  %v8081_v40 = vld [vmem:[#allocation7 + $0x44] ss:$8 sps:$4 sm:$0xff]  }
 0x4d2   :  { %v5427_v57 = vadd.f32 %v5426_v51, %v14137_v15  ;;  %v5428_v37 = vpop.f32.mrb[79].mxu1  ;;  %v5444_v41 = vmul.f32 0.125, %v5424_v46  ;;  %v8076_v46 = vld [vmem:[#allocation7 + $0x30] ss:$8 sps:$4 sm:$0xff]  }
 0x4d3   :  { %6299 = vmatpush1.bf16.msra.mxu0 %v8076_v46  ;;  %v8082_v51 = vld [vmem:[#allocation7 + $0x50] ss:$8 sps:$4 sm:$0xff]   ;;  %v8085_v37 = vld [vmem:[#allocation7 + $0x60] ss:$8 sps:$4 sm:$0xff]  }
 0x4d4   :  { %v5445_v1 = vmul.f32 0.125, %v5427_v57  ;;  %6300 = vmatprep.subr.bf16.mxu0 %v8081_v40  ;;  %v8087_v57 = vld [vmem:[#allocation7 + $0x64] ss:$8 sps:$4 sm:$0xff]  }
 0x4d6   :  { %v5453_v7 = vpack.c.bf16 %v5445_v1, %v5444_v41  ;;  %v8090_v41 = vld [vmem:[#allocation7 + $0x74] ss:$8 sps:$4 sm:$0xff]  }
 0x4d7   :  { %6301 = vmatpush1.bf16.msra.mxu0 %v8079_v45 }
 0x4d8   :  { %5665 = vmatmul.mubr.bf16.gmra.mrb[76].mxu0 %v5453_v7  ;;  %6302 = vmatprep.subr.bf16.mxu0 %v8084_v18 }
 0x4db   :  { %v5596_v15 = vpop.f32.mrb[48].mxu0  ;;  %6303 = vmatpush1.bf16.msra.mxu0 %v8082_v51 }
 0x4dc   :  { %v5597_v27 = vadd.f32 %v5596_v15, %v14162_v29  ;;  %v5598_v4 = vpop.f32.mrb[49].mxu0  ;;  %6304 = vmatprep.subr.bf16.mxu0 %v8087_v57 }
 0x4dd   :  { %v5599_v10 = vadd.f32 %v5598_v4, %v14165_v28  ;;  %v5600_v12 = vpop.f32.mrb[50].mxu0 }
 0x4de   :  { %v5601_v6 = vadd.f32 %v5600_v12, %v14162_v29  ;;  %v5602_v55 = vpop.f32.mrb[51].mxu0  ;;  %v5675_v9 = vmax.f32 %v5597_v27, 0.0  ;;  %v8093_v27 = vld [vmem:[#allocation7 + $0x84] ss:$8 sps:$4 sm:$0xff]  }
 0x4df   :  { %v5603_v59 = vadd.f32 %v5602_v55, %v14165_v28  ;;  %v5676_v54 = vmax.f32 %v5599_v10, 0.0  ;;  %6305 = vmatpush1.bf16.msra.mxu0 %v8085_v37 }
 0x4e0   :  { %v5677_v17 = vmax.f32 %v5601_v6, 0.0  ;;  %6306 = vmatprep.subr.bf16.mxu0 %v8090_v41 }
 0x4e1   :  { %v5678_v62 = vmax.f32 %v5603_v59, 0.0  ;;  %v8091_v59 = vld [vmem:[#allocation7 + $0x80] ss:$8 sps:$4 sm:$0xff]  }
 0x4e2   :  { %v5707_v2 = vpack.c.bf16 %v5677_v17, %v5675_v9 }
 0x4e3   :  { %v5708_v42 = vpack.c.bf16 %v5678_v62, %v5676_v54  ;;  %6307 = vmatpush1.bf16.msra.mxu0 %v8088_v23  ;;  %v8096_v54 = vld [vmem:[#allocation7 + $0x94] ss:$8 sps:$4 sm:$0xff]  }
 0x4e4   :  { %6308 = vmatprep.subr.bf16.mxu0 %v8093_v27 }
 0x4e5   :  { %5959 = vmatprep.mubr.bf16.mxu1 %v5708_v42 }
 0x4e6   :  { %5960 = vmatmul.mubr.bf16.vlgmr.msra.gmra.mrb[80].mxu1 %v5707_v2 }
 0x4e7   :  { %6309 = vmatpush1.bf16.msra.mxu0 %v8091_v59 }
 0x4e8   :  { %6310 = vmatprep.subr.bf16.mxu0 %v8096_v54 }
 0x4f3   :  { %v5606_v25 = vpop.f32.mrb[52].mxu0 }
 0x4f4   :  { %v5607_v24 = vadd.f32 %v5606_v25, %v14162_v29  ;;  %v5608_v43 = vpop.f32.mrb[53].mxu0 }
 0x4f5   :  { %v5609_v0 = vadd.f32 %v5608_v43, %v14165_v28  ;;  %v5610_v52 = vpop.f32.mrb[54].mxu0  ;;  %v8099_v43 = vld [vmem:[#allocation7 + $0xa4] ss:$8 sps:$4 sm:$0xff]  }
 0x4f6   :  { %v5611_v50 = vadd.f32 %v5610_v52, %v14162_v29  ;;  %v5612_v26 = vpop.f32.mrb[55].mxu0  ;;  %v5679_v48 = vmax.f32 %v5607_v24, 0.0  ;;  %v8094_v24 = vld [vmem:[#allocation7 + $0x90] ss:$8 sps:$4 sm:$0xff]   ;;  %v8102_v52 = vld [vmem:[#allocation7 + $0xb4] ss:$8 sps:$4 sm:$0xff]  }
 0x4f7   :  { %v5613_v3 = vadd.f32 %v5612_v26, %v14165_v28  ;;  %v5680_v49 = vmax.f32 %v5609_v0, 0.0  ;;  %6311 = vmatpush1.bf16.msra.mxu0 %v8094_v24  ;;  %v8097_v0 = vld [vmem:[#allocation7 + $0xa0] ss:$8 sps:$4 sm:$0xff]   ;;  %v8105_v26 = vld [vmem:[#allocation7 + $0xc4] ss:$8 sps:$4 sm:$0xff]  }
 0x4f8   :  { %v5681_v53 = vmax.f32 %v5611_v50, 0.0  ;;  %6312 = vmatprep.subr.bf16.mxu0 %v8099_v43  ;;  %v8100_v50 = vld [vmem:[#allocation7 + $0xb0] ss:$8 sps:$4 sm:$0xff]  }
 0x4f9   :  { %v5682_v30 = vmax.f32 %v5613_v3, 0.0  ;;  %v8103_v3 = vld [vmem:[#allocation7 + $0xc0] ss:$8 sps:$4 sm:$0xff]  }
 0x4fa   :  { %v5709_v13 = vpack.c.bf16 %v5681_v53, %v5679_v48  ;;  %v8108_v53 = vld [vmem:[#allocation7 + $0xd4] ss:$8 sps:$4 sm:$0xff]  }
 0x4fb   :  { %v5710_v21 = vpack.c.bf16 %v5682_v30, %v5680_v49  ;;  %6313 = vmatpush1.bf16.msra.mxu0 %v8097_v0 }
 0x4fc   :  { %6314 = vmatprep.subr.bf16.mxu0 %v8102_v52 }
 0x4fd   :  { %5969 = vmatprep.mubr.bf16.mxu1 %v5710_v21 }
 0x4fe   :  { %5970 = vmatmul.mubr.bf16.gmra.mrb[84].mxu1 %v5709_v13 }
 0x4ff   :  { %6315 = vmatpush1.bf16.msra.mxu0 %v8100_v50 }
 0x500   :  { %6316 = vmatprep.subr.bf16.mxu0 %v8105_v26 }
 0x503   :  { %6317 = vmatpush1.bf16.msra.mxu0 %v8103_v3 }
 0x504   :  { %6318 = vmatprep.subr.bf16.mxu0 %v8108_v53 }
 0x520   :  { %v5616_v38 = vpop.f32.mrb[56].mxu0 }
 0x521   :  { %v5617_v35 = vadd.f32 %v5616_v38, %v14162_v29  ;;  %v5618_v47 = vpop.f32.mrb[57].mxu0 }
 0x522   :  { %v5619_v56 = vadd.f32 %v5618_v47, %v14165_v28  ;;  %v5620_v33 = vpop.f32.mrb[58].mxu0  ;;  %v8106_v47 = vld [vmem:[#allocation7 + $0xd0] ss:$8 sps:$4 sm:$0xff]  }
 0x523   :  { %v5621_v20 = vadd.f32 %v5620_v33, %v14162_v29  ;;  %v5622_v22 = vpop.f32.mrb[59].mxu0  ;;  %v5683_v61 = vmax.f32 %v5617_v35, 0.0  ;;  %v8111_v33 = vld [vmem:[#allocation7 + $0xe4] ss:$8 sps:$4 sm:$0xff]   ;;  %6319 = vmatpush1.bf16.msra.mxu0 %v8106_v47 }
 0x524   :  { %v5623_v44 = vadd.f32 %v5622_v22, %v14165_v28  ;;  %v5684_v11 = vmax.f32 %v5619_v56, 0.0  ;;  %6320 = vmatprep.subr.bf16.mxu0 %v8111_v33 }
 0x525   :  { %v5685_v39 = vmax.f32 %v5621_v20, 0.0 }
 0x526   :  { %v5686_v16 = vmax.f32 %v5623_v44, 0.0 }
 0x527   :  { %v5711_v8 = vpack.c.bf16 %v5685_v39, %v5683_v61 }
 0x528   :  { %v5712_v5 = vpack.c.bf16 %v5686_v16, %v5684_v11  ;;  %v8109_v11 = vld [vmem:[#allocation7 + $0xe0] ss:$8 sps:$4 sm:$0xff]  }
 0x529   :  { %6321 = vmatpush1.bf16.msra.mxu0 %v8109_v11 }
 0x52a   :  { %5979 = vmatprep.mubr.bf16.mxu1 %v5712_v5  ;;  %v8112_v5 = vld [vmem:[#allocation7 + $0xf0] ss:$8 sps:$4 sm:$0xff]  }
 0x52b   :  { %5980 = vmatmul.mubr.bf16.gmra.mrb[88].mxu1 %v5711_v8  ;;  %v8114_v8 = vld [vmem:[#allocation7 + $0xf4] ss:$8 sps:$4 sm:$0xff]  }
 0x52c   :  { %6322 = vmatprep.subr.bf16.mxu0 %v8114_v8 }
 0x52d   :  { %6323 = vmatpush1.bf16.msra.mxu0 %v8112_v5 }
 0x54f   :  { %v5626_v1 = vpop.f32.mrb[60].mxu0 }
 0x550   :  { %v5627_v7 = vadd.f32 %v5626_v1, %v14162_v29  ;;  %v5628_v15 = vpop.f32.mrb[61].mxu0 }
 0x551   :  { %v5629_v4 = vadd.f32 %v5628_v15, %v14165_v28  ;;  %v5630_v10 = vpop.f32.mrb[62].mxu0 }
 0x552   :  { %v5631_v12 = vadd.f32 %v5630_v10, %v14162_v29  ;;  %v5632_v6 = vpop.f32.mrb[63].mxu0  ;;  %v5687_v9 = vmax.f32 %v5627_v7, 0.0 }
 0x553   :  { %v5633_v55 = vadd.f32 %v5632_v6, %v14165_v28  ;;  %v5688_v62 = vmax.f32 %v5629_v4, 0.0 }
 0x554   :  { %v5689_v17 = vmax.f32 %v5631_v12, 0.0 }
 0x555   :  { %v5690_v2 = vmax.f32 %v5633_v55, 0.0 }
 0x556   :  { %v5713_v42 = vpack.c.bf16 %v5689_v17, %v5687_v9 }
 0x557   :  { %v5714_v25 = vpack.c.bf16 %v5690_v2, %v5688_v62 }
 0x559   :  { %5989 = vmatprep.mubr.bf16.mxu1 %v5714_v25 }
 0x55a   :  { %5990 = vmatmul.mubr.bf16.gmra.mrb[92].mxu1 %v5713_v42 }
 0x565   :  { %v5636_v48 = vpop.f32.mrb[64].mxu0 }
 0x566   :  { %v5637_v49 = vadd.f32 %v5636_v48, %v14162_v29  ;;  %v5638_v30 = vpop.f32.mrb[65].mxu0 }
 0x567   :  { %v5639_v13 = vadd.f32 %v5638_v30, %v14165_v28  ;;  %v5640_v21 = vpop.f32.mrb[66].mxu0 }
 0x568   :  { %v5641_v38 = vadd.f32 %v5640_v21, %v14162_v29  ;;  %v5642_v35 = vpop.f32.mrb[67].mxu0  ;;  %v5691_v20 = vmax.f32 %v5637_v49, 0.0  ;;  %v5755_v49 = vld [vmem:[%s14298_s5] sm:$0x3] }
 0x569   :  { %v5643_v56 = vadd.f32 %v5642_v35, %v14165_v28  ;;  %v5692_v44 = vmax.f32 %v5639_v13, 0.0  ;;  %v14203_v30 = vrot.slane %v5755_v49, %v14154_v31 }
 0x56a   :  { %v5693_v22 = vmax.f32 %v5641_v38, 0.0 }
 0x56b   :  { %v5694_v61 = vmax.f32 %v5643_v56, 0.0 }
 0x56c   :  { %v5715_v39 = vpack.c.bf16 %v5693_v22, %v5691_v20 }
 0x56d   :  { %v5716_v16 = vpack.c.bf16 %v5694_v61, %v5692_v44 }
 0x56f   :  { %5999 = vmatprep.mubr.bf16.mxu1 %v5716_v16 }
 0x570   :  { %6000 = vmatmul.mubr.bf16.gmra.mrb[96].mxu1 %v5715_v39 }
 0x57b   :  { %v5646_v63 = vpop.f32.mrb[68].mxu0 }
 0x57c   :  { %v5647_v36 = vadd.f32 %v5646_v63, %v14162_v29  ;;  %v5648_v60 = vpop.f32.mrb[69].mxu0 }
 0x57d   :  { %v5649_v14 = vadd.f32 %v5648_v60, %v14165_v28  ;;  %v5650_v34 = vpop.f32.mrb[70].mxu0 }
 0x57e   :  { %v5651_v32 = vadd.f32 %v5650_v34, %v14162_v29  ;;  %v5652_v19 = vpop.f32.mrb[71].mxu0  ;;  %v5695_v40 = vmax.f32 %v5647_v36, 0.0 }
 0x57f   :  { %v5653_v46 = vadd.f32 %v5652_v19, %v14165_v28  ;;  %v5696_v18 = vmax.f32 %v5649_v14, 0.0 }
 0x580   :  { %v5697_v45 = vmax.f32 %v5651_v32, 0.0 }
 0x581   :  { %v5698_v51 = vmax.f32 %v5653_v46, 0.0 }
 0x582   :  { %v5717_v57 = vpack.c.bf16 %v5697_v45, %v5695_v40 }
 0x583   :  { %v5718_v37 = vpack.c.bf16 %v5698_v51, %v5696_v18 }
 0x585   :  { %6009 = vmatprep.mubr.bf16.mxu1 %v5718_v37 }
 0x586   :  { %6010 = vmatmul.mubr.bf16.gmra.mrb[100].mxu1 %v5717_v57 }
 0x593   :  { %v5656_v41 = vpop.f32.mrb[72].mxu0 }
 0x594   :  { %v5657_v1 = vadd.f32 %v5656_v41, %v14162_v29  ;;  %v5658_v23 = vpop.f32.mrb[73].mxu0 }
 0x595   :  { %v5659_v7 = vadd.f32 %v5658_v23, %v14165_v28  ;;  %v5660_v15 = vpop.f32.mrb[74].mxu0 }
 0x596   :  { %v5661_v27 = vadd.f32 %v5660_v15, %v14162_v29  ;;  %v5662_v4 = vpop.f32.mrb[75].mxu0  ;;  %v5699_v12 = vmax.f32 %v5657_v1, 0.0 }
 0x597   :  { %v5663_v10 = vadd.f32 %v5662_v4, %v14165_v28  ;;  %v5700_v55 = vmax.f32 %v5659_v7, 0.0 }
 0x598   :  { %v5701_v6 = vmax.f32 %v5661_v27, 0.0 }
 0x599   :  { %v5702_v59 = vmax.f32 %v5663_v10, 0.0 }
 0x59a   :  { %v5719_v9 = vpack.c.bf16 %v5701_v6, %v5699_v12 }
 0x59b   :  { %v5720_v17 = vpack.c.bf16 %v5702_v59, %v5700_v55 }
 0x59d   :  { %6019 = vmatprep.mubr.bf16.mxu1 %v5720_v17 }
 0x59e   :  { %6020 = vmatmul.mubr.bf16.gmra.mrb[104].mxu1 %v5719_v9 }
 0x5ab   :  { %v5666_v54 = vpop.f32.mrb[76].mxu0 }
 0x5ac   :  { %v5667_v62 = vadd.f32 %v5666_v54, %v14162_v29  ;;  %v5668_v2 = vpop.f32.mrb[77].mxu0 }
 0x5ad   :  { %v5669_v42 = vadd.f32 %v5668_v2, %v14165_v28  ;;  %v5670_v25 = vpop.f32.mrb[78].mxu0 }
 0x5ae   :  { %v5671_v24 = vadd.f32 %v5670_v25, %v14162_v29  ;;  %v5672_v43 = vpop.f32.mrb[79].mxu0  ;;  %v5703_v52 = vmax.f32 %v5667_v62, 0.0  ;;  %v14206_v29 = vrot.slane %v5755_v49, %v14159_v58 }
 0x5af   :  { %v5673_v0 = vadd.f32 %v5672_v43, %v14165_v28  ;;  %v5704_v26 = vmax.f32 %v5669_v42, 0.0 }
 0x5b0   :  { %v5705_v50 = vmax.f32 %v5671_v24, 0.0 }
 0x5b1   :  { %v5706_v3 = vmax.f32 %v5673_v0, 0.0 }
 0x5b2   :  { %v5721_v48 = vpack.c.bf16 %v5705_v50, %v5703_v52 }
 0x5b3   :  { %v5722_v53 = vpack.c.bf16 %v5706_v3, %v5704_v26 }
 0x5b5   :  { %6029 = vmatprep.mubr.bf16.mxu1 %v5722_v53 }
 0x5b6   :  { %6030 = vmatmul.mubr.bf16.gmra.mrb[108].mxu1 %v5721_v48 }
 0x5b9   :  { %v5961_v13 = vpop.f32.mrb[80].mxu1 }
 0x5ba   :  { %v5962_v28 = vadd.f32 %v5961_v13, %v14203_v30  ;;  %v5963_v21 = vpop.f32.mrb[81].mxu1 }
 0x5bb   :  { %v5964_v38 = vadd.f32 %v5963_v21, %v14206_v29  ;;  %v5965_v35 = vpop.f32.mrb[82].mxu1 }
 0x5bc   :  { %v5966_v47 = vadd.f32 %v5965_v35, %v14203_v30  ;;  %v5967_v56 = vpop.f32.mrb[83].mxu1  ;;  %v6040_v20 = vmax.f32 %v5962_v28, 0.0 }
 0x5bd   :  { %v5968_v33 = vadd.f32 %v5967_v56, %v14206_v29  ;;  %v6041_v44 = vmax.f32 %v5964_v38, 0.0 }
 0x5be   :  { %v6042_v22 = vmax.f32 %v5966_v47, 0.0 }
 0x5bf   :  { %v6043_v61 = vmax.f32 %v5968_v33, 0.0 }
 0x5c0   :  { %v6072_v39 = vpack.c.bf16 %v6042_v22, %v6040_v20 }
 0x5c1   :  { %v6073_v11 = vpack.c.bf16 %v6043_v61, %v6041_v44 }
 0x5c3   :  { %6324 = vmatprep.mubr.bf16.mxu0 %v6073_v11 }
 0x5c4   :  { %6325 = vmatmul.mubr.bf16.vlgmr.msra.gmra.mrb[80].mxu0 %v6072_v39 }
 0x5d1   :  { %v5971_v16 = vpop.f32.mrb[84].mxu1 }
 0x5d2   :  { %v5972_v8 = vadd.f32 %v5971_v16, %v14203_v30  ;;  %v5973_v5 = vpop.f32.mrb[85].mxu1 }
 0x5d3   :  { %v5974_v63 = vadd.f32 %v5973_v5, %v14206_v29  ;;  %v5975_v36 = vpop.f32.mrb[86].mxu1 }
 0x5d4   :  { %v5976_v60 = vadd.f32 %v5975_v36, %v14203_v30  ;;  %v5977_v14 = vpop.f32.mrb[87].mxu1  ;;  %v6044_v32 = vmax.f32 %v5972_v8, 0.0 }
 0x5d5   :  { %v5978_v34 = vadd.f32 %v5977_v14, %v14206_v29  ;;  %v6045_v46 = vmax.f32 %v5974_v63, 0.0 }
 0x5d6   :  { %v6046_v19 = vmax.f32 %v5976_v60, 0.0 }
 0x5d7   :  { %v6047_v40 = vmax.f32 %v5978_v34, 0.0 }
 0x5d8   :  { %v6074_v45 = vpack.c.bf16 %v6046_v19, %v6044_v32 }
 0x5d9   :  { %v6075_v18 = vpack.c.bf16 %v6047_v40, %v6045_v46 }
 0x5db   :  { %6334 = vmatprep.mubr.bf16.mxu0 %v6075_v18 }
 0x5dc   :  { %6335 = vmatmul.mubr.bf16.gmra.mrb[84].mxu0 %v6074_v45 }
 0x5fe   :  { %v5981_v51 = vpop.f32.mrb[88].mxu1 }
 0x5ff   :  { %v5982_v57 = vadd.f32 %v5981_v51, %v14203_v30  ;;  %v5983_v37 = vpop.f32.mrb[89].mxu1 }
 0x600   :  { %v5984_v41 = vadd.f32 %v5983_v37, %v14206_v29  ;;  %v5985_v1 = vpop.f32.mrb[90].mxu1 }
 0x601   :  { %v5986_v23 = vadd.f32 %v5985_v1, %v14203_v30  ;;  %v5987_v7 = vpop.f32.mrb[91].mxu1  ;;  %v6048_v27 = vmax.f32 %v5982_v57, 0.0 }
 0x602   :  { %v5988_v15 = vadd.f32 %v5987_v7, %v14206_v29  ;;  %v6049_v10 = vmax.f32 %v5984_v41, 0.0 }
 0x603   :  { %v6050_v4 = vmax.f32 %v5986_v23, 0.0 }
 0x604   :  { %v6051_v12 = vmax.f32 %v5988_v15, 0.0 }
 0x605   :  { %v6076_v6 = vpack.c.bf16 %v6050_v4, %v6048_v27 }
 0x606   :  { %v6077_v55 = vpack.c.bf16 %v6051_v12, %v6049_v10 }
 0x608   :  { %6344 = vmatprep.mubr.bf16.mxu0 %v6077_v55 }
 0x609   :  { %6345 = vmatmul.mubr.bf16.gmra.mrb[88].mxu0 %v6076_v6 }
 0x62d   :  { %v5991_v59 = vpop.f32.mrb[92].mxu1 }
 0x62e   :  { %v5992_v9 = vadd.f32 %v5991_v59, %v14203_v30  ;;  %v5993_v17 = vpop.f32.mrb[93].mxu1 }
 0x62f   :  { %v5994_v54 = vadd.f32 %v5993_v17, %v14206_v29  ;;  %v5995_v62 = vpop.f32.mrb[94].mxu1 }
 0x630   :  { %v5996_v2 = vadd.f32 %v5995_v62, %v14203_v30  ;;  %v5997_v42 = vpop.f32.mrb[95].mxu1  ;;  %v6052_v24 = vmax.f32 %v5992_v9, 0.0 }
 0x631   :  { %v5998_v25 = vadd.f32 %v5997_v42, %v14206_v29  ;;  %v6053_v0 = vmax.f32 %v5994_v54, 0.0 }
 0x632   :  { %v6054_v43 = vmax.f32 %v5996_v2, 0.0 }
 0x633   :  { %v6055_v52 = vmax.f32 %v5998_v25, 0.0 }
 0x634   :  { %v6078_v50 = vpack.c.bf16 %v6054_v43, %v6052_v24 }
 0x635   :  { %v6079_v26 = vpack.c.bf16 %v6055_v52, %v6053_v0  ;;  %v6120_v0 = vld [vmem:[%s14300_s7] sm:$0x3]  ;;  %s8233_s7 = smov [#allocation8]  }
 0x636   :  { %v14244_v52 = vrot.slane %v6120_v0, %v14154_v31  ;;  %s6442_s26 = sshll.u32 %s8233_s7, 4  ;;  %s6443_s26 = int_to_ptr.vmem [resolvable:$true] %s6442_s26 }
 0x637   :  { %6354 = vmatprep.mubr.bf16.mxu0 %v6079_v26  ;;  %s8189_s27 = scalar_lea.vmem %s6443_s26, 4096  ;;  %p8194_p11 = scmp.lt.s32.totalorder %s6443_s26, %s6443_s26 }
 0x638   :  { %6355 = vmatmul.mubr.bf16.gmra.mrb[92].mxu0 %v6078_v50  ;;  %p8190_p10 = scmp.ne.s32.totalorder %s6443_s26, %s8189_s27  ;;  %p8195_p12 = scmp.lt.s32.totalorder %s8189_s27, %s8189_s27 }
 0x63a   :  { %p8196_p13 = por %p8195_p12, %p8194_p11 }
 0x63c   :  { %p8197_p0 = pnand %p8196_p13, %p8190_p10 }
 0x643   :  { %v6001_v3 = vpop.f32.mrb[96].mxu1 }
 0x644   :  { %v6002_v48 = vadd.f32 %v6001_v3, %v14203_v30  ;;  %v6003_v53 = vpop.f32.mrb[97].mxu1 }
 0x645   :  { %v6004_v49 = vadd.f32 %v6003_v53, %v14206_v29  ;;  %v6005_v13 = vpop.f32.mrb[98].mxu1 }
 0x646   :  { %v6006_v28 = vadd.f32 %v6005_v13, %v14203_v30  ;;  %v6007_v21 = vpop.f32.mrb[99].mxu1  ;;  %v6056_v35 = vmax.f32 %v6002_v48, 0.0 }
 0x647   :  { %v6008_v38 = vadd.f32 %v6007_v21, %v14206_v29  ;;  %v6057_v56 = vmax.f32 %v6004_v49, 0.0 }
 0x648   :  { %v6058_v47 = vmax.f32 %v6006_v28, 0.0 }
 0x649   :  { %v6059_v33 = vmax.f32 %v6008_v38, 0.0 }
 0x64a   :  { %v6080_v20 = vpack.c.bf16 %v6058_v47, %v6056_v35 }
 0x64b   :  { %v6081_v22 = vpack.c.bf16 %v6059_v33, %v6057_v56 }
 0x64d   :  { %6364 = vmatprep.mubr.bf16.mxu0 %v6081_v22 }
 0x64e   :  { %6365 = vmatmul.mubr.bf16.gmra.mrb[96].mxu0 %v6080_v20 }
 0x659   :  { %v6011_v44 = vpop.f32.mrb[100].mxu1 }
 0x65a   :  { %v6012_v61 = vadd.f32 %v6011_v44, %v14203_v30  ;;  %v6013_v39 = vpop.f32.mrb[101].mxu1 }
 0x65b   :  { %v6014_v11 = vadd.f32 %v6013_v39, %v14206_v29  ;;  %v6015_v16 = vpop.f32.mrb[102].mxu1 }
 0x65c   :  { %v6016_v8 = vadd.f32 %v6015_v16, %v14203_v30  ;;  %v6017_v5 = vpop.f32.mrb[103].mxu1  ;;  %v6060_v36 = vmax.f32 %v6012_v61, 0.0 }
 0x65d   :  { %v6018_v63 = vadd.f32 %v6017_v5, %v14206_v29  ;;  %v6061_v14 = vmax.f32 %v6014_v11, 0.0 }
 0x65e   :  { %v6062_v60 = vmax.f32 %v6016_v8, 0.0 }
 0x65f   :  { %v6063_v34 = vmax.f32 %v6018_v63, 0.0 }
 0x660   :  { %v6082_v32 = vpack.c.bf16 %v6062_v60, %v6060_v36 }
 0x661   :  { %v6083_v19 = vpack.c.bf16 %v6063_v34, %v6061_v14 }
 0x663   :  { %6374 = vmatprep.mubr.bf16.mxu0 %v6083_v19 }
 0x664   :  { %6375 = vmatmul.mubr.bf16.gmra.mrb[100].mxu0 %v6082_v32 }
 0x671   :  { %v6021_v46 = vpop.f32.mrb[104].mxu1 }
 0x672   :  { %v6022_v40 = vadd.f32 %v6021_v46, %v14203_v30  ;;  %v6023_v45 = vpop.f32.mrb[105].mxu1 }
 0x673   :  { %v6024_v18 = vadd.f32 %v6023_v45, %v14206_v29  ;;  %v6025_v51 = vpop.f32.mrb[106].mxu1 }
 0x674   :  { %v6026_v57 = vadd.f32 %v6025_v51, %v14203_v30  ;;  %v6027_v37 = vpop.f32.mrb[107].mxu1  ;;  %v6064_v1 = vmax.f32 %v6022_v40, 0.0 }
 0x675   :  { %v6028_v41 = vadd.f32 %v6027_v37, %v14206_v29  ;;  %v6065_v7 = vmax.f32 %v6024_v18, 0.0 }
 0x676   :  { %v6066_v23 = vmax.f32 %v6026_v57, 0.0 }
 0x677   :  { %v6067_v15 = vmax.f32 %v6028_v41, 0.0 }
 0x678   :  { %v6084_v27 = vpack.c.bf16 %v6066_v23, %v6064_v1 }
 0x679   :  { %v6085_v4 = vpack.c.bf16 %v6067_v15, %v6065_v7 }
 0x67b   :  { %6384 = vmatprep.mubr.bf16.mxu0 %v6085_v4 }
 0x67c   :  { %6385 = vmatmul.mubr.bf16.gmra.mrb[104].mxu0 %v6084_v27 }
 0x689   :  { %v6031_v10 = vpop.f32.mrb[108].mxu1 }
 0x68a   :  { %v6032_v12 = vadd.f32 %v6031_v10, %v14203_v30  ;;  %v6033_v6 = vpop.f32.mrb[109].mxu1 }
 0x68b   :  { %v6034_v55 = vadd.f32 %v6033_v6, %v14206_v29  ;;  %v6035_v59 = vpop.f32.mrb[110].mxu1 }
 0x68c   :  { %v6036_v9 = vadd.f32 %v6035_v59, %v14203_v30  ;;  %v6037_v17 = vpop.f32.mrb[111].mxu1  ;;  %v6068_v62 = vmax.f32 %v6032_v12, 0.0  ;;  %v14247_v30 = vrot.slane %v6120_v0, %v14159_v58 }
 0x68d   :  { %v6038_v54 = vadd.f32 %v6037_v17, %v14206_v29  ;;  %v6069_v42 = vmax.f32 %v6034_v55, 0.0 }
 0x68e   :  { %v6070_v2 = vmax.f32 %v6036_v9, 0.0 }
 0x68f   :  { %v6071_v25 = vmax.f32 %v6038_v54, 0.0 }
 0x690   :  { %v6086_v24 = vpack.c.bf16 %v6070_v2, %v6068_v62 }
 0x691   :  { %v6087_v43 = vpack.c.bf16 %v6071_v25, %v6069_v42 }
 0x693   :  { %6394 = vmatprep.mubr.bf16.mxu0 %v6087_v43 }
 0x694   :  { %6395 = vmatmul.mubr.bf16.gmra.mrb[108].mxu0 %v6086_v24 }
 0x697   :  { %v6326_v50 = vpop.f32.mrb[80].mxu0 }
 0x698   :  { %v6327_v29 = vadd.f32 %v6326_v50, %v14244_v52  ;;  %v6328_v26 = vpop.f32.mrb[81].mxu0 }
 0x699   :  { %v6329_v3 = vadd.f32 %v6328_v26, %v14247_v30  ;;  %v6330_v48 = vpop.f32.mrb[82].mxu0 }
 0x69a   :  { %6405 = vst [vmem:[#allocation8] sm:$0xff] %v6327_v29  ;;  %v6331_v53 = vadd.f32 %v6330_v48, %v14244_v52  ;;  %v6332_v49 = vpop.f32.mrb[83].mxu0 }
 0x69b   :  { %6406 = vst [vmem:[#allocation8 + $0x8] sm:$0xff] %v6329_v3  ;;  %v6333_v13 = vadd.f32 %v6332_v49, %v14247_v30 }
 0x69c   :  { %6407 = vst [vmem:[#allocation8 + $0x10] sm:$0xff] %v6331_v53 }
 0x69d   :  { %6408 = vst [vmem:[#allocation8 + $0x18] sm:$0xff] %v6333_v13 }
 0x6af   :  { %v6336_v31 = vpop.f32.mrb[84].mxu0 }
 0x6b0   :  { %v6337_v58 = vadd.f32 %v6336_v31, %v14244_v52  ;;  %v6338_v28 = vpop.f32.mrb[85].mxu0 }
 0x6b1   :  { %v6339_v21 = vadd.f32 %v6338_v28, %v14247_v30  ;;  %v6340_v38 = vpop.f32.mrb[86].mxu0 }
 0x6b2   :  { %6409 = vst [vmem:[#allocation8 + $0x20] sm:$0xff] %v6337_v58  ;;  %v6341_v35 = vadd.f32 %v6340_v38, %v14244_v52  ;;  %v6342_v47 = vpop.f32.mrb[87].mxu0 }
 0x6b3   :  { %6410 = vst [vmem:[#allocation8 + $0x28] sm:$0xff] %v6339_v21  ;;  %v6343_v56 = vadd.f32 %v6342_v47, %v14247_v30 }
 0x6b4   :  { %6411 = vst [vmem:[#allocation8 + $0x30] sm:$0xff] %v6341_v35 }
 0x6b5   :  { %6412 = vst [vmem:[#allocation8 + $0x38] sm:$0xff] %v6343_v56 }
 0x6dc   :  { %v6346_v33 = vpop.f32.mrb[88].mxu0 }
 0x6dd   :  { %v6347_v20 = vadd.f32 %v6346_v33, %v14244_v52  ;;  %v6348_v22 = vpop.f32.mrb[89].mxu0 }
 0x6de   :  { %v6349_v44 = vadd.f32 %v6348_v22, %v14247_v30  ;;  %v6350_v61 = vpop.f32.mrb[90].mxu0 }
 0x6df   :  { %6413 = vst [vmem:[#allocation8 + $0x40] sm:$0xff] %v6347_v20  ;;  %v6351_v39 = vadd.f32 %v6350_v61, %v14244_v52  ;;  %v6352_v11 = vpop.f32.mrb[91].mxu0 }
 0x6e0   :  { %6414 = vst [vmem:[#allocation8 + $0x48] sm:$0xff] %v6349_v44  ;;  %v6353_v16 = vadd.f32 %v6352_v11, %v14247_v30 }
 0x6e1   :  { %6415 = vst [vmem:[#allocation8 + $0x50] sm:$0xff] %v6351_v39 }
 0x6e2   :  { %6416 = vst [vmem:[#allocation8 + $0x58] sm:$0xff] %v6353_v16 }
 0x70b   :  { %v6356_v8 = vpop.f32.mrb[92].mxu0 }
 0x70c   :  { %v6357_v5 = vadd.f32 %v6356_v8, %v14244_v52  ;;  %v6358_v63 = vpop.f32.mrb[93].mxu0 }
 0x70d   :  { %v6359_v36 = vadd.f32 %v6358_v63, %v14247_v30  ;;  %v6360_v60 = vpop.f32.mrb[94].mxu0 }
 0x70e   :  { %6417 = vst [vmem:[#allocation8 + $0x60] sm:$0xff] %v6357_v5  ;;  %v6361_v14 = vadd.f32 %v6360_v60, %v14244_v52  ;;  %v6362_v34 = vpop.f32.mrb[95].mxu0 }
 0x70f   :  { %6418 = vst [vmem:[#allocation8 + $0x68] sm:$0xff] %v6359_v36  ;;  %v6363_v32 = vadd.f32 %v6362_v34, %v14247_v30 }
 0x710   :  { %6419 = vst [vmem:[#allocation8 + $0x70] sm:$0xff] %v6361_v14 }
 0x711   :  { %6420 = vst [vmem:[#allocation8 + $0x78] sm:$0xff] %v6363_v32 }
 0x721   :  { %v6366_v19 = vpop.f32.mrb[96].mxu0 }
 0x722   :  { %v6367_v46 = vadd.f32 %v6366_v19, %v14244_v52  ;;  %v6368_v40 = vpop.f32.mrb[97].mxu0 }
 0x723   :  { %v6369_v45 = vadd.f32 %v6368_v40, %v14247_v30  ;;  %v6370_v18 = vpop.f32.mrb[98].mxu0 }
 0x724   :  { %6421 = vst [vmem:[#allocation8 + $0x80] sm:$0xff] %v6367_v46  ;;  %v6371_v51 = vadd.f32 %v6370_v18, %v14244_v52  ;;  %v6372_v57 = vpop.f32.mrb[99].mxu0 }
 0x725   :  { %6422 = vst [vmem:[#allocation8 + $0x88] sm:$0xff] %v6369_v45  ;;  %v6373_v37 = vadd.f32 %v6372_v57, %v14247_v30 }
 0x726   :  { %6423 = vst [vmem:[#allocation8 + $0x90] sm:$0xff] %v6371_v51 }
 0x727   :  { %6424 = vst [vmem:[#allocation8 + $0x98] sm:$0xff] %v6373_v37 }
 0x737   :  { %v6376_v41 = vpop.f32.mrb[100].mxu0 }
 0x738   :  { %v6377_v1 = vadd.f32 %v6376_v41, %v14244_v52  ;;  %v6378_v23 = vpop.f32.mrb[101].mxu0 }
 0x739   :  { %v6379_v7 = vadd.f32 %v6378_v23, %v14247_v30  ;;  %v6380_v15 = vpop.f32.mrb[102].mxu0 }
 0x73a   :  { %6425 = vst [vmem:[#allocation8 + $0xa0] sm:$0xff] %v6377_v1  ;;  %v6381_v27 = vadd.f32 %v6380_v15, %v14244_v52  ;;  %v6382_v4 = vpop.f32.mrb[103].mxu0 }
 0x73b   :  { %6426 = vst [vmem:[#allocation8 + $0xa8] sm:$0xff] %v6379_v7  ;;  %v6383_v10 = vadd.f32 %v6382_v4, %v14247_v30 }
 0x73c   :  { %6427 = vst [vmem:[#allocation8 + $0xb0] sm:$0xff] %v6381_v27 }
 0x73d   :  { %6428 = vst [vmem:[#allocation8 + $0xb8] sm:$0xff] %v6383_v10 }
 0x74f   :  { %v6386_v12 = vpop.f32.mrb[104].mxu0 }
 0x750   :  { %v6387_v6 = vadd.f32 %v6386_v12, %v14244_v52  ;;  %v6388_v55 = vpop.f32.mrb[105].mxu0 }
 0x751   :  { %v6389_v59 = vadd.f32 %v6388_v55, %v14247_v30  ;;  %v6390_v9 = vpop.f32.mrb[106].mxu0 }
 0x752   :  { %6429 = vst [vmem:[#allocation8 + $0xc0] sm:$0xff] %v6387_v6  ;;  %v6391_v17 = vadd.f32 %v6390_v9, %v14244_v52  ;;  %v6392_v54 = vpop.f32.mrb[107].mxu0 }
 0x753   :  { %6430 = vst [vmem:[#allocation8 + $0xc8] sm:$0xff] %v6389_v59  ;;  %v6393_v62 = vadd.f32 %v6392_v54, %v14247_v30 }
 0x754   :  { %6431 = vst [vmem:[#allocation8 + $0xd0] sm:$0xff] %v6391_v17 }
 0x755   :  { %6432 = vst [vmem:[#allocation8 + $0xd8] sm:$0xff] %v6393_v62 }
 0x767   :  { %v6396_v2 = vpop.f32.mrb[108].mxu0 }
 0x768   :  { %v6397_v42 = vadd.f32 %v6396_v2, %v14244_v52  ;;  %v6398_v25 = vpop.f32.mrb[109].mxu0 }
 0x769   :  { %v6399_v24 = vadd.f32 %v6398_v25, %v14247_v30  ;;  %v6400_v43 = vpop.f32.mrb[110].mxu0 }
 0x76a   :  { %6433 = vst [vmem:[#allocation8 + $0xe0] sm:$0xff] %v6397_v42  ;;  %v6401_v0 = vadd.f32 %v6400_v43, %v14244_v52  ;;  %v6402_v50 = vpop.f32.mrb[111].mxu0 }
 0x76b   :  { %6434 = vst [vmem:[#allocation8 + $0xe8] sm:$0xff] %v6399_v24  ;;  %v6403_v29 = vadd.f32 %v6402_v50, %v14247_v30 }
 0x76c   :  { %6435 = vst [vmem:[#allocation8 + $0xf0] sm:$0xff] %v6401_v0 }
 0x76d   :  { %6436 = vst [vmem:[#allocation8 + $0xf8] sm:$0xff] %v6403_v29 }
 0x76e   :  { %8200 = shalt.err (!%p8197_p0)
}
 0x76f   :  { %s8201_s28 = scalar_lea.hbm %s14301_s8, 4096 }
 0x770   :  { %p8202_p1 = scmp.ne.s32.totalorder %s14301_s8, %s8201_s28  ;;  %p8205_p2 = scmp.lt.u32.totalorder %s8201_s28, %s14301_s8 }
 0x772   :  { %p8207_p3 = pnand %p8205_p2, %p8202_p1 }
 0x774   :  { %8210 = shalt.err (!%p8207_p3)
}
 0x775   :  { %s8234_s12 = smov 256   ;;  %s8235_s13 = smov 16  }
 0x776   :  { %6448 = dma.vmem_to_hbm [thread:$0]  %s6443_s26, 4096, %s14301_s8, [#allocation4], %s8234_s12, %s8234_s12, %s8235_s13  }
 0x777   :  { %8215 = dma.done.wait [#allocation4], 4096  }
 0x778   :  { %8216 = vsyncadd [#allocation4], 4294963200 }
 0x779   :  { %6452 = vsyncpa [#allocation3], 1 }
 0x77a   :  { %6453 = vsyncpa [#allocation6], 1 }
 0x77b   :  { %6454 = vsyncpa [#allocation4], 1 }

</bundles_post_ra>
